<compile_context>
chip_gen: v6e
topology: v6e:2x2x1
jax: 0.10.0
libtpu: 0.0.40
codegen_flags: <defaults>
</compile_context>

<pallas_src>
import numpy as np
import jax
import jax.numpy as jnp
from jax.experimental import pallas as pl
from jax.experimental.pallas import tpu as pltpu


def _round_up(x, m):
    return ((x + m - 1) // m) * m


# ----------------------------------------------------------------------------
# Exact (erf-based) GELU matching torch.nn.functional.gelu's default.
# erf via Abramowitz & Stegun 7.1.26 (|err| < ~1e-4 with the approx reciprocal,
# well inside the bf16-matmul tolerance budget).
# ----------------------------------------------------------------------------
def _erf(x):
    ax = jnp.abs(x)
    t = pl.reciprocal(1.0 + 0.3275911 * ax, approx=True)     # EUP, off the VALU path
    poly = t * (0.254829592 + t * (-0.284496736 + t * (1.421413741
              + t * (-1.453152027 + t * 1.061405429))))
    y = 1.0 - poly * jnp.exp(-ax * ax)
    return jnp.where(x < 0, -y, y)


def _gelu(x):
    return 0.5 * x * (1.0 + _erf(x * 0.7071067811865476))


# ----------------------------------------------------------------------------
# Boundary masks for the 25 conv taps (zero padding expressed as a mask on the
# lane-flattened spatial axis).  masks[t, y*W + x] = 1 iff the tap stays inside
# the image.  The same masks, tiled per image, also zero the cross-image
# wrap-around introduced by folding the batch into the lane axis.
# ----------------------------------------------------------------------------
def build_conv_masks(H, W):
    ys, xs = np.meshgrid(np.arange(H), np.arange(W), indexing="ij")
    rows = []
    for ky in range(5):
        for kx in range(5):
            dy, dx = ky - 2, kx - 2
            valid = ((ys + dy >= 0) & (ys + dy < H) &
                     (xs + dx >= 0) & (xs + dx < W))
            rows.append(valid.reshape(-1))
    return np.stack(rows).astype(np.float32)                 # (25, H*W)


# ----------------------------------------------------------------------------
# Fused kernel factory: 4 x (im2col conv -> bias -> GELU) on one batch tile.
# ----------------------------------------------------------------------------
def _make_fused_kernel(W, L, cins, math_dtype, stride0_masks):
    n_layers = len(cins)

    def kernel(*refs):
        # refs: x, masks, (w, b) * n_layers, out, slab_scratch
        x_ref, masks_ref = refs[0], refs[1]
        wb = refs[2:2 + 2 * n_layers]
        o_ref = refs[2 + 2 * n_layers]
        slab_ref = refs[3 + 2 * n_layers]

        act = x_ref[...]                                   # (cin0, L), math dtype
        for layer in range(n_layers):
            cin = cins[layer]
            w_ref = wb[2 * layer]                          # (cout, 25*cin)  bf16
            b_ref = wb[2 * layer + 1]                      # (cout, 1)       f32

            # Build the (25*cin, L) im2col slab: one lane-roll + boundary mask
            # per tap, cast to bf16 on store at 16-aligned sublane offsets.
            for ky in range(5):
                for kx in range(5):
                    t = ky * 5 + kx
                    s = (ky - 2) * W + (kx - 2)
                    if s == 0:                             # center tap: mask all-ones
                        val = act
                    else:
                        shifted = pltpu.roll(act, shift=(-s) % L, axis=1)
                        if stride0_masks:
                            # stride-0 sublane broadcast: vld does the broadcast
                            m = masks_ref[pl.ds(t, cin, stride=0), :]
                        else:
                            m = masks_ref[pl.ds(t, 1), :]  # (1,L) -> implicit bcast
                        val = shifted * m
                    slab_ref[pl.ds(t * cin, cin), :] = val.astype(jnp.bfloat16)

            acc = jnp.dot(w_ref[...], slab_ref[pl.ds(0, 25 * cin), :],
                          preferred_element_type=jnp.float32)     # MXU, f32 acc
            y = _gelu(acc + b_ref[...])                            # f32 elementwise
            if layer + 1 < n_layers:
                act = y.astype(math_dtype)                         # cast once/layer
            else:
                o_ref[...] = y                                     # lane-dense store

    return kernel


# ----------------------------------------------------------------------------
# Core forward for one configuration (math dtype / mask-load strategy).
# ----------------------------------------------------------------------------
def _cnn_forward(x_nchw, params, chan_dim, slot_dim, *, math_dtype,
                 stride0_masks, b_tile=None):
    B, cin_raw, H, W = x_nchw.shape
    N = H * W

    # Channel padding to multiples of 16 -> every t*cin slab offset is
    # (16,128)-aligned for the bf16 slab stores.
    cin0 = _round_up(max(cin_raw, 16), 16)
    chan_p = _round_up(chan_dim, 16)
    slot_p = _round_up(slot_dim, 16)
    cins = (cin0, chan_p, chan_p, chan_p)
    couts = (chan_p, chan_p, chan_p, slot_p)

    # Batch folding into the lane axis; keep the grid >= 2 for v7x's 2 TCs.
    if b_tile is None:
        b_tile = max(1, min(8, B // 2))
    B_pad = _round_up(B, b_tile)
    G = B_pad // b_tile
    L = b_tile * N

    # Input: NCHW -> channel-major lane-dense (C, B_pad*N).
    x = jnp.pad(x_nchw.astype(jnp.float32),
                ((0, B_pad - B), (0, cin0 - cin_raw), (0, 0), (0, 0)))
    x = jnp.transpose(x, (1, 0, 2, 3)).reshape(cin0, B_pad * N).astype(math_dtype)

    # Boundary masks tiled once over the batch fold (hoisted out of the kernel).
    masks = jnp.tile(jnp.asarray(build_conv_masks(H, W)), (1, b_tile)).astype(math_dtype)

    def im2col_w(w, cin_p, cout_p):
        kh, kw, cin, cout = w.shape
        w = jnp.pad(w, ((0, 0), (0, 0), (0, cin_p - cin), (0, cout_p - cout)))
        # Row order must match slab rows: tap-major, channel-minor.
        return jnp.transpose(w, (3, 0, 1, 2)).reshape(
            cout_p, kh * kw * cin_p).astype(jnp.bfloat16)

    def pad_bias(b, cout_p):
        return jnp.pad(b, (0, cout_p - b.shape[0])).reshape(cout_p, 1).astype(jnp.float32)

    ws = [im2col_w(params["conv1_w"], cin0, chan_p),
          im2col_w(params["conv2_w"], chan_p, chan_p),
          im2col_w(params["conv3_w"], chan_p, chan_p),
          im2col_w(params["conv4_w"], chan_p, slot_p)]
    bs = [pad_bias(params["conv1_b"], chan_p),
          pad_bias(params["conv2_b"], chan_p),
          pad_bias(params["conv3_b"], chan_p),
          pad_bias(params["conv4_b"], slot_p)]

    in_specs = [pl.BlockSpec((cin0, L), lambda i: (0, i)),
                pl.BlockSpec((25, L), lambda i: (0, 0))]
    operands = [x, masks]
    for w, b in zip(ws, bs):
        in_specs.append(pl.BlockSpec(w.shape, lambda i: (0, 0)))
        in_specs.append(pl.BlockSpec(b.shape, lambda i: (0, 0)))
        operands += [w, b]

    max_rows = 25 * max(cins)

    # Whole-call cost estimate for XLA's scheduler.
    flops, trans = 0, 0
    for cin, cout in zip(cins, couts):
        flops += 2 * cout * (25 * cin) * B_pad * N + 10 * cout * B_pad * N
        trans += 2 * cout * B_pad * N           # exp + approx-reciprocal per element
    bytes_accessed = int(
        x.size * x.dtype.itemsize + masks.size * masks.dtype.itemsize
        + sum(w.size * 2 + b.size * 4 for w, b in zip(ws, bs))
        + slot_p * B_pad * N * 4)
    cost = pl.CostEstimate(flops=int(flops), transcendentals=int(trans),
                           bytes_accessed=bytes_accessed)

    # Explicit VMEM budget (bf16 slab); stays well inside v7x's 64 MiB.
    msz = jnp.dtype(math_dtype).itemsize
    vmem_est = (2 * cin0 * L * msz + 2 * 25 * L * msz
                + 2 * sum(w.size * 2 + b.size * 4 for w, b in zip(ws, bs))
                + 2 * slot_p * L * 4
                + max_rows * L * 2 + (1 << 20))
    vmem_limit = int(min(max(2 * vmem_est, 32 << 20), 48 << 20))

    kernel = _make_fused_kernel(W, L, cins, math_dtype, stride0_masks)

    out = pl.pallas_call(
        kernel,
        out_shape=jax.ShapeDtypeStruct((slot_p, B_pad * N), jnp.float32),
        grid=(G,),
        in_specs=in_specs,
        out_specs=pl.BlockSpec((slot_p, L), lambda i: (0, i)),
        scratch_shapes=[pltpu.VMEM((max_rows, L), jnp.bfloat16)],
        compiler_params=pltpu.CompilerParams(
            dimension_semantics=("parallel",),          # batch tiles across TCs (v7x)
            vmem_limit_bytes=vmem_limit),
        cost_estimate=cost,
    )(*operands)

    out = out.reshape(slot_p, B_pad, H, W)
    out = jnp.transpose(out, (1, 0, 2, 3))[:B, :slot_dim]       # NCHW, unpadded
    return out


# ----------------------------------------------------------------------------
# Public wrapper: NCHW in, NCHW out (matches the PyTorch module).  Picks bf16
# slab-build math on v6e/v7x (bf16 VPU/XLU), f32 math on v5e/older, and falls
# back to a fully conservative configuration if a tuned variant fails to lower
# on the local chip.
# ----------------------------------------------------------------------------
def cnn_backbone_forward(x_nchw, params, chan_dim, slot_dim, b_tile=None):
    try:
        kind = jax.devices()[0].device_kind.lower()
    except Exception:
        kind = ""
    prefer_bf16 = ("v6" in kind) or ("v7" in kind)   # v5e has no bf16 VALU

    configs = []
    if prefer_bf16:
        configs.append(dict(math_dtype=jnp.bfloat16, stride0_masks=True))
    configs.append(dict(math_dtype=jnp.float32, stride0_masks=True))
    configs.append(dict(math_dtype=jnp.float32, stride0_masks=False))

    for cfg in configs[:-1]:
        try:
            return _cnn_forward(x_nchw, params, chan_dim, slot_dim,
                                b_tile=b_tile, **cfg)
        except Exception:
            # Lowering / resource issue with the tuned config -> try safer one.
            continue
    return _cnn_forward(x_nchw, params, chan_dim, slot_dim,
                        b_tile=b_tile, **configs[-1])


# ----------------------------------------------------------------------------
# Pure-JAX f32 reference (cross-correlation, exact GELU) for validation.
# ----------------------------------------------------------------------------
def reference_forward(x, params):
    def layer(h, w, b):
        y = jax.lax.conv_general_dilated(
            h, w, window_strides=(1, 1), padding=((2, 2), (2, 2)),
            dimension_numbers=("NCHW", "HWIO", "NCHW"))
        return jax.nn.gelu(y + b[None, :, None, None], approximate=False)

    h = layer(x, params["conv1_w"], params["conv1_b"])
    h = layer(h, params["conv2_w"], params["conv2_b"])
    h = layer(h, params["conv3_w"], params["conv3_b"])
    h = layer(h, params["conv4_w"], params["conv4_b"])
    return h


# ----------------------------------------------------------------------------
# Parameter init (deterministic; HWIO layout (5,5,Cin,Cout)).
# ----------------------------------------------------------------------------
def init_params(key, chan_dim, slot_dim):
    ks = jax.random.split(key, 8)

    def conv_w(k, cin, cout):
        return jax.random.normal(k, (5, 5, cin, cout), jnp.float32) / np.sqrt(25.0 * cin)

    def bias(k, c):
        return 0.1 * jax.random.normal(k, (c,), jnp.float32)

    return {
        "conv1_w": conv_w(ks[0], 3, chan_dim),        "conv1_b": bias(ks[4], chan_dim),
        "conv2_w": conv_w(ks[1], chan_dim, chan_dim), "conv2_b": bias(ks[5], chan_dim),
        "conv3_w": conv_w(ks[2], chan_dim, chan_dim), "conv3_b": bias(ks[6], chan_dim),
        "conv4_w": conv_w(ks[3], chan_dim, slot_dim), "conv4_b": bias(ks[7], slot_dim),
    }


if __name__ == "__main__":
    B, H, W = 2, 16, 16
    chan_dim, slot_dim = 16, 32
    key = jax.random.PRNGKey(0)
    kx_, kp_ = jax.random.split(key)
    x = jax.random.normal(kx_, (B, 3, H, W), jnp.float32)   # PyTorch-style NCHW
    params = init_params(kp_, chan_dim, slot_dim)

    out = jax.block_until_ready(cnn_backbone_forward(x, params, chan_dim, slot_dim))
    assert out.shape == (B, slot_dim, H, W)
    assert bool(jnp.isfinite(out).all())

    ref = jax.block_until_ready(reference_forward(x, params))
    rel_err = float(jnp.max(jnp.abs(out - ref)) / (jnp.max(jnp.abs(ref)) + 1e-6))
    assert rel_err < 5e-2, f"kernel/reference mismatch: rel_err={rel_err}"
    print("KERNEL_OK")
</pallas_src>

<mosaic_0001>
module attributes {stable_mosaic.version = 11 : i64} {
  func.func @kernel(%arg0: i32, %arg1: memref<16x256xf32, #tpu.memory_space<vmem>>, %arg2: memref<25x256xf32, #tpu.memory_space<vmem>>, %arg3: memref<16x400xbf16, #tpu.memory_space<vmem>>, %arg4: memref<16x1xf32, #tpu.memory_space<vmem>>, %arg5: memref<16x400xbf16, #tpu.memory_space<vmem>>, %arg6: memref<16x1xf32, #tpu.memory_space<vmem>>, %arg7: memref<16x400xbf16, #tpu.memory_space<vmem>>, %arg8: memref<16x1xf32, #tpu.memory_space<vmem>>, %arg9: memref<32x400xbf16, #tpu.memory_space<vmem>>, %arg10: memref<32x1xf32, #tpu.memory_space<vmem>>, %arg11: memref<32x256xf32, #tpu.memory_space<vmem>>, %arg12: memref<400x256xbf16, #tpu.memory_space<vmem>>) attributes {dimension_semantics = [#tpu.dimension_semantics<parallel>], iteration_bounds = array<i64: 2>, scalar_prefetch = 0 : i64, scratch_operands = 1 : i64, tpu.core_type = #tpu.core_type<tc>, window_params = [{transform_indices = @transform_0, window_bounds = array<i64: 16, 256>}, {pipeline_mode = #tpu.pipeline_mode<synchronous>, transform_indices = @transform_1, window_bounds = array<i64: 25, 256>}, {pipeline_mode = #tpu.pipeline_mode<synchronous>, transform_indices = @transform_2, window_bounds = array<i64: 16, 400>}, {pipeline_mode = #tpu.pipeline_mode<synchronous>, transform_indices = @transform_3, window_bounds = array<i64: 16, 1>}, {pipeline_mode = #tpu.pipeline_mode<synchronous>, transform_indices = @transform_4, window_bounds = array<i64: 16, 400>}, {pipeline_mode = #tpu.pipeline_mode<synchronous>, transform_indices = @transform_5, window_bounds = array<i64: 16, 1>}, {pipeline_mode = #tpu.pipeline_mode<synchronous>, transform_indices = @transform_6, window_bounds = array<i64: 16, 400>}, {pipeline_mode = #tpu.pipeline_mode<synchronous>, transform_indices = @transform_7, window_bounds = array<i64: 16, 1>}, {pipeline_mode = #tpu.pipeline_mode<synchronous>, transform_indices = @transform_8, window_bounds = array<i64: 32, 400>}, {pipeline_mode = #tpu.pipeline_mode<synchronous>, transform_indices = @transform_9, window_bounds = array<i64: 32, 1>}, {transform_indices = @transform_10, window_bounds = array<i64: 32, 256>}]} {
    %c0 = arith.constant 0 : index
    %c0_0 = arith.constant 0 : index
    %0 = vector.load %arg1[%c0, %c0_0] : memref<16x256xf32, #tpu.memory_space<vmem>>, vector<16x256xf32>
    %c34_i32 = arith.constant 34 : i32
    %1 = tpu.dynamic_rotate %0 by %c34_i32 dim 1 : vector<16x256xf32>, i32 -> vector<16x256xf32>
    %c0_1 = arith.constant 0 : index
    %c0_2 = arith.constant 0 : index
    %2 = tpu.strided_load %arg2[%c0_1, %c0_2] {strides = array<i32: 0, 1>} : memref<25x256xf32, #tpu.memory_space<vmem>>, vector<16x256xf32>
    %3 = arith.mulf %1, %2 : vector<16x256xf32>
    %4 = arith.truncf %3 : vector<16x256xf32> to vector<16x256xbf16>
    %c0_3 = arith.constant 0 : index
    %c0_4 = arith.constant 0 : index
    %5 = vector.load %arg12[%c0_3, %c0_4] : memref<400x256xbf16, #tpu.memory_space<vmem>>, vector<16x256xbf16>
    tpu.vector_store %arg12[%c0_3, %c0_4], %4 {strides = array<i32>} : memref<400x256xbf16, #tpu.memory_space<vmem>>, vector<16x256xbf16>,
    %c33_i32 = arith.constant 33 : i32
    %6 = tpu.dynamic_rotate %0 by %c33_i32 dim 1 : vector<16x256xf32>, i32 -> vector<16x256xf32>
    %c1 = arith.constant 1 : index
    %c0_5 = arith.constant 0 : index
    %7 = tpu.strided_load %arg2[%c1, %c0_5] {strides = array<i32: 0, 1>} : memref<25x256xf32, #tpu.memory_space<vmem>>, vector<16x256xf32>
    %8 = arith.mulf %6, %7 : vector<16x256xf32>
    %9 = arith.truncf %8 : vector<16x256xf32> to vector<16x256xbf16>
    %c16 = arith.constant 16 : index
    %c0_6 = arith.constant 0 : index
    %10 = vector.load %arg12[%c16, %c0_6] : memref<400x256xbf16, #tpu.memory_space<vmem>>, vector<16x256xbf16>
    tpu.vector_store %arg12[%c16, %c0_6], %9 {strides = array<i32>} : memref<400x256xbf16, #tpu.memory_space<vmem>>, vector<16x256xbf16>,
    %c32_i32 = arith.constant 32 : i32
    %11 = tpu.dynamic_rotate %0 by %c32_i32 dim 1 : vector<16x256xf32>, i32 -> vector<16x256xf32>
    %c2 = arith.constant 2 : index
    %c0_7 = arith.constant 0 : index
    %12 = tpu.strided_load %arg2[%c2, %c0_7] {strides = array<i32: 0, 1>} : memref<25x256xf32, #tpu.memory_space<vmem>>, vector<16x256xf32>
    %13 = arith.mulf %11, %12 : vector<16x256xf32>
    %14 = arith.truncf %13 : vector<16x256xf32> to vector<16x256xbf16>
    %c32 = arith.constant 32 : index
    %c0_8 = arith.constant 0 : index
    %15 = vector.load %arg12[%c32, %c0_8] : memref<400x256xbf16, #tpu.memory_space<vmem>>, vector<16x256xbf16>
    tpu.vector_store %arg12[%c32, %c0_8], %14 {strides = array<i32>} : memref<400x256xbf16, #tpu.memory_space<vmem>>, vector<16x256xbf16>,
    %c31_i32 = arith.constant 31 : i32
    %16 = tpu.dynamic_rotate %0 by %c31_i32 dim 1 : vector<16x256xf32>, i32 -> vector<16x256xf32>
    %c3 = arith.constant 3 : index
    %c0_9 = arith.constant 0 : index
    %17 = tpu.strided_load %arg2[%c3, %c0_9] {strides = array<i32: 0, 1>} : memref<25x256xf32, #tpu.memory_space<vmem>>, vector<16x256xf32>
    %18 = arith.mulf %16, %17 : vector<16x256xf32>
    %19 = arith.truncf %18 : vector<16x256xf32> to vector<16x256xbf16>
    %c48 = arith.constant 48 : index
    %c0_10 = arith.constant 0 : index
    %20 = vector.load %arg12[%c48, %c0_10] : memref<400x256xbf16, #tpu.memory_space<vmem>>, vector<16x256xbf16>
    tpu.vector_store %arg12[%c48, %c0_10], %19 {strides = array<i32>} : memref<400x256xbf16, #tpu.memory_space<vmem>>, vector<16x256xbf16>,
    %c30_i32 = arith.constant 30 : i32
    %21 = tpu.dynamic_rotate %0 by %c30_i32 dim 1 : vector<16x256xf32>, i32 -> vector<16x256xf32>
    %c4 = arith.constant 4 : index
    %c0_11 = arith.constant 0 : index
    %22 = tpu.strided_load %arg2[%c4, %c0_11] {strides = array<i32: 0, 1>} : memref<25x256xf32, #tpu.memory_space<vmem>>, vector<16x256xf32>
    %23 = arith.mulf %21, %22 : vector<16x256xf32>
    %24 = arith.truncf %23 : vector<16x256xf32> to vector<16x256xbf16>
    %c64 = arith.constant 64 : index
    %c0_12 = arith.constant 0 : index
    %25 = vector.load %arg12[%c64, %c0_12] : memref<400x256xbf16, #tpu.memory_space<vmem>>, vector<16x256xbf16>
    tpu.vector_store %arg12[%c64, %c0_12], %24 {strides = array<i32>} : memref<400x256xbf16, #tpu.memory_space<vmem>>, vector<16x256xbf16>,
    %c18_i32 = arith.constant 18 : i32
    %26 = tpu.dynamic_rotate %0 by %c18_i32 dim 1 : vector<16x256xf32>, i32 -> vector<16x256xf32>
    %c5 = arith.constant 5 : index
    %c0_13 = arith.constant 0 : index
    %27 = tpu.strided_load %arg2[%c5, %c0_13] {strides = array<i32: 0, 1>} : memref<25x256xf32, #tpu.memory_space<vmem>>, vector<16x256xf32>
    %28 = arith.mulf %26, %27 : vector<16x256xf32>
    %29 = arith.truncf %28 : vector<16x256xf32> to vector<16x256xbf16>
    %c80 = arith.constant 80 : index
    %c0_14 = arith.constant 0 : index
    %30 = vector.load %arg12[%c80, %c0_14] : memref<400x256xbf16, #tpu.memory_space<vmem>>, vector<16x256xbf16>
    tpu.vector_store %arg12[%c80, %c0_14], %29 {strides = array<i32>} : memref<400x256xbf16, #tpu.memory_space<vmem>>, vector<16x256xbf16>,
    %c17_i32 = arith.constant 17 : i32
    %31 = tpu.dynamic_rotate %0 by %c17_i32 dim 1 : vector<16x256xf32>, i32 -> vector<16x256xf32>
    %c6 = arith.constant 6 : index
    %c0_15 = arith.constant 0 : index
    %32 = tpu.strided_load %arg2[%c6, %c0_15] {strides = array<i32: 0, 1>} : memref<25x256xf32, #tpu.memory_space<vmem>>, vector<16x256xf32>
    %33 = arith.mulf %31, %32 : vector<16x256xf32>
    %34 = arith.truncf %33 : vector<16x256xf32> to vector<16x256xbf16>
    %c96 = arith.constant 96 : index
    %c0_16 = arith.constant 0 : index
    %35 = vector.load %arg12[%c96, %c0_16] : memref<400x256xbf16, #tpu.memory_space<vmem>>, vector<16x256xbf16>
    tpu.vector_store %arg12[%c96, %c0_16], %34 {strides = array<i32>} : memref<400x256xbf16, #tpu.memory_space<vmem>>, vector<16x256xbf16>,
    %c16_i32 = arith.constant 16 : i32
    %36 = tpu.dynamic_rotate %0 by %c16_i32 dim 1 : vector<16x256xf32>, i32 -> vector<16x256xf32>
    %c7 = arith.constant 7 : index
    %c0_17 = arith.constant 0 : index
    %37 = tpu.strided_load %arg2[%c7, %c0_17] {strides = array<i32: 0, 1>} : memref<25x256xf32, #tpu.memory_space<vmem>>, vector<16x256xf32>
    %38 = arith.mulf %36, %37 : vector<16x256xf32>
    %39 = arith.truncf %38 : vector<16x256xf32> to vector<16x256xbf16>
    %c112 = arith.constant 112 : index
    %c0_18 = arith.constant 0 : index
    %40 = vector.load %arg12[%c112, %c0_18] : memref<400x256xbf16, #tpu.memory_space<vmem>>, vector<16x256xbf16>
    tpu.vector_store %arg12[%c112, %c0_18], %39 {strides = array<i32>} : memref<400x256xbf16, #tpu.memory_space<vmem>>, vector<16x256xbf16>,
    %c15_i32 = arith.constant 15 : i32
    %41 = tpu.dynamic_rotate %0 by %c15_i32 dim 1 : vector<16x256xf32>, i32 -> vector<16x256xf32>
    %c8 = arith.constant 8 : index
    %c0_19 = arith.constant 0 : index
    %42 = tpu.strided_load %arg2[%c8, %c0_19] {strides = array<i32: 0, 1>} : memref<25x256xf32, #tpu.memory_space<vmem>>, vector<16x256xf32>
    %43 = arith.mulf %41, %42 : vector<16x256xf32>
    %44 = arith.truncf %43 : vector<16x256xf32> to vector<16x256xbf16>
    %c128 = arith.constant 128 : index
    %c0_20 = arith.constant 0 : index
    %45 = vector.load %arg12[%c128, %c0_20] : memref<400x256xbf16, #tpu.memory_space<vmem>>, vector<16x256xbf16>
    tpu.vector_store %arg12[%c128, %c0_20], %44 {strides = array<i32>} : memref<400x256xbf16, #tpu.memory_space<vmem>>, vector<16x256xbf16>,
    %c14_i32 = arith.constant 14 : i32
    %46 = tpu.dynamic_rotate %0 by %c14_i32 dim 1 : vector<16x256xf32>, i32 -> vector<16x256xf32>
    %c9 = arith.constant 9 : index
    %c0_21 = arith.constant 0 : index
    %47 = tpu.strided_load %arg2[%c9, %c0_21] {strides = array<i32: 0, 1>} : memref<25x256xf32, #tpu.memory_space<vmem>>, vector<16x256xf32>
    %48 = arith.mulf %46, %47 : vector<16x256xf32>
    %49 = arith.truncf %48 : vector<16x256xf32> to vector<16x256xbf16>
    %c144 = arith.constant 144 : index
    %c0_22 = arith.constant 0 : index
    %50 = vector.load %arg12[%c144, %c0_22] : memref<400x256xbf16, #tpu.memory_space<vmem>>, vector<16x256xbf16>
    tpu.vector_store %arg12[%c144, %c0_22], %49 {strides = array<i32>} : memref<400x256xbf16, #tpu.memory_space<vmem>>, vector<16x256xbf16>,
    %c2_i32 = arith.constant 2 : i32
    %51 = tpu.dynamic_rotate %0 by %c2_i32 dim 1 : vector<16x256xf32>, i32 -> vector<16x256xf32>
    %c10 = arith.constant 10 : index
    %c0_23 = arith.constant 0 : index
    %52 = tpu.strided_load %arg2[%c10, %c0_23] {strides = array<i32: 0, 1>} : memref<25x256xf32, #tpu.memory_space<vmem>>, vector<16x256xf32>
    %53 = arith.mulf %51, %52 : vector<16x256xf32>
    %54 = arith.truncf %53 : vector<16x256xf32> to vector<16x256xbf16>
    %c160 = arith.constant 160 : index
    %c0_24 = arith.constant 0 : index
    %55 = vector.load %arg12[%c160, %c0_24] : memref<400x256xbf16, #tpu.memory_space<vmem>>, vector<16x256xbf16>
    tpu.vector_store %arg12[%c160, %c0_24], %54 {strides = array<i32>} : memref<400x256xbf16, #tpu.memory_space<vmem>>, vector<16x256xbf16>,
    %c1_i32 = arith.constant 1 : i32
    %56 = tpu.dynamic_rotate %0 by %c1_i32 dim 1 : vector<16x256xf32>, i32 -> vector<16x256xf32>
    %c11 = arith.constant 11 : index
    %c0_25 = arith.constant 0 : index
    %57 = tpu.strided_load %arg2[%c11, %c0_25] {strides = array<i32: 0, 1>} : memref<25x256xf32, #tpu.memory_space<vmem>>, vector<16x256xf32>
    %58 = arith.mulf %56, %57 : vector<16x256xf32>
    %59 = arith.truncf %58 : vector<16x256xf32> to vector<16x256xbf16>
    %c176 = arith.constant 176 : index
    %c0_26 = arith.constant 0 : index
    %60 = vector.load %arg12[%c176, %c0_26] : memref<400x256xbf16, #tpu.memory_space<vmem>>, vector<16x256xbf16>
    tpu.vector_store %arg12[%c176, %c0_26], %59 {strides = array<i32>} : memref<400x256xbf16, #tpu.memory_space<vmem>>, vector<16x256xbf16>,
    %61 = arith.truncf %0 : vector<16x256xf32> to vector<16x256xbf16>
    %c192 = arith.constant 192 : index
    %c0_27 = arith.constant 0 : index
    %62 = vector.load %arg12[%c192, %c0_27] : memref<400x256xbf16, #tpu.memory_space<vmem>>, vector<16x256xbf16>
    tpu.vector_store %arg12[%c192, %c0_27], %61 {strides = array<i32>} : memref<400x256xbf16, #tpu.memory_space<vmem>>, vector<16x256xbf16>,
    %c255_i32 = arith.constant 255 : i32
    %63 = tpu.dynamic_rotate %0 by %c255_i32 dim 1 : vector<16x256xf32>, i32 -> vector<16x256xf32>
    %c13 = arith.constant 13 : index
    %c0_28 = arith.constant 0 : index
    %64 = tpu.strided_load %arg2[%c13, %c0_28] {strides = array<i32: 0, 1>} : memref<25x256xf32, #tpu.memory_space<vmem>>, vector<16x256xf32>
    %65 = arith.mulf %63, %64 : vector<16x256xf32>
    %66 = arith.truncf %65 : vector<16x256xf32> to vector<16x256xbf16>
    %c208 = arith.constant 208 : index
    %c0_29 = arith.constant 0 : index
    %67 = vector.load %arg12[%c208, %c0_29] : memref<400x256xbf16, #tpu.memory_space<vmem>>, vector<16x256xbf16>
    tpu.vector_store %arg12[%c208, %c0_29], %66 {strides = array<i32>} : memref<400x256xbf16, #tpu.memory_space<vmem>>, vector<16x256xbf16>,
    %c254_i32 = arith.constant 254 : i32
    %68 = tpu.dynamic_rotate %0 by %c254_i32 dim 1 : vector<16x256xf32>, i32 -> vector<16x256xf32>
    %c14 = arith.constant 14 : index
    %c0_30 = arith.constant 0 : index
    %69 = tpu.strided_load %arg2[%c14, %c0_30] {strides = array<i32: 0, 1>} : memref<25x256xf32, #tpu.memory_space<vmem>>, vector<16x256xf32>
    %70 = arith.mulf %68, %69 : vector<16x256xf32>
    %71 = arith.truncf %70 : vector<16x256xf32> to vector<16x256xbf16>
    %c224 = arith.constant 224 : index
    %c0_31 = arith.constant 0 : index
    %72 = vector.load %arg12[%c224, %c0_31] : memref<400x256xbf16, #tpu.memory_space<vmem>>, vector<16x256xbf16>
    tpu.vector_store %arg12[%c224, %c0_31], %71 {strides = array<i32>} : memref<400x256xbf16, #tpu.memory_space<vmem>>, vector<16x256xbf16>,
    %c242_i32 = arith.constant 242 : i32
    %73 = tpu.dynamic_rotate %0 by %c242_i32 dim 1 : vector<16x256xf32>, i32 -> vector<16x256xf32>
    %c15 = arith.constant 15 : index
    %c0_32 = arith.constant 0 : index
    %74 = tpu.strided_load %arg2[%c15, %c0_32] {strides = array<i32: 0, 1>} : memref<25x256xf32, #tpu.memory_space<vmem>>, vector<16x256xf32>
    %75 = arith.mulf %73, %74 : vector<16x256xf32>
    %76 = arith.truncf %75 : vector<16x256xf32> to vector<16x256xbf16>
    %c240 = arith.constant 240 : index
    %c0_33 = arith.constant 0 : index
    %77 = vector.load %arg12[%c240, %c0_33] : memref<400x256xbf16, #tpu.memory_space<vmem>>, vector<16x256xbf16>
    tpu.vector_store %arg12[%c240, %c0_33], %76 {strides = array<i32>} : memref<400x256xbf16, #tpu.memory_space<vmem>>, vector<16x256xbf16>,
    %c241_i32 = arith.constant 241 : i32
    %78 = tpu.dynamic_rotate %0 by %c241_i32 dim 1 : vector<16x256xf32>, i32 -> vector<16x256xf32>
    %c16_34 = arith.constant 16 : index
    %c0_35 = arith.constant 0 : index
    %79 = tpu.strided_load %arg2[%c16_34, %c0_35] {strides = array<i32: 0, 1>} : memref<25x256xf32, #tpu.memory_space<vmem>>, vector<16x256xf32>
    %80 = arith.mulf %78, %79 : vector<16x256xf32>
    %81 = arith.truncf %80 : vector<16x256xf32> to vector<16x256xbf16>
    %c256 = arith.constant 256 : index
    %c0_36 = arith.constant 0 : index
    %82 = vector.load %arg12[%c256, %c0_36] : memref<400x256xbf16, #tpu.memory_space<vmem>>, vector<16x256xbf16>
    tpu.vector_store %arg12[%c256, %c0_36], %81 {strides = array<i32>} : memref<400x256xbf16, #tpu.memory_space<vmem>>, vector<16x256xbf16>,
    %c240_i32 = arith.constant 240 : i32
    %83 = tpu.dynamic_rotate %0 by %c240_i32 dim 1 : vector<16x256xf32>, i32 -> vector<16x256xf32>
    %c17 = arith.constant 17 : index
    %c0_37 = arith.constant 0 : index
    %84 = tpu.strided_load %arg2[%c17, %c0_37] {strides = array<i32: 0, 1>} : memref<25x256xf32, #tpu.memory_space<vmem>>, vector<16x256xf32>
    %85 = arith.mulf %83, %84 : vector<16x256xf32>
    %86 = arith.truncf %85 : vector<16x256xf32> to vector<16x256xbf16>
    %c272 = arith.constant 272 : index
    %c0_38 = arith.constant 0 : index
    %87 = vector.load %arg12[%c272, %c0_38] : memref<400x256xbf16, #tpu.memory_space<vmem>>, vector<16x256xbf16>
    tpu.vector_store %arg12[%c272, %c0_38], %86 {strides = array<i32>} : memref<400x256xbf16, #tpu.memory_space<vmem>>, vector<16x256xbf16>,
    %c239_i32 = arith.constant 239 : i32
    %88 = tpu.dynamic_rotate %0 by %c239_i32 dim 1 : vector<16x256xf32>, i32 -> vector<16x256xf32>
    %c18 = arith.constant 18 : index
    %c0_39 = arith.constant 0 : index
    %89 = tpu.strided_load %arg2[%c18, %c0_39] {strides = array<i32: 0, 1>} : memref<25x256xf32, #tpu.memory_space<vmem>>, vector<16x256xf32>
    %90 = arith.mulf %88, %89 : vector<16x256xf32>
    %91 = arith.truncf %90 : vector<16x256xf32> to vector<16x256xbf16>
    %c288 = arith.constant 288 : index
    %c0_40 = arith.constant 0 : index
    %92 = vector.load %arg12[%c288, %c0_40] : memref<400x256xbf16, #tpu.memory_space<vmem>>, vector<16x256xbf16>
    tpu.vector_store %arg12[%c288, %c0_40], %91 {strides = array<i32>} : memref<400x256xbf16, #tpu.memory_space<vmem>>, vector<16x256xbf16>,
    %c238_i32 = arith.constant 238 : i32
    %93 = tpu.dynamic_rotate %0 by %c238_i32 dim 1 : vector<16x256xf32>, i32 -> vector<16x256xf32>
    %c19 = arith.constant 19 : index
    %c0_41 = arith.constant 0 : index
    %94 = tpu.strided_load %arg2[%c19, %c0_41] {strides = array<i32: 0, 1>} : memref<25x256xf32, #tpu.memory_space<vmem>>, vector<16x256xf32>
    %95 = arith.mulf %93, %94 : vector<16x256xf32>
    %96 = arith.truncf %95 : vector<16x256xf32> to vector<16x256xbf16>
    %c304 = arith.constant 304 : index
    %c0_42 = arith.constant 0 : index
    %97 = vector.load %arg12[%c304, %c0_42] : memref<400x256xbf16, #tpu.memory_space<vmem>>, vector<16x256xbf16>
    tpu.vector_store %arg12[%c304, %c0_42], %96 {strides = array<i32>} : memref<400x256xbf16, #tpu.memory_space<vmem>>, vector<16x256xbf16>,
    %c226_i32 = arith.constant 226 : i32
    %98 = tpu.dynamic_rotate %0 by %c226_i32 dim 1 : vector<16x256xf32>, i32 -> vector<16x256xf32>
    %c20 = arith.constant 20 : index
    %c0_43 = arith.constant 0 : index
    %99 = tpu.strided_load %arg2[%c20, %c0_43] {strides = array<i32: 0, 1>} : memref<25x256xf32, #tpu.memory_space<vmem>>, vector<16x256xf32>
    %100 = arith.mulf %98, %99 : vector<16x256xf32>
    %101 = arith.truncf %100 : vector<16x256xf32> to vector<16x256xbf16>
    %c320 = arith.constant 320 : index
    %c0_44 = arith.constant 0 : index
    %102 = vector.load %arg12[%c320, %c0_44] : memref<400x256xbf16, #tpu.memory_space<vmem>>, vector<16x256xbf16>
    tpu.vector_store %arg12[%c320, %c0_44], %101 {strides = array<i32>} : memref<400x256xbf16, #tpu.memory_space<vmem>>, vector<16x256xbf16>,
    %c225_i32 = arith.constant 225 : i32
    %103 = tpu.dynamic_rotate %0 by %c225_i32 dim 1 : vector<16x256xf32>, i32 -> vector<16x256xf32>
    %c21 = arith.constant 21 : index
    %c0_45 = arith.constant 0 : index
    %104 = tpu.strided_load %arg2[%c21, %c0_45] {strides = array<i32: 0, 1>} : memref<25x256xf32, #tpu.memory_space<vmem>>, vector<16x256xf32>
    %105 = arith.mulf %103, %104 : vector<16x256xf32>
    %106 = arith.truncf %105 : vector<16x256xf32> to vector<16x256xbf16>
    %c336 = arith.constant 336 : index
    %c0_46 = arith.constant 0 : index
    %107 = vector.load %arg12[%c336, %c0_46] : memref<400x256xbf16, #tpu.memory_space<vmem>>, vector<16x256xbf16>
    tpu.vector_store %arg12[%c336, %c0_46], %106 {strides = array<i32>} : memref<400x256xbf16, #tpu.memory_space<vmem>>, vector<16x256xbf16>,
    %c224_i32 = arith.constant 224 : i32
    %108 = tpu.dynamic_rotate %0 by %c224_i32 dim 1 : vector<16x256xf32>, i32 -> vector<16x256xf32>
    %c22 = arith.constant 22 : index
    %c0_47 = arith.constant 0 : index
    %109 = tpu.strided_load %arg2[%c22, %c0_47] {strides = array<i32: 0, 1>} : memref<25x256xf32, #tpu.memory_space<vmem>>, vector<16x256xf32>
    %110 = arith.mulf %108, %109 : vector<16x256xf32>
    %111 = arith.truncf %110 : vector<16x256xf32> to vector<16x256xbf16>
    %c352 = arith.constant 352 : index
    %c0_48 = arith.constant 0 : index
    %112 = vector.load %arg12[%c352, %c0_48] : memref<400x256xbf16, #tpu.memory_space<vmem>>, vector<16x256xbf16>
    tpu.vector_store %arg12[%c352, %c0_48], %111 {strides = array<i32>} : memref<400x256xbf16, #tpu.memory_space<vmem>>, vector<16x256xbf16>,
    %c223_i32 = arith.constant 223 : i32
    %113 = tpu.dynamic_rotate %0 by %c223_i32 dim 1 : vector<16x256xf32>, i32 -> vector<16x256xf32>
    %c23 = arith.constant 23 : index
    %c0_49 = arith.constant 0 : index
    %114 = tpu.strided_load %arg2[%c23, %c0_49] {strides = array<i32: 0, 1>} : memref<25x256xf32, #tpu.memory_space<vmem>>, vector<16x256xf32>
    %115 = arith.mulf %113, %114 : vector<16x256xf32>
    %116 = arith.truncf %115 : vector<16x256xf32> to vector<16x256xbf16>
    %c368 = arith.constant 368 : index
    %c0_50 = arith.constant 0 : index
    %117 = vector.load %arg12[%c368, %c0_50] : memref<400x256xbf16, #tpu.memory_space<vmem>>, vector<16x256xbf16>
    tpu.vector_store %arg12[%c368, %c0_50], %116 {strides = array<i32>} : memref<400x256xbf16, #tpu.memory_space<vmem>>, vector<16x256xbf16>,
    %c222_i32 = arith.constant 222 : i32
    %118 = tpu.dynamic_rotate %0 by %c222_i32 dim 1 : vector<16x256xf32>, i32 -> vector<16x256xf32>
    %c24 = arith.constant 24 : index
    %c0_51 = arith.constant 0 : index
    %119 = tpu.strided_load %arg2[%c24, %c0_51] {strides = array<i32: 0, 1>} : memref<25x256xf32, #tpu.memory_space<vmem>>, vector<16x256xf32>
    %120 = arith.mulf %118, %119 : vector<16x256xf32>
    %121 = arith.truncf %120 : vector<16x256xf32> to vector<16x256xbf16>
    %c384 = arith.constant 384 : index
    %c0_52 = arith.constant 0 : index
    %122 = vector.load %arg12[%c384, %c0_52] : memref<400x256xbf16, #tpu.memory_space<vmem>>, vector<16x256xbf16>
    tpu.vector_store %arg12[%c384, %c0_52], %121 {strides = array<i32>} : memref<400x256xbf16, #tpu.memory_space<vmem>>, vector<16x256xbf16>,
    %c0_53 = arith.constant 0 : index
    %c0_54 = arith.constant 0 : index
    %123 = vector.load %arg3[%c0_53, %c0_54] : memref<16x400xbf16, #tpu.memory_space<vmem>>, vector<16x400xbf16>
    %c0_55 = arith.constant 0 : index
    %c0_56 = arith.constant 0 : index
    %124 = vector.load %arg12[%c0_55, %c0_56] : memref<400x256xbf16, #tpu.memory_space<vmem>>, vector<400x256xbf16>
    %cst = arith.constant dense<0.000000e+00> : vector<16x256xf32>
    %125 = tpu.matmul %123, %124, %cst {dimension_numbers = #tpu.dot_dimension_numbers<[1], [0], [0], [1], [0, 0, 1, 1], [], []>} : vector<16x400xbf16>, vector<400x256xbf16>, vector<16x256xf32> -> vector<16x256xf32>
    %c0_57 = arith.constant 0 : index
    %c0_58 = arith.constant 0 : index
    %126 = vector.load %arg4[%c0_57, %c0_58] : memref<16x1xf32, #tpu.memory_space<vmem>>, vector<16x1xf32>
    %127 = vector.broadcast %126 : vector<16x1xf32> to vector<16x256xf32>
    %128 = arith.addf %125, %127 : vector<16x256xf32>
    %cst_59 = arith.constant 5.000000e-01 : f32
    %129 = vector.broadcast %cst_59 : f32 to vector<16x256xf32>
    %130 = arith.mulf %129, %128 : vector<16x256xf32>
    %cst_60 = arith.constant 0.707106769 : f32
    %131 = vector.broadcast %cst_60 : f32 to vector<16x256xf32>
    %132 = arith.mulf %128, %131 : vector<16x256xf32>
    %133 = math.absf %132 : vector<16x256xf32>
    %cst_61 = arith.constant 0.327591091 : f32
    %134 = vector.broadcast %cst_61 : f32 to vector<16x256xf32>
    %135 = arith.mulf %134, %133 : vector<16x256xf32>
    %cst_62 = arith.constant 1.000000e+00 : f32
    %136 = vector.broadcast %cst_62 : f32 to vector<16x256xf32>
    %137 = arith.addf %136, %135 : vector<16x256xf32>
    %138 = tpu.reciprocal %137 {approx = true} : vector<16x256xf32> -> vector<16x256xf32>
    %cst_63 = arith.constant 1.06140542 : f32
    %139 = vector.broadcast %cst_63 : f32 to vector<16x256xf32>
    %140 = arith.mulf %138, %139 : vector<16x256xf32>
    %cst_64 = arith.constant -1.45315206 : f32
    %141 = vector.broadcast %cst_64 : f32 to vector<16x256xf32>
    %142 = arith.addf %141, %140 : vector<16x256xf32>
    %143 = arith.mulf %138, %142 : vector<16x256xf32>
    %cst_65 = arith.constant 1.42141378 : f32
    %144 = vector.broadcast %cst_65 : f32 to vector<16x256xf32>
    %145 = arith.addf %144, %143 : vector<16x256xf32>
    %146 = arith.mulf %138, %145 : vector<16x256xf32>
    %cst_66 = arith.constant -0.284496725 : f32
    %147 = vector.broadcast %cst_66 : f32 to vector<16x256xf32>
    %148 = arith.addf %147, %146 : vector<16x256xf32>
    %149 = arith.mulf %138, %148 : vector<16x256xf32>
    %cst_67 = arith.constant 0.254829586 : f32
    %150 = vector.broadcast %cst_67 : f32 to vector<16x256xf32>
    %151 = arith.addf %150, %149 : vector<16x256xf32>
    %152 = arith.mulf %138, %151 : vector<16x256xf32>
    %cst_68 = arith.constant 0.000000e+00 : f32
    %153 = vector.broadcast %cst_68 : f32 to vector<16x256xf32>
    %154 = arith.subf %153, %133 : vector<16x256xf32>
    %155 = arith.mulf %154, %133 : vector<16x256xf32>
    %156 = math.exp %155 : vector<16x256xf32>
    %157 = arith.mulf %152, %156 : vector<16x256xf32>
    %cst_69 = arith.constant 1.000000e+00 : f32
    %158 = vector.broadcast %cst_69 : f32 to vector<16x256xf32>
    %159 = arith.subf %158, %157 : vector<16x256xf32>
    %cst_70 = arith.constant 0.000000e+00 : f32
    %160 = vector.broadcast %cst_70 : f32 to vector<16x256xf32>
    %161 = arith.cmpf olt, %132, %160 : vector<16x256xf32>
    %cst_71 = arith.constant 0.000000e+00 : f32
    %162 = vector.broadcast %cst_71 : f32 to vector<16x256xf32>
    %163 = arith.subf %162, %159 : vector<16x256xf32>
    %164 = arith.select %161, %163, %159 : vector<16x256xi1>, vector<16x256xf32>
    %cst_72 = arith.constant 1.000000e+00 : f32
    %165 = vector.broadcast %cst_72 : f32 to vector<16x256xf32>
    %166 = arith.addf %165, %164 : vector<16x256xf32>
    %167 = arith.mulf %130, %166 : vector<16x256xf32>
    %c34_i32_73 = arith.constant 34 : i32
    %168 = tpu.dynamic_rotate %167 by %c34_i32_73 dim 1 : vector<16x256xf32>, i32 -> vector<16x256xf32>
    %c0_74 = arith.constant 0 : index
    %c0_75 = arith.constant 0 : index
    %169 = tpu.strided_load %arg2[%c0_74, %c0_75] {strides = array<i32: 0, 1>} : memref<25x256xf32, #tpu.memory_space<vmem>>, vector<16x256xf32>
    %170 = arith.mulf %168, %169 : vector<16x256xf32>
    %171 = arith.truncf %170 : vector<16x256xf32> to vector<16x256xbf16>
    %c0_76 = arith.constant 0 : index
    %c0_77 = arith.constant 0 : index
    %172 = vector.load %arg12[%c0_76, %c0_77] : memref<400x256xbf16, #tpu.memory_space<vmem>>, vector<16x256xbf16>
    tpu.vector_store %arg12[%c0_76, %c0_77], %171 {strides = array<i32>} : memref<400x256xbf16, #tpu.memory_space<vmem>>, vector<16x256xbf16>,
    %c33_i32_78 = arith.constant 33 : i32
    %173 = tpu.dynamic_rotate %167 by %c33_i32_78 dim 1 : vector<16x256xf32>, i32 -> vector<16x256xf32>
    %c1_79 = arith.constant 1 : index
    %c0_80 = arith.constant 0 : index
    %174 = tpu.strided_load %arg2[%c1_79, %c0_80] {strides = array<i32: 0, 1>} : memref<25x256xf32, #tpu.memory_space<vmem>>, vector<16x256xf32>
    %175 = arith.mulf %173, %174 : vector<16x256xf32>
    %176 = arith.truncf %175 : vector<16x256xf32> to vector<16x256xbf16>
    %c16_81 = arith.constant 16 : index
    %c0_82 = arith.constant 0 : index
    %177 = vector.load %arg12[%c16_81, %c0_82] : memref<400x256xbf16, #tpu.memory_space<vmem>>, vector<16x256xbf16>
    tpu.vector_store %arg12[%c16_81, %c0_82], %176 {strides = array<i32>} : memref<400x256xbf16, #tpu.memory_space<vmem>>, vector<16x256xbf16>,
    %c32_i32_83 = arith.constant 32 : i32
    %178 = tpu.dynamic_rotate %167 by %c32_i32_83 dim 1 : vector<16x256xf32>, i32 -> vector<16x256xf32>
    %c2_84 = arith.constant 2 : index
    %c0_85 = arith.constant 0 : index
    %179 = tpu.strided_load %arg2[%c2_84, %c0_85] {strides = array<i32: 0, 1>} : memref<25x256xf32, #tpu.memory_space<vmem>>, vector<16x256xf32>
    %180 = arith.mulf %178, %179 : vector<16x256xf32>
    %181 = arith.truncf %180 : vector<16x256xf32> to vector<16x256xbf16>
    %c32_86 = arith.constant 32 : index
    %c0_87 = arith.constant 0 : index
    %182 = vector.load %arg12[%c32_86, %c0_87] : memref<400x256xbf16, #tpu.memory_space<vmem>>, vector<16x256xbf16>
    tpu.vector_store %arg12[%c32_86, %c0_87], %181 {strides = array<i32>} : memref<400x256xbf16, #tpu.memory_space<vmem>>, vector<16x256xbf16>,
    %c31_i32_88 = arith.constant 31 : i32
    %183 = tpu.dynamic_rotate %167 by %c31_i32_88 dim 1 : vector<16x256xf32>, i32 -> vector<16x256xf32>
    %c3_89 = arith.constant 3 : index
    %c0_90 = arith.constant 0 : index
    %184 = tpu.strided_load %arg2[%c3_89, %c0_90] {strides = array<i32: 0, 1>} : memref<25x256xf32, #tpu.memory_space<vmem>>, vector<16x256xf32>
    %185 = arith.mulf %183, %184 : vector<16x256xf32>
    %186 = arith.truncf %185 : vector<16x256xf32> to vector<16x256xbf16>
    %c48_91 = arith.constant 48 : index
    %c0_92 = arith.constant 0 : index
    %187 = vector.load %arg12[%c48_91, %c0_92] : memref<400x256xbf16, #tpu.memory_space<vmem>>, vector<16x256xbf16>
    tpu.vector_store %arg12[%c48_91, %c0_92], %186 {strides = array<i32>} : memref<400x256xbf16, #tpu.memory_space<vmem>>, vector<16x256xbf16>,
    %c30_i32_93 = arith.constant 30 : i32
    %188 = tpu.dynamic_rotate %167 by %c30_i32_93 dim 1 : vector<16x256xf32>, i32 -> vector<16x256xf32>
    %c4_94 = arith.constant 4 : index
    %c0_95 = arith.constant 0 : index
    %189 = tpu.strided_load %arg2[%c4_94, %c0_95] {strides = array<i32: 0, 1>} : memref<25x256xf32, #tpu.memory_space<vmem>>, vector<16x256xf32>
    %190 = arith.mulf %188, %189 : vector<16x256xf32>
    %191 = arith.truncf %190 : vector<16x256xf32> to vector<16x256xbf16>
    %c64_96 = arith.constant 64 : index
    %c0_97 = arith.constant 0 : index
    %192 = vector.load %arg12[%c64_96, %c0_97] : memref<400x256xbf16, #tpu.memory_space<vmem>>, vector<16x256xbf16>
    tpu.vector_store %arg12[%c64_96, %c0_97], %191 {strides = array<i32>} : memref<400x256xbf16, #tpu.memory_space<vmem>>, vector<16x256xbf16>,
    %c18_i32_98 = arith.constant 18 : i32
    %193 = tpu.dynamic_rotate %167 by %c18_i32_98 dim 1 : vector<16x256xf32>, i32 -> vector<16x256xf32>
    %c5_99 = arith.constant 5 : index
    %c0_100 = arith.constant 0 : index
    %194 = tpu.strided_load %arg2[%c5_99, %c0_100] {strides = array<i32: 0, 1>} : memref<25x256xf32, #tpu.memory_space<vmem>>, vector<16x256xf32>
    %195 = arith.mulf %193, %194 : vector<16x256xf32>
    %196 = arith.truncf %195 : vector<16x256xf32> to vector<16x256xbf16>
    %c80_101 = arith.constant 80 : index
    %c0_102 = arith.constant 0 : index
    %197 = vector.load %arg12[%c80_101, %c0_102] : memref<400x256xbf16, #tpu.memory_space<vmem>>, vector<16x256xbf16>
    tpu.vector_store %arg12[%c80_101, %c0_102], %196 {strides = array<i32>} : memref<400x256xbf16, #tpu.memory_space<vmem>>, vector<16x256xbf16>,
    %c17_i32_103 = arith.constant 17 : i32
    %198 = tpu.dynamic_rotate %167 by %c17_i32_103 dim 1 : vector<16x256xf32>, i32 -> vector<16x256xf32>
    %c6_104 = arith.constant 6 : index
    %c0_105 = arith.constant 0 : index
    %199 = tpu.strided_load %arg2[%c6_104, %c0_105] {strides = array<i32: 0, 1>} : memref<25x256xf32, #tpu.memory_space<vmem>>, vector<16x256xf32>
    %200 = arith.mulf %198, %199 : vector<16x256xf32>
    %201 = arith.truncf %200 : vector<16x256xf32> to vector<16x256xbf16>
    %c96_106 = arith.constant 96 : index
    %c0_107 = arith.constant 0 : index
    %202 = vector.load %arg12[%c96_106, %c0_107] : memref<400x256xbf16, #tpu.memory_space<vmem>>, vector<16x256xbf16>
    tpu.vector_store %arg12[%c96_106, %c0_107], %201 {strides = array<i32>} : memref<400x256xbf16, #tpu.memory_space<vmem>>, vector<16x256xbf16>,
    %c16_i32_108 = arith.constant 16 : i32
    %203 = tpu.dynamic_rotate %167 by %c16_i32_108 dim 1 : vector<16x256xf32>, i32 -> vector<16x256xf32>
    %c7_109 = arith.constant 7 : index
    %c0_110 = arith.constant 0 : index
    %204 = tpu.strided_load %arg2[%c7_109, %c0_110] {strides = array<i32: 0, 1>} : memref<25x256xf32, #tpu.memory_space<vmem>>, vector<16x256xf32>
    %205 = arith.mulf %203, %204 : vector<16x256xf32>
    %206 = arith.truncf %205 : vector<16x256xf32> to vector<16x256xbf16>
    %c112_111 = arith.constant 112 : index
    %c0_112 = arith.constant 0 : index
    %207 = vector.load %arg12[%c112_111, %c0_112] : memref<400x256xbf16, #tpu.memory_space<vmem>>, vector<16x256xbf16>
    tpu.vector_store %arg12[%c112_111, %c0_112], %206 {strides = array<i32>} : memref<400x256xbf16, #tpu.memory_space<vmem>>, vector<16x256xbf16>,
    %c15_i32_113 = arith.constant 15 : i32
    %208 = tpu.dynamic_rotate %167 by %c15_i32_113 dim 1 : vector<16x256xf32>, i32 -> vector<16x256xf32>
    %c8_114 = arith.constant 8 : index
    %c0_115 = arith.constant 0 : index
    %209 = tpu.strided_load %arg2[%c8_114, %c0_115] {strides = array<i32: 0, 1>} : memref<25x256xf32, #tpu.memory_space<vmem>>, vector<16x256xf32>
    %210 = arith.mulf %208, %209 : vector<16x256xf32>
    %211 = arith.truncf %210 : vector<16x256xf32> to vector<16x256xbf16>
    %c128_116 = arith.constant 128 : index
    %c0_117 = arith.constant 0 : index
    %212 = vector.load %arg12[%c128_116, %c0_117] : memref<400x256xbf16, #tpu.memory_space<vmem>>, vector<16x256xbf16>
    tpu.vector_store %arg12[%c128_116, %c0_117], %211 {strides = array<i32>} : memref<400x256xbf16, #tpu.memory_space<vmem>>, vector<16x256xbf16>,
    %c14_i32_118 = arith.constant 14 : i32
    %213 = tpu.dynamic_rotate %167 by %c14_i32_118 dim 1 : vector<16x256xf32>, i32 -> vector<16x256xf32>
    %c9_119 = arith.constant 9 : index
    %c0_120 = arith.constant 0 : index
    %214 = tpu.strided_load %arg2[%c9_119, %c0_120] {strides = array<i32: 0, 1>} : memref<25x256xf32, #tpu.memory_space<vmem>>, vector<16x256xf32>
    %215 = arith.mulf %213, %214 : vector<16x256xf32>
    %216 = arith.truncf %215 : vector<16x256xf32> to vector<16x256xbf16>
    %c144_121 = arith.constant 144 : index
    %c0_122 = arith.constant 0 : index
    %217 = vector.load %arg12[%c144_121, %c0_122] : memref<400x256xbf16, #tpu.memory_space<vmem>>, vector<16x256xbf16>
    tpu.vector_store %arg12[%c144_121, %c0_122], %216 {strides = array<i32>} : memref<400x256xbf16, #tpu.memory_space<vmem>>, vector<16x256xbf16>,
    %c2_i32_123 = arith.constant 2 : i32
    %218 = tpu.dynamic_rotate %167 by %c2_i32_123 dim 1 : vector<16x256xf32>, i32 -> vector<16x256xf32>
    %c10_124 = arith.constant 10 : index
    %c0_125 = arith.constant 0 : index
    %219 = tpu.strided_load %arg2[%c10_124, %c0_125] {strides = array<i32: 0, 1>} : memref<25x256xf32, #tpu.memory_space<vmem>>, vector<16x256xf32>
    %220 = arith.mulf %218, %219 : vector<16x256xf32>
    %221 = arith.truncf %220 : vector<16x256xf32> to vector<16x256xbf16>
    %c160_126 = arith.constant 160 : index
    %c0_127 = arith.constant 0 : index
    %222 = vector.load %arg12[%c160_126, %c0_127] : memref<400x256xbf16, #tpu.memory_space<vmem>>, vector<16x256xbf16>
    tpu.vector_store %arg12[%c160_126, %c0_127], %221 {strides = array<i32>} : memref<400x256xbf16, #tpu.memory_space<vmem>>, vector<16x256xbf16>,
    %c1_i32_128 = arith.constant 1 : i32
    %223 = tpu.dynamic_rotate %167 by %c1_i32_128 dim 1 : vector<16x256xf32>, i32 -> vector<16x256xf32>
    %c11_129 = arith.constant 11 : index
    %c0_130 = arith.constant 0 : index
    %224 = tpu.strided_load %arg2[%c11_129, %c0_130] {strides = array<i32: 0, 1>} : memref<25x256xf32, #tpu.memory_space<vmem>>, vector<16x256xf32>
    %225 = arith.mulf %223, %224 : vector<16x256xf32>
    %226 = arith.truncf %225 : vector<16x256xf32> to vector<16x256xbf16>
    %c176_131 = arith.constant 176 : index
    %c0_132 = arith.constant 0 : index
    %227 = vector.load %arg12[%c176_131, %c0_132] : memref<400x256xbf16, #tpu.memory_space<vmem>>, vector<16x256xbf16>
    tpu.vector_store %arg12[%c176_131, %c0_132], %226 {strides = array<i32>} : memref<400x256xbf16, #tpu.memory_space<vmem>>, vector<16x256xbf16>,
    %228 = arith.truncf %167 : vector<16x256xf32> to vector<16x256xbf16>
    %c192_133 = arith.constant 192 : index
    %c0_134 = arith.constant 0 : index
    %229 = vector.load %arg12[%c192_133, %c0_134] : memref<400x256xbf16, #tpu.memory_space<vmem>>, vector<16x256xbf16>
    tpu.vector_store %arg12[%c192_133, %c0_134], %228 {strides = array<i32>} : memref<400x256xbf16, #tpu.memory_space<vmem>>, vector<16x256xbf16>,
    %c255_i32_135 = arith.constant 255 : i32
    %230 = tpu.dynamic_rotate %167 by %c255_i32_135 dim 1 : vector<16x256xf32>, i32 -> vector<16x256xf32>
    %c13_136 = arith.constant 13 : index
    %c0_137 = arith.constant 0 : index
    %231 = tpu.strided_load %arg2[%c13_136, %c0_137] {strides = array<i32: 0, 1>} : memref<25x256xf32, #tpu.memory_space<vmem>>, vector<16x256xf32>
    %232 = arith.mulf %230, %231 : vector<16x256xf32>
    %233 = arith.truncf %232 : vector<16x256xf32> to vector<16x256xbf16>
    %c208_138 = arith.constant 208 : index
    %c0_139 = arith.constant 0 : index
    %234 = vector.load %arg12[%c208_138, %c0_139] : memref<400x256xbf16, #tpu.memory_space<vmem>>, vector<16x256xbf16>
    tpu.vector_store %arg12[%c208_138, %c0_139], %233 {strides = array<i32>} : memref<400x256xbf16, #tpu.memory_space<vmem>>, vector<16x256xbf16>,
    %c254_i32_140 = arith.constant 254 : i32
    %235 = tpu.dynamic_rotate %167 by %c254_i32_140 dim 1 : vector<16x256xf32>, i32 -> vector<16x256xf32>
    %c14_141 = arith.constant 14 : index
    %c0_142 = arith.constant 0 : index
    %236 = tpu.strided_load %arg2[%c14_141, %c0_142] {strides = array<i32: 0, 1>} : memref<25x256xf32, #tpu.memory_space<vmem>>, vector<16x256xf32>
    %237 = arith.mulf %235, %236 : vector<16x256xf32>
    %238 = arith.truncf %237 : vector<16x256xf32> to vector<16x256xbf16>
    %c224_143 = arith.constant 224 : index
    %c0_144 = arith.constant 0 : index
    %239 = vector.load %arg12[%c224_143, %c0_144] : memref<400x256xbf16, #tpu.memory_space<vmem>>, vector<16x256xbf16>
    tpu.vector_store %arg12[%c224_143, %c0_144], %238 {strides = array<i32>} : memref<400x256xbf16, #tpu.memory_space<vmem>>, vector<16x256xbf16>,
    %c242_i32_145 = arith.constant 242 : i32
    %240 = tpu.dynamic_rotate %167 by %c242_i32_145 dim 1 : vector<16x256xf32>, i32 -> vector<16x256xf32>
    %c15_146 = arith.constant 15 : index
    %c0_147 = arith.constant 0 : index
    %241 = tpu.strided_load %arg2[%c15_146, %c0_147] {strides = array<i32: 0, 1>} : memref<25x256xf32, #tpu.memory_space<vmem>>, vector<16x256xf32>
    %242 = arith.mulf %240, %241 : vector<16x256xf32>
    %243 = arith.truncf %242 : vector<16x256xf32> to vector<16x256xbf16>
    %c240_148 = arith.constant 240 : index
    %c0_149 = arith.constant 0 : index
    %244 = vector.load %arg12[%c240_148, %c0_149] : memref<400x256xbf16, #tpu.memory_space<vmem>>, vector<16x256xbf16>
    tpu.vector_store %arg12[%c240_148, %c0_149], %243 {strides = array<i32>} : memref<400x256xbf16, #tpu.memory_space<vmem>>, vector<16x256xbf16>,
    %c241_i32_150 = arith.constant 241 : i32
    %245 = tpu.dynamic_rotate %167 by %c241_i32_150 dim 1 : vector<16x256xf32>, i32 -> vector<16x256xf32>
    %c16_151 = arith.constant 16 : index
    %c0_152 = arith.constant 0 : index
    %246 = tpu.strided_load %arg2[%c16_151, %c0_152] {strides = array<i32: 0, 1>} : memref<25x256xf32, #tpu.memory_space<vmem>>, vector<16x256xf32>
    %247 = arith.mulf %245, %246 : vector<16x256xf32>
    %248 = arith.truncf %247 : vector<16x256xf32> to vector<16x256xbf16>
    %c256_153 = arith.constant 256 : index
    %c0_154 = arith.constant 0 : index
    %249 = vector.load %arg12[%c256_153, %c0_154] : memref<400x256xbf16, #tpu.memory_space<vmem>>, vector<16x256xbf16>
    tpu.vector_store %arg12[%c256_153, %c0_154], %248 {strides = array<i32>} : memref<400x256xbf16, #tpu.memory_space<vmem>>, vector<16x256xbf16>,
    %c240_i32_155 = arith.constant 240 : i32
    %250 = tpu.dynamic_rotate %167 by %c240_i32_155 dim 1 : vector<16x256xf32>, i32 -> vector<16x256xf32>
    %c17_156 = arith.constant 17 : index
    %c0_157 = arith.constant 0 : index
    %251 = tpu.strided_load %arg2[%c17_156, %c0_157] {strides = array<i32: 0, 1>} : memref<25x256xf32, #tpu.memory_space<vmem>>, vector<16x256xf32>
    %252 = arith.mulf %250, %251 : vector<16x256xf32>
    %253 = arith.truncf %252 : vector<16x256xf32> to vector<16x256xbf16>
    %c272_158 = arith.constant 272 : index
    %c0_159 = arith.constant 0 : index
    %254 = vector.load %arg12[%c272_158, %c0_159] : memref<400x256xbf16, #tpu.memory_space<vmem>>, vector<16x256xbf16>
    tpu.vector_store %arg12[%c272_158, %c0_159], %253 {strides = array<i32>} : memref<400x256xbf16, #tpu.memory_space<vmem>>, vector<16x256xbf16>,
    %c239_i32_160 = arith.constant 239 : i32
    %255 = tpu.dynamic_rotate %167 by %c239_i32_160 dim 1 : vector<16x256xf32>, i32 -> vector<16x256xf32>
    %c18_161 = arith.constant 18 : index
    %c0_162 = arith.constant 0 : index
    %256 = tpu.strided_load %arg2[%c18_161, %c0_162] {strides = array<i32: 0, 1>} : memref<25x256xf32, #tpu.memory_space<vmem>>, vector<16x256xf32>
    %257 = arith.mulf %255, %256 : vector<16x256xf32>
    %258 = arith.truncf %257 : vector<16x256xf32> to vector<16x256xbf16>
    %c288_163 = arith.constant 288 : index
    %c0_164 = arith.constant 0 : index
    %259 = vector.load %arg12[%c288_163, %c0_164] : memref<400x256xbf16, #tpu.memory_space<vmem>>, vector<16x256xbf16>
    tpu.vector_store %arg12[%c288_163, %c0_164], %258 {strides = array<i32>} : memref<400x256xbf16, #tpu.memory_space<vmem>>, vector<16x256xbf16>,
    %c238_i32_165 = arith.constant 238 : i32
    %260 = tpu.dynamic_rotate %167 by %c238_i32_165 dim 1 : vector<16x256xf32>, i32 -> vector<16x256xf32>
    %c19_166 = arith.constant 19 : index
    %c0_167 = arith.constant 0 : index
    %261 = tpu.strided_load %arg2[%c19_166, %c0_167] {strides = array<i32: 0, 1>} : memref<25x256xf32, #tpu.memory_space<vmem>>, vector<16x256xf32>
    %262 = arith.mulf %260, %261 : vector<16x256xf32>
    %263 = arith.truncf %262 : vector<16x256xf32> to vector<16x256xbf16>
    %c304_168 = arith.constant 304 : index
    %c0_169 = arith.constant 0 : index
    %264 = vector.load %arg12[%c304_168, %c0_169] : memref<400x256xbf16, #tpu.memory_space<vmem>>, vector<16x256xbf16>
    tpu.vector_store %arg12[%c304_168, %c0_169], %263 {strides = array<i32>} : memref<400x256xbf16, #tpu.memory_space<vmem>>, vector<16x256xbf16>,
    %c226_i32_170 = arith.constant 226 : i32
    %265 = tpu.dynamic_rotate %167 by %c226_i32_170 dim 1 : vector<16x256xf32>, i32 -> vector<16x256xf32>
    %c20_171 = arith.constant 20 : index
    %c0_172 = arith.constant 0 : index
    %266 = tpu.strided_load %arg2[%c20_171, %c0_172] {strides = array<i32: 0, 1>} : memref<25x256xf32, #tpu.memory_space<vmem>>, vector<16x256xf32>
    %267 = arith.mulf %265, %266 : vector<16x256xf32>
    %268 = arith.truncf %267 : vector<16x256xf32> to vector<16x256xbf16>
    %c320_173 = arith.constant 320 : index
    %c0_174 = arith.constant 0 : index
    %269 = vector.load %arg12[%c320_173, %c0_174] : memref<400x256xbf16, #tpu.memory_space<vmem>>, vector<16x256xbf16>
    tpu.vector_store %arg12[%c320_173, %c0_174], %268 {strides = array<i32>} : memref<400x256xbf16, #tpu.memory_space<vmem>>, vector<16x256xbf16>,
    %c225_i32_175 = arith.constant 225 : i32
    %270 = tpu.dynamic_rotate %167 by %c225_i32_175 dim 1 : vector<16x256xf32>, i32 -> vector<16x256xf32>
    %c21_176 = arith.constant 21 : index
    %c0_177 = arith.constant 0 : index
    %271 = tpu.strided_load %arg2[%c21_176, %c0_177] {strides = array<i32: 0, 1>} : memref<25x256xf32, #tpu.memory_space<vmem>>, vector<16x256xf32>
    %272 = arith.mulf %270, %271 : vector<16x256xf32>
    %273 = arith.truncf %272 : vector<16x256xf32> to vector<16x256xbf16>
    %c336_178 = arith.constant 336 : index
    %c0_179 = arith.constant 0 : index
    %274 = vector.load %arg12[%c336_178, %c0_179] : memref<400x256xbf16, #tpu.memory_space<vmem>>, vector<16x256xbf16>
    tpu.vector_store %arg12[%c336_178, %c0_179], %273 {strides = array<i32>} : memref<400x256xbf16, #tpu.memory_space<vmem>>, vector<16x256xbf16>,
    %c224_i32_180 = arith.constant 224 : i32
    %275 = tpu.dynamic_rotate %167 by %c224_i32_180 dim 1 : vector<16x256xf32>, i32 -> vector<16x256xf32>
    %c22_181 = arith.constant 22 : index
    %c0_182 = arith.constant 0 : index
    %276 = tpu.strided_load %arg2[%c22_181, %c0_182] {strides = array<i32: 0, 1>} : memref<25x256xf32, #tpu.memory_space<vmem>>, vector<16x256xf32>
    %277 = arith.mulf %275, %276 : vector<16x256xf32>
    %278 = arith.truncf %277 : vector<16x256xf32> to vector<16x256xbf16>
    %c352_183 = arith.constant 352 : index
    %c0_184 = arith.constant 0 : index
    %279 = vector.load %arg12[%c352_183, %c0_184] : memref<400x256xbf16, #tpu.memory_space<vmem>>, vector<16x256xbf16>
    tpu.vector_store %arg12[%c352_183, %c0_184], %278 {strides = array<i32>} : memref<400x256xbf16, #tpu.memory_space<vmem>>, vector<16x256xbf16>,
    %c223_i32_185 = arith.constant 223 : i32
    %280 = tpu.dynamic_rotate %167 by %c223_i32_185 dim 1 : vector<16x256xf32>, i32 -> vector<16x256xf32>
    %c23_186 = arith.constant 23 : index
    %c0_187 = arith.constant 0 : index
    %281 = tpu.strided_load %arg2[%c23_186, %c0_187] {strides = array<i32: 0, 1>} : memref<25x256xf32, #tpu.memory_space<vmem>>, vector<16x256xf32>
    %282 = arith.mulf %280, %281 : vector<16x256xf32>
    %283 = arith.truncf %282 : vector<16x256xf32> to vector<16x256xbf16>
    %c368_188 = arith.constant 368 : index
    %c0_189 = arith.constant 0 : index
    %284 = vector.load %arg12[%c368_188, %c0_189] : memref<400x256xbf16, #tpu.memory_space<vmem>>, vector<16x256xbf16>
    tpu.vector_store %arg12[%c368_188, %c0_189], %283 {strides = array<i32>} : memref<400x256xbf16, #tpu.memory_space<vmem>>, vector<16x256xbf16>,
    %c222_i32_190 = arith.constant 222 : i32
    %285 = tpu.dynamic_rotate %167 by %c222_i32_190 dim 1 : vector<16x256xf32>, i32 -> vector<16x256xf32>
    %c24_191 = arith.constant 24 : index
    %c0_192 = arith.constant 0 : index
    %286 = tpu.strided_load %arg2[%c24_191, %c0_192] {strides = array<i32: 0, 1>} : memref<25x256xf32, #tpu.memory_space<vmem>>, vector<16x256xf32>
    %287 = arith.mulf %285, %286 : vector<16x256xf32>
    %288 = arith.truncf %287 : vector<16x256xf32> to vector<16x256xbf16>
    %c384_193 = arith.constant 384 : index
    %c0_194 = arith.constant 0 : index
    %289 = vector.load %arg12[%c384_193, %c0_194] : memref<400x256xbf16, #tpu.memory_space<vmem>>, vector<16x256xbf16>
    tpu.vector_store %arg12[%c384_193, %c0_194], %288 {strides = array<i32>} : memref<400x256xbf16, #tpu.memory_space<vmem>>, vector<16x256xbf16>,
    %c0_195 = arith.constant 0 : index
    %c0_196 = arith.constant 0 : index
    %290 = vector.load %arg5[%c0_195, %c0_196] : memref<16x400xbf16, #tpu.memory_space<vmem>>, vector<16x400xbf16>
    %c0_197 = arith.constant 0 : index
    %c0_198 = arith.constant 0 : index
    %291 = vector.load %arg12[%c0_197, %c0_198] : memref<400x256xbf16, #tpu.memory_space<vmem>>, vector<400x256xbf16>
    %cst_199 = arith.constant dense<0.000000e+00> : vector<16x256xf32>
    %292 = tpu.matmul %290, %291, %cst_199 {dimension_numbers = #tpu.dot_dimension_numbers<[1], [0], [0], [1], [0, 0, 1, 1], [], []>} : vector<16x400xbf16>, vector<400x256xbf16>, vector<16x256xf32> -> vector<16x256xf32>
    %c0_200 = arith.constant 0 : index
    %c0_201 = arith.constant 0 : index
    %293 = vector.load %arg6[%c0_200, %c0_201] : memref<16x1xf32, #tpu.memory_space<vmem>>, vector<16x1xf32>
    %294 = vector.broadcast %293 : vector<16x1xf32> to vector<16x256xf32>
    %295 = arith.addf %292, %294 : vector<16x256xf32>
    %cst_202 = arith.constant 5.000000e-01 : f32
    %296 = vector.broadcast %cst_202 : f32 to vector<16x256xf32>
    %297 = arith.mulf %296, %295 : vector<16x256xf32>
    %cst_203 = arith.constant 0.707106769 : f32
    %298 = vector.broadcast %cst_203 : f32 to vector<16x256xf32>
    %299 = arith.mulf %295, %298 : vector<16x256xf32>
    %300 = math.absf %299 : vector<16x256xf32>
    %cst_204 = arith.constant 0.327591091 : f32
    %301 = vector.broadcast %cst_204 : f32 to vector<16x256xf32>
    %302 = arith.mulf %301, %300 : vector<16x256xf32>
    %cst_205 = arith.constant 1.000000e+00 : f32
    %303 = vector.broadcast %cst_205 : f32 to vector<16x256xf32>
    %304 = arith.addf %303, %302 : vector<16x256xf32>
    %305 = tpu.reciprocal %304 {approx = true} : vector<16x256xf32> -> vector<16x256xf32>
    %cst_206 = arith.constant 1.06140542 : f32
    %306 = vector.broadcast %cst_206 : f32 to vector<16x256xf32>
    %307 = arith.mulf %305, %306 : vector<16x256xf32>
    %cst_207 = arith.constant -1.45315206 : f32
    %308 = vector.broadcast %cst_207 : f32 to vector<16x256xf32>
    %309 = arith.addf %308, %307 : vector<16x256xf32>
    %310 = arith.mulf %305, %309 : vector<16x256xf32>
    %cst_208 = arith.constant 1.42141378 : f32
    %311 = vector.broadcast %cst_208 : f32 to vector<16x256xf32>
    %312 = arith.addf %311, %310 : vector<16x256xf32>
    %313 = arith.mulf %305, %312 : vector<16x256xf32>
    %cst_209 = arith.constant -0.284496725 : f32
    %314 = vector.broadcast %cst_209 : f32 to vector<16x256xf32>
    %315 = arith.addf %314, %313 : vector<16x256xf32>
    %316 = arith.mulf %305, %315 : vector<16x256xf32>
    %cst_210 = arith.constant 0.254829586 : f32
    %317 = vector.broadcast %cst_210 : f32 to vector<16x256xf32>
    %318 = arith.addf %317, %316 : vector<16x256xf32>
    %319 = arith.mulf %305, %318 : vector<16x256xf32>
    %cst_211 = arith.constant 0.000000e+00 : f32
    %320 = vector.broadcast %cst_211 : f32 to vector<16x256xf32>
    %321 = arith.subf %320, %300 : vector<16x256xf32>
    %322 = arith.mulf %321, %300 : vector<16x256xf32>
    %323 = math.exp %322 : vector<16x256xf32>
    %324 = arith.mulf %319, %323 : vector<16x256xf32>
    %cst_212 = arith.constant 1.000000e+00 : f32
    %325 = vector.broadcast %cst_212 : f32 to vector<16x256xf32>
    %326 = arith.subf %325, %324 : vector<16x256xf32>
    %cst_213 = arith.constant 0.000000e+00 : f32
    %327 = vector.broadcast %cst_213 : f32 to vector<16x256xf32>
    %328 = arith.cmpf olt, %299, %327 : vector<16x256xf32>
    %cst_214 = arith.constant 0.000000e+00 : f32
    %329 = vector.broadcast %cst_214 : f32 to vector<16x256xf32>
    %330 = arith.subf %329, %326 : vector<16x256xf32>
    %331 = arith.select %328, %330, %326 : vector<16x256xi1>, vector<16x256xf32>
    %cst_215 = arith.constant 1.000000e+00 : f32
    %332 = vector.broadcast %cst_215 : f32 to vector<16x256xf32>
    %333 = arith.addf %332, %331 : vector<16x256xf32>
    %334 = arith.mulf %297, %333 : vector<16x256xf32>
    %c34_i32_216 = arith.constant 34 : i32
    %335 = tpu.dynamic_rotate %334 by %c34_i32_216 dim 1 : vector<16x256xf32>, i32 -> vector<16x256xf32>
    %c0_217 = arith.constant 0 : index
    %c0_218 = arith.constant 0 : index
    %336 = tpu.strided_load %arg2[%c0_217, %c0_218] {strides = array<i32: 0, 1>} : memref<25x256xf32, #tpu.memory_space<vmem>>, vector<16x256xf32>
    %337 = arith.mulf %335, %336 : vector<16x256xf32>
    %338 = arith.truncf %337 : vector<16x256xf32> to vector<16x256xbf16>
    %c0_219 = arith.constant 0 : index
    %c0_220 = arith.constant 0 : index
    %339 = vector.load %arg12[%c0_219, %c0_220] : memref<400x256xbf16, #tpu.memory_space<vmem>>, vector<16x256xbf16>
    tpu.vector_store %arg12[%c0_219, %c0_220], %338 {strides = array<i32>} : memref<400x256xbf16, #tpu.memory_space<vmem>>, vector<16x256xbf16>,
    %c33_i32_221 = arith.constant 33 : i32
    %340 = tpu.dynamic_rotate %334 by %c33_i32_221 dim 1 : vector<16x256xf32>, i32 -> vector<16x256xf32>
    %c1_222 = arith.constant 1 : index
    %c0_223 = arith.constant 0 : index
    %341 = tpu.strided_load %arg2[%c1_222, %c0_223] {strides = array<i32: 0, 1>} : memref<25x256xf32, #tpu.memory_space<vmem>>, vector<16x256xf32>
    %342 = arith.mulf %340, %341 : vector<16x256xf32>
    %343 = arith.truncf %342 : vector<16x256xf32> to vector<16x256xbf16>
    %c16_224 = arith.constant 16 : index
    %c0_225 = arith.constant 0 : index
    %344 = vector.load %arg12[%c16_224, %c0_225] : memref<400x256xbf16, #tpu.memory_space<vmem>>, vector<16x256xbf16>
    tpu.vector_store %arg12[%c16_224, %c0_225], %343 {strides = array<i32>} : memref<400x256xbf16, #tpu.memory_space<vmem>>, vector<16x256xbf16>,
    %c32_i32_226 = arith.constant 32 : i32
    %345 = tpu.dynamic_rotate %334 by %c32_i32_226 dim 1 : vector<16x256xf32>, i32 -> vector<16x256xf32>
    %c2_227 = arith.constant 2 : index
    %c0_228 = arith.constant 0 : index
    %346 = tpu.strided_load %arg2[%c2_227, %c0_228] {strides = array<i32: 0, 1>} : memref<25x256xf32, #tpu.memory_space<vmem>>, vector<16x256xf32>
    %347 = arith.mulf %345, %346 : vector<16x256xf32>
    %348 = arith.truncf %347 : vector<16x256xf32> to vector<16x256xbf16>
    %c32_229 = arith.constant 32 : index
    %c0_230 = arith.constant 0 : index
    %349 = vector.load %arg12[%c32_229, %c0_230] : memref<400x256xbf16, #tpu.memory_space<vmem>>, vector<16x256xbf16>
    tpu.vector_store %arg12[%c32_229, %c0_230], %348 {strides = array<i32>} : memref<400x256xbf16, #tpu.memory_space<vmem>>, vector<16x256xbf16>,
    %c31_i32_231 = arith.constant 31 : i32
    %350 = tpu.dynamic_rotate %334 by %c31_i32_231 dim 1 : vector<16x256xf32>, i32 -> vector<16x256xf32>
    %c3_232 = arith.constant 3 : index
    %c0_233 = arith.constant 0 : index
    %351 = tpu.strided_load %arg2[%c3_232, %c0_233] {strides = array<i32: 0, 1>} : memref<25x256xf32, #tpu.memory_space<vmem>>, vector<16x256xf32>
    %352 = arith.mulf %350, %351 : vector<16x256xf32>
    %353 = arith.truncf %352 : vector<16x256xf32> to vector<16x256xbf16>
    %c48_234 = arith.constant 48 : index
    %c0_235 = arith.constant 0 : index
    %354 = vector.load %arg12[%c48_234, %c0_235] : memref<400x256xbf16, #tpu.memory_space<vmem>>, vector<16x256xbf16>
    tpu.vector_store %arg12[%c48_234, %c0_235], %353 {strides = array<i32>} : memref<400x256xbf16, #tpu.memory_space<vmem>>, vector<16x256xbf16>,
    %c30_i32_236 = arith.constant 30 : i32
    %355 = tpu.dynamic_rotate %334 by %c30_i32_236 dim 1 : vector<16x256xf32>, i32 -> vector<16x256xf32>
    %c4_237 = arith.constant 4 : index
    %c0_238 = arith.constant 0 : index
    %356 = tpu.strided_load %arg2[%c4_237, %c0_238] {strides = array<i32: 0, 1>} : memref<25x256xf32, #tpu.memory_space<vmem>>, vector<16x256xf32>
    %357 = arith.mulf %355, %356 : vector<16x256xf32>
    %358 = arith.truncf %357 : vector<16x256xf32> to vector<16x256xbf16>
    %c64_239 = arith.constant 64 : index
    %c0_240 = arith.constant 0 : index
    %359 = vector.load %arg12[%c64_239, %c0_240] : memref<400x256xbf16, #tpu.memory_space<vmem>>, vector<16x256xbf16>
    tpu.vector_store %arg12[%c64_239, %c0_240], %358 {strides = array<i32>} : memref<400x256xbf16, #tpu.memory_space<vmem>>, vector<16x256xbf16>,
    %c18_i32_241 = arith.constant 18 : i32
    %360 = tpu.dynamic_rotate %334 by %c18_i32_241 dim 1 : vector<16x256xf32>, i32 -> vector<16x256xf32>
    %c5_242 = arith.constant 5 : index
    %c0_243 = arith.constant 0 : index
    %361 = tpu.strided_load %arg2[%c5_242, %c0_243] {strides = array<i32: 0, 1>} : memref<25x256xf32, #tpu.memory_space<vmem>>, vector<16x256xf32>
    %362 = arith.mulf %360, %361 : vector<16x256xf32>
    %363 = arith.truncf %362 : vector<16x256xf32> to vector<16x256xbf16>
    %c80_244 = arith.constant 80 : index
    %c0_245 = arith.constant 0 : index
    %364 = vector.load %arg12[%c80_244, %c0_245] : memref<400x256xbf16, #tpu.memory_space<vmem>>, vector<16x256xbf16>
    tpu.vector_store %arg12[%c80_244, %c0_245], %363 {strides = array<i32>} : memref<400x256xbf16, #tpu.memory_space<vmem>>, vector<16x256xbf16>,
    %c17_i32_246 = arith.constant 17 : i32
    %365 = tpu.dynamic_rotate %334 by %c17_i32_246 dim 1 : vector<16x256xf32>, i32 -> vector<16x256xf32>
    %c6_247 = arith.constant 6 : index
    %c0_248 = arith.constant 0 : index
    %366 = tpu.strided_load %arg2[%c6_247, %c0_248] {strides = array<i32: 0, 1>} : memref<25x256xf32, #tpu.memory_space<vmem>>, vector<16x256xf32>
    %367 = arith.mulf %365, %366 : vector<16x256xf32>
    %368 = arith.truncf %367 : vector<16x256xf32> to vector<16x256xbf16>
    %c96_249 = arith.constant 96 : index
    %c0_250 = arith.constant 0 : index
    %369 = vector.load %arg12[%c96_249, %c0_250] : memref<400x256xbf16, #tpu.memory_space<vmem>>, vector<16x256xbf16>
    tpu.vector_store %arg12[%c96_249, %c0_250], %368 {strides = array<i32>} : memref<400x256xbf16, #tpu.memory_space<vmem>>, vector<16x256xbf16>,
    %c16_i32_251 = arith.constant 16 : i32
    %370 = tpu.dynamic_rotate %334 by %c16_i32_251 dim 1 : vector<16x256xf32>, i32 -> vector<16x256xf32>
    %c7_252 = arith.constant 7 : index
    %c0_253 = arith.constant 0 : index
    %371 = tpu.strided_load %arg2[%c7_252, %c0_253] {strides = array<i32: 0, 1>} : memref<25x256xf32, #tpu.memory_space<vmem>>, vector<16x256xf32>
    %372 = arith.mulf %370, %371 : vector<16x256xf32>
    %373 = arith.truncf %372 : vector<16x256xf32> to vector<16x256xbf16>
    %c112_254 = arith.constant 112 : index
    %c0_255 = arith.constant 0 : index
    %374 = vector.load %arg12[%c112_254, %c0_255] : memref<400x256xbf16, #tpu.memory_space<vmem>>, vector<16x256xbf16>
    tpu.vector_store %arg12[%c112_254, %c0_255], %373 {strides = array<i32>} : memref<400x256xbf16, #tpu.memory_space<vmem>>, vector<16x256xbf16>,
    %c15_i32_256 = arith.constant 15 : i32
    %375 = tpu.dynamic_rotate %334 by %c15_i32_256 dim 1 : vector<16x256xf32>, i32 -> vector<16x256xf32>
    %c8_257 = arith.constant 8 : index
    %c0_258 = arith.constant 0 : index
    %376 = tpu.strided_load %arg2[%c8_257, %c0_258] {strides = array<i32: 0, 1>} : memref<25x256xf32, #tpu.memory_space<vmem>>, vector<16x256xf32>
    %377 = arith.mulf %375, %376 : vector<16x256xf32>
    %378 = arith.truncf %377 : vector<16x256xf32> to vector<16x256xbf16>
    %c128_259 = arith.constant 128 : index
    %c0_260 = arith.constant 0 : index
    %379 = vector.load %arg12[%c128_259, %c0_260] : memref<400x256xbf16, #tpu.memory_space<vmem>>, vector<16x256xbf16>
    tpu.vector_store %arg12[%c128_259, %c0_260], %378 {strides = array<i32>} : memref<400x256xbf16, #tpu.memory_space<vmem>>, vector<16x256xbf16>,
    %c14_i32_261 = arith.constant 14 : i32
    %380 = tpu.dynamic_rotate %334 by %c14_i32_261 dim 1 : vector<16x256xf32>, i32 -> vector<16x256xf32>
    %c9_262 = arith.constant 9 : index
    %c0_263 = arith.constant 0 : index
    %381 = tpu.strided_load %arg2[%c9_262, %c0_263] {strides = array<i32: 0, 1>} : memref<25x256xf32, #tpu.memory_space<vmem>>, vector<16x256xf32>
    %382 = arith.mulf %380, %381 : vector<16x256xf32>
    %383 = arith.truncf %382 : vector<16x256xf32> to vector<16x256xbf16>
    %c144_264 = arith.constant 144 : index
    %c0_265 = arith.constant 0 : index
    %384 = vector.load %arg12[%c144_264, %c0_265] : memref<400x256xbf16, #tpu.memory_space<vmem>>, vector<16x256xbf16>
    tpu.vector_store %arg12[%c144_264, %c0_265], %383 {strides = array<i32>} : memref<400x256xbf16, #tpu.memory_space<vmem>>, vector<16x256xbf16>,
    %c2_i32_266 = arith.constant 2 : i32
    %385 = tpu.dynamic_rotate %334 by %c2_i32_266 dim 1 : vector<16x256xf32>, i32 -> vector<16x256xf32>
    %c10_267 = arith.constant 10 : index
    %c0_268 = arith.constant 0 : index
    %386 = tpu.strided_load %arg2[%c10_267, %c0_268] {strides = array<i32: 0, 1>} : memref<25x256xf32, #tpu.memory_space<vmem>>, vector<16x256xf32>
    %387 = arith.mulf %385, %386 : vector<16x256xf32>
    %388 = arith.truncf %387 : vector<16x256xf32> to vector<16x256xbf16>
    %c160_269 = arith.constant 160 : index
    %c0_270 = arith.constant 0 : index
    %389 = vector.load %arg12[%c160_269, %c0_270] : memref<400x256xbf16, #tpu.memory_space<vmem>>, vector<16x256xbf16>
    tpu.vector_store %arg12[%c160_269, %c0_270], %388 {strides = array<i32>} : memref<400x256xbf16, #tpu.memory_space<vmem>>, vector<16x256xbf16>,
    %c1_i32_271 = arith.constant 1 : i32
    %390 = tpu.dynamic_rotate %334 by %c1_i32_271 dim 1 : vector<16x256xf32>, i32 -> vector<16x256xf32>
    %c11_272 = arith.constant 11 : index
    %c0_273 = arith.constant 0 : index
    %391 = tpu.strided_load %arg2[%c11_272, %c0_273] {strides = array<i32: 0, 1>} : memref<25x256xf32, #tpu.memory_space<vmem>>, vector<16x256xf32>
    %392 = arith.mulf %390, %391 : vector<16x256xf32>
    %393 = arith.truncf %392 : vector<16x256xf32> to vector<16x256xbf16>
    %c176_274 = arith.constant 176 : index
    %c0_275 = arith.constant 0 : index
    %394 = vector.load %arg12[%c176_274, %c0_275] : memref<400x256xbf16, #tpu.memory_space<vmem>>, vector<16x256xbf16>
    tpu.vector_store %arg12[%c176_274, %c0_275], %393 {strides = array<i32>} : memref<400x256xbf16, #tpu.memory_space<vmem>>, vector<16x256xbf16>,
    %395 = arith.truncf %334 : vector<16x256xf32> to vector<16x256xbf16>
    %c192_276 = arith.constant 192 : index
    %c0_277 = arith.constant 0 : index
    %396 = vector.load %arg12[%c192_276, %c0_277] : memref<400x256xbf16, #tpu.memory_space<vmem>>, vector<16x256xbf16>
    tpu.vector_store %arg12[%c192_276, %c0_277], %395 {strides = array<i32>} : memref<400x256xbf16, #tpu.memory_space<vmem>>, vector<16x256xbf16>,
    %c255_i32_278 = arith.constant 255 : i32
    %397 = tpu.dynamic_rotate %334 by %c255_i32_278 dim 1 : vector<16x256xf32>, i32 -> vector<16x256xf32>
    %c13_279 = arith.constant 13 : index
    %c0_280 = arith.constant 0 : index
    %398 = tpu.strided_load %arg2[%c13_279, %c0_280] {strides = array<i32: 0, 1>} : memref<25x256xf32, #tpu.memory_space<vmem>>, vector<16x256xf32>
    %399 = arith.mulf %397, %398 : vector<16x256xf32>
    %400 = arith.truncf %399 : vector<16x256xf32> to vector<16x256xbf16>
    %c208_281 = arith.constant 208 : index
    %c0_282 = arith.constant 0 : index
    %401 = vector.load %arg12[%c208_281, %c0_282] : memref<400x256xbf16, #tpu.memory_space<vmem>>, vector<16x256xbf16>
    tpu.vector_store %arg12[%c208_281, %c0_282], %400 {strides = array<i32>} : memref<400x256xbf16, #tpu.memory_space<vmem>>, vector<16x256xbf16>,
    %c254_i32_283 = arith.constant 254 : i32
    %402 = tpu.dynamic_rotate %334 by %c254_i32_283 dim 1 : vector<16x256xf32>, i32 -> vector<16x256xf32>
    %c14_284 = arith.constant 14 : index
    %c0_285 = arith.constant 0 : index
    %403 = tpu.strided_load %arg2[%c14_284, %c0_285] {strides = array<i32: 0, 1>} : memref<25x256xf32, #tpu.memory_space<vmem>>, vector<16x256xf32>
    %404 = arith.mulf %402, %403 : vector<16x256xf32>
    %405 = arith.truncf %404 : vector<16x256xf32> to vector<16x256xbf16>
    %c224_286 = arith.constant 224 : index
    %c0_287 = arith.constant 0 : index
    %406 = vector.load %arg12[%c224_286, %c0_287] : memref<400x256xbf16, #tpu.memory_space<vmem>>, vector<16x256xbf16>
    tpu.vector_store %arg12[%c224_286, %c0_287], %405 {strides = array<i32>} : memref<400x256xbf16, #tpu.memory_space<vmem>>, vector<16x256xbf16>,
    %c242_i32_288 = arith.constant 242 : i32
    %407 = tpu.dynamic_rotate %334 by %c242_i32_288 dim 1 : vector<16x256xf32>, i32 -> vector<16x256xf32>
    %c15_289 = arith.constant 15 : index
    %c0_290 = arith.constant 0 : index
    %408 = tpu.strided_load %arg2[%c15_289, %c0_290] {strides = array<i32: 0, 1>} : memref<25x256xf32, #tpu.memory_space<vmem>>, vector<16x256xf32>
    %409 = arith.mulf %407, %408 : vector<16x256xf32>
    %410 = arith.truncf %409 : vector<16x256xf32> to vector<16x256xbf16>
    %c240_291 = arith.constant 240 : index
    %c0_292 = arith.constant 0 : index
    %411 = vector.load %arg12[%c240_291, %c0_292] : memref<400x256xbf16, #tpu.memory_space<vmem>>, vector<16x256xbf16>
    tpu.vector_store %arg12[%c240_291, %c0_292], %410 {strides = array<i32>} : memref<400x256xbf16, #tpu.memory_space<vmem>>, vector<16x256xbf16>,
    %c241_i32_293 = arith.constant 241 : i32
    %412 = tpu.dynamic_rotate %334 by %c241_i32_293 dim 1 : vector<16x256xf32>, i32 -> vector<16x256xf32>
    %c16_294 = arith.constant 16 : index
    %c0_295 = arith.constant 0 : index
    %413 = tpu.strided_load %arg2[%c16_294, %c0_295] {strides = array<i32: 0, 1>} : memref<25x256xf32, #tpu.memory_space<vmem>>, vector<16x256xf32>
    %414 = arith.mulf %412, %413 : vector<16x256xf32>
    %415 = arith.truncf %414 : vector<16x256xf32> to vector<16x256xbf16>
    %c256_296 = arith.constant 256 : index
    %c0_297 = arith.constant 0 : index
    %416 = vector.load %arg12[%c256_296, %c0_297] : memref<400x256xbf16, #tpu.memory_space<vmem>>, vector<16x256xbf16>
    tpu.vector_store %arg12[%c256_296, %c0_297], %415 {strides = array<i32>} : memref<400x256xbf16, #tpu.memory_space<vmem>>, vector<16x256xbf16>,
    %c240_i32_298 = arith.constant 240 : i32
    %417 = tpu.dynamic_rotate %334 by %c240_i32_298 dim 1 : vector<16x256xf32>, i32 -> vector<16x256xf32>
    %c17_299 = arith.constant 17 : index
    %c0_300 = arith.constant 0 : index
    %418 = tpu.strided_load %arg2[%c17_299, %c0_300] {strides = array<i32: 0, 1>} : memref<25x256xf32, #tpu.memory_space<vmem>>, vector<16x256xf32>
    %419 = arith.mulf %417, %418 : vector<16x256xf32>
    %420 = arith.truncf %419 : vector<16x256xf32> to vector<16x256xbf16>
    %c272_301 = arith.constant 272 : index
    %c0_302 = arith.constant 0 : index
    %421 = vector.load %arg12[%c272_301, %c0_302] : memref<400x256xbf16, #tpu.memory_space<vmem>>, vector<16x256xbf16>
    tpu.vector_store %arg12[%c272_301, %c0_302], %420 {strides = array<i32>} : memref<400x256xbf16, #tpu.memory_space<vmem>>, vector<16x256xbf16>,
    %c239_i32_303 = arith.constant 239 : i32
    %422 = tpu.dynamic_rotate %334 by %c239_i32_303 dim 1 : vector<16x256xf32>, i32 -> vector<16x256xf32>
    %c18_304 = arith.constant 18 : index
    %c0_305 = arith.constant 0 : index
    %423 = tpu.strided_load %arg2[%c18_304, %c0_305] {strides = array<i32: 0, 1>} : memref<25x256xf32, #tpu.memory_space<vmem>>, vector<16x256xf32>
    %424 = arith.mulf %422, %423 : vector<16x256xf32>
    %425 = arith.truncf %424 : vector<16x256xf32> to vector<16x256xbf16>
    %c288_306 = arith.constant 288 : index
    %c0_307 = arith.constant 0 : index
    %426 = vector.load %arg12[%c288_306, %c0_307] : memref<400x256xbf16, #tpu.memory_space<vmem>>, vector<16x256xbf16>
    tpu.vector_store %arg12[%c288_306, %c0_307], %425 {strides = array<i32>} : memref<400x256xbf16, #tpu.memory_space<vmem>>, vector<16x256xbf16>,
    %c238_i32_308 = arith.constant 238 : i32
    %427 = tpu.dynamic_rotate %334 by %c238_i32_308 dim 1 : vector<16x256xf32>, i32 -> vector<16x256xf32>
    %c19_309 = arith.constant 19 : index
    %c0_310 = arith.constant 0 : index
    %428 = tpu.strided_load %arg2[%c19_309, %c0_310] {strides = array<i32: 0, 1>} : memref<25x256xf32, #tpu.memory_space<vmem>>, vector<16x256xf32>
    %429 = arith.mulf %427, %428 : vector<16x256xf32>
    %430 = arith.truncf %429 : vector<16x256xf32> to vector<16x256xbf16>
    %c304_311 = arith.constant 304 : index
    %c0_312 = arith.constant 0 : index
    %431 = vector.load %arg12[%c304_311, %c0_312] : memref<400x256xbf16, #tpu.memory_space<vmem>>, vector<16x256xbf16>
    tpu.vector_store %arg12[%c304_311, %c0_312], %430 {strides = array<i32>} : memref<400x256xbf16, #tpu.memory_space<vmem>>, vector<16x256xbf16>,
    %c226_i32_313 = arith.constant 226 : i32
    %432 = tpu.dynamic_rotate %334 by %c226_i32_313 dim 1 : vector<16x256xf32>, i32 -> vector<16x256xf32>
    %c20_314 = arith.constant 20 : index
    %c0_315 = arith.constant 0 : index
    %433 = tpu.strided_load %arg2[%c20_314, %c0_315] {strides = array<i32: 0, 1>} : memref<25x256xf32, #tpu.memory_space<vmem>>, vector<16x256xf32>
    %434 = arith.mulf %432, %433 : vector<16x256xf32>
    %435 = arith.truncf %434 : vector<16x256xf32> to vector<16x256xbf16>
    %c320_316 = arith.constant 320 : index
    %c0_317 = arith.constant 0 : index
    %436 = vector.load %arg12[%c320_316, %c0_317] : memref<400x256xbf16, #tpu.memory_space<vmem>>, vector<16x256xbf16>
    tpu.vector_store %arg12[%c320_316, %c0_317], %435 {strides = array<i32>} : memref<400x256xbf16, #tpu.memory_space<vmem>>, vector<16x256xbf16>,
    %c225_i32_318 = arith.constant 225 : i32
    %437 = tpu.dynamic_rotate %334 by %c225_i32_318 dim 1 : vector<16x256xf32>, i32 -> vector<16x256xf32>
    %c21_319 = arith.constant 21 : index
    %c0_320 = arith.constant 0 : index
    %438 = tpu.strided_load %arg2[%c21_319, %c0_320] {strides = array<i32: 0, 1>} : memref<25x256xf32, #tpu.memory_space<vmem>>, vector<16x256xf32>
    %439 = arith.mulf %437, %438 : vector<16x256xf32>
    %440 = arith.truncf %439 : vector<16x256xf32> to vector<16x256xbf16>
    %c336_321 = arith.constant 336 : index
    %c0_322 = arith.constant 0 : index
    %441 = vector.load %arg12[%c336_321, %c0_322] : memref<400x256xbf16, #tpu.memory_space<vmem>>, vector<16x256xbf16>
    tpu.vector_store %arg12[%c336_321, %c0_322], %440 {strides = array<i32>} : memref<400x256xbf16, #tpu.memory_space<vmem>>, vector<16x256xbf16>,
    %c224_i32_323 = arith.constant 224 : i32
    %442 = tpu.dynamic_rotate %334 by %c224_i32_323 dim 1 : vector<16x256xf32>, i32 -> vector<16x256xf32>
    %c22_324 = arith.constant 22 : index
    %c0_325 = arith.constant 0 : index
    %443 = tpu.strided_load %arg2[%c22_324, %c0_325] {strides = array<i32: 0, 1>} : memref<25x256xf32, #tpu.memory_space<vmem>>, vector<16x256xf32>
    %444 = arith.mulf %442, %443 : vector<16x256xf32>
    %445 = arith.truncf %444 : vector<16x256xf32> to vector<16x256xbf16>
    %c352_326 = arith.constant 352 : index
    %c0_327 = arith.constant 0 : index
    %446 = vector.load %arg12[%c352_326, %c0_327] : memref<400x256xbf16, #tpu.memory_space<vmem>>, vector<16x256xbf16>
    tpu.vector_store %arg12[%c352_326, %c0_327], %445 {strides = array<i32>} : memref<400x256xbf16, #tpu.memory_space<vmem>>, vector<16x256xbf16>,
    %c223_i32_328 = arith.constant 223 : i32
    %447 = tpu.dynamic_rotate %334 by %c223_i32_328 dim 1 : vector<16x256xf32>, i32 -> vector<16x256xf32>
    %c23_329 = arith.constant 23 : index
    %c0_330 = arith.constant 0 : index
    %448 = tpu.strided_load %arg2[%c23_329, %c0_330] {strides = array<i32: 0, 1>} : memref<25x256xf32, #tpu.memory_space<vmem>>, vector<16x256xf32>
    %449 = arith.mulf %447, %448 : vector<16x256xf32>
    %450 = arith.truncf %449 : vector<16x256xf32> to vector<16x256xbf16>
    %c368_331 = arith.constant 368 : index
    %c0_332 = arith.constant 0 : index
    %451 = vector.load %arg12[%c368_331, %c0_332] : memref<400x256xbf16, #tpu.memory_space<vmem>>, vector<16x256xbf16>
    tpu.vector_store %arg12[%c368_331, %c0_332], %450 {strides = array<i32>} : memref<400x256xbf16, #tpu.memory_space<vmem>>, vector<16x256xbf16>,
    %c222_i32_333 = arith.constant 222 : i32
    %452 = tpu.dynamic_rotate %334 by %c222_i32_333 dim 1 : vector<16x256xf32>, i32 -> vector<16x256xf32>
    %c24_334 = arith.constant 24 : index
    %c0_335 = arith.constant 0 : index
    %453 = tpu.strided_load %arg2[%c24_334, %c0_335] {strides = array<i32: 0, 1>} : memref<25x256xf32, #tpu.memory_space<vmem>>, vector<16x256xf32>
    %454 = arith.mulf %452, %453 : vector<16x256xf32>
    %455 = arith.truncf %454 : vector<16x256xf32> to vector<16x256xbf16>
    %c384_336 = arith.constant 384 : index
    %c0_337 = arith.constant 0 : index
    %456 = vector.load %arg12[%c384_336, %c0_337] : memref<400x256xbf16, #tpu.memory_space<vmem>>, vector<16x256xbf16>
    tpu.vector_store %arg12[%c384_336, %c0_337], %455 {strides = array<i32>} : memref<400x256xbf16, #tpu.memory_space<vmem>>, vector<16x256xbf16>,
    %c0_338 = arith.constant 0 : index
    %c0_339 = arith.constant 0 : index
    %457 = vector.load %arg7[%c0_338, %c0_339] : memref<16x400xbf16, #tpu.memory_space<vmem>>, vector<16x400xbf16>
    %c0_340 = arith.constant 0 : index
    %c0_341 = arith.constant 0 : index
    %458 = vector.load %arg12[%c0_340, %c0_341] : memref<400x256xbf16, #tpu.memory_space<vmem>>, vector<400x256xbf16>
    %cst_342 = arith.constant dense<0.000000e+00> : vector<16x256xf32>
    %459 = tpu.matmul %457, %458, %cst_342 {dimension_numbers = #tpu.dot_dimension_numbers<[1], [0], [0], [1], [0, 0, 1, 1], [], []>} : vector<16x400xbf16>, vector<400x256xbf16>, vector<16x256xf32> -> vector<16x256xf32>
    %c0_343 = arith.constant 0 : index
    %c0_344 = arith.constant 0 : index
    %460 = vector.load %arg8[%c0_343, %c0_344] : memref<16x1xf32, #tpu.memory_space<vmem>>, vector<16x1xf32>
    %461 = vector.broadcast %460 : vector<16x1xf32> to vector<16x256xf32>
    %462 = arith.addf %459, %461 : vector<16x256xf32>
    %cst_345 = arith.constant 5.000000e-01 : f32
    %463 = vector.broadcast %cst_345 : f32 to vector<16x256xf32>
    %464 = arith.mulf %463, %462 : vector<16x256xf32>
    %cst_346 = arith.constant 0.707106769 : f32
    %465 = vector.broadcast %cst_346 : f32 to vector<16x256xf32>
    %466 = arith.mulf %462, %465 : vector<16x256xf32>
    %467 = math.absf %466 : vector<16x256xf32>
    %cst_347 = arith.constant 0.327591091 : f32
    %468 = vector.broadcast %cst_347 : f32 to vector<16x256xf32>
    %469 = arith.mulf %468, %467 : vector<16x256xf32>
    %cst_348 = arith.constant 1.000000e+00 : f32
    %470 = vector.broadcast %cst_348 : f32 to vector<16x256xf32>
    %471 = arith.addf %470, %469 : vector<16x256xf32>
    %472 = tpu.reciprocal %471 {approx = true} : vector<16x256xf32> -> vector<16x256xf32>
    %cst_349 = arith.constant 1.06140542 : f32
    %473 = vector.broadcast %cst_349 : f32 to vector<16x256xf32>
    %474 = arith.mulf %472, %473 : vector<16x256xf32>
    %cst_350 = arith.constant -1.45315206 : f32
    %475 = vector.broadcast %cst_350 : f32 to vector<16x256xf32>
    %476 = arith.addf %475, %474 : vector<16x256xf32>
    %477 = arith.mulf %472, %476 : vector<16x256xf32>
    %cst_351 = arith.constant 1.42141378 : f32
    %478 = vector.broadcast %cst_351 : f32 to vector<16x256xf32>
    %479 = arith.addf %478, %477 : vector<16x256xf32>
    %480 = arith.mulf %472, %479 : vector<16x256xf32>
    %cst_352 = arith.constant -0.284496725 : f32
    %481 = vector.broadcast %cst_352 : f32 to vector<16x256xf32>
    %482 = arith.addf %481, %480 : vector<16x256xf32>
    %483 = arith.mulf %472, %482 : vector<16x256xf32>
    %cst_353 = arith.constant 0.254829586 : f32
    %484 = vector.broadcast %cst_353 : f32 to vector<16x256xf32>
    %485 = arith.addf %484, %483 : vector<16x256xf32>
    %486 = arith.mulf %472, %485 : vector<16x256xf32>
    %cst_354 = arith.constant 0.000000e+00 : f32
    %487 = vector.broadcast %cst_354 : f32 to vector<16x256xf32>
    %488 = arith.subf %487, %467 : vector<16x256xf32>
    %489 = arith.mulf %488, %467 : vector<16x256xf32>
    %490 = math.exp %489 : vector<16x256xf32>
    %491 = arith.mulf %486, %490 : vector<16x256xf32>
    %cst_355 = arith.constant 1.000000e+00 : f32
    %492 = vector.broadcast %cst_355 : f32 to vector<16x256xf32>
    %493 = arith.subf %492, %491 : vector<16x256xf32>
    %cst_356 = arith.constant 0.000000e+00 : f32
    %494 = vector.broadcast %cst_356 : f32 to vector<16x256xf32>
    %495 = arith.cmpf olt, %466, %494 : vector<16x256xf32>
    %cst_357 = arith.constant 0.000000e+00 : f32
    %496 = vector.broadcast %cst_357 : f32 to vector<16x256xf32>
    %497 = arith.subf %496, %493 : vector<16x256xf32>
    %498 = arith.select %495, %497, %493 : vector<16x256xi1>, vector<16x256xf32>
    %cst_358 = arith.constant 1.000000e+00 : f32
    %499 = vector.broadcast %cst_358 : f32 to vector<16x256xf32>
    %500 = arith.addf %499, %498 : vector<16x256xf32>
    %501 = arith.mulf %464, %500 : vector<16x256xf32>
    %c34_i32_359 = arith.constant 34 : i32
    %502 = tpu.dynamic_rotate %501 by %c34_i32_359 dim 1 : vector<16x256xf32>, i32 -> vector<16x256xf32>
    %c0_360 = arith.constant 0 : index
    %c0_361 = arith.constant 0 : index
    %503 = tpu.strided_load %arg2[%c0_360, %c0_361] {strides = array<i32: 0, 1>} : memref<25x256xf32, #tpu.memory_space<vmem>>, vector<16x256xf32>
    %504 = arith.mulf %502, %503 : vector<16x256xf32>
    %505 = arith.truncf %504 : vector<16x256xf32> to vector<16x256xbf16>
    %c0_362 = arith.constant 0 : index
    %c0_363 = arith.constant 0 : index
    %506 = vector.load %arg12[%c0_362, %c0_363] : memref<400x256xbf16, #tpu.memory_space<vmem>>, vector<16x256xbf16>
    tpu.vector_store %arg12[%c0_362, %c0_363], %505 {strides = array<i32>} : memref<400x256xbf16, #tpu.memory_space<vmem>>, vector<16x256xbf16>,
    %c33_i32_364 = arith.constant 33 : i32
    %507 = tpu.dynamic_rotate %501 by %c33_i32_364 dim 1 : vector<16x256xf32>, i32 -> vector<16x256xf32>
    %c1_365 = arith.constant 1 : index
    %c0_366 = arith.constant 0 : index
    %508 = tpu.strided_load %arg2[%c1_365, %c0_366] {strides = array<i32: 0, 1>} : memref<25x256xf32, #tpu.memory_space<vmem>>, vector<16x256xf32>
    %509 = arith.mulf %507, %508 : vector<16x256xf32>
    %510 = arith.truncf %509 : vector<16x256xf32> to vector<16x256xbf16>
    %c16_367 = arith.constant 16 : index
    %c0_368 = arith.constant 0 : index
    %511 = vector.load %arg12[%c16_367, %c0_368] : memref<400x256xbf16, #tpu.memory_space<vmem>>, vector<16x256xbf16>
    tpu.vector_store %arg12[%c16_367, %c0_368], %510 {strides = array<i32>} : memref<400x256xbf16, #tpu.memory_space<vmem>>, vector<16x256xbf16>,
    %c32_i32_369 = arith.constant 32 : i32
    %512 = tpu.dynamic_rotate %501 by %c32_i32_369 dim 1 : vector<16x256xf32>, i32 -> vector<16x256xf32>
    %c2_370 = arith.constant 2 : index
    %c0_371 = arith.constant 0 : index
    %513 = tpu.strided_load %arg2[%c2_370, %c0_371] {strides = array<i32: 0, 1>} : memref<25x256xf32, #tpu.memory_space<vmem>>, vector<16x256xf32>
    %514 = arith.mulf %512, %513 : vector<16x256xf32>
    %515 = arith.truncf %514 : vector<16x256xf32> to vector<16x256xbf16>
    %c32_372 = arith.constant 32 : index
    %c0_373 = arith.constant 0 : index
    %516 = vector.load %arg12[%c32_372, %c0_373] : memref<400x256xbf16, #tpu.memory_space<vmem>>, vector<16x256xbf16>
    tpu.vector_store %arg12[%c32_372, %c0_373], %515 {strides = array<i32>} : memref<400x256xbf16, #tpu.memory_space<vmem>>, vector<16x256xbf16>,
    %c31_i32_374 = arith.constant 31 : i32
    %517 = tpu.dynamic_rotate %501 by %c31_i32_374 dim 1 : vector<16x256xf32>, i32 -> vector<16x256xf32>
    %c3_375 = arith.constant 3 : index
    %c0_376 = arith.constant 0 : index
    %518 = tpu.strided_load %arg2[%c3_375, %c0_376] {strides = array<i32: 0, 1>} : memref<25x256xf32, #tpu.memory_space<vmem>>, vector<16x256xf32>
    %519 = arith.mulf %517, %518 : vector<16x256xf32>
    %520 = arith.truncf %519 : vector<16x256xf32> to vector<16x256xbf16>
    %c48_377 = arith.constant 48 : index
    %c0_378 = arith.constant 0 : index
    %521 = vector.load %arg12[%c48_377, %c0_378] : memref<400x256xbf16, #tpu.memory_space<vmem>>, vector<16x256xbf16>
    tpu.vector_store %arg12[%c48_377, %c0_378], %520 {strides = array<i32>} : memref<400x256xbf16, #tpu.memory_space<vmem>>, vector<16x256xbf16>,
    %c30_i32_379 = arith.constant 30 : i32
    %522 = tpu.dynamic_rotate %501 by %c30_i32_379 dim 1 : vector<16x256xf32>, i32 -> vector<16x256xf32>
    %c4_380 = arith.constant 4 : index
    %c0_381 = arith.constant 0 : index
    %523 = tpu.strided_load %arg2[%c4_380, %c0_381] {strides = array<i32: 0, 1>} : memref<25x256xf32, #tpu.memory_space<vmem>>, vector<16x256xf32>
    %524 = arith.mulf %522, %523 : vector<16x256xf32>
    %525 = arith.truncf %524 : vector<16x256xf32> to vector<16x256xbf16>
    %c64_382 = arith.constant 64 : index
    %c0_383 = arith.constant 0 : index
    %526 = vector.load %arg12[%c64_382, %c0_383] : memref<400x256xbf16, #tpu.memory_space<vmem>>, vector<16x256xbf16>
    tpu.vector_store %arg12[%c64_382, %c0_383], %525 {strides = array<i32>} : memref<400x256xbf16, #tpu.memory_space<vmem>>, vector<16x256xbf16>,
    %c18_i32_384 = arith.constant 18 : i32
    %527 = tpu.dynamic_rotate %501 by %c18_i32_384 dim 1 : vector<16x256xf32>, i32 -> vector<16x256xf32>
    %c5_385 = arith.constant 5 : index
    %c0_386 = arith.constant 0 : index
    %528 = tpu.strided_load %arg2[%c5_385, %c0_386] {strides = array<i32: 0, 1>} : memref<25x256xf32, #tpu.memory_space<vmem>>, vector<16x256xf32>
    %529 = arith.mulf %527, %528 : vector<16x256xf32>
    %530 = arith.truncf %529 : vector<16x256xf32> to vector<16x256xbf16>
    %c80_387 = arith.constant 80 : index
    %c0_388 = arith.constant 0 : index
    %531 = vector.load %arg12[%c80_387, %c0_388] : memref<400x256xbf16, #tpu.memory_space<vmem>>, vector<16x256xbf16>
    tpu.vector_store %arg12[%c80_387, %c0_388], %530 {strides = array<i32>} : memref<400x256xbf16, #tpu.memory_space<vmem>>, vector<16x256xbf16>,
    %c17_i32_389 = arith.constant 17 : i32
    %532 = tpu.dynamic_rotate %501 by %c17_i32_389 dim 1 : vector<16x256xf32>, i32 -> vector<16x256xf32>
    %c6_390 = arith.constant 6 : index
    %c0_391 = arith.constant 0 : index
    %533 = tpu.strided_load %arg2[%c6_390, %c0_391] {strides = array<i32: 0, 1>} : memref<25x256xf32, #tpu.memory_space<vmem>>, vector<16x256xf32>
    %534 = arith.mulf %532, %533 : vector<16x256xf32>
    %535 = arith.truncf %534 : vector<16x256xf32> to vector<16x256xbf16>
    %c96_392 = arith.constant 96 : index
    %c0_393 = arith.constant 0 : index
    %536 = vector.load %arg12[%c96_392, %c0_393] : memref<400x256xbf16, #tpu.memory_space<vmem>>, vector<16x256xbf16>
    tpu.vector_store %arg12[%c96_392, %c0_393], %535 {strides = array<i32>} : memref<400x256xbf16, #tpu.memory_space<vmem>>, vector<16x256xbf16>,
    %c16_i32_394 = arith.constant 16 : i32
    %537 = tpu.dynamic_rotate %501 by %c16_i32_394 dim 1 : vector<16x256xf32>, i32 -> vector<16x256xf32>
    %c7_395 = arith.constant 7 : index
    %c0_396 = arith.constant 0 : index
    %538 = tpu.strided_load %arg2[%c7_395, %c0_396] {strides = array<i32: 0, 1>} : memref<25x256xf32, #tpu.memory_space<vmem>>, vector<16x256xf32>
    %539 = arith.mulf %537, %538 : vector<16x256xf32>
    %540 = arith.truncf %539 : vector<16x256xf32> to vector<16x256xbf16>
    %c112_397 = arith.constant 112 : index
    %c0_398 = arith.constant 0 : index
    %541 = vector.load %arg12[%c112_397, %c0_398] : memref<400x256xbf16, #tpu.memory_space<vmem>>, vector<16x256xbf16>
    tpu.vector_store %arg12[%c112_397, %c0_398], %540 {strides = array<i32>} : memref<400x256xbf16, #tpu.memory_space<vmem>>, vector<16x256xbf16>,
    %c15_i32_399 = arith.constant 15 : i32
    %542 = tpu.dynamic_rotate %501 by %c15_i32_399 dim 1 : vector<16x256xf32>, i32 -> vector<16x256xf32>
    %c8_400 = arith.constant 8 : index
    %c0_401 = arith.constant 0 : index
    %543 = tpu.strided_load %arg2[%c8_400, %c0_401] {strides = array<i32: 0, 1>} : memref<25x256xf32, #tpu.memory_space<vmem>>, vector<16x256xf32>
    %544 = arith.mulf %542, %543 : vector<16x256xf32>
    %545 = arith.truncf %544 : vector<16x256xf32> to vector<16x256xbf16>
    %c128_402 = arith.constant 128 : index
    %c0_403 = arith.constant 0 : index
    %546 = vector.load %arg12[%c128_402, %c0_403] : memref<400x256xbf16, #tpu.memory_space<vmem>>, vector<16x256xbf16>
    tpu.vector_store %arg12[%c128_402, %c0_403], %545 {strides = array<i32>} : memref<400x256xbf16, #tpu.memory_space<vmem>>, vector<16x256xbf16>,
    %c14_i32_404 = arith.constant 14 : i32
    %547 = tpu.dynamic_rotate %501 by %c14_i32_404 dim 1 : vector<16x256xf32>, i32 -> vector<16x256xf32>
    %c9_405 = arith.constant 9 : index
    %c0_406 = arith.constant 0 : index
    %548 = tpu.strided_load %arg2[%c9_405, %c0_406] {strides = array<i32: 0, 1>} : memref<25x256xf32, #tpu.memory_space<vmem>>, vector<16x256xf32>
    %549 = arith.mulf %547, %548 : vector<16x256xf32>
    %550 = arith.truncf %549 : vector<16x256xf32> to vector<16x256xbf16>
    %c144_407 = arith.constant 144 : index
    %c0_408 = arith.constant 0 : index
    %551 = vector.load %arg12[%c144_407, %c0_408] : memref<400x256xbf16, #tpu.memory_space<vmem>>, vector<16x256xbf16>
    tpu.vector_store %arg12[%c144_407, %c0_408], %550 {strides = array<i32>} : memref<400x256xbf16, #tpu.memory_space<vmem>>, vector<16x256xbf16>,
    %c2_i32_409 = arith.constant 2 : i32
    %552 = tpu.dynamic_rotate %501 by %c2_i32_409 dim 1 : vector<16x256xf32>, i32 -> vector<16x256xf32>
    %c10_410 = arith.constant 10 : index
    %c0_411 = arith.constant 0 : index
    %553 = tpu.strided_load %arg2[%c10_410, %c0_411] {strides = array<i32: 0, 1>} : memref<25x256xf32, #tpu.memory_space<vmem>>, vector<16x256xf32>
    %554 = arith.mulf %552, %553 : vector<16x256xf32>
    %555 = arith.truncf %554 : vector<16x256xf32> to vector<16x256xbf16>
    %c160_412 = arith.constant 160 : index
    %c0_413 = arith.constant 0 : index
    %556 = vector.load %arg12[%c160_412, %c0_413] : memref<400x256xbf16, #tpu.memory_space<vmem>>, vector<16x256xbf16>
    tpu.vector_store %arg12[%c160_412, %c0_413], %555 {strides = array<i32>} : memref<400x256xbf16, #tpu.memory_space<vmem>>, vector<16x256xbf16>,
    %c1_i32_414 = arith.constant 1 : i32
    %557 = tpu.dynamic_rotate %501 by %c1_i32_414 dim 1 : vector<16x256xf32>, i32 -> vector<16x256xf32>
    %c11_415 = arith.constant 11 : index
    %c0_416 = arith.constant 0 : index
    %558 = tpu.strided_load %arg2[%c11_415, %c0_416] {strides = array<i32: 0, 1>} : memref<25x256xf32, #tpu.memory_space<vmem>>, vector<16x256xf32>
    %559 = arith.mulf %557, %558 : vector<16x256xf32>
    %560 = arith.truncf %559 : vector<16x256xf32> to vector<16x256xbf16>
    %c176_417 = arith.constant 176 : index
    %c0_418 = arith.constant 0 : index
    %561 = vector.load %arg12[%c176_417, %c0_418] : memref<400x256xbf16, #tpu.memory_space<vmem>>, vector<16x256xbf16>
    tpu.vector_store %arg12[%c176_417, %c0_418], %560 {strides = array<i32>} : memref<400x256xbf16, #tpu.memory_space<vmem>>, vector<16x256xbf16>,
    %562 = arith.truncf %501 : vector<16x256xf32> to vector<16x256xbf16>
    %c192_419 = arith.constant 192 : index
    %c0_420 = arith.constant 0 : index
    %563 = vector.load %arg12[%c192_419, %c0_420] : memref<400x256xbf16, #tpu.memory_space<vmem>>, vector<16x256xbf16>
    tpu.vector_store %arg12[%c192_419, %c0_420], %562 {strides = array<i32>} : memref<400x256xbf16, #tpu.memory_space<vmem>>, vector<16x256xbf16>,
    %c255_i32_421 = arith.constant 255 : i32
    %564 = tpu.dynamic_rotate %501 by %c255_i32_421 dim 1 : vector<16x256xf32>, i32 -> vector<16x256xf32>
    %c13_422 = arith.constant 13 : index
    %c0_423 = arith.constant 0 : index
    %565 = tpu.strided_load %arg2[%c13_422, %c0_423] {strides = array<i32: 0, 1>} : memref<25x256xf32, #tpu.memory_space<vmem>>, vector<16x256xf32>
    %566 = arith.mulf %564, %565 : vector<16x256xf32>
    %567 = arith.truncf %566 : vector<16x256xf32> to vector<16x256xbf16>
    %c208_424 = arith.constant 208 : index
    %c0_425 = arith.constant 0 : index
    %568 = vector.load %arg12[%c208_424, %c0_425] : memref<400x256xbf16, #tpu.memory_space<vmem>>, vector<16x256xbf16>
    tpu.vector_store %arg12[%c208_424, %c0_425], %567 {strides = array<i32>} : memref<400x256xbf16, #tpu.memory_space<vmem>>, vector<16x256xbf16>,
    %c254_i32_426 = arith.constant 254 : i32
    %569 = tpu.dynamic_rotate %501 by %c254_i32_426 dim 1 : vector<16x256xf32>, i32 -> vector<16x256xf32>
    %c14_427 = arith.constant 14 : index
    %c0_428 = arith.constant 0 : index
    %570 = tpu.strided_load %arg2[%c14_427, %c0_428] {strides = array<i32: 0, 1>} : memref<25x256xf32, #tpu.memory_space<vmem>>, vector<16x256xf32>
    %571 = arith.mulf %569, %570 : vector<16x256xf32>
    %572 = arith.truncf %571 : vector<16x256xf32> to vector<16x256xbf16>
    %c224_429 = arith.constant 224 : index
    %c0_430 = arith.constant 0 : index
    %573 = vector.load %arg12[%c224_429, %c0_430] : memref<400x256xbf16, #tpu.memory_space<vmem>>, vector<16x256xbf16>
    tpu.vector_store %arg12[%c224_429, %c0_430], %572 {strides = array<i32>} : memref<400x256xbf16, #tpu.memory_space<vmem>>, vector<16x256xbf16>,
    %c242_i32_431 = arith.constant 242 : i32
    %574 = tpu.dynamic_rotate %501 by %c242_i32_431 dim 1 : vector<16x256xf32>, i32 -> vector<16x256xf32>
    %c15_432 = arith.constant 15 : index
    %c0_433 = arith.constant 0 : index
    %575 = tpu.strided_load %arg2[%c15_432, %c0_433] {strides = array<i32: 0, 1>} : memref<25x256xf32, #tpu.memory_space<vmem>>, vector<16x256xf32>
    %576 = arith.mulf %574, %575 : vector<16x256xf32>
    %577 = arith.truncf %576 : vector<16x256xf32> to vector<16x256xbf16>
    %c240_434 = arith.constant 240 : index
    %c0_435 = arith.constant 0 : index
    %578 = vector.load %arg12[%c240_434, %c0_435] : memref<400x256xbf16, #tpu.memory_space<vmem>>, vector<16x256xbf16>
    tpu.vector_store %arg12[%c240_434, %c0_435], %577 {strides = array<i32>} : memref<400x256xbf16, #tpu.memory_space<vmem>>, vector<16x256xbf16>,
    %c241_i32_436 = arith.constant 241 : i32
    %579 = tpu.dynamic_rotate %501 by %c241_i32_436 dim 1 : vector<16x256xf32>, i32 -> vector<16x256xf32>
    %c16_437 = arith.constant 16 : index
    %c0_438 = arith.constant 0 : index
    %580 = tpu.strided_load %arg2[%c16_437, %c0_438] {strides = array<i32: 0, 1>} : memref<25x256xf32, #tpu.memory_space<vmem>>, vector<16x256xf32>
    %581 = arith.mulf %579, %580 : vector<16x256xf32>
    %582 = arith.truncf %581 : vector<16x256xf32> to vector<16x256xbf16>
    %c256_439 = arith.constant 256 : index
    %c0_440 = arith.constant 0 : index
    %583 = vector.load %arg12[%c256_439, %c0_440] : memref<400x256xbf16, #tpu.memory_space<vmem>>, vector<16x256xbf16>
    tpu.vector_store %arg12[%c256_439, %c0_440], %582 {strides = array<i32>} : memref<400x256xbf16, #tpu.memory_space<vmem>>, vector<16x256xbf16>,
    %c240_i32_441 = arith.constant 240 : i32
    %584 = tpu.dynamic_rotate %501 by %c240_i32_441 dim 1 : vector<16x256xf32>, i32 -> vector<16x256xf32>
    %c17_442 = arith.constant 17 : index
    %c0_443 = arith.constant 0 : index
    %585 = tpu.strided_load %arg2[%c17_442, %c0_443] {strides = array<i32: 0, 1>} : memref<25x256xf32, #tpu.memory_space<vmem>>, vector<16x256xf32>
    %586 = arith.mulf %584, %585 : vector<16x256xf32>
    %587 = arith.truncf %586 : vector<16x256xf32> to vector<16x256xbf16>
    %c272_444 = arith.constant 272 : index
    %c0_445 = arith.constant 0 : index
    %588 = vector.load %arg12[%c272_444, %c0_445] : memref<400x256xbf16, #tpu.memory_space<vmem>>, vector<16x256xbf16>
    tpu.vector_store %arg12[%c272_444, %c0_445], %587 {strides = array<i32>} : memref<400x256xbf16, #tpu.memory_space<vmem>>, vector<16x256xbf16>,
    %c239_i32_446 = arith.constant 239 : i32
    %589 = tpu.dynamic_rotate %501 by %c239_i32_446 dim 1 : vector<16x256xf32>, i32 -> vector<16x256xf32>
    %c18_447 = arith.constant 18 : index
    %c0_448 = arith.constant 0 : index
    %590 = tpu.strided_load %arg2[%c18_447, %c0_448] {strides = array<i32: 0, 1>} : memref<25x256xf32, #tpu.memory_space<vmem>>, vector<16x256xf32>
    %591 = arith.mulf %589, %590 : vector<16x256xf32>
    %592 = arith.truncf %591 : vector<16x256xf32> to vector<16x256xbf16>
    %c288_449 = arith.constant 288 : index
    %c0_450 = arith.constant 0 : index
    %593 = vector.load %arg12[%c288_449, %c0_450] : memref<400x256xbf16, #tpu.memory_space<vmem>>, vector<16x256xbf16>
    tpu.vector_store %arg12[%c288_449, %c0_450], %592 {strides = array<i32>} : memref<400x256xbf16, #tpu.memory_space<vmem>>, vector<16x256xbf16>,
    %c238_i32_451 = arith.constant 238 : i32
    %594 = tpu.dynamic_rotate %501 by %c238_i32_451 dim 1 : vector<16x256xf32>, i32 -> vector<16x256xf32>
    %c19_452 = arith.constant 19 : index
    %c0_453 = arith.constant 0 : index
    %595 = tpu.strided_load %arg2[%c19_452, %c0_453] {strides = array<i32: 0, 1>} : memref<25x256xf32, #tpu.memory_space<vmem>>, vector<16x256xf32>
    %596 = arith.mulf %594, %595 : vector<16x256xf32>
    %597 = arith.truncf %596 : vector<16x256xf32> to vector<16x256xbf16>
    %c304_454 = arith.constant 304 : index
    %c0_455 = arith.constant 0 : index
    %598 = vector.load %arg12[%c304_454, %c0_455] : memref<400x256xbf16, #tpu.memory_space<vmem>>, vector<16x256xbf16>
    tpu.vector_store %arg12[%c304_454, %c0_455], %597 {strides = array<i32>} : memref<400x256xbf16, #tpu.memory_space<vmem>>, vector<16x256xbf16>,
    %c226_i32_456 = arith.constant 226 : i32
    %599 = tpu.dynamic_rotate %501 by %c226_i32_456 dim 1 : vector<16x256xf32>, i32 -> vector<16x256xf32>
    %c20_457 = arith.constant 20 : index
    %c0_458 = arith.constant 0 : index
    %600 = tpu.strided_load %arg2[%c20_457, %c0_458] {strides = array<i32: 0, 1>} : memref<25x256xf32, #tpu.memory_space<vmem>>, vector<16x256xf32>
    %601 = arith.mulf %599, %600 : vector<16x256xf32>
    %602 = arith.truncf %601 : vector<16x256xf32> to vector<16x256xbf16>
    %c320_459 = arith.constant 320 : index
    %c0_460 = arith.constant 0 : index
    %603 = vector.load %arg12[%c320_459, %c0_460] : memref<400x256xbf16, #tpu.memory_space<vmem>>, vector<16x256xbf16>
    tpu.vector_store %arg12[%c320_459, %c0_460], %602 {strides = array<i32>} : memref<400x256xbf16, #tpu.memory_space<vmem>>, vector<16x256xbf16>,
    %c225_i32_461 = arith.constant 225 : i32
    %604 = tpu.dynamic_rotate %501 by %c225_i32_461 dim 1 : vector<16x256xf32>, i32 -> vector<16x256xf32>
    %c21_462 = arith.constant 21 : index
    %c0_463 = arith.constant 0 : index
    %605 = tpu.strided_load %arg2[%c21_462, %c0_463] {strides = array<i32: 0, 1>} : memref<25x256xf32, #tpu.memory_space<vmem>>, vector<16x256xf32>
    %606 = arith.mulf %604, %605 : vector<16x256xf32>
    %607 = arith.truncf %606 : vector<16x256xf32> to vector<16x256xbf16>
    %c336_464 = arith.constant 336 : index
    %c0_465 = arith.constant 0 : index
    %608 = vector.load %arg12[%c336_464, %c0_465] : memref<400x256xbf16, #tpu.memory_space<vmem>>, vector<16x256xbf16>
    tpu.vector_store %arg12[%c336_464, %c0_465], %607 {strides = array<i32>} : memref<400x256xbf16, #tpu.memory_space<vmem>>, vector<16x256xbf16>,
    %c224_i32_466 = arith.constant 224 : i32
    %609 = tpu.dynamic_rotate %501 by %c224_i32_466 dim 1 : vector<16x256xf32>, i32 -> vector<16x256xf32>
    %c22_467 = arith.constant 22 : index
    %c0_468 = arith.constant 0 : index
    %610 = tpu.strided_load %arg2[%c22_467, %c0_468] {strides = array<i32: 0, 1>} : memref<25x256xf32, #tpu.memory_space<vmem>>, vector<16x256xf32>
    %611 = arith.mulf %609, %610 : vector<16x256xf32>
    %612 = arith.truncf %611 : vector<16x256xf32> to vector<16x256xbf16>
    %c352_469 = arith.constant 352 : index
    %c0_470 = arith.constant 0 : index
    %613 = vector.load %arg12[%c352_469, %c0_470] : memref<400x256xbf16, #tpu.memory_space<vmem>>, vector<16x256xbf16>
    tpu.vector_store %arg12[%c352_469, %c0_470], %612 {strides = array<i32>} : memref<400x256xbf16, #tpu.memory_space<vmem>>, vector<16x256xbf16>,
    %c223_i32_471 = arith.constant 223 : i32
    %614 = tpu.dynamic_rotate %501 by %c223_i32_471 dim 1 : vector<16x256xf32>, i32 -> vector<16x256xf32>
    %c23_472 = arith.constant 23 : index
    %c0_473 = arith.constant 0 : index
    %615 = tpu.strided_load %arg2[%c23_472, %c0_473] {strides = array<i32: 0, 1>} : memref<25x256xf32, #tpu.memory_space<vmem>>, vector<16x256xf32>
    %616 = arith.mulf %614, %615 : vector<16x256xf32>
    %617 = arith.truncf %616 : vector<16x256xf32> to vector<16x256xbf16>
    %c368_474 = arith.constant 368 : index
    %c0_475 = arith.constant 0 : index
    %618 = vector.load %arg12[%c368_474, %c0_475] : memref<400x256xbf16, #tpu.memory_space<vmem>>, vector<16x256xbf16>
    tpu.vector_store %arg12[%c368_474, %c0_475], %617 {strides = array<i32>} : memref<400x256xbf16, #tpu.memory_space<vmem>>, vector<16x256xbf16>,
    %c222_i32_476 = arith.constant 222 : i32
    %619 = tpu.dynamic_rotate %501 by %c222_i32_476 dim 1 : vector<16x256xf32>, i32 -> vector<16x256xf32>
    %c24_477 = arith.constant 24 : index
    %c0_478 = arith.constant 0 : index
    %620 = tpu.strided_load %arg2[%c24_477, %c0_478] {strides = array<i32: 0, 1>} : memref<25x256xf32, #tpu.memory_space<vmem>>, vector<16x256xf32>
    %621 = arith.mulf %619, %620 : vector<16x256xf32>
    %622 = arith.truncf %621 : vector<16x256xf32> to vector<16x256xbf16>
    %c384_479 = arith.constant 384 : index
    %c0_480 = arith.constant 0 : index
    %623 = vector.load %arg12[%c384_479, %c0_480] : memref<400x256xbf16, #tpu.memory_space<vmem>>, vector<16x256xbf16>
    tpu.vector_store %arg12[%c384_479, %c0_480], %622 {strides = array<i32>} : memref<400x256xbf16, #tpu.memory_space<vmem>>, vector<16x256xbf16>,
    %c0_481 = arith.constant 0 : index
    %c0_482 = arith.constant 0 : index
    %624 = vector.load %arg9[%c0_481, %c0_482] : memref<32x400xbf16, #tpu.memory_space<vmem>>, vector<32x400xbf16>
    %c0_483 = arith.constant 0 : index
    %c0_484 = arith.constant 0 : index
    %625 = vector.load %arg12[%c0_483, %c0_484] : memref<400x256xbf16, #tpu.memory_space<vmem>>, vector<400x256xbf16>
    %cst_485 = arith.constant dense<0.000000e+00> : vector<32x256xf32>
    %626 = tpu.matmul %624, %625, %cst_485 {dimension_numbers = #tpu.dot_dimension_numbers<[1], [0], [0], [1], [0, 0, 1, 1], [], []>} : vector<32x400xbf16>, vector<400x256xbf16>, vector<32x256xf32> -> vector<32x256xf32>
    %c0_486 = arith.constant 0 : index
    %c0_487 = arith.constant 0 : index
    %627 = vector.load %arg10[%c0_486, %c0_487] : memref<32x1xf32, #tpu.memory_space<vmem>>, vector<32x1xf32>
    %628 = vector.broadcast %627 : vector<32x1xf32> to vector<32x256xf32>
    %629 = arith.addf %626, %628 : vector<32x256xf32>
    %cst_488 = arith.constant 5.000000e-01 : f32
    %630 = vector.broadcast %cst_488 : f32 to vector<32x256xf32>
    %631 = arith.mulf %630, %629 : vector<32x256xf32>
    %cst_489 = arith.constant 0.707106769 : f32
    %632 = vector.broadcast %cst_489 : f32 to vector<32x256xf32>
    %633 = arith.mulf %629, %632 : vector<32x256xf32>
    %634 = math.absf %633 : vector<32x256xf32>
    %cst_490 = arith.constant 0.327591091 : f32
    %635 = vector.broadcast %cst_490 : f32 to vector<32x256xf32>
    %636 = arith.mulf %635, %634 : vector<32x256xf32>
    %cst_491 = arith.constant 1.000000e+00 : f32
    %637 = vector.broadcast %cst_491 : f32 to vector<32x256xf32>
    %638 = arith.addf %637, %636 : vector<32x256xf32>
    %639 = tpu.reciprocal %638 {approx = true} : vector<32x256xf32> -> vector<32x256xf32>
    %cst_492 = arith.constant 1.06140542 : f32
    %640 = vector.broadcast %cst_492 : f32 to vector<32x256xf32>
    %641 = arith.mulf %639, %640 : vector<32x256xf32>
    %cst_493 = arith.constant -1.45315206 : f32
    %642 = vector.broadcast %cst_493 : f32 to vector<32x256xf32>
    %643 = arith.addf %642, %641 : vector<32x256xf32>
    %644 = arith.mulf %639, %643 : vector<32x256xf32>
    %cst_494 = arith.constant 1.42141378 : f32
    %645 = vector.broadcast %cst_494 : f32 to vector<32x256xf32>
    %646 = arith.addf %645, %644 : vector<32x256xf32>
    %647 = arith.mulf %639, %646 : vector<32x256xf32>
    %cst_495 = arith.constant -0.284496725 : f32
    %648 = vector.broadcast %cst_495 : f32 to vector<32x256xf32>
    %649 = arith.addf %648, %647 : vector<32x256xf32>
    %650 = arith.mulf %639, %649 : vector<32x256xf32>
    %cst_496 = arith.constant 0.254829586 : f32
    %651 = vector.broadcast %cst_496 : f32 to vector<32x256xf32>
    %652 = arith.addf %651, %650 : vector<32x256xf32>
    %653 = arith.mulf %639, %652 : vector<32x256xf32>
    %cst_497 = arith.constant 0.000000e+00 : f32
    %654 = vector.broadcast %cst_497 : f32 to vector<32x256xf32>
    %655 = arith.subf %654, %634 : vector<32x256xf32>
    %656 = arith.mulf %655, %634 : vector<32x256xf32>
    %657 = math.exp %656 : vector<32x256xf32>
    %658 = arith.mulf %653, %657 : vector<32x256xf32>
    %cst_498 = arith.constant 1.000000e+00 : f32
    %659 = vector.broadcast %cst_498 : f32 to vector<32x256xf32>
    %660 = arith.subf %659, %658 : vector<32x256xf32>
    %cst_499 = arith.constant 0.000000e+00 : f32
    %661 = vector.broadcast %cst_499 : f32 to vector<32x256xf32>
    %662 = arith.cmpf olt, %633, %661 : vector<32x256xf32>
    %cst_500 = arith.constant 0.000000e+00 : f32
    %663 = vector.broadcast %cst_500 : f32 to vector<32x256xf32>
    %664 = arith.subf %663, %660 : vector<32x256xf32>
    %665 = arith.select %662, %664, %660 : vector<32x256xi1>, vector<32x256xf32>
    %cst_501 = arith.constant 1.000000e+00 : f32
    %666 = vector.broadcast %cst_501 : f32 to vector<32x256xf32>
    %667 = arith.addf %666, %665 : vector<32x256xf32>
    %668 = arith.mulf %631, %667 : vector<32x256xf32>
    %c0_502 = arith.constant 0 : index
    %c0_503 = arith.constant 0 : index
    %669 = vector.load %arg11[%c0_502, %c0_503] : memref<32x256xf32, #tpu.memory_space<vmem>>, vector<32x256xf32>
    tpu.vector_store %arg11[%c0_502, %c0_503], %668 {strides = array<i32>} : memref<32x256xf32, #tpu.memory_space<vmem>>, vector<32x256xf32>,
    return
  }
  func.func @transform_0(%arg0: i32) -> (i32, i32) {
    %c0_i32 = arith.constant 0 : i32
    %c0_i32_0 = arith.constant 0 : i32
    return %c0_i32, %arg0 : i32, i32
  }
  func.func @transform_1(%arg0: i32) -> (i32, i32) {
    %c0_i32 = arith.constant 0 : i32
    %c0_i32_0 = arith.constant 0 : i32
    %c0_i32_1 = arith.constant 0 : i32
    return %c0_i32, %c0_i32_0 : i32, i32
  }
  func.func @transform_2(%arg0: i32) -> (i32, i32) {
    %c0_i32 = arith.constant 0 : i32
    %c0_i32_0 = arith.constant 0 : i32
    %c0_i32_1 = arith.constant 0 : i32
    return %c0_i32, %c0_i32_0 : i32, i32
  }
  func.func @transform_3(%arg0: i32) -> (i32, i32) {
    %c0_i32 = arith.constant 0 : i32
    %c0_i32_0 = arith.constant 0 : i32
    %c0_i32_1 = arith.constant 0 : i32
    return %c0_i32, %c0_i32_0 : i32, i32
  }
  func.func @transform_4(%arg0: i32) -> (i32, i32) {
    %c0_i32 = arith.constant 0 : i32
    %c0_i32_0 = arith.constant 0 : i32
    %c0_i32_1 = arith.constant 0 : i32
    return %c0_i32, %c0_i32_0 : i32, i32
  }
  func.func @transform_5(%arg0: i32) -> (i32, i32) {
    %c0_i32 = arith.constant 0 : i32
    %c0_i32_0 = arith.constant 0 : i32
    %c0_i32_1 = arith.constant 0 : i32
    return %c0_i32, %c0_i32_0 : i32, i32
  }
  func.func @transform_6(%arg0: i32) -> (i32, i32) {
    %c0_i32 = arith.constant 0 : i32
    %c0_i32_0 = arith.constant 0 : i32
    %c0_i32_1 = arith.constant 0 : i32
    return %c0_i32, %c0_i32_0 : i32, i32
  }
  func.func @transform_7(%arg0: i32) -> (i32, i32) {
    %c0_i32 = arith.constant 0 : i32
    %c0_i32_0 = arith.constant 0 : i32
    %c0_i32_1 = arith.constant 0 : i32
    return %c0_i32, %c0_i32_0 : i32, i32
  }
  func.func @transform_8(%arg0: i32) -> (i32, i32) {
    %c0_i32 = arith.constant 0 : i32
    %c0_i32_0 = arith.constant 0 : i32
    %c0_i32_1 = arith.constant 0 : i32
    return %c0_i32, %c0_i32_0 : i32, i32
  }
  func.func @transform_9(%arg0: i32) -> (i32, i32) {
    %c0_i32 = arith.constant 0 : i32
    %c0_i32_0 = arith.constant 0 : i32
    %c0_i32_1 = arith.constant 0 : i32
    return %c0_i32, %c0_i32_0 : i32, i32
  }
  func.func @transform_10(%arg0: i32) -> (i32, i32) {
    %c0_i32 = arith.constant 0 : i32
    %c0_i32_0 = arith.constant 0 : i32
    return %c0_i32, %arg0 : i32, i32
  }
}

module attributes {stable_mosaic.version = 11 : i64} {
  func.func @kernel(%arg0: i32, %arg1: memref<16x256xf32, #tpu.memory_space<vmem>>, %arg2: memref<25x256xf32, #tpu.memory_space<vmem>>, %arg3: memref<16x400xbf16, #tpu.memory_space<vmem>>, %arg4: memref<16x1xf32, #tpu.memory_space<vmem>>, %arg5: memref<16x400xbf16, #tpu.memory_space<vmem>>, %arg6: memref<16x1xf32, #tpu.memory_space<vmem>>, %arg7: memref<16x400xbf16, #tpu.memory_space<vmem>>, %arg8: memref<16x1xf32, #tpu.memory_space<vmem>>, %arg9: memref<32x400xbf16, #tpu.memory_space<vmem>>, %arg10: memref<32x1xf32, #tpu.memory_space<vmem>>, %arg11: memref<32x256xf32, #tpu.memory_space<vmem>>, %arg12: memref<400x256xbf16, #tpu.memory_space<vmem>>) attributes {dimension_semantics = [#tpu.dimension_semantics<parallel>], iteration_bounds = array<i64: 2>, scalar_prefetch = 0 : i64, scratch_operands = 1 : i64, tpu.core_type = #tpu.core_type<tc>, window_params = [{transform_indices = @transform_0, window_bounds = array<i64: 16, 256>}, {pipeline_mode = #tpu.pipeline_mode<synchronous>, transform_indices = @transform_1, window_bounds = array<i64: 25, 256>}, {pipeline_mode = #tpu.pipeline_mode<synchronous>, transform_indices = @transform_2, window_bounds = array<i64: 16, 400>}, {pipeline_mode = #tpu.pipeline_mode<synchronous>, transform_indices = @transform_3, window_bounds = array<i64: 16, 1>}, {pipeline_mode = #tpu.pipeline_mode<synchronous>, transform_indices = @transform_4, window_bounds = array<i64: 16, 400>}, {pipeline_mode = #tpu.pipeline_mode<synchronous>, transform_indices = @transform_5, window_bounds = array<i64: 16, 1>}, {pipeline_mode = #tpu.pipeline_mode<synchronous>, transform_indices = @transform_6, window_bounds = array<i64: 16, 400>}, {pipeline_mode = #tpu.pipeline_mode<synchronous>, transform_indices = @transform_7, window_bounds = array<i64: 16, 1>}, {pipeline_mode = #tpu.pipeline_mode<synchronous>, transform_indices = @transform_8, window_bounds = array<i64: 32, 400>}, {pipeline_mode = #tpu.pipeline_mode<synchronous>, transform_indices = @transform_9, window_bounds = array<i64: 32, 1>}, {transform_indices = @transform_10, window_bounds = array<i64: 32, 256>}]} {
    %c0 = arith.constant 0 : index
    %c0_0 = arith.constant 0 : index
    %0 = vector.load %arg1[%c0, %c0_0] : memref<16x256xf32, #tpu.memory_space<vmem>>, vector<16x256xf32>
    %c34_i32 = arith.constant 34 : i32
    %1 = tpu.dynamic_rotate %0 by %c34_i32 dim 1 : vector<16x256xf32>, i32 -> vector<16x256xf32>
    %c0_1 = arith.constant 0 : index
    %c0_2 = arith.constant 0 : index
    %2 = vector.load %arg2[%c0_1, %c0_2] : memref<25x256xf32, #tpu.memory_space<vmem>>, vector<1x256xf32>
    %3 = vector.broadcast %2 : vector<1x256xf32> to vector<16x256xf32>
    %4 = arith.mulf %1, %3 : vector<16x256xf32>
    %5 = arith.truncf %4 : vector<16x256xf32> to vector<16x256xbf16>
    %c0_3 = arith.constant 0 : index
    %c0_4 = arith.constant 0 : index
    %6 = vector.load %arg12[%c0_3, %c0_4] : memref<400x256xbf16, #tpu.memory_space<vmem>>, vector<16x256xbf16>
    tpu.vector_store %arg12[%c0_3, %c0_4], %5 {strides = array<i32>} : memref<400x256xbf16, #tpu.memory_space<vmem>>, vector<16x256xbf16>,
    %c33_i32 = arith.constant 33 : i32
    %7 = tpu.dynamic_rotate %0 by %c33_i32 dim 1 : vector<16x256xf32>, i32 -> vector<16x256xf32>
    %c1 = arith.constant 1 : index
    %c0_5 = arith.constant 0 : index
    %8 = vector.load %arg2[%c1, %c0_5] : memref<25x256xf32, #tpu.memory_space<vmem>>, vector<1x256xf32>
    %9 = vector.broadcast %8 : vector<1x256xf32> to vector<16x256xf32>
    %10 = arith.mulf %7, %9 : vector<16x256xf32>
    %11 = arith.truncf %10 : vector<16x256xf32> to vector<16x256xbf16>
    %c16 = arith.constant 16 : index
    %c0_6 = arith.constant 0 : index
    %12 = vector.load %arg12[%c16, %c0_6] : memref<400x256xbf16, #tpu.memory_space<vmem>>, vector<16x256xbf16>
    tpu.vector_store %arg12[%c16, %c0_6], %11 {strides = array<i32>} : memref<400x256xbf16, #tpu.memory_space<vmem>>, vector<16x256xbf16>,
    %c32_i32 = arith.constant 32 : i32
    %13 = tpu.dynamic_rotate %0 by %c32_i32 dim 1 : vector<16x256xf32>, i32 -> vector<16x256xf32>
    %c2 = arith.constant 2 : index
    %c0_7 = arith.constant 0 : index
    %14 = vector.load %arg2[%c2, %c0_7] : memref<25x256xf32, #tpu.memory_space<vmem>>, vector<1x256xf32>
    %15 = vector.broadcast %14 : vector<1x256xf32> to vector<16x256xf32>
    %16 = arith.mulf %13, %15 : vector<16x256xf32>
    %17 = arith.truncf %16 : vector<16x256xf32> to vector<16x256xbf16>
    %c32 = arith.constant 32 : index
    %c0_8 = arith.constant 0 : index
    %18 = vector.load %arg12[%c32, %c0_8] : memref<400x256xbf16, #tpu.memory_space<vmem>>, vector<16x256xbf16>
    tpu.vector_store %arg12[%c32, %c0_8], %17 {strides = array<i32>} : memref<400x256xbf16, #tpu.memory_space<vmem>>, vector<16x256xbf16>,
    %c31_i32 = arith.constant 31 : i32
    %19 = tpu.dynamic_rotate %0 by %c31_i32 dim 1 : vector<16x256xf32>, i32 -> vector<16x256xf32>
    %c3 = arith.constant 3 : index
    %c0_9 = arith.constant 0 : index
    %20 = vector.load %arg2[%c3, %c0_9] : memref<25x256xf32, #tpu.memory_space<vmem>>, vector<1x256xf32>
    %21 = vector.broadcast %20 : vector<1x256xf32> to vector<16x256xf32>
    %22 = arith.mulf %19, %21 : vector<16x256xf32>
    %23 = arith.truncf %22 : vector<16x256xf32> to vector<16x256xbf16>
    %c48 = arith.constant 48 : index
    %c0_10 = arith.constant 0 : index
    %24 = vector.load %arg12[%c48, %c0_10] : memref<400x256xbf16, #tpu.memory_space<vmem>>, vector<16x256xbf16>
    tpu.vector_store %arg12[%c48, %c0_10], %23 {strides = array<i32>} : memref<400x256xbf16, #tpu.memory_space<vmem>>, vector<16x256xbf16>,
    %c30_i32 = arith.constant 30 : i32
    %25 = tpu.dynamic_rotate %0 by %c30_i32 dim 1 : vector<16x256xf32>, i32 -> vector<16x256xf32>
    %c4 = arith.constant 4 : index
    %c0_11 = arith.constant 0 : index
    %26 = vector.load %arg2[%c4, %c0_11] : memref<25x256xf32, #tpu.memory_space<vmem>>, vector<1x256xf32>
    %27 = vector.broadcast %26 : vector<1x256xf32> to vector<16x256xf32>
    %28 = arith.mulf %25, %27 : vector<16x256xf32>
    %29 = arith.truncf %28 : vector<16x256xf32> to vector<16x256xbf16>
    %c64 = arith.constant 64 : index
    %c0_12 = arith.constant 0 : index
    %30 = vector.load %arg12[%c64, %c0_12] : memref<400x256xbf16, #tpu.memory_space<vmem>>, vector<16x256xbf16>
    tpu.vector_store %arg12[%c64, %c0_12], %29 {strides = array<i32>} : memref<400x256xbf16, #tpu.memory_space<vmem>>, vector<16x256xbf16>,
    %c18_i32 = arith.constant 18 : i32
    %31 = tpu.dynamic_rotate %0 by %c18_i32 dim 1 : vector<16x256xf32>, i32 -> vector<16x256xf32>
    %c5 = arith.constant 5 : index
    %c0_13 = arith.constant 0 : index
    %32 = vector.load %arg2[%c5, %c0_13] : memref<25x256xf32, #tpu.memory_space<vmem>>, vector<1x256xf32>
    %33 = vector.broadcast %32 : vector<1x256xf32> to vector<16x256xf32>
    %34 = arith.mulf %31, %33 : vector<16x256xf32>
    %35 = arith.truncf %34 : vector<16x256xf32> to vector<16x256xbf16>
    %c80 = arith.constant 80 : index
    %c0_14 = arith.constant 0 : index
    %36 = vector.load %arg12[%c80, %c0_14] : memref<400x256xbf16, #tpu.memory_space<vmem>>, vector<16x256xbf16>
    tpu.vector_store %arg12[%c80, %c0_14], %35 {strides = array<i32>} : memref<400x256xbf16, #tpu.memory_space<vmem>>, vector<16x256xbf16>,
    %c17_i32 = arith.constant 17 : i32
    %37 = tpu.dynamic_rotate %0 by %c17_i32 dim 1 : vector<16x256xf32>, i32 -> vector<16x256xf32>
    %c6 = arith.constant 6 : index
    %c0_15 = arith.constant 0 : index
    %38 = vector.load %arg2[%c6, %c0_15] : memref<25x256xf32, #tpu.memory_space<vmem>>, vector<1x256xf32>
    %39 = vector.broadcast %38 : vector<1x256xf32> to vector<16x256xf32>
    %40 = arith.mulf %37, %39 : vector<16x256xf32>
    %41 = arith.truncf %40 : vector<16x256xf32> to vector<16x256xbf16>
    %c96 = arith.constant 96 : index
    %c0_16 = arith.constant 0 : index
    %42 = vector.load %arg12[%c96, %c0_16] : memref<400x256xbf16, #tpu.memory_space<vmem>>, vector<16x256xbf16>
    tpu.vector_store %arg12[%c96, %c0_16], %41 {strides = array<i32>} : memref<400x256xbf16, #tpu.memory_space<vmem>>, vector<16x256xbf16>,
    %c16_i32 = arith.constant 16 : i32
    %43 = tpu.dynamic_rotate %0 by %c16_i32 dim 1 : vector<16x256xf32>, i32 -> vector<16x256xf32>
    %c7 = arith.constant 7 : index
    %c0_17 = arith.constant 0 : index
    %44 = vector.load %arg2[%c7, %c0_17] : memref<25x256xf32, #tpu.memory_space<vmem>>, vector<1x256xf32>
    %45 = vector.broadcast %44 : vector<1x256xf32> to vector<16x256xf32>
    %46 = arith.mulf %43, %45 : vector<16x256xf32>
    %47 = arith.truncf %46 : vector<16x256xf32> to vector<16x256xbf16>
    %c112 = arith.constant 112 : index
    %c0_18 = arith.constant 0 : index
    %48 = vector.load %arg12[%c112, %c0_18] : memref<400x256xbf16, #tpu.memory_space<vmem>>, vector<16x256xbf16>
    tpu.vector_store %arg12[%c112, %c0_18], %47 {strides = array<i32>} : memref<400x256xbf16, #tpu.memory_space<vmem>>, vector<16x256xbf16>,
    %c15_i32 = arith.constant 15 : i32
    %49 = tpu.dynamic_rotate %0 by %c15_i32 dim 1 : vector<16x256xf32>, i32 -> vector<16x256xf32>
    %c8 = arith.constant 8 : index
    %c0_19 = arith.constant 0 : index
    %50 = vector.load %arg2[%c8, %c0_19] : memref<25x256xf32, #tpu.memory_space<vmem>>, vector<1x256xf32>
    %51 = vector.broadcast %50 : vector<1x256xf32> to vector<16x256xf32>
    %52 = arith.mulf %49, %51 : vector<16x256xf32>
    %53 = arith.truncf %52 : vector<16x256xf32> to vector<16x256xbf16>
    %c128 = arith.constant 128 : index
    %c0_20 = arith.constant 0 : index
    %54 = vector.load %arg12[%c128, %c0_20] : memref<400x256xbf16, #tpu.memory_space<vmem>>, vector<16x256xbf16>
    tpu.vector_store %arg12[%c128, %c0_20], %53 {strides = array<i32>} : memref<400x256xbf16, #tpu.memory_space<vmem>>, vector<16x256xbf16>,
    %c14_i32 = arith.constant 14 : i32
    %55 = tpu.dynamic_rotate %0 by %c14_i32 dim 1 : vector<16x256xf32>, i32 -> vector<16x256xf32>
    %c9 = arith.constant 9 : index
    %c0_21 = arith.constant 0 : index
    %56 = vector.load %arg2[%c9, %c0_21] : memref<25x256xf32, #tpu.memory_space<vmem>>, vector<1x256xf32>
    %57 = vector.broadcast %56 : vector<1x256xf32> to vector<16x256xf32>
    %58 = arith.mulf %55, %57 : vector<16x256xf32>
    %59 = arith.truncf %58 : vector<16x256xf32> to vector<16x256xbf16>
    %c144 = arith.constant 144 : index
    %c0_22 = arith.constant 0 : index
    %60 = vector.load %arg12[%c144, %c0_22] : memref<400x256xbf16, #tpu.memory_space<vmem>>, vector<16x256xbf16>
    tpu.vector_store %arg12[%c144, %c0_22], %59 {strides = array<i32>} : memref<400x256xbf16, #tpu.memory_space<vmem>>, vector<16x256xbf16>,
    %c2_i32 = arith.constant 2 : i32
    %61 = tpu.dynamic_rotate %0 by %c2_i32 dim 1 : vector<16x256xf32>, i32 -> vector<16x256xf32>
    %c10 = arith.constant 10 : index
    %c0_23 = arith.constant 0 : index
    %62 = vector.load %arg2[%c10, %c0_23] : memref<25x256xf32, #tpu.memory_space<vmem>>, vector<1x256xf32>
    %63 = vector.broadcast %62 : vector<1x256xf32> to vector<16x256xf32>
    %64 = arith.mulf %61, %63 : vector<16x256xf32>
    %65 = arith.truncf %64 : vector<16x256xf32> to vector<16x256xbf16>
    %c160 = arith.constant 160 : index
    %c0_24 = arith.constant 0 : index
    %66 = vector.load %arg12[%c160, %c0_24] : memref<400x256xbf16, #tpu.memory_space<vmem>>, vector<16x256xbf16>
    tpu.vector_store %arg12[%c160, %c0_24], %65 {strides = array<i32>} : memref<400x256xbf16, #tpu.memory_space<vmem>>, vector<16x256xbf16>,
    %c1_i32 = arith.constant 1 : i32
    %67 = tpu.dynamic_rotate %0 by %c1_i32 dim 1 : vector<16x256xf32>, i32 -> vector<16x256xf32>
    %c11 = arith.constant 11 : index
    %c0_25 = arith.constant 0 : index
    %68 = vector.load %arg2[%c11, %c0_25] : memref<25x256xf32, #tpu.memory_space<vmem>>, vector<1x256xf32>
    %69 = vector.broadcast %68 : vector<1x256xf32> to vector<16x256xf32>
    %70 = arith.mulf %67, %69 : vector<16x256xf32>
    %71 = arith.truncf %70 : vector<16x256xf32> to vector<16x256xbf16>
    %c176 = arith.constant 176 : index
    %c0_26 = arith.constant 0 : index
    %72 = vector.load %arg12[%c176, %c0_26] : memref<400x256xbf16, #tpu.memory_space<vmem>>, vector<16x256xbf16>
    tpu.vector_store %arg12[%c176, %c0_26], %71 {strides = array<i32>} : memref<400x256xbf16, #tpu.memory_space<vmem>>, vector<16x256xbf16>,
    %73 = arith.truncf %0 : vector<16x256xf32> to vector<16x256xbf16>
    %c192 = arith.constant 192 : index
    %c0_27 = arith.constant 0 : index
    %74 = vector.load %arg12[%c192, %c0_27] : memref<400x256xbf16, #tpu.memory_space<vmem>>, vector<16x256xbf16>
    tpu.vector_store %arg12[%c192, %c0_27], %73 {strides = array<i32>} : memref<400x256xbf16, #tpu.memory_space<vmem>>, vector<16x256xbf16>,
    %c255_i32 = arith.constant 255 : i32
    %75 = tpu.dynamic_rotate %0 by %c255_i32 dim 1 : vector<16x256xf32>, i32 -> vector<16x256xf32>
    %c13 = arith.constant 13 : index
    %c0_28 = arith.constant 0 : index
    %76 = vector.load %arg2[%c13, %c0_28] : memref<25x256xf32, #tpu.memory_space<vmem>>, vector<1x256xf32>
    %77 = vector.broadcast %76 : vector<1x256xf32> to vector<16x256xf32>
    %78 = arith.mulf %75, %77 : vector<16x256xf32>
    %79 = arith.truncf %78 : vector<16x256xf32> to vector<16x256xbf16>
    %c208 = arith.constant 208 : index
    %c0_29 = arith.constant 0 : index
    %80 = vector.load %arg12[%c208, %c0_29] : memref<400x256xbf16, #tpu.memory_space<vmem>>, vector<16x256xbf16>
    tpu.vector_store %arg12[%c208, %c0_29], %79 {strides = array<i32>} : memref<400x256xbf16, #tpu.memory_space<vmem>>, vector<16x256xbf16>,
    %c254_i32 = arith.constant 254 : i32
    %81 = tpu.dynamic_rotate %0 by %c254_i32 dim 1 : vector<16x256xf32>, i32 -> vector<16x256xf32>
    %c14 = arith.constant 14 : index
    %c0_30 = arith.constant 0 : index
    %82 = vector.load %arg2[%c14, %c0_30] : memref<25x256xf32, #tpu.memory_space<vmem>>, vector<1x256xf32>
    %83 = vector.broadcast %82 : vector<1x256xf32> to vector<16x256xf32>
    %84 = arith.mulf %81, %83 : vector<16x256xf32>
    %85 = arith.truncf %84 : vector<16x256xf32> to vector<16x256xbf16>
    %c224 = arith.constant 224 : index
    %c0_31 = arith.constant 0 : index
    %86 = vector.load %arg12[%c224, %c0_31] : memref<400x256xbf16, #tpu.memory_space<vmem>>, vector<16x256xbf16>
    tpu.vector_store %arg12[%c224, %c0_31], %85 {strides = array<i32>} : memref<400x256xbf16, #tpu.memory_space<vmem>>, vector<16x256xbf16>,
    %c242_i32 = arith.constant 242 : i32
    %87 = tpu.dynamic_rotate %0 by %c242_i32 dim 1 : vector<16x256xf32>, i32 -> vector<16x256xf32>
    %c15 = arith.constant 15 : index
    %c0_32 = arith.constant 0 : index
    %88 = vector.load %arg2[%c15, %c0_32] : memref<25x256xf32, #tpu.memory_space<vmem>>, vector<1x256xf32>
    %89 = vector.broadcast %88 : vector<1x256xf32> to vector<16x256xf32>
    %90 = arith.mulf %87, %89 : vector<16x256xf32>
    %91 = arith.truncf %90 : vector<16x256xf32> to vector<16x256xbf16>
    %c240 = arith.constant 240 : index
    %c0_33 = arith.constant 0 : index
    %92 = vector.load %arg12[%c240, %c0_33] : memref<400x256xbf16, #tpu.memory_space<vmem>>, vector<16x256xbf16>
    tpu.vector_store %arg12[%c240, %c0_33], %91 {strides = array<i32>} : memref<400x256xbf16, #tpu.memory_space<vmem>>, vector<16x256xbf16>,
    %c241_i32 = arith.constant 241 : i32
    %93 = tpu.dynamic_rotate %0 by %c241_i32 dim 1 : vector<16x256xf32>, i32 -> vector<16x256xf32>
    %c16_34 = arith.constant 16 : index
    %c0_35 = arith.constant 0 : index
    %94 = vector.load %arg2[%c16_34, %c0_35] : memref<25x256xf32, #tpu.memory_space<vmem>>, vector<1x256xf32>
    %95 = vector.broadcast %94 : vector<1x256xf32> to vector<16x256xf32>
    %96 = arith.mulf %93, %95 : vector<16x256xf32>
    %97 = arith.truncf %96 : vector<16x256xf32> to vector<16x256xbf16>
    %c256 = arith.constant 256 : index
    %c0_36 = arith.constant 0 : index
    %98 = vector.load %arg12[%c256, %c0_36] : memref<400x256xbf16, #tpu.memory_space<vmem>>, vector<16x256xbf16>
    tpu.vector_store %arg12[%c256, %c0_36], %97 {strides = array<i32>} : memref<400x256xbf16, #tpu.memory_space<vmem>>, vector<16x256xbf16>,
    %c240_i32 = arith.constant 240 : i32
    %99 = tpu.dynamic_rotate %0 by %c240_i32 dim 1 : vector<16x256xf32>, i32 -> vector<16x256xf32>
    %c17 = arith.constant 17 : index
    %c0_37 = arith.constant 0 : index
    %100 = vector.load %arg2[%c17, %c0_37] : memref<25x256xf32, #tpu.memory_space<vmem>>, vector<1x256xf32>
    %101 = vector.broadcast %100 : vector<1x256xf32> to vector<16x256xf32>
    %102 = arith.mulf %99, %101 : vector<16x256xf32>
    %103 = arith.truncf %102 : vector<16x256xf32> to vector<16x256xbf16>
    %c272 = arith.constant 272 : index
    %c0_38 = arith.constant 0 : index
    %104 = vector.load %arg12[%c272, %c0_38] : memref<400x256xbf16, #tpu.memory_space<vmem>>, vector<16x256xbf16>
    tpu.vector_store %arg12[%c272, %c0_38], %103 {strides = array<i32>} : memref<400x256xbf16, #tpu.memory_space<vmem>>, vector<16x256xbf16>,
    %c239_i32 = arith.constant 239 : i32
    %105 = tpu.dynamic_rotate %0 by %c239_i32 dim 1 : vector<16x256xf32>, i32 -> vector<16x256xf32>
    %c18 = arith.constant 18 : index
    %c0_39 = arith.constant 0 : index
    %106 = vector.load %arg2[%c18, %c0_39] : memref<25x256xf32, #tpu.memory_space<vmem>>, vector<1x256xf32>
    %107 = vector.broadcast %106 : vector<1x256xf32> to vector<16x256xf32>
    %108 = arith.mulf %105, %107 : vector<16x256xf32>
    %109 = arith.truncf %108 : vector<16x256xf32> to vector<16x256xbf16>
    %c288 = arith.constant 288 : index
    %c0_40 = arith.constant 0 : index
    %110 = vector.load %arg12[%c288, %c0_40] : memref<400x256xbf16, #tpu.memory_space<vmem>>, vector<16x256xbf16>
    tpu.vector_store %arg12[%c288, %c0_40], %109 {strides = array<i32>} : memref<400x256xbf16, #tpu.memory_space<vmem>>, vector<16x256xbf16>,
    %c238_i32 = arith.constant 238 : i32
    %111 = tpu.dynamic_rotate %0 by %c238_i32 dim 1 : vector<16x256xf32>, i32 -> vector<16x256xf32>
    %c19 = arith.constant 19 : index
    %c0_41 = arith.constant 0 : index
    %112 = vector.load %arg2[%c19, %c0_41] : memref<25x256xf32, #tpu.memory_space<vmem>>, vector<1x256xf32>
    %113 = vector.broadcast %112 : vector<1x256xf32> to vector<16x256xf32>
    %114 = arith.mulf %111, %113 : vector<16x256xf32>
    %115 = arith.truncf %114 : vector<16x256xf32> to vector<16x256xbf16>
    %c304 = arith.constant 304 : index
    %c0_42 = arith.constant 0 : index
    %116 = vector.load %arg12[%c304, %c0_42] : memref<400x256xbf16, #tpu.memory_space<vmem>>, vector<16x256xbf16>
    tpu.vector_store %arg12[%c304, %c0_42], %115 {strides = array<i32>} : memref<400x256xbf16, #tpu.memory_space<vmem>>, vector<16x256xbf16>,
    %c226_i32 = arith.constant 226 : i32
    %117 = tpu.dynamic_rotate %0 by %c226_i32 dim 1 : vector<16x256xf32>, i32 -> vector<16x256xf32>
    %c20 = arith.constant 20 : index
    %c0_43 = arith.constant 0 : index
    %118 = vector.load %arg2[%c20, %c0_43] : memref<25x256xf32, #tpu.memory_space<vmem>>, vector<1x256xf32>
    %119 = vector.broadcast %118 : vector<1x256xf32> to vector<16x256xf32>
    %120 = arith.mulf %117, %119 : vector<16x256xf32>
    %121 = arith.truncf %120 : vector<16x256xf32> to vector<16x256xbf16>
    %c320 = arith.constant 320 : index
    %c0_44 = arith.constant 0 : index
    %122 = vector.load %arg12[%c320, %c0_44] : memref<400x256xbf16, #tpu.memory_space<vmem>>, vector<16x256xbf16>
    tpu.vector_store %arg12[%c320, %c0_44], %121 {strides = array<i32>} : memref<400x256xbf16, #tpu.memory_space<vmem>>, vector<16x256xbf16>,
    %c225_i32 = arith.constant 225 : i32
    %123 = tpu.dynamic_rotate %0 by %c225_i32 dim 1 : vector<16x256xf32>, i32 -> vector<16x256xf32>
    %c21 = arith.constant 21 : index
    %c0_45 = arith.constant 0 : index
    %124 = vector.load %arg2[%c21, %c0_45] : memref<25x256xf32, #tpu.memory_space<vmem>>, vector<1x256xf32>
    %125 = vector.broadcast %124 : vector<1x256xf32> to vector<16x256xf32>
    %126 = arith.mulf %123, %125 : vector<16x256xf32>
    %127 = arith.truncf %126 : vector<16x256xf32> to vector<16x256xbf16>
    %c336 = arith.constant 336 : index
    %c0_46 = arith.constant 0 : index
    %128 = vector.load %arg12[%c336, %c0_46] : memref<400x256xbf16, #tpu.memory_space<vmem>>, vector<16x256xbf16>
    tpu.vector_store %arg12[%c336, %c0_46], %127 {strides = array<i32>} : memref<400x256xbf16, #tpu.memory_space<vmem>>, vector<16x256xbf16>,
    %c224_i32 = arith.constant 224 : i32
    %129 = tpu.dynamic_rotate %0 by %c224_i32 dim 1 : vector<16x256xf32>, i32 -> vector<16x256xf32>
    %c22 = arith.constant 22 : index
    %c0_47 = arith.constant 0 : index
    %130 = vector.load %arg2[%c22, %c0_47] : memref<25x256xf32, #tpu.memory_space<vmem>>, vector<1x256xf32>
    %131 = vector.broadcast %130 : vector<1x256xf32> to vector<16x256xf32>
    %132 = arith.mulf %129, %131 : vector<16x256xf32>
    %133 = arith.truncf %132 : vector<16x256xf32> to vector<16x256xbf16>
    %c352 = arith.constant 352 : index
    %c0_48 = arith.constant 0 : index
    %134 = vector.load %arg12[%c352, %c0_48] : memref<400x256xbf16, #tpu.memory_space<vmem>>, vector<16x256xbf16>
    tpu.vector_store %arg12[%c352, %c0_48], %133 {strides = array<i32>} : memref<400x256xbf16, #tpu.memory_space<vmem>>, vector<16x256xbf16>,
    %c223_i32 = arith.constant 223 : i32
    %135 = tpu.dynamic_rotate %0 by %c223_i32 dim 1 : vector<16x256xf32>, i32 -> vector<16x256xf32>
    %c23 = arith.constant 23 : index
    %c0_49 = arith.constant 0 : index
    %136 = vector.load %arg2[%c23, %c0_49] : memref<25x256xf32, #tpu.memory_space<vmem>>, vector<1x256xf32>
    %137 = vector.broadcast %136 : vector<1x256xf32> to vector<16x256xf32>
    %138 = arith.mulf %135, %137 : vector<16x256xf32>
    %139 = arith.truncf %138 : vector<16x256xf32> to vector<16x256xbf16>
    %c368 = arith.constant 368 : index
    %c0_50 = arith.constant 0 : index
    %140 = vector.load %arg12[%c368, %c0_50] : memref<400x256xbf16, #tpu.memory_space<vmem>>, vector<16x256xbf16>
    tpu.vector_store %arg12[%c368, %c0_50], %139 {strides = array<i32>} : memref<400x256xbf16, #tpu.memory_space<vmem>>, vector<16x256xbf16>,
    %c222_i32 = arith.constant 222 : i32
    %141 = tpu.dynamic_rotate %0 by %c222_i32 dim 1 : vector<16x256xf32>, i32 -> vector<16x256xf32>
    %c24 = arith.constant 24 : index
    %c0_51 = arith.constant 0 : index
    %142 = vector.load %arg2[%c24, %c0_51] : memref<25x256xf32, #tpu.memory_space<vmem>>, vector<1x256xf32>
    %143 = vector.broadcast %142 : vector<1x256xf32> to vector<16x256xf32>
    %144 = arith.mulf %141, %143 : vector<16x256xf32>
    %145 = arith.truncf %144 : vector<16x256xf32> to vector<16x256xbf16>
    %c384 = arith.constant 384 : index
    %c0_52 = arith.constant 0 : index
    %146 = vector.load %arg12[%c384, %c0_52] : memref<400x256xbf16, #tpu.memory_space<vmem>>, vector<16x256xbf16>
    tpu.vector_store %arg12[%c384, %c0_52], %145 {strides = array<i32>} : memref<400x256xbf16, #tpu.memory_space<vmem>>, vector<16x256xbf16>,
    %c0_53 = arith.constant 0 : index
    %c0_54 = arith.constant 0 : index
    %147 = vector.load %arg3[%c0_53, %c0_54] : memref<16x400xbf16, #tpu.memory_space<vmem>>, vector<16x400xbf16>
    %c0_55 = arith.constant 0 : index
    %c0_56 = arith.constant 0 : index
    %148 = vector.load %arg12[%c0_55, %c0_56] : memref<400x256xbf16, #tpu.memory_space<vmem>>, vector<400x256xbf16>
    %cst = arith.constant dense<0.000000e+00> : vector<16x256xf32>
    %149 = tpu.matmul %147, %148, %cst {dimension_numbers = #tpu.dot_dimension_numbers<[1], [0], [0], [1], [0, 0, 1, 1], [], []>} : vector<16x400xbf16>, vector<400x256xbf16>, vector<16x256xf32> -> vector<16x256xf32>
    %c0_57 = arith.constant 0 : index
    %c0_58 = arith.constant 0 : index
    %150 = vector.load %arg4[%c0_57, %c0_58] : memref<16x1xf32, #tpu.memory_space<vmem>>, vector<16x1xf32>
    %151 = vector.broadcast %150 : vector<16x1xf32> to vector<16x256xf32>
    %152 = arith.addf %149, %151 : vector<16x256xf32>
    %cst_59 = arith.constant 5.000000e-01 : f32
    %153 = vector.broadcast %cst_59 : f32 to vector<16x256xf32>
    %154 = arith.mulf %153, %152 : vector<16x256xf32>
    %cst_60 = arith.constant 0.707106769 : f32
    %155 = vector.broadcast %cst_60 : f32 to vector<16x256xf32>
    %156 = arith.mulf %152, %155 : vector<16x256xf32>
    %157 = math.absf %156 : vector<16x256xf32>
    %cst_61 = arith.constant 0.327591091 : f32
    %158 = vector.broadcast %cst_61 : f32 to vector<16x256xf32>
    %159 = arith.mulf %158, %157 : vector<16x256xf32>
    %cst_62 = arith.constant 1.000000e+00 : f32
    %160 = vector.broadcast %cst_62 : f32 to vector<16x256xf32>
    %161 = arith.addf %160, %159 : vector<16x256xf32>
    %162 = tpu.reciprocal %161 {approx = true} : vector<16x256xf32> -> vector<16x256xf32>
    %cst_63 = arith.constant 1.06140542 : f32
    %163 = vector.broadcast %cst_63 : f32 to vector<16x256xf32>
    %164 = arith.mulf %162, %163 : vector<16x256xf32>
    %cst_64 = arith.constant -1.45315206 : f32
    %165 = vector.broadcast %cst_64 : f32 to vector<16x256xf32>
    %166 = arith.addf %165, %164 : vector<16x256xf32>
    %167 = arith.mulf %162, %166 : vector<16x256xf32>
    %cst_65 = arith.constant 1.42141378 : f32
    %168 = vector.broadcast %cst_65 : f32 to vector<16x256xf32>
    %169 = arith.addf %168, %167 : vector<16x256xf32>
    %170 = arith.mulf %162, %169 : vector<16x256xf32>
    %cst_66 = arith.constant -0.284496725 : f32
    %171 = vector.broadcast %cst_66 : f32 to vector<16x256xf32>
    %172 = arith.addf %171, %170 : vector<16x256xf32>
    %173 = arith.mulf %162, %172 : vector<16x256xf32>
    %cst_67 = arith.constant 0.254829586 : f32
    %174 = vector.broadcast %cst_67 : f32 to vector<16x256xf32>
    %175 = arith.addf %174, %173 : vector<16x256xf32>
    %176 = arith.mulf %162, %175 : vector<16x256xf32>
    %cst_68 = arith.constant 0.000000e+00 : f32
    %177 = vector.broadcast %cst_68 : f32 to vector<16x256xf32>
    %178 = arith.subf %177, %157 : vector<16x256xf32>
    %179 = arith.mulf %178, %157 : vector<16x256xf32>
    %180 = math.exp %179 : vector<16x256xf32>
    %181 = arith.mulf %176, %180 : vector<16x256xf32>
    %cst_69 = arith.constant 1.000000e+00 : f32
    %182 = vector.broadcast %cst_69 : f32 to vector<16x256xf32>
    %183 = arith.subf %182, %181 : vector<16x256xf32>
    %cst_70 = arith.constant 0.000000e+00 : f32
    %184 = vector.broadcast %cst_70 : f32 to vector<16x256xf32>
    %185 = arith.cmpf olt, %156, %184 : vector<16x256xf32>
    %cst_71 = arith.constant 0.000000e+00 : f32
    %186 = vector.broadcast %cst_71 : f32 to vector<16x256xf32>
    %187 = arith.subf %186, %183 : vector<16x256xf32>
    %188 = arith.select %185, %187, %183 : vector<16x256xi1>, vector<16x256xf32>
    %cst_72 = arith.constant 1.000000e+00 : f32
    %189 = vector.broadcast %cst_72 : f32 to vector<16x256xf32>
    %190 = arith.addf %189, %188 : vector<16x256xf32>
    %191 = arith.mulf %154, %190 : vector<16x256xf32>
    %c34_i32_73 = arith.constant 34 : i32
    %192 = tpu.dynamic_rotate %191 by %c34_i32_73 dim 1 : vector<16x256xf32>, i32 -> vector<16x256xf32>
    %c0_74 = arith.constant 0 : index
    %c0_75 = arith.constant 0 : index
    %193 = vector.load %arg2[%c0_74, %c0_75] : memref<25x256xf32, #tpu.memory_space<vmem>>, vector<1x256xf32>
    %194 = vector.broadcast %193 : vector<1x256xf32> to vector<16x256xf32>
    %195 = arith.mulf %192, %194 : vector<16x256xf32>
    %196 = arith.truncf %195 : vector<16x256xf32> to vector<16x256xbf16>
    %c0_76 = arith.constant 0 : index
    %c0_77 = arith.constant 0 : index
    %197 = vector.load %arg12[%c0_76, %c0_77] : memref<400x256xbf16, #tpu.memory_space<vmem>>, vector<16x256xbf16>
    tpu.vector_store %arg12[%c0_76, %c0_77], %196 {strides = array<i32>} : memref<400x256xbf16, #tpu.memory_space<vmem>>, vector<16x256xbf16>,
    %c33_i32_78 = arith.constant 33 : i32
    %198 = tpu.dynamic_rotate %191 by %c33_i32_78 dim 1 : vector<16x256xf32>, i32 -> vector<16x256xf32>
    %c1_79 = arith.constant 1 : index
    %c0_80 = arith.constant 0 : index
    %199 = vector.load %arg2[%c1_79, %c0_80] : memref<25x256xf32, #tpu.memory_space<vmem>>, vector<1x256xf32>
    %200 = vector.broadcast %199 : vector<1x256xf32> to vector<16x256xf32>
    %201 = arith.mulf %198, %200 : vector<16x256xf32>
    %202 = arith.truncf %201 : vector<16x256xf32> to vector<16x256xbf16>
    %c16_81 = arith.constant 16 : index
    %c0_82 = arith.constant 0 : index
    %203 = vector.load %arg12[%c16_81, %c0_82] : memref<400x256xbf16, #tpu.memory_space<vmem>>, vector<16x256xbf16>
    tpu.vector_store %arg12[%c16_81, %c0_82], %202 {strides = array<i32>} : memref<400x256xbf16, #tpu.memory_space<vmem>>, vector<16x256xbf16>,
    %c32_i32_83 = arith.constant 32 : i32
    %204 = tpu.dynamic_rotate %191 by %c32_i32_83 dim 1 : vector<16x256xf32>, i32 -> vector<16x256xf32>
    %c2_84 = arith.constant 2 : index
    %c0_85 = arith.constant 0 : index
    %205 = vector.load %arg2[%c2_84, %c0_85] : memref<25x256xf32, #tpu.memory_space<vmem>>, vector<1x256xf32>
    %206 = vector.broadcast %205 : vector<1x256xf32> to vector<16x256xf32>
    %207 = arith.mulf %204, %206 : vector<16x256xf32>
    %208 = arith.truncf %207 : vector<16x256xf32> to vector<16x256xbf16>
    %c32_86 = arith.constant 32 : index
    %c0_87 = arith.constant 0 : index
    %209 = vector.load %arg12[%c32_86, %c0_87] : memref<400x256xbf16, #tpu.memory_space<vmem>>, vector<16x256xbf16>
    tpu.vector_store %arg12[%c32_86, %c0_87], %208 {strides = array<i32>} : memref<400x256xbf16, #tpu.memory_space<vmem>>, vector<16x256xbf16>,
    %c31_i32_88 = arith.constant 31 : i32
    %210 = tpu.dynamic_rotate %191 by %c31_i32_88 dim 1 : vector<16x256xf32>, i32 -> vector<16x256xf32>
    %c3_89 = arith.constant 3 : index
    %c0_90 = arith.constant 0 : index
    %211 = vector.load %arg2[%c3_89, %c0_90] : memref<25x256xf32, #tpu.memory_space<vmem>>, vector<1x256xf32>
    %212 = vector.broadcast %211 : vector<1x256xf32> to vector<16x256xf32>
    %213 = arith.mulf %210, %212 : vector<16x256xf32>
    %214 = arith.truncf %213 : vector<16x256xf32> to vector<16x256xbf16>
    %c48_91 = arith.constant 48 : index
    %c0_92 = arith.constant 0 : index
    %215 = vector.load %arg12[%c48_91, %c0_92] : memref<400x256xbf16, #tpu.memory_space<vmem>>, vector<16x256xbf16>
    tpu.vector_store %arg12[%c48_91, %c0_92], %214 {strides = array<i32>} : memref<400x256xbf16, #tpu.memory_space<vmem>>, vector<16x256xbf16>,
    %c30_i32_93 = arith.constant 30 : i32
    %216 = tpu.dynamic_rotate %191 by %c30_i32_93 dim 1 : vector<16x256xf32>, i32 -> vector<16x256xf32>
    %c4_94 = arith.constant 4 : index
    %c0_95 = arith.constant 0 : index
    %217 = vector.load %arg2[%c4_94, %c0_95] : memref<25x256xf32, #tpu.memory_space<vmem>>, vector<1x256xf32>
    %218 = vector.broadcast %217 : vector<1x256xf32> to vector<16x256xf32>
    %219 = arith.mulf %216, %218 : vector<16x256xf32>
    %220 = arith.truncf %219 : vector<16x256xf32> to vector<16x256xbf16>
    %c64_96 = arith.constant 64 : index
    %c0_97 = arith.constant 0 : index
    %221 = vector.load %arg12[%c64_96, %c0_97] : memref<400x256xbf16, #tpu.memory_space<vmem>>, vector<16x256xbf16>
    tpu.vector_store %arg12[%c64_96, %c0_97], %220 {strides = array<i32>} : memref<400x256xbf16, #tpu.memory_space<vmem>>, vector<16x256xbf16>,
    %c18_i32_98 = arith.constant 18 : i32
    %222 = tpu.dynamic_rotate %191 by %c18_i32_98 dim 1 : vector<16x256xf32>, i32 -> vector<16x256xf32>
    %c5_99 = arith.constant 5 : index
    %c0_100 = arith.constant 0 : index
    %223 = vector.load %arg2[%c5_99, %c0_100] : memref<25x256xf32, #tpu.memory_space<vmem>>, vector<1x256xf32>
    %224 = vector.broadcast %223 : vector<1x256xf32> to vector<16x256xf32>
    %225 = arith.mulf %222, %224 : vector<16x256xf32>
    %226 = arith.truncf %225 : vector<16x256xf32> to vector<16x256xbf16>
    %c80_101 = arith.constant 80 : index
    %c0_102 = arith.constant 0 : index
    %227 = vector.load %arg12[%c80_101, %c0_102] : memref<400x256xbf16, #tpu.memory_space<vmem>>, vector<16x256xbf16>
    tpu.vector_store %arg12[%c80_101, %c0_102], %226 {strides = array<i32>} : memref<400x256xbf16, #tpu.memory_space<vmem>>, vector<16x256xbf16>,
    %c17_i32_103 = arith.constant 17 : i32
    %228 = tpu.dynamic_rotate %191 by %c17_i32_103 dim 1 : vector<16x256xf32>, i32 -> vector<16x256xf32>
    %c6_104 = arith.constant 6 : index
    %c0_105 = arith.constant 0 : index
    %229 = vector.load %arg2[%c6_104, %c0_105] : memref<25x256xf32, #tpu.memory_space<vmem>>, vector<1x256xf32>
    %230 = vector.broadcast %229 : vector<1x256xf32> to vector<16x256xf32>
    %231 = arith.mulf %228, %230 : vector<16x256xf32>
    %232 = arith.truncf %231 : vector<16x256xf32> to vector<16x256xbf16>
    %c96_106 = arith.constant 96 : index
    %c0_107 = arith.constant 0 : index
    %233 = vector.load %arg12[%c96_106, %c0_107] : memref<400x256xbf16, #tpu.memory_space<vmem>>, vector<16x256xbf16>
    tpu.vector_store %arg12[%c96_106, %c0_107], %232 {strides = array<i32>} : memref<400x256xbf16, #tpu.memory_space<vmem>>, vector<16x256xbf16>,
    %c16_i32_108 = arith.constant 16 : i32
    %234 = tpu.dynamic_rotate %191 by %c16_i32_108 dim 1 : vector<16x256xf32>, i32 -> vector<16x256xf32>
    %c7_109 = arith.constant 7 : index
    %c0_110 = arith.constant 0 : index
    %235 = vector.load %arg2[%c7_109, %c0_110] : memref<25x256xf32, #tpu.memory_space<vmem>>, vector<1x256xf32>
    %236 = vector.broadcast %235 : vector<1x256xf32> to vector<16x256xf32>
    %237 = arith.mulf %234, %236 : vector<16x256xf32>
    %238 = arith.truncf %237 : vector<16x256xf32> to vector<16x256xbf16>
    %c112_111 = arith.constant 112 : index
    %c0_112 = arith.constant 0 : index
    %239 = vector.load %arg12[%c112_111, %c0_112] : memref<400x256xbf16, #tpu.memory_space<vmem>>, vector<16x256xbf16>
    tpu.vector_store %arg12[%c112_111, %c0_112], %238 {strides = array<i32>} : memref<400x256xbf16, #tpu.memory_space<vmem>>, vector<16x256xbf16>,
    %c15_i32_113 = arith.constant 15 : i32
    %240 = tpu.dynamic_rotate %191 by %c15_i32_113 dim 1 : vector<16x256xf32>, i32 -> vector<16x256xf32>
    %c8_114 = arith.constant 8 : index
    %c0_115 = arith.constant 0 : index
    %241 = vector.load %arg2[%c8_114, %c0_115] : memref<25x256xf32, #tpu.memory_space<vmem>>, vector<1x256xf32>
    %242 = vector.broadcast %241 : vector<1x256xf32> to vector<16x256xf32>
    %243 = arith.mulf %240, %242 : vector<16x256xf32>
    %244 = arith.truncf %243 : vector<16x256xf32> to vector<16x256xbf16>
    %c128_116 = arith.constant 128 : index
    %c0_117 = arith.constant 0 : index
    %245 = vector.load %arg12[%c128_116, %c0_117] : memref<400x256xbf16, #tpu.memory_space<vmem>>, vector<16x256xbf16>
    tpu.vector_store %arg12[%c128_116, %c0_117], %244 {strides = array<i32>} : memref<400x256xbf16, #tpu.memory_space<vmem>>, vector<16x256xbf16>,
    %c14_i32_118 = arith.constant 14 : i32
    %246 = tpu.dynamic_rotate %191 by %c14_i32_118 dim 1 : vector<16x256xf32>, i32 -> vector<16x256xf32>
    %c9_119 = arith.constant 9 : index
    %c0_120 = arith.constant 0 : index
    %247 = vector.load %arg2[%c9_119, %c0_120] : memref<25x256xf32, #tpu.memory_space<vmem>>, vector<1x256xf32>
    %248 = vector.broadcast %247 : vector<1x256xf32> to vector<16x256xf32>
    %249 = arith.mulf %246, %248 : vector<16x256xf32>
    %250 = arith.truncf %249 : vector<16x256xf32> to vector<16x256xbf16>
    %c144_121 = arith.constant 144 : index
    %c0_122 = arith.constant 0 : index
    %251 = vector.load %arg12[%c144_121, %c0_122] : memref<400x256xbf16, #tpu.memory_space<vmem>>, vector<16x256xbf16>
    tpu.vector_store %arg12[%c144_121, %c0_122], %250 {strides = array<i32>} : memref<400x256xbf16, #tpu.memory_space<vmem>>, vector<16x256xbf16>,
    %c2_i32_123 = arith.constant 2 : i32
    %252 = tpu.dynamic_rotate %191 by %c2_i32_123 dim 1 : vector<16x256xf32>, i32 -> vector<16x256xf32>
    %c10_124 = arith.constant 10 : index
    %c0_125 = arith.constant 0 : index
    %253 = vector.load %arg2[%c10_124, %c0_125] : memref<25x256xf32, #tpu.memory_space<vmem>>, vector<1x256xf32>
    %254 = vector.broadcast %253 : vector<1x256xf32> to vector<16x256xf32>
    %255 = arith.mulf %252, %254 : vector<16x256xf32>
    %256 = arith.truncf %255 : vector<16x256xf32> to vector<16x256xbf16>
    %c160_126 = arith.constant 160 : index
    %c0_127 = arith.constant 0 : index
    %257 = vector.load %arg12[%c160_126, %c0_127] : memref<400x256xbf16, #tpu.memory_space<vmem>>, vector<16x256xbf16>
    tpu.vector_store %arg12[%c160_126, %c0_127], %256 {strides = array<i32>} : memref<400x256xbf16, #tpu.memory_space<vmem>>, vector<16x256xbf16>,
    %c1_i32_128 = arith.constant 1 : i32
    %258 = tpu.dynamic_rotate %191 by %c1_i32_128 dim 1 : vector<16x256xf32>, i32 -> vector<16x256xf32>
    %c11_129 = arith.constant 11 : index
    %c0_130 = arith.constant 0 : index
    %259 = vector.load %arg2[%c11_129, %c0_130] : memref<25x256xf32, #tpu.memory_space<vmem>>, vector<1x256xf32>
    %260 = vector.broadcast %259 : vector<1x256xf32> to vector<16x256xf32>
    %261 = arith.mulf %258, %260 : vector<16x256xf32>
    %262 = arith.truncf %261 : vector<16x256xf32> to vector<16x256xbf16>
    %c176_131 = arith.constant 176 : index
    %c0_132 = arith.constant 0 : index
    %263 = vector.load %arg12[%c176_131, %c0_132] : memref<400x256xbf16, #tpu.memory_space<vmem>>, vector<16x256xbf16>
    tpu.vector_store %arg12[%c176_131, %c0_132], %262 {strides = array<i32>} : memref<400x256xbf16, #tpu.memory_space<vmem>>, vector<16x256xbf16>,
    %264 = arith.truncf %191 : vector<16x256xf32> to vector<16x256xbf16>
    %c192_133 = arith.constant 192 : index
    %c0_134 = arith.constant 0 : index
    %265 = vector.load %arg12[%c192_133, %c0_134] : memref<400x256xbf16, #tpu.memory_space<vmem>>, vector<16x256xbf16>
    tpu.vector_store %arg12[%c192_133, %c0_134], %264 {strides = array<i32>} : memref<400x256xbf16, #tpu.memory_space<vmem>>, vector<16x256xbf16>,
    %c255_i32_135 = arith.constant 255 : i32
    %266 = tpu.dynamic_rotate %191 by %c255_i32_135 dim 1 : vector<16x256xf32>, i32 -> vector<16x256xf32>
    %c13_136 = arith.constant 13 : index
    %c0_137 = arith.constant 0 : index
    %267 = vector.load %arg2[%c13_136, %c0_137] : memref<25x256xf32, #tpu.memory_space<vmem>>, vector<1x256xf32>
    %268 = vector.broadcast %267 : vector<1x256xf32> to vector<16x256xf32>
    %269 = arith.mulf %266, %268 : vector<16x256xf32>
    %270 = arith.truncf %269 : vector<16x256xf32> to vector<16x256xbf16>
    %c208_138 = arith.constant 208 : index
    %c0_139 = arith.constant 0 : index
    %271 = vector.load %arg12[%c208_138, %c0_139] : memref<400x256xbf16, #tpu.memory_space<vmem>>, vector<16x256xbf16>
    tpu.vector_store %arg12[%c208_138, %c0_139], %270 {strides = array<i32>} : memref<400x256xbf16, #tpu.memory_space<vmem>>, vector<16x256xbf16>,
    %c254_i32_140 = arith.constant 254 : i32
    %272 = tpu.dynamic_rotate %191 by %c254_i32_140 dim 1 : vector<16x256xf32>, i32 -> vector<16x256xf32>
    %c14_141 = arith.constant 14 : index
    %c0_142 = arith.constant 0 : index
    %273 = vector.load %arg2[%c14_141, %c0_142] : memref<25x256xf32, #tpu.memory_space<vmem>>, vector<1x256xf32>
    %274 = vector.broadcast %273 : vector<1x256xf32> to vector<16x256xf32>
    %275 = arith.mulf %272, %274 : vector<16x256xf32>
    %276 = arith.truncf %275 : vector<16x256xf32> to vector<16x256xbf16>
    %c224_143 = arith.constant 224 : index
    %c0_144 = arith.constant 0 : index
    %277 = vector.load %arg12[%c224_143, %c0_144] : memref<400x256xbf16, #tpu.memory_space<vmem>>, vector<16x256xbf16>
    tpu.vector_store %arg12[%c224_143, %c0_144], %276 {strides = array<i32>} : memref<400x256xbf16, #tpu.memory_space<vmem>>, vector<16x256xbf16>,
    %c242_i32_145 = arith.constant 242 : i32
    %278 = tpu.dynamic_rotate %191 by %c242_i32_145 dim 1 : vector<16x256xf32>, i32 -> vector<16x256xf32>
    %c15_146 = arith.constant 15 : index
    %c0_147 = arith.constant 0 : index
    %279 = vector.load %arg2[%c15_146, %c0_147] : memref<25x256xf32, #tpu.memory_space<vmem>>, vector<1x256xf32>
    %280 = vector.broadcast %279 : vector<1x256xf32> to vector<16x256xf32>
    %281 = arith.mulf %278, %280 : vector<16x256xf32>
    %282 = arith.truncf %281 : vector<16x256xf32> to vector<16x256xbf16>
    %c240_148 = arith.constant 240 : index
    %c0_149 = arith.constant 0 : index
    %283 = vector.load %arg12[%c240_148, %c0_149] : memref<400x256xbf16, #tpu.memory_space<vmem>>, vector<16x256xbf16>
    tpu.vector_store %arg12[%c240_148, %c0_149], %282 {strides = array<i32>} : memref<400x256xbf16, #tpu.memory_space<vmem>>, vector<16x256xbf16>,
    %c241_i32_150 = arith.constant 241 : i32
    %284 = tpu.dynamic_rotate %191 by %c241_i32_150 dim 1 : vector<16x256xf32>, i32 -> vector<16x256xf32>
    %c16_151 = arith.constant 16 : index
    %c0_152 = arith.constant 0 : index
    %285 = vector.load %arg2[%c16_151, %c0_152] : memref<25x256xf32, #tpu.memory_space<vmem>>, vector<1x256xf32>
    %286 = vector.broadcast %285 : vector<1x256xf32> to vector<16x256xf32>
    %287 = arith.mulf %284, %286 : vector<16x256xf32>
    %288 = arith.truncf %287 : vector<16x256xf32> to vector<16x256xbf16>
    %c256_153 = arith.constant 256 : index
    %c0_154 = arith.constant 0 : index
    %289 = vector.load %arg12[%c256_153, %c0_154] : memref<400x256xbf16, #tpu.memory_space<vmem>>, vector<16x256xbf16>
    tpu.vector_store %arg12[%c256_153, %c0_154], %288 {strides = array<i32>} : memref<400x256xbf16, #tpu.memory_space<vmem>>, vector<16x256xbf16>,
    %c240_i32_155 = arith.constant 240 : i32
    %290 = tpu.dynamic_rotate %191 by %c240_i32_155 dim 1 : vector<16x256xf32>, i32 -> vector<16x256xf32>
    %c17_156 = arith.constant 17 : index
    %c0_157 = arith.constant 0 : index
    %291 = vector.load %arg2[%c17_156, %c0_157] : memref<25x256xf32, #tpu.memory_space<vmem>>, vector<1x256xf32>
    %292 = vector.broadcast %291 : vector<1x256xf32> to vector<16x256xf32>
    %293 = arith.mulf %290, %292 : vector<16x256xf32>
    %294 = arith.truncf %293 : vector<16x256xf32> to vector<16x256xbf16>
    %c272_158 = arith.constant 272 : index
    %c0_159 = arith.constant 0 : index
    %295 = vector.load %arg12[%c272_158, %c0_159] : memref<400x256xbf16, #tpu.memory_space<vmem>>, vector<16x256xbf16>
    tpu.vector_store %arg12[%c272_158, %c0_159], %294 {strides = array<i32>} : memref<400x256xbf16, #tpu.memory_space<vmem>>, vector<16x256xbf16>,
    %c239_i32_160 = arith.constant 239 : i32
    %296 = tpu.dynamic_rotate %191 by %c239_i32_160 dim 1 : vector<16x256xf32>, i32 -> vector<16x256xf32>
    %c18_161 = arith.constant 18 : index
    %c0_162 = arith.constant 0 : index
    %297 = vector.load %arg2[%c18_161, %c0_162] : memref<25x256xf32, #tpu.memory_space<vmem>>, vector<1x256xf32>
    %298 = vector.broadcast %297 : vector<1x256xf32> to vector<16x256xf32>
    %299 = arith.mulf %296, %298 : vector<16x256xf32>
    %300 = arith.truncf %299 : vector<16x256xf32> to vector<16x256xbf16>
    %c288_163 = arith.constant 288 : index
    %c0_164 = arith.constant 0 : index
    %301 = vector.load %arg12[%c288_163, %c0_164] : memref<400x256xbf16, #tpu.memory_space<vmem>>, vector<16x256xbf16>
    tpu.vector_store %arg12[%c288_163, %c0_164], %300 {strides = array<i32>} : memref<400x256xbf16, #tpu.memory_space<vmem>>, vector<16x256xbf16>,
    %c238_i32_165 = arith.constant 238 : i32
    %302 = tpu.dynamic_rotate %191 by %c238_i32_165 dim 1 : vector<16x256xf32>, i32 -> vector<16x256xf32>
    %c19_166 = arith.constant 19 : index
    %c0_167 = arith.constant 0 : index
    %303 = vector.load %arg2[%c19_166, %c0_167] : memref<25x256xf32, #tpu.memory_space<vmem>>, vector<1x256xf32>
    %304 = vector.broadcast %303 : vector<1x256xf32> to vector<16x256xf32>
    %305 = arith.mulf %302, %304 : vector<16x256xf32>
    %306 = arith.truncf %305 : vector<16x256xf32> to vector<16x256xbf16>
    %c304_168 = arith.constant 304 : index
    %c0_169 = arith.constant 0 : index
    %307 = vector.load %arg12[%c304_168, %c0_169] : memref<400x256xbf16, #tpu.memory_space<vmem>>, vector<16x256xbf16>
    tpu.vector_store %arg12[%c304_168, %c0_169], %306 {strides = array<i32>} : memref<400x256xbf16, #tpu.memory_space<vmem>>, vector<16x256xbf16>,
    %c226_i32_170 = arith.constant 226 : i32
    %308 = tpu.dynamic_rotate %191 by %c226_i32_170 dim 1 : vector<16x256xf32>, i32 -> vector<16x256xf32>
    %c20_171 = arith.constant 20 : index
    %c0_172 = arith.constant 0 : index
    %309 = vector.load %arg2[%c20_171, %c0_172] : memref<25x256xf32, #tpu.memory_space<vmem>>, vector<1x256xf32>
    %310 = vector.broadcast %309 : vector<1x256xf32> to vector<16x256xf32>
    %311 = arith.mulf %308, %310 : vector<16x256xf32>
    %312 = arith.truncf %311 : vector<16x256xf32> to vector<16x256xbf16>
    %c320_173 = arith.constant 320 : index
    %c0_174 = arith.constant 0 : index
    %313 = vector.load %arg12[%c320_173, %c0_174] : memref<400x256xbf16, #tpu.memory_space<vmem>>, vector<16x256xbf16>
    tpu.vector_store %arg12[%c320_173, %c0_174], %312 {strides = array<i32>} : memref<400x256xbf16, #tpu.memory_space<vmem>>, vector<16x256xbf16>,
    %c225_i32_175 = arith.constant 225 : i32
    %314 = tpu.dynamic_rotate %191 by %c225_i32_175 dim 1 : vector<16x256xf32>, i32 -> vector<16x256xf32>
    %c21_176 = arith.constant 21 : index
    %c0_177 = arith.constant 0 : index
    %315 = vector.load %arg2[%c21_176, %c0_177] : memref<25x256xf32, #tpu.memory_space<vmem>>, vector<1x256xf32>
    %316 = vector.broadcast %315 : vector<1x256xf32> to vector<16x256xf32>
    %317 = arith.mulf %314, %316 : vector<16x256xf32>
    %318 = arith.truncf %317 : vector<16x256xf32> to vector<16x256xbf16>
    %c336_178 = arith.constant 336 : index
    %c0_179 = arith.constant 0 : index
    %319 = vector.load %arg12[%c336_178, %c0_179] : memref<400x256xbf16, #tpu.memory_space<vmem>>, vector<16x256xbf16>
    tpu.vector_store %arg12[%c336_178, %c0_179], %318 {strides = array<i32>} : memref<400x256xbf16, #tpu.memory_space<vmem>>, vector<16x256xbf16>,
    %c224_i32_180 = arith.constant 224 : i32
    %320 = tpu.dynamic_rotate %191 by %c224_i32_180 dim 1 : vector<16x256xf32>, i32 -> vector<16x256xf32>
    %c22_181 = arith.constant 22 : index
    %c0_182 = arith.constant 0 : index
    %321 = vector.load %arg2[%c22_181, %c0_182] : memref<25x256xf32, #tpu.memory_space<vmem>>, vector<1x256xf32>
    %322 = vector.broadcast %321 : vector<1x256xf32> to vector<16x256xf32>
    %323 = arith.mulf %320, %322 : vector<16x256xf32>
    %324 = arith.truncf %323 : vector<16x256xf32> to vector<16x256xbf16>
    %c352_183 = arith.constant 352 : index
    %c0_184 = arith.constant 0 : index
    %325 = vector.load %arg12[%c352_183, %c0_184] : memref<400x256xbf16, #tpu.memory_space<vmem>>, vector<16x256xbf16>
    tpu.vector_store %arg12[%c352_183, %c0_184], %324 {strides = array<i32>} : memref<400x256xbf16, #tpu.memory_space<vmem>>, vector<16x256xbf16>,
    %c223_i32_185 = arith.constant 223 : i32
    %326 = tpu.dynamic_rotate %191 by %c223_i32_185 dim 1 : vector<16x256xf32>, i32 -> vector<16x256xf32>
    %c23_186 = arith.constant 23 : index
    %c0_187 = arith.constant 0 : index
    %327 = vector.load %arg2[%c23_186, %c0_187] : memref<25x256xf32, #tpu.memory_space<vmem>>, vector<1x256xf32>
    %328 = vector.broadcast %327 : vector<1x256xf32> to vector<16x256xf32>
    %329 = arith.mulf %326, %328 : vector<16x256xf32>
    %330 = arith.truncf %329 : vector<16x256xf32> to vector<16x256xbf16>
    %c368_188 = arith.constant 368 : index
    %c0_189 = arith.constant 0 : index
    %331 = vector.load %arg12[%c368_188, %c0_189] : memref<400x256xbf16, #tpu.memory_space<vmem>>, vector<16x256xbf16>
    tpu.vector_store %arg12[%c368_188, %c0_189], %330 {strides = array<i32>} : memref<400x256xbf16, #tpu.memory_space<vmem>>, vector<16x256xbf16>,
    %c222_i32_190 = arith.constant 222 : i32
    %332 = tpu.dynamic_rotate %191 by %c222_i32_190 dim 1 : vector<16x256xf32>, i32 -> vector<16x256xf32>
    %c24_191 = arith.constant 24 : index
    %c0_192 = arith.constant 0 : index
    %333 = vector.load %arg2[%c24_191, %c0_192] : memref<25x256xf32, #tpu.memory_space<vmem>>, vector<1x256xf32>
    %334 = vector.broadcast %333 : vector<1x256xf32> to vector<16x256xf32>
    %335 = arith.mulf %332, %334 : vector<16x256xf32>
    %336 = arith.truncf %335 : vector<16x256xf32> to vector<16x256xbf16>
    %c384_193 = arith.constant 384 : index
    %c0_194 = arith.constant 0 : index
    %337 = vector.load %arg12[%c384_193, %c0_194] : memref<400x256xbf16, #tpu.memory_space<vmem>>, vector<16x256xbf16>
    tpu.vector_store %arg12[%c384_193, %c0_194], %336 {strides = array<i32>} : memref<400x256xbf16, #tpu.memory_space<vmem>>, vector<16x256xbf16>,
    %c0_195 = arith.constant 0 : index
    %c0_196 = arith.constant 0 : index
    %338 = vector.load %arg5[%c0_195, %c0_196] : memref<16x400xbf16, #tpu.memory_space<vmem>>, vector<16x400xbf16>
    %c0_197 = arith.constant 0 : index
    %c0_198 = arith.constant 0 : index
    %339 = vector.load %arg12[%c0_197, %c0_198] : memref<400x256xbf16, #tpu.memory_space<vmem>>, vector<400x256xbf16>
    %cst_199 = arith.constant dense<0.000000e+00> : vector<16x256xf32>
    %340 = tpu.matmul %338, %339, %cst_199 {dimension_numbers = #tpu.dot_dimension_numbers<[1], [0], [0], [1], [0, 0, 1, 1], [], []>} : vector<16x400xbf16>, vector<400x256xbf16>, vector<16x256xf32> -> vector<16x256xf32>
    %c0_200 = arith.constant 0 : index
    %c0_201 = arith.constant 0 : index
    %341 = vector.load %arg6[%c0_200, %c0_201] : memref<16x1xf32, #tpu.memory_space<vmem>>, vector<16x1xf32>
    %342 = vector.broadcast %341 : vector<16x1xf32> to vector<16x256xf32>
    %343 = arith.addf %340, %342 : vector<16x256xf32>
    %cst_202 = arith.constant 5.000000e-01 : f32
    %344 = vector.broadcast %cst_202 : f32 to vector<16x256xf32>
    %345 = arith.mulf %344, %343 : vector<16x256xf32>
    %cst_203 = arith.constant 0.707106769 : f32
    %346 = vector.broadcast %cst_203 : f32 to vector<16x256xf32>
    %347 = arith.mulf %343, %346 : vector<16x256xf32>
    %348 = math.absf %347 : vector<16x256xf32>
    %cst_204 = arith.constant 0.327591091 : f32
    %349 = vector.broadcast %cst_204 : f32 to vector<16x256xf32>
    %350 = arith.mulf %349, %348 : vector<16x256xf32>
    %cst_205 = arith.constant 1.000000e+00 : f32
    %351 = vector.broadcast %cst_205 : f32 to vector<16x256xf32>
    %352 = arith.addf %351, %350 : vector<16x256xf32>
    %353 = tpu.reciprocal %352 {approx = true} : vector<16x256xf32> -> vector<16x256xf32>
    %cst_206 = arith.constant 1.06140542 : f32
    %354 = vector.broadcast %cst_206 : f32 to vector<16x256xf32>
    %355 = arith.mulf %353, %354 : vector<16x256xf32>
    %cst_207 = arith.constant -1.45315206 : f32
    %356 = vector.broadcast %cst_207 : f32 to vector<16x256xf32>
    %357 = arith.addf %356, %355 : vector<16x256xf32>
    %358 = arith.mulf %353, %357 : vector<16x256xf32>
    %cst_208 = arith.constant 1.42141378 : f32
    %359 = vector.broadcast %cst_208 : f32 to vector<16x256xf32>
    %360 = arith.addf %359, %358 : vector<16x256xf32>
    %361 = arith.mulf %353, %360 : vector<16x256xf32>
    %cst_209 = arith.constant -0.284496725 : f32
    %362 = vector.broadcast %cst_209 : f32 to vector<16x256xf32>
    %363 = arith.addf %362, %361 : vector<16x256xf32>
    %364 = arith.mulf %353, %363 : vector<16x256xf32>
    %cst_210 = arith.constant 0.254829586 : f32
    %365 = vector.broadcast %cst_210 : f32 to vector<16x256xf32>
    %366 = arith.addf %365, %364 : vector<16x256xf32>
    %367 = arith.mulf %353, %366 : vector<16x256xf32>
    %cst_211 = arith.constant 0.000000e+00 : f32
    %368 = vector.broadcast %cst_211 : f32 to vector<16x256xf32>
    %369 = arith.subf %368, %348 : vector<16x256xf32>
    %370 = arith.mulf %369, %348 : vector<16x256xf32>
    %371 = math.exp %370 : vector<16x256xf32>
    %372 = arith.mulf %367, %371 : vector<16x256xf32>
    %cst_212 = arith.constant 1.000000e+00 : f32
    %373 = vector.broadcast %cst_212 : f32 to vector<16x256xf32>
    %374 = arith.subf %373, %372 : vector<16x256xf32>
    %cst_213 = arith.constant 0.000000e+00 : f32
    %375 = vector.broadcast %cst_213 : f32 to vector<16x256xf32>
    %376 = arith.cmpf olt, %347, %375 : vector<16x256xf32>
    %cst_214 = arith.constant 0.000000e+00 : f32
    %377 = vector.broadcast %cst_214 : f32 to vector<16x256xf32>
    %378 = arith.subf %377, %374 : vector<16x256xf32>
    %379 = arith.select %376, %378, %374 : vector<16x256xi1>, vector<16x256xf32>
    %cst_215 = arith.constant 1.000000e+00 : f32
    %380 = vector.broadcast %cst_215 : f32 to vector<16x256xf32>
    %381 = arith.addf %380, %379 : vector<16x256xf32>
    %382 = arith.mulf %345, %381 : vector<16x256xf32>
    %c34_i32_216 = arith.constant 34 : i32
    %383 = tpu.dynamic_rotate %382 by %c34_i32_216 dim 1 : vector<16x256xf32>, i32 -> vector<16x256xf32>
    %c0_217 = arith.constant 0 : index
    %c0_218 = arith.constant 0 : index
    %384 = vector.load %arg2[%c0_217, %c0_218] : memref<25x256xf32, #tpu.memory_space<vmem>>, vector<1x256xf32>
    %385 = vector.broadcast %384 : vector<1x256xf32> to vector<16x256xf32>
    %386 = arith.mulf %383, %385 : vector<16x256xf32>
    %387 = arith.truncf %386 : vector<16x256xf32> to vector<16x256xbf16>
    %c0_219 = arith.constant 0 : index
    %c0_220 = arith.constant 0 : index
    %388 = vector.load %arg12[%c0_219, %c0_220] : memref<400x256xbf16, #tpu.memory_space<vmem>>, vector<16x256xbf16>
    tpu.vector_store %arg12[%c0_219, %c0_220], %387 {strides = array<i32>} : memref<400x256xbf16, #tpu.memory_space<vmem>>, vector<16x256xbf16>,
    %c33_i32_221 = arith.constant 33 : i32
    %389 = tpu.dynamic_rotate %382 by %c33_i32_221 dim 1 : vector<16x256xf32>, i32 -> vector<16x256xf32>
    %c1_222 = arith.constant 1 : index
    %c0_223 = arith.constant 0 : index
    %390 = vector.load %arg2[%c1_222, %c0_223] : memref<25x256xf32, #tpu.memory_space<vmem>>, vector<1x256xf32>
    %391 = vector.broadcast %390 : vector<1x256xf32> to vector<16x256xf32>
    %392 = arith.mulf %389, %391 : vector<16x256xf32>
    %393 = arith.truncf %392 : vector<16x256xf32> to vector<16x256xbf16>
    %c16_224 = arith.constant 16 : index
    %c0_225 = arith.constant 0 : index
    %394 = vector.load %arg12[%c16_224, %c0_225] : memref<400x256xbf16, #tpu.memory_space<vmem>>, vector<16x256xbf16>
    tpu.vector_store %arg12[%c16_224, %c0_225], %393 {strides = array<i32>} : memref<400x256xbf16, #tpu.memory_space<vmem>>, vector<16x256xbf16>,
    %c32_i32_226 = arith.constant 32 : i32
    %395 = tpu.dynamic_rotate %382 by %c32_i32_226 dim 1 : vector<16x256xf32>, i32 -> vector<16x256xf32>
    %c2_227 = arith.constant 2 : index
    %c0_228 = arith.constant 0 : index
    %396 = vector.load %arg2[%c2_227, %c0_228] : memref<25x256xf32, #tpu.memory_space<vmem>>, vector<1x256xf32>
    %397 = vector.broadcast %396 : vector<1x256xf32> to vector<16x256xf32>
    %398 = arith.mulf %395, %397 : vector<16x256xf32>
    %399 = arith.truncf %398 : vector<16x256xf32> to vector<16x256xbf16>
    %c32_229 = arith.constant 32 : index
    %c0_230 = arith.constant 0 : index
    %400 = vector.load %arg12[%c32_229, %c0_230] : memref<400x256xbf16, #tpu.memory_space<vmem>>, vector<16x256xbf16>
    tpu.vector_store %arg12[%c32_229, %c0_230], %399 {strides = array<i32>} : memref<400x256xbf16, #tpu.memory_space<vmem>>, vector<16x256xbf16>,
    %c31_i32_231 = arith.constant 31 : i32
    %401 = tpu.dynamic_rotate %382 by %c31_i32_231 dim 1 : vector<16x256xf32>, i32 -> vector<16x256xf32>
    %c3_232 = arith.constant 3 : index
    %c0_233 = arith.constant 0 : index
    %402 = vector.load %arg2[%c3_232, %c0_233] : memref<25x256xf32, #tpu.memory_space<vmem>>, vector<1x256xf32>
    %403 = vector.broadcast %402 : vector<1x256xf32> to vector<16x256xf32>
    %404 = arith.mulf %401, %403 : vector<16x256xf32>
    %405 = arith.truncf %404 : vector<16x256xf32> to vector<16x256xbf16>
    %c48_234 = arith.constant 48 : index
    %c0_235 = arith.constant 0 : index
    %406 = vector.load %arg12[%c48_234, %c0_235] : memref<400x256xbf16, #tpu.memory_space<vmem>>, vector<16x256xbf16>
    tpu.vector_store %arg12[%c48_234, %c0_235], %405 {strides = array<i32>} : memref<400x256xbf16, #tpu.memory_space<vmem>>, vector<16x256xbf16>,
    %c30_i32_236 = arith.constant 30 : i32
    %407 = tpu.dynamic_rotate %382 by %c30_i32_236 dim 1 : vector<16x256xf32>, i32 -> vector<16x256xf32>
    %c4_237 = arith.constant 4 : index
    %c0_238 = arith.constant 0 : index
    %408 = vector.load %arg2[%c4_237, %c0_238] : memref<25x256xf32, #tpu.memory_space<vmem>>, vector<1x256xf32>
    %409 = vector.broadcast %408 : vector<1x256xf32> to vector<16x256xf32>
    %410 = arith.mulf %407, %409 : vector<16x256xf32>
    %411 = arith.truncf %410 : vector<16x256xf32> to vector<16x256xbf16>
    %c64_239 = arith.constant 64 : index
    %c0_240 = arith.constant 0 : index
    %412 = vector.load %arg12[%c64_239, %c0_240] : memref<400x256xbf16, #tpu.memory_space<vmem>>, vector<16x256xbf16>
    tpu.vector_store %arg12[%c64_239, %c0_240], %411 {strides = array<i32>} : memref<400x256xbf16, #tpu.memory_space<vmem>>, vector<16x256xbf16>,
    %c18_i32_241 = arith.constant 18 : i32
    %413 = tpu.dynamic_rotate %382 by %c18_i32_241 dim 1 : vector<16x256xf32>, i32 -> vector<16x256xf32>
    %c5_242 = arith.constant 5 : index
    %c0_243 = arith.constant 0 : index
    %414 = vector.load %arg2[%c5_242, %c0_243] : memref<25x256xf32, #tpu.memory_space<vmem>>, vector<1x256xf32>
    %415 = vector.broadcast %414 : vector<1x256xf32> to vector<16x256xf32>
    %416 = arith.mulf %413, %415 : vector<16x256xf32>
    %417 = arith.truncf %416 : vector<16x256xf32> to vector<16x256xbf16>
    %c80_244 = arith.constant 80 : index
    %c0_245 = arith.constant 0 : index
    %418 = vector.load %arg12[%c80_244, %c0_245] : memref<400x256xbf16, #tpu.memory_space<vmem>>, vector<16x256xbf16>
    tpu.vector_store %arg12[%c80_244, %c0_245], %417 {strides = array<i32>} : memref<400x256xbf16, #tpu.memory_space<vmem>>, vector<16x256xbf16>,
    %c17_i32_246 = arith.constant 17 : i32
    %419 = tpu.dynamic_rotate %382 by %c17_i32_246 dim 1 : vector<16x256xf32>, i32 -> vector<16x256xf32>
    %c6_247 = arith.constant 6 : index
    %c0_248 = arith.constant 0 : index
    %420 = vector.load %arg2[%c6_247, %c0_248] : memref<25x256xf32, #tpu.memory_space<vmem>>, vector<1x256xf32>
    %421 = vector.broadcast %420 : vector<1x256xf32> to vector<16x256xf32>
    %422 = arith.mulf %419, %421 : vector<16x256xf32>
    %423 = arith.truncf %422 : vector<16x256xf32> to vector<16x256xbf16>
    %c96_249 = arith.constant 96 : index
    %c0_250 = arith.constant 0 : index
    %424 = vector.load %arg12[%c96_249, %c0_250] : memref<400x256xbf16, #tpu.memory_space<vmem>>, vector<16x256xbf16>
    tpu.vector_store %arg12[%c96_249, %c0_250], %423 {strides = array<i32>} : memref<400x256xbf16, #tpu.memory_space<vmem>>, vector<16x256xbf16>,
    %c16_i32_251 = arith.constant 16 : i32
    %425 = tpu.dynamic_rotate %382 by %c16_i32_251 dim 1 : vector<16x256xf32>, i32 -> vector<16x256xf32>
    %c7_252 = arith.constant 7 : index
    %c0_253 = arith.constant 0 : index
    %426 = vector.load %arg2[%c7_252, %c0_253] : memref<25x256xf32, #tpu.memory_space<vmem>>, vector<1x256xf32>
    %427 = vector.broadcast %426 : vector<1x256xf32> to vector<16x256xf32>
    %428 = arith.mulf %425, %427 : vector<16x256xf32>
    %429 = arith.truncf %428 : vector<16x256xf32> to vector<16x256xbf16>
    %c112_254 = arith.constant 112 : index
    %c0_255 = arith.constant 0 : index
    %430 = vector.load %arg12[%c112_254, %c0_255] : memref<400x256xbf16, #tpu.memory_space<vmem>>, vector<16x256xbf16>
    tpu.vector_store %arg12[%c112_254, %c0_255], %429 {strides = array<i32>} : memref<400x256xbf16, #tpu.memory_space<vmem>>, vector<16x256xbf16>,
    %c15_i32_256 = arith.constant 15 : i32
    %431 = tpu.dynamic_rotate %382 by %c15_i32_256 dim 1 : vector<16x256xf32>, i32 -> vector<16x256xf32>
    %c8_257 = arith.constant 8 : index
    %c0_258 = arith.constant 0 : index
    %432 = vector.load %arg2[%c8_257, %c0_258] : memref<25x256xf32, #tpu.memory_space<vmem>>, vector<1x256xf32>
    %433 = vector.broadcast %432 : vector<1x256xf32> to vector<16x256xf32>
    %434 = arith.mulf %431, %433 : vector<16x256xf32>
    %435 = arith.truncf %434 : vector<16x256xf32> to vector<16x256xbf16>
    %c128_259 = arith.constant 128 : index
    %c0_260 = arith.constant 0 : index
    %436 = vector.load %arg12[%c128_259, %c0_260] : memref<400x256xbf16, #tpu.memory_space<vmem>>, vector<16x256xbf16>
    tpu.vector_store %arg12[%c128_259, %c0_260], %435 {strides = array<i32>} : memref<400x256xbf16, #tpu.memory_space<vmem>>, vector<16x256xbf16>,
    %c14_i32_261 = arith.constant 14 : i32
    %437 = tpu.dynamic_rotate %382 by %c14_i32_261 dim 1 : vector<16x256xf32>, i32 -> vector<16x256xf32>
    %c9_262 = arith.constant 9 : index
    %c0_263 = arith.constant 0 : index
    %438 = vector.load %arg2[%c9_262, %c0_263] : memref<25x256xf32, #tpu.memory_space<vmem>>, vector<1x256xf32>
    %439 = vector.broadcast %438 : vector<1x256xf32> to vector<16x256xf32>
    %440 = arith.mulf %437, %439 : vector<16x256xf32>
    %441 = arith.truncf %440 : vector<16x256xf32> to vector<16x256xbf16>
    %c144_264 = arith.constant 144 : index
    %c0_265 = arith.constant 0 : index
    %442 = vector.load %arg12[%c144_264, %c0_265] : memref<400x256xbf16, #tpu.memory_space<vmem>>, vector<16x256xbf16>
    tpu.vector_store %arg12[%c144_264, %c0_265], %441 {strides = array<i32>} : memref<400x256xbf16, #tpu.memory_space<vmem>>, vector<16x256xbf16>,
    %c2_i32_266 = arith.constant 2 : i32
    %443 = tpu.dynamic_rotate %382 by %c2_i32_266 dim 1 : vector<16x256xf32>, i32 -> vector<16x256xf32>
    %c10_267 = arith.constant 10 : index
    %c0_268 = arith.constant 0 : index
    %444 = vector.load %arg2[%c10_267, %c0_268] : memref<25x256xf32, #tpu.memory_space<vmem>>, vector<1x256xf32>
    %445 = vector.broadcast %444 : vector<1x256xf32> to vector<16x256xf32>
    %446 = arith.mulf %443, %445 : vector<16x256xf32>
    %447 = arith.truncf %446 : vector<16x256xf32> to vector<16x256xbf16>
    %c160_269 = arith.constant 160 : index
    %c0_270 = arith.constant 0 : index
    %448 = vector.load %arg12[%c160_269, %c0_270] : memref<400x256xbf16, #tpu.memory_space<vmem>>, vector<16x256xbf16>
    tpu.vector_store %arg12[%c160_269, %c0_270], %447 {strides = array<i32>} : memref<400x256xbf16, #tpu.memory_space<vmem>>, vector<16x256xbf16>,
    %c1_i32_271 = arith.constant 1 : i32
    %449 = tpu.dynamic_rotate %382 by %c1_i32_271 dim 1 : vector<16x256xf32>, i32 -> vector<16x256xf32>
    %c11_272 = arith.constant 11 : index
    %c0_273 = arith.constant 0 : index
    %450 = vector.load %arg2[%c11_272, %c0_273] : memref<25x256xf32, #tpu.memory_space<vmem>>, vector<1x256xf32>
    %451 = vector.broadcast %450 : vector<1x256xf32> to vector<16x256xf32>
    %452 = arith.mulf %449, %451 : vector<16x256xf32>
    %453 = arith.truncf %452 : vector<16x256xf32> to vector<16x256xbf16>
    %c176_274 = arith.constant 176 : index
    %c0_275 = arith.constant 0 : index
    %454 = vector.load %arg12[%c176_274, %c0_275] : memref<400x256xbf16, #tpu.memory_space<vmem>>, vector<16x256xbf16>
    tpu.vector_store %arg12[%c176_274, %c0_275], %453 {strides = array<i32>} : memref<400x256xbf16, #tpu.memory_space<vmem>>, vector<16x256xbf16>,
    %455 = arith.truncf %382 : vector<16x256xf32> to vector<16x256xbf16>
    %c192_276 = arith.constant 192 : index
    %c0_277 = arith.constant 0 : index
    %456 = vector.load %arg12[%c192_276, %c0_277] : memref<400x256xbf16, #tpu.memory_space<vmem>>, vector<16x256xbf16>
    tpu.vector_store %arg12[%c192_276, %c0_277], %455 {strides = array<i32>} : memref<400x256xbf16, #tpu.memory_space<vmem>>, vector<16x256xbf16>,
    %c255_i32_278 = arith.constant 255 : i32
    %457 = tpu.dynamic_rotate %382 by %c255_i32_278 dim 1 : vector<16x256xf32>, i32 -> vector<16x256xf32>
    %c13_279 = arith.constant 13 : index
    %c0_280 = arith.constant 0 : index
    %458 = vector.load %arg2[%c13_279, %c0_280] : memref<25x256xf32, #tpu.memory_space<vmem>>, vector<1x256xf32>
    %459 = vector.broadcast %458 : vector<1x256xf32> to vector<16x256xf32>
    %460 = arith.mulf %457, %459 : vector<16x256xf32>
    %461 = arith.truncf %460 : vector<16x256xf32> to vector<16x256xbf16>
    %c208_281 = arith.constant 208 : index
    %c0_282 = arith.constant 0 : index
    %462 = vector.load %arg12[%c208_281, %c0_282] : memref<400x256xbf16, #tpu.memory_space<vmem>>, vector<16x256xbf16>
    tpu.vector_store %arg12[%c208_281, %c0_282], %461 {strides = array<i32>} : memref<400x256xbf16, #tpu.memory_space<vmem>>, vector<16x256xbf16>,
    %c254_i32_283 = arith.constant 254 : i32
    %463 = tpu.dynamic_rotate %382 by %c254_i32_283 dim 1 : vector<16x256xf32>, i32 -> vector<16x256xf32>
    %c14_284 = arith.constant 14 : index
    %c0_285 = arith.constant 0 : index
    %464 = vector.load %arg2[%c14_284, %c0_285] : memref<25x256xf32, #tpu.memory_space<vmem>>, vector<1x256xf32>
    %465 = vector.broadcast %464 : vector<1x256xf32> to vector<16x256xf32>
    %466 = arith.mulf %463, %465 : vector<16x256xf32>
    %467 = arith.truncf %466 : vector<16x256xf32> to vector<16x256xbf16>
    %c224_286 = arith.constant 224 : index
    %c0_287 = arith.constant 0 : index
    %468 = vector.load %arg12[%c224_286, %c0_287] : memref<400x256xbf16, #tpu.memory_space<vmem>>, vector<16x256xbf16>
    tpu.vector_store %arg12[%c224_286, %c0_287], %467 {strides = array<i32>} : memref<400x256xbf16, #tpu.memory_space<vmem>>, vector<16x256xbf16>,
    %c242_i32_288 = arith.constant 242 : i32
    %469 = tpu.dynamic_rotate %382 by %c242_i32_288 dim 1 : vector<16x256xf32>, i32 -> vector<16x256xf32>
    %c15_289 = arith.constant 15 : index
    %c0_290 = arith.constant 0 : index
    %470 = vector.load %arg2[%c15_289, %c0_290] : memref<25x256xf32, #tpu.memory_space<vmem>>, vector<1x256xf32>
    %471 = vector.broadcast %470 : vector<1x256xf32> to vector<16x256xf32>
    %472 = arith.mulf %469, %471 : vector<16x256xf32>
    %473 = arith.truncf %472 : vector<16x256xf32> to vector<16x256xbf16>
    %c240_291 = arith.constant 240 : index
    %c0_292 = arith.constant 0 : index
    %474 = vector.load %arg12[%c240_291, %c0_292] : memref<400x256xbf16, #tpu.memory_space<vmem>>, vector<16x256xbf16>
    tpu.vector_store %arg12[%c240_291, %c0_292], %473 {strides = array<i32>} : memref<400x256xbf16, #tpu.memory_space<vmem>>, vector<16x256xbf16>,
    %c241_i32_293 = arith.constant 241 : i32
    %475 = tpu.dynamic_rotate %382 by %c241_i32_293 dim 1 : vector<16x256xf32>, i32 -> vector<16x256xf32>
    %c16_294 = arith.constant 16 : index
    %c0_295 = arith.constant 0 : index
    %476 = vector.load %arg2[%c16_294, %c0_295] : memref<25x256xf32, #tpu.memory_space<vmem>>, vector<1x256xf32>
    %477 = vector.broadcast %476 : vector<1x256xf32> to vector<16x256xf32>
    %478 = arith.mulf %475, %477 : vector<16x256xf32>
    %479 = arith.truncf %478 : vector<16x256xf32> to vector<16x256xbf16>
    %c256_296 = arith.constant 256 : index
    %c0_297 = arith.constant 0 : index
    %480 = vector.load %arg12[%c256_296, %c0_297] : memref<400x256xbf16, #tpu.memory_space<vmem>>, vector<16x256xbf16>
    tpu.vector_store %arg12[%c256_296, %c0_297], %479 {strides = array<i32>} : memref<400x256xbf16, #tpu.memory_space<vmem>>, vector<16x256xbf16>,
    %c240_i32_298 = arith.constant 240 : i32
    %481 = tpu.dynamic_rotate %382 by %c240_i32_298 dim 1 : vector<16x256xf32>, i32 -> vector<16x256xf32>
    %c17_299 = arith.constant 17 : index
    %c0_300 = arith.constant 0 : index
    %482 = vector.load %arg2[%c17_299, %c0_300] : memref<25x256xf32, #tpu.memory_space<vmem>>, vector<1x256xf32>
    %483 = vector.broadcast %482 : vector<1x256xf32> to vector<16x256xf32>
    %484 = arith.mulf %481, %483 : vector<16x256xf32>
    %485 = arith.truncf %484 : vector<16x256xf32> to vector<16x256xbf16>
    %c272_301 = arith.constant 272 : index
    %c0_302 = arith.constant 0 : index
    %486 = vector.load %arg12[%c272_301, %c0_302] : memref<400x256xbf16, #tpu.memory_space<vmem>>, vector<16x256xbf16>
    tpu.vector_store %arg12[%c272_301, %c0_302], %485 {strides = array<i32>} : memref<400x256xbf16, #tpu.memory_space<vmem>>, vector<16x256xbf16>,
    %c239_i32_303 = arith.constant 239 : i32
    %487 = tpu.dynamic_rotate %382 by %c239_i32_303 dim 1 : vector<16x256xf32>, i32 -> vector<16x256xf32>
    %c18_304 = arith.constant 18 : index
    %c0_305 = arith.constant 0 : index
    %488 = vector.load %arg2[%c18_304, %c0_305] : memref<25x256xf32, #tpu.memory_space<vmem>>, vector<1x256xf32>
    %489 = vector.broadcast %488 : vector<1x256xf32> to vector<16x256xf32>
    %490 = arith.mulf %487, %489 : vector<16x256xf32>
    %491 = arith.truncf %490 : vector<16x256xf32> to vector<16x256xbf16>
    %c288_306 = arith.constant 288 : index
    %c0_307 = arith.constant 0 : index
    %492 = vector.load %arg12[%c288_306, %c0_307] : memref<400x256xbf16, #tpu.memory_space<vmem>>, vector<16x256xbf16>
    tpu.vector_store %arg12[%c288_306, %c0_307], %491 {strides = array<i32>} : memref<400x256xbf16, #tpu.memory_space<vmem>>, vector<16x256xbf16>,
    %c238_i32_308 = arith.constant 238 : i32
    %493 = tpu.dynamic_rotate %382 by %c238_i32_308 dim 1 : vector<16x256xf32>, i32 -> vector<16x256xf32>
    %c19_309 = arith.constant 19 : index
    %c0_310 = arith.constant 0 : index
    %494 = vector.load %arg2[%c19_309, %c0_310] : memref<25x256xf32, #tpu.memory_space<vmem>>, vector<1x256xf32>
    %495 = vector.broadcast %494 : vector<1x256xf32> to vector<16x256xf32>
    %496 = arith.mulf %493, %495 : vector<16x256xf32>
    %497 = arith.truncf %496 : vector<16x256xf32> to vector<16x256xbf16>
    %c304_311 = arith.constant 304 : index
    %c0_312 = arith.constant 0 : index
    %498 = vector.load %arg12[%c304_311, %c0_312] : memref<400x256xbf16, #tpu.memory_space<vmem>>, vector<16x256xbf16>
    tpu.vector_store %arg12[%c304_311, %c0_312], %497 {strides = array<i32>} : memref<400x256xbf16, #tpu.memory_space<vmem>>, vector<16x256xbf16>,
    %c226_i32_313 = arith.constant 226 : i32
    %499 = tpu.dynamic_rotate %382 by %c226_i32_313 dim 1 : vector<16x256xf32>, i32 -> vector<16x256xf32>
    %c20_314 = arith.constant 20 : index
    %c0_315 = arith.constant 0 : index
    %500 = vector.load %arg2[%c20_314, %c0_315] : memref<25x256xf32, #tpu.memory_space<vmem>>, vector<1x256xf32>
    %501 = vector.broadcast %500 : vector<1x256xf32> to vector<16x256xf32>
    %502 = arith.mulf %499, %501 : vector<16x256xf32>
    %503 = arith.truncf %502 : vector<16x256xf32> to vector<16x256xbf16>
    %c320_316 = arith.constant 320 : index
    %c0_317 = arith.constant 0 : index
    %504 = vector.load %arg12[%c320_316, %c0_317] : memref<400x256xbf16, #tpu.memory_space<vmem>>, vector<16x256xbf16>
    tpu.vector_store %arg12[%c320_316, %c0_317], %503 {strides = array<i32>} : memref<400x256xbf16, #tpu.memory_space<vmem>>, vector<16x256xbf16>,
    %c225_i32_318 = arith.constant 225 : i32
    %505 = tpu.dynamic_rotate %382 by %c225_i32_318 dim 1 : vector<16x256xf32>, i32 -> vector<16x256xf32>
    %c21_319 = arith.constant 21 : index
    %c0_320 = arith.constant 0 : index
    %506 = vector.load %arg2[%c21_319, %c0_320] : memref<25x256xf32, #tpu.memory_space<vmem>>, vector<1x256xf32>
    %507 = vector.broadcast %506 : vector<1x256xf32> to vector<16x256xf32>
    %508 = arith.mulf %505, %507 : vector<16x256xf32>
    %509 = arith.truncf %508 : vector<16x256xf32> to vector<16x256xbf16>
    %c336_321 = arith.constant 336 : index
    %c0_322 = arith.constant 0 : index
    %510 = vector.load %arg12[%c336_321, %c0_322] : memref<400x256xbf16, #tpu.memory_space<vmem>>, vector<16x256xbf16>
    tpu.vector_store %arg12[%c336_321, %c0_322], %509 {strides = array<i32>} : memref<400x256xbf16, #tpu.memory_space<vmem>>, vector<16x256xbf16>,
    %c224_i32_323 = arith.constant 224 : i32
    %511 = tpu.dynamic_rotate %382 by %c224_i32_323 dim 1 : vector<16x256xf32>, i32 -> vector<16x256xf32>
    %c22_324 = arith.constant 22 : index
    %c0_325 = arith.constant 0 : index
    %512 = vector.load %arg2[%c22_324, %c0_325] : memref<25x256xf32, #tpu.memory_space<vmem>>, vector<1x256xf32>
    %513 = vector.broadcast %512 : vector<1x256xf32> to vector<16x256xf32>
    %514 = arith.mulf %511, %513 : vector<16x256xf32>
    %515 = arith.truncf %514 : vector<16x256xf32> to vector<16x256xbf16>
    %c352_326 = arith.constant 352 : index
    %c0_327 = arith.constant 0 : index
    %516 = vector.load %arg12[%c352_326, %c0_327] : memref<400x256xbf16, #tpu.memory_space<vmem>>, vector<16x256xbf16>
    tpu.vector_store %arg12[%c352_326, %c0_327], %515 {strides = array<i32>} : memref<400x256xbf16, #tpu.memory_space<vmem>>, vector<16x256xbf16>,
    %c223_i32_328 = arith.constant 223 : i32
    %517 = tpu.dynamic_rotate %382 by %c223_i32_328 dim 1 : vector<16x256xf32>, i32 -> vector<16x256xf32>
    %c23_329 = arith.constant 23 : index
    %c0_330 = arith.constant 0 : index
    %518 = vector.load %arg2[%c23_329, %c0_330] : memref<25x256xf32, #tpu.memory_space<vmem>>, vector<1x256xf32>
    %519 = vector.broadcast %518 : vector<1x256xf32> to vector<16x256xf32>
    %520 = arith.mulf %517, %519 : vector<16x256xf32>
    %521 = arith.truncf %520 : vector<16x256xf32> to vector<16x256xbf16>
    %c368_331 = arith.constant 368 : index
    %c0_332 = arith.constant 0 : index
    %522 = vector.load %arg12[%c368_331, %c0_332] : memref<400x256xbf16, #tpu.memory_space<vmem>>, vector<16x256xbf16>
    tpu.vector_store %arg12[%c368_331, %c0_332], %521 {strides = array<i32>} : memref<400x256xbf16, #tpu.memory_space<vmem>>, vector<16x256xbf16>,
    %c222_i32_333 = arith.constant 222 : i32
    %523 = tpu.dynamic_rotate %382 by %c222_i32_333 dim 1 : vector<16x256xf32>, i32 -> vector<16x256xf32>
    %c24_334 = arith.constant 24 : index
    %c0_335 = arith.constant 0 : index
    %524 = vector.load %arg2[%c24_334, %c0_335] : memref<25x256xf32, #tpu.memory_space<vmem>>, vector<1x256xf32>
    %525 = vector.broadcast %524 : vector<1x256xf32> to vector<16x256xf32>
    %526 = arith.mulf %523, %525 : vector<16x256xf32>
    %527 = arith.truncf %526 : vector<16x256xf32> to vector<16x256xbf16>
    %c384_336 = arith.constant 384 : index
    %c0_337 = arith.constant 0 : index
    %528 = vector.load %arg12[%c384_336, %c0_337] : memref<400x256xbf16, #tpu.memory_space<vmem>>, vector<16x256xbf16>
    tpu.vector_store %arg12[%c384_336, %c0_337], %527 {strides = array<i32>} : memref<400x256xbf16, #tpu.memory_space<vmem>>, vector<16x256xbf16>,
    %c0_338 = arith.constant 0 : index
    %c0_339 = arith.constant 0 : index
    %529 = vector.load %arg7[%c0_338, %c0_339] : memref<16x400xbf16, #tpu.memory_space<vmem>>, vector<16x400xbf16>
    %c0_340 = arith.constant 0 : index
    %c0_341 = arith.constant 0 : index
    %530 = vector.load %arg12[%c0_340, %c0_341] : memref<400x256xbf16, #tpu.memory_space<vmem>>, vector<400x256xbf16>
    %cst_342 = arith.constant dense<0.000000e+00> : vector<16x256xf32>
    %531 = tpu.matmul %529, %530, %cst_342 {dimension_numbers = #tpu.dot_dimension_numbers<[1], [0], [0], [1], [0, 0, 1, 1], [], []>} : vector<16x400xbf16>, vector<400x256xbf16>, vector<16x256xf32> -> vector<16x256xf32>
    %c0_343 = arith.constant 0 : index
    %c0_344 = arith.constant 0 : index
    %532 = vector.load %arg8[%c0_343, %c0_344] : memref<16x1xf32, #tpu.memory_space<vmem>>, vector<16x1xf32>
    %533 = vector.broadcast %532 : vector<16x1xf32> to vector<16x256xf32>
    %534 = arith.addf %531, %533 : vector<16x256xf32>
    %cst_345 = arith.constant 5.000000e-01 : f32
    %535 = vector.broadcast %cst_345 : f32 to vector<16x256xf32>
    %536 = arith.mulf %535, %534 : vector<16x256xf32>
    %cst_346 = arith.constant 0.707106769 : f32
    %537 = vector.broadcast %cst_346 : f32 to vector<16x256xf32>
    %538 = arith.mulf %534, %537 : vector<16x256xf32>
    %539 = math.absf %538 : vector<16x256xf32>
    %cst_347 = arith.constant 0.327591091 : f32
    %540 = vector.broadcast %cst_347 : f32 to vector<16x256xf32>
    %541 = arith.mulf %540, %539 : vector<16x256xf32>
    %cst_348 = arith.constant 1.000000e+00 : f32
    %542 = vector.broadcast %cst_348 : f32 to vector<16x256xf32>
    %543 = arith.addf %542, %541 : vector<16x256xf32>
    %544 = tpu.reciprocal %543 {approx = true} : vector<16x256xf32> -> vector<16x256xf32>
    %cst_349 = arith.constant 1.06140542 : f32
    %545 = vector.broadcast %cst_349 : f32 to vector<16x256xf32>
    %546 = arith.mulf %544, %545 : vector<16x256xf32>
    %cst_350 = arith.constant -1.45315206 : f32
    %547 = vector.broadcast %cst_350 : f32 to vector<16x256xf32>
    %548 = arith.addf %547, %546 : vector<16x256xf32>
    %549 = arith.mulf %544, %548 : vector<16x256xf32>
    %cst_351 = arith.constant 1.42141378 : f32
    %550 = vector.broadcast %cst_351 : f32 to vector<16x256xf32>
    %551 = arith.addf %550, %549 : vector<16x256xf32>
    %552 = arith.mulf %544, %551 : vector<16x256xf32>
    %cst_352 = arith.constant -0.284496725 : f32
    %553 = vector.broadcast %cst_352 : f32 to vector<16x256xf32>
    %554 = arith.addf %553, %552 : vector<16x256xf32>
    %555 = arith.mulf %544, %554 : vector<16x256xf32>
    %cst_353 = arith.constant 0.254829586 : f32
    %556 = vector.broadcast %cst_353 : f32 to vector<16x256xf32>
    %557 = arith.addf %556, %555 : vector<16x256xf32>
    %558 = arith.mulf %544, %557 : vector<16x256xf32>
    %cst_354 = arith.constant 0.000000e+00 : f32
    %559 = vector.broadcast %cst_354 : f32 to vector<16x256xf32>
    %560 = arith.subf %559, %539 : vector<16x256xf32>
    %561 = arith.mulf %560, %539 : vector<16x256xf32>
    %562 = math.exp %561 : vector<16x256xf32>
    %563 = arith.mulf %558, %562 : vector<16x256xf32>
    %cst_355 = arith.constant 1.000000e+00 : f32
    %564 = vector.broadcast %cst_355 : f32 to vector<16x256xf32>
    %565 = arith.subf %564, %563 : vector<16x256xf32>
    %cst_356 = arith.constant 0.000000e+00 : f32
    %566 = vector.broadcast %cst_356 : f32 to vector<16x256xf32>
    %567 = arith.cmpf olt, %538, %566 : vector<16x256xf32>
    %cst_357 = arith.constant 0.000000e+00 : f32
    %568 = vector.broadcast %cst_357 : f32 to vector<16x256xf32>
    %569 = arith.subf %568, %565 : vector<16x256xf32>
    %570 = arith.select %567, %569, %565 : vector<16x256xi1>, vector<16x256xf32>
    %cst_358 = arith.constant 1.000000e+00 : f32
    %571 = vector.broadcast %cst_358 : f32 to vector<16x256xf32>
    %572 = arith.addf %571, %570 : vector<16x256xf32>
    %573 = arith.mulf %536, %572 : vector<16x256xf32>
    %c34_i32_359 = arith.constant 34 : i32
    %574 = tpu.dynamic_rotate %573 by %c34_i32_359 dim 1 : vector<16x256xf32>, i32 -> vector<16x256xf32>
    %c0_360 = arith.constant 0 : index
    %c0_361 = arith.constant 0 : index
    %575 = vector.load %arg2[%c0_360, %c0_361] : memref<25x256xf32, #tpu.memory_space<vmem>>, vector<1x256xf32>
    %576 = vector.broadcast %575 : vector<1x256xf32> to vector<16x256xf32>
    %577 = arith.mulf %574, %576 : vector<16x256xf32>
    %578 = arith.truncf %577 : vector<16x256xf32> to vector<16x256xbf16>
    %c0_362 = arith.constant 0 : index
    %c0_363 = arith.constant 0 : index
    %579 = vector.load %arg12[%c0_362, %c0_363] : memref<400x256xbf16, #tpu.memory_space<vmem>>, vector<16x256xbf16>
    tpu.vector_store %arg12[%c0_362, %c0_363], %578 {strides = array<i32>} : memref<400x256xbf16, #tpu.memory_space<vmem>>, vector<16x256xbf16>,
    %c33_i32_364 = arith.constant 33 : i32
    %580 = tpu.dynamic_rotate %573 by %c33_i32_364 dim 1 : vector<16x256xf32>, i32 -> vector<16x256xf32>
    %c1_365 = arith.constant 1 : index
    %c0_366 = arith.constant 0 : index
    %581 = vector.load %arg2[%c1_365, %c0_366] : memref<25x256xf32, #tpu.memory_space<vmem>>, vector<1x256xf32>
    %582 = vector.broadcast %581 : vector<1x256xf32> to vector<16x256xf32>
    %583 = arith.mulf %580, %582 : vector<16x256xf32>
    %584 = arith.truncf %583 : vector<16x256xf32> to vector<16x256xbf16>
    %c16_367 = arith.constant 16 : index
    %c0_368 = arith.constant 0 : index
    %585 = vector.load %arg12[%c16_367, %c0_368] : memref<400x256xbf16, #tpu.memory_space<vmem>>, vector<16x256xbf16>
    tpu.vector_store %arg12[%c16_367, %c0_368], %584 {strides = array<i32>} : memref<400x256xbf16, #tpu.memory_space<vmem>>, vector<16x256xbf16>,
    %c32_i32_369 = arith.constant 32 : i32
    %586 = tpu.dynamic_rotate %573 by %c32_i32_369 dim 1 : vector<16x256xf32>, i32 -> vector<16x256xf32>
    %c2_370 = arith.constant 2 : index
    %c0_371 = arith.constant 0 : index
    %587 = vector.load %arg2[%c2_370, %c0_371] : memref<25x256xf32, #tpu.memory_space<vmem>>, vector<1x256xf32>
    %588 = vector.broadcast %587 : vector<1x256xf32> to vector<16x256xf32>
    %589 = arith.mulf %586, %588 : vector<16x256xf32>
    %590 = arith.truncf %589 : vector<16x256xf32> to vector<16x256xbf16>
    %c32_372 = arith.constant 32 : index
    %c0_373 = arith.constant 0 : index
    %591 = vector.load %arg12[%c32_372, %c0_373] : memref<400x256xbf16, #tpu.memory_space<vmem>>, vector<16x256xbf16>
    tpu.vector_store %arg12[%c32_372, %c0_373], %590 {strides = array<i32>} : memref<400x256xbf16, #tpu.memory_space<vmem>>, vector<16x256xbf16>,
    %c31_i32_374 = arith.constant 31 : i32
    %592 = tpu.dynamic_rotate %573 by %c31_i32_374 dim 1 : vector<16x256xf32>, i32 -> vector<16x256xf32>
    %c3_375 = arith.constant 3 : index
    %c0_376 = arith.constant 0 : index
    %593 = vector.load %arg2[%c3_375, %c0_376] : memref<25x256xf32, #tpu.memory_space<vmem>>, vector<1x256xf32>
    %594 = vector.broadcast %593 : vector<1x256xf32> to vector<16x256xf32>
    %595 = arith.mulf %592, %594 : vector<16x256xf32>
    %596 = arith.truncf %595 : vector<16x256xf32> to vector<16x256xbf16>
    %c48_377 = arith.constant 48 : index
    %c0_378 = arith.constant 0 : index
    %597 = vector.load %arg12[%c48_377, %c0_378] : memref<400x256xbf16, #tpu.memory_space<vmem>>, vector<16x256xbf16>
    tpu.vector_store %arg12[%c48_377, %c0_378], %596 {strides = array<i32>} : memref<400x256xbf16, #tpu.memory_space<vmem>>, vector<16x256xbf16>,
    %c30_i32_379 = arith.constant 30 : i32
    %598 = tpu.dynamic_rotate %573 by %c30_i32_379 dim 1 : vector<16x256xf32>, i32 -> vector<16x256xf32>
    %c4_380 = arith.constant 4 : index
    %c0_381 = arith.constant 0 : index
    %599 = vector.load %arg2[%c4_380, %c0_381] : memref<25x256xf32, #tpu.memory_space<vmem>>, vector<1x256xf32>
    %600 = vector.broadcast %599 : vector<1x256xf32> to vector<16x256xf32>
    %601 = arith.mulf %598, %600 : vector<16x256xf32>
    %602 = arith.truncf %601 : vector<16x256xf32> to vector<16x256xbf16>
    %c64_382 = arith.constant 64 : index
    %c0_383 = arith.constant 0 : index
    %603 = vector.load %arg12[%c64_382, %c0_383] : memref<400x256xbf16, #tpu.memory_space<vmem>>, vector<16x256xbf16>
    tpu.vector_store %arg12[%c64_382, %c0_383], %602 {strides = array<i32>} : memref<400x256xbf16, #tpu.memory_space<vmem>>, vector<16x256xbf16>,
    %c18_i32_384 = arith.constant 18 : i32
    %604 = tpu.dynamic_rotate %573 by %c18_i32_384 dim 1 : vector<16x256xf32>, i32 -> vector<16x256xf32>
    %c5_385 = arith.constant 5 : index
    %c0_386 = arith.constant 0 : index
    %605 = vector.load %arg2[%c5_385, %c0_386] : memref<25x256xf32, #tpu.memory_space<vmem>>, vector<1x256xf32>
    %606 = vector.broadcast %605 : vector<1x256xf32> to vector<16x256xf32>
    %607 = arith.mulf %604, %606 : vector<16x256xf32>
    %608 = arith.truncf %607 : vector<16x256xf32> to vector<16x256xbf16>
    %c80_387 = arith.constant 80 : index
    %c0_388 = arith.constant 0 : index
    %609 = vector.load %arg12[%c80_387, %c0_388] : memref<400x256xbf16, #tpu.memory_space<vmem>>, vector<16x256xbf16>
    tpu.vector_store %arg12[%c80_387, %c0_388], %608 {strides = array<i32>} : memref<400x256xbf16, #tpu.memory_space<vmem>>, vector<16x256xbf16>,
    %c17_i32_389 = arith.constant 17 : i32
    %610 = tpu.dynamic_rotate %573 by %c17_i32_389 dim 1 : vector<16x256xf32>, i32 -> vector<16x256xf32>
    %c6_390 = arith.constant 6 : index
    %c0_391 = arith.constant 0 : index
    %611 = vector.load %arg2[%c6_390, %c0_391] : memref<25x256xf32, #tpu.memory_space<vmem>>, vector<1x256xf32>
    %612 = vector.broadcast %611 : vector<1x256xf32> to vector<16x256xf32>
    %613 = arith.mulf %610, %612 : vector<16x256xf32>
    %614 = arith.truncf %613 : vector<16x256xf32> to vector<16x256xbf16>
    %c96_392 = arith.constant 96 : index
    %c0_393 = arith.constant 0 : index
    %615 = vector.load %arg12[%c96_392, %c0_393] : memref<400x256xbf16, #tpu.memory_space<vmem>>, vector<16x256xbf16>
    tpu.vector_store %arg12[%c96_392, %c0_393], %614 {strides = array<i32>} : memref<400x256xbf16, #tpu.memory_space<vmem>>, vector<16x256xbf16>,
    %c16_i32_394 = arith.constant 16 : i32
    %616 = tpu.dynamic_rotate %573 by %c16_i32_394 dim 1 : vector<16x256xf32>, i32 -> vector<16x256xf32>
    %c7_395 = arith.constant 7 : index
    %c0_396 = arith.constant 0 : index
    %617 = vector.load %arg2[%c7_395, %c0_396] : memref<25x256xf32, #tpu.memory_space<vmem>>, vector<1x256xf32>
    %618 = vector.broadcast %617 : vector<1x256xf32> to vector<16x256xf32>
    %619 = arith.mulf %616, %618 : vector<16x256xf32>
    %620 = arith.truncf %619 : vector<16x256xf32> to vector<16x256xbf16>
    %c112_397 = arith.constant 112 : index
    %c0_398 = arith.constant 0 : index
    %621 = vector.load %arg12[%c112_397, %c0_398] : memref<400x256xbf16, #tpu.memory_space<vmem>>, vector<16x256xbf16>
    tpu.vector_store %arg12[%c112_397, %c0_398], %620 {strides = array<i32>} : memref<400x256xbf16, #tpu.memory_space<vmem>>, vector<16x256xbf16>,
    %c15_i32_399 = arith.constant 15 : i32
    %622 = tpu.dynamic_rotate %573 by %c15_i32_399 dim 1 : vector<16x256xf32>, i32 -> vector<16x256xf32>
    %c8_400 = arith.constant 8 : index
    %c0_401 = arith.constant 0 : index
    %623 = vector.load %arg2[%c8_400, %c0_401] : memref<25x256xf32, #tpu.memory_space<vmem>>, vector<1x256xf32>
    %624 = vector.broadcast %623 : vector<1x256xf32> to vector<16x256xf32>
    %625 = arith.mulf %622, %624 : vector<16x256xf32>
    %626 = arith.truncf %625 : vector<16x256xf32> to vector<16x256xbf16>
    %c128_402 = arith.constant 128 : index
    %c0_403 = arith.constant 0 : index
    %627 = vector.load %arg12[%c128_402, %c0_403] : memref<400x256xbf16, #tpu.memory_space<vmem>>, vector<16x256xbf16>
    tpu.vector_store %arg12[%c128_402, %c0_403], %626 {strides = array<i32>} : memref<400x256xbf16, #tpu.memory_space<vmem>>, vector<16x256xbf16>,
    %c14_i32_404 = arith.constant 14 : i32
    %628 = tpu.dynamic_rotate %573 by %c14_i32_404 dim 1 : vector<16x256xf32>, i32 -> vector<16x256xf32>
    %c9_405 = arith.constant 9 : index
    %c0_406 = arith.constant 0 : index
    %629 = vector.load %arg2[%c9_405, %c0_406] : memref<25x256xf32, #tpu.memory_space<vmem>>, vector<1x256xf32>
    %630 = vector.broadcast %629 : vector<1x256xf32> to vector<16x256xf32>
    %631 = arith.mulf %628, %630 : vector<16x256xf32>
    %632 = arith.truncf %631 : vector<16x256xf32> to vector<16x256xbf16>
    %c144_407 = arith.constant 144 : index
    %c0_408 = arith.constant 0 : index
    %633 = vector.load %arg12[%c144_407, %c0_408] : memref<400x256xbf16, #tpu.memory_space<vmem>>, vector<16x256xbf16>
    tpu.vector_store %arg12[%c144_407, %c0_408], %632 {strides = array<i32>} : memref<400x256xbf16, #tpu.memory_space<vmem>>, vector<16x256xbf16>,
    %c2_i32_409 = arith.constant 2 : i32
    %634 = tpu.dynamic_rotate %573 by %c2_i32_409 dim 1 : vector<16x256xf32>, i32 -> vector<16x256xf32>
    %c10_410 = arith.constant 10 : index
    %c0_411 = arith.constant 0 : index
    %635 = vector.load %arg2[%c10_410, %c0_411] : memref<25x256xf32, #tpu.memory_space<vmem>>, vector<1x256xf32>
    %636 = vector.broadcast %635 : vector<1x256xf32> to vector<16x256xf32>
    %637 = arith.mulf %634, %636 : vector<16x256xf32>
    %638 = arith.truncf %637 : vector<16x256xf32> to vector<16x256xbf16>
    %c160_412 = arith.constant 160 : index
    %c0_413 = arith.constant 0 : index
    %639 = vector.load %arg12[%c160_412, %c0_413] : memref<400x256xbf16, #tpu.memory_space<vmem>>, vector<16x256xbf16>
    tpu.vector_store %arg12[%c160_412, %c0_413], %638 {strides = array<i32>} : memref<400x256xbf16, #tpu.memory_space<vmem>>, vector<16x256xbf16>,
    %c1_i32_414 = arith.constant 1 : i32
    %640 = tpu.dynamic_rotate %573 by %c1_i32_414 dim 1 : vector<16x256xf32>, i32 -> vector<16x256xf32>
    %c11_415 = arith.constant 11 : index
    %c0_416 = arith.constant 0 : index
    %641 = vector.load %arg2[%c11_415, %c0_416] : memref<25x256xf32, #tpu.memory_space<vmem>>, vector<1x256xf32>
    %642 = vector.broadcast %641 : vector<1x256xf32> to vector<16x256xf32>
    %643 = arith.mulf %640, %642 : vector<16x256xf32>
    %644 = arith.truncf %643 : vector<16x256xf32> to vector<16x256xbf16>
    %c176_417 = arith.constant 176 : index
    %c0_418 = arith.constant 0 : index
    %645 = vector.load %arg12[%c176_417, %c0_418] : memref<400x256xbf16, #tpu.memory_space<vmem>>, vector<16x256xbf16>
    tpu.vector_store %arg12[%c176_417, %c0_418], %644 {strides = array<i32>} : memref<400x256xbf16, #tpu.memory_space<vmem>>, vector<16x256xbf16>,
    %646 = arith.truncf %573 : vector<16x256xf32> to vector<16x256xbf16>
    %c192_419 = arith.constant 192 : index
    %c0_420 = arith.constant 0 : index
    %647 = vector.load %arg12[%c192_419, %c0_420] : memref<400x256xbf16, #tpu.memory_space<vmem>>, vector<16x256xbf16>
    tpu.vector_store %arg12[%c192_419, %c0_420], %646 {strides = array<i32>} : memref<400x256xbf16, #tpu.memory_space<vmem>>, vector<16x256xbf16>,
    %c255_i32_421 = arith.constant 255 : i32
    %648 = tpu.dynamic_rotate %573 by %c255_i32_421 dim 1 : vector<16x256xf32>, i32 -> vector<16x256xf32>
    %c13_422 = arith.constant 13 : index
    %c0_423 = arith.constant 0 : index
    %649 = vector.load %arg2[%c13_422, %c0_423] : memref<25x256xf32, #tpu.memory_space<vmem>>, vector<1x256xf32>
    %650 = vector.broadcast %649 : vector<1x256xf32> to vector<16x256xf32>
    %651 = arith.mulf %648, %650 : vector<16x256xf32>
    %652 = arith.truncf %651 : vector<16x256xf32> to vector<16x256xbf16>
    %c208_424 = arith.constant 208 : index
    %c0_425 = arith.constant 0 : index
    %653 = vector.load %arg12[%c208_424, %c0_425] : memref<400x256xbf16, #tpu.memory_space<vmem>>, vector<16x256xbf16>
    tpu.vector_store %arg12[%c208_424, %c0_425], %652 {strides = array<i32>} : memref<400x256xbf16, #tpu.memory_space<vmem>>, vector<16x256xbf16>,
    %c254_i32_426 = arith.constant 254 : i32
    %654 = tpu.dynamic_rotate %573 by %c254_i32_426 dim 1 : vector<16x256xf32>, i32 -> vector<16x256xf32>
    %c14_427 = arith.constant 14 : index
    %c0_428 = arith.constant 0 : index
    %655 = vector.load %arg2[%c14_427, %c0_428] : memref<25x256xf32, #tpu.memory_space<vmem>>, vector<1x256xf32>
    %656 = vector.broadcast %655 : vector<1x256xf32> to vector<16x256xf32>
    %657 = arith.mulf %654, %656 : vector<16x256xf32>
    %658 = arith.truncf %657 : vector<16x256xf32> to vector<16x256xbf16>
    %c224_429 = arith.constant 224 : index
    %c0_430 = arith.constant 0 : index
    %659 = vector.load %arg12[%c224_429, %c0_430] : memref<400x256xbf16, #tpu.memory_space<vmem>>, vector<16x256xbf16>
    tpu.vector_store %arg12[%c224_429, %c0_430], %658 {strides = array<i32>} : memref<400x256xbf16, #tpu.memory_space<vmem>>, vector<16x256xbf16>,
    %c242_i32_431 = arith.constant 242 : i32
    %660 = tpu.dynamic_rotate %573 by %c242_i32_431 dim 1 : vector<16x256xf32>, i32 -> vector<16x256xf32>
    %c15_432 = arith.constant 15 : index
    %c0_433 = arith.constant 0 : index
    %661 = vector.load %arg2[%c15_432, %c0_433] : memref<25x256xf32, #tpu.memory_space<vmem>>, vector<1x256xf32>
    %662 = vector.broadcast %661 : vector<1x256xf32> to vector<16x256xf32>
    %663 = arith.mulf %660, %662 : vector<16x256xf32>
    %664 = arith.truncf %663 : vector<16x256xf32> to vector<16x256xbf16>
    %c240_434 = arith.constant 240 : index
    %c0_435 = arith.constant 0 : index
    %665 = vector.load %arg12[%c240_434, %c0_435] : memref<400x256xbf16, #tpu.memory_space<vmem>>, vector<16x256xbf16>
    tpu.vector_store %arg12[%c240_434, %c0_435], %664 {strides = array<i32>} : memref<400x256xbf16, #tpu.memory_space<vmem>>, vector<16x256xbf16>,
    %c241_i32_436 = arith.constant 241 : i32
    %666 = tpu.dynamic_rotate %573 by %c241_i32_436 dim 1 : vector<16x256xf32>, i32 -> vector<16x256xf32>
    %c16_437 = arith.constant 16 : index
    %c0_438 = arith.constant 0 : index
    %667 = vector.load %arg2[%c16_437, %c0_438] : memref<25x256xf32, #tpu.memory_space<vmem>>, vector<1x256xf32>
    %668 = vector.broadcast %667 : vector<1x256xf32> to vector<16x256xf32>
    %669 = arith.mulf %666, %668 : vector<16x256xf32>
    %670 = arith.truncf %669 : vector<16x256xf32> to vector<16x256xbf16>
    %c256_439 = arith.constant 256 : index
    %c0_440 = arith.constant 0 : index
    %671 = vector.load %arg12[%c256_439, %c0_440] : memref<400x256xbf16, #tpu.memory_space<vmem>>, vector<16x256xbf16>
    tpu.vector_store %arg12[%c256_439, %c0_440], %670 {strides = array<i32>} : memref<400x256xbf16, #tpu.memory_space<vmem>>, vector<16x256xbf16>,
    %c240_i32_441 = arith.constant 240 : i32
    %672 = tpu.dynamic_rotate %573 by %c240_i32_441 dim 1 : vector<16x256xf32>, i32 -> vector<16x256xf32>
    %c17_442 = arith.constant 17 : index
    %c0_443 = arith.constant 0 : index
    %673 = vector.load %arg2[%c17_442, %c0_443] : memref<25x256xf32, #tpu.memory_space<vmem>>, vector<1x256xf32>
    %674 = vector.broadcast %673 : vector<1x256xf32> to vector<16x256xf32>
    %675 = arith.mulf %672, %674 : vector<16x256xf32>
    %676 = arith.truncf %675 : vector<16x256xf32> to vector<16x256xbf16>
    %c272_444 = arith.constant 272 : index
    %c0_445 = arith.constant 0 : index
    %677 = vector.load %arg12[%c272_444, %c0_445] : memref<400x256xbf16, #tpu.memory_space<vmem>>, vector<16x256xbf16>
    tpu.vector_store %arg12[%c272_444, %c0_445], %676 {strides = array<i32>} : memref<400x256xbf16, #tpu.memory_space<vmem>>, vector<16x256xbf16>,
    %c239_i32_446 = arith.constant 239 : i32
    %678 = tpu.dynamic_rotate %573 by %c239_i32_446 dim 1 : vector<16x256xf32>, i32 -> vector<16x256xf32>
    %c18_447 = arith.constant 18 : index
    %c0_448 = arith.constant 0 : index
    %679 = vector.load %arg2[%c18_447, %c0_448] : memref<25x256xf32, #tpu.memory_space<vmem>>, vector<1x256xf32>
    %680 = vector.broadcast %679 : vector<1x256xf32> to vector<16x256xf32>
    %681 = arith.mulf %678, %680 : vector<16x256xf32>
    %682 = arith.truncf %681 : vector<16x256xf32> to vector<16x256xbf16>
    %c288_449 = arith.constant 288 : index
    %c0_450 = arith.constant 0 : index
    %683 = vector.load %arg12[%c288_449, %c0_450] : memref<400x256xbf16, #tpu.memory_space<vmem>>, vector<16x256xbf16>
    tpu.vector_store %arg12[%c288_449, %c0_450], %682 {strides = array<i32>} : memref<400x256xbf16, #tpu.memory_space<vmem>>, vector<16x256xbf16>,
    %c238_i32_451 = arith.constant 238 : i32
    %684 = tpu.dynamic_rotate %573 by %c238_i32_451 dim 1 : vector<16x256xf32>, i32 -> vector<16x256xf32>
    %c19_452 = arith.constant 19 : index
    %c0_453 = arith.constant 0 : index
    %685 = vector.load %arg2[%c19_452, %c0_453] : memref<25x256xf32, #tpu.memory_space<vmem>>, vector<1x256xf32>
    %686 = vector.broadcast %685 : vector<1x256xf32> to vector<16x256xf32>
    %687 = arith.mulf %684, %686 : vector<16x256xf32>
    %688 = arith.truncf %687 : vector<16x256xf32> to vector<16x256xbf16>
    %c304_454 = arith.constant 304 : index
    %c0_455 = arith.constant 0 : index
    %689 = vector.load %arg12[%c304_454, %c0_455] : memref<400x256xbf16, #tpu.memory_space<vmem>>, vector<16x256xbf16>
    tpu.vector_store %arg12[%c304_454, %c0_455], %688 {strides = array<i32>} : memref<400x256xbf16, #tpu.memory_space<vmem>>, vector<16x256xbf16>,
    %c226_i32_456 = arith.constant 226 : i32
    %690 = tpu.dynamic_rotate %573 by %c226_i32_456 dim 1 : vector<16x256xf32>, i32 -> vector<16x256xf32>
    %c20_457 = arith.constant 20 : index
    %c0_458 = arith.constant 0 : index
    %691 = vector.load %arg2[%c20_457, %c0_458] : memref<25x256xf32, #tpu.memory_space<vmem>>, vector<1x256xf32>
    %692 = vector.broadcast %691 : vector<1x256xf32> to vector<16x256xf32>
    %693 = arith.mulf %690, %692 : vector<16x256xf32>
    %694 = arith.truncf %693 : vector<16x256xf32> to vector<16x256xbf16>
    %c320_459 = arith.constant 320 : index
    %c0_460 = arith.constant 0 : index
    %695 = vector.load %arg12[%c320_459, %c0_460] : memref<400x256xbf16, #tpu.memory_space<vmem>>, vector<16x256xbf16>
    tpu.vector_store %arg12[%c320_459, %c0_460], %694 {strides = array<i32>} : memref<400x256xbf16, #tpu.memory_space<vmem>>, vector<16x256xbf16>,
    %c225_i32_461 = arith.constant 225 : i32
    %696 = tpu.dynamic_rotate %573 by %c225_i32_461 dim 1 : vector<16x256xf32>, i32 -> vector<16x256xf32>
    %c21_462 = arith.constant 21 : index
    %c0_463 = arith.constant 0 : index
    %697 = vector.load %arg2[%c21_462, %c0_463] : memref<25x256xf32, #tpu.memory_space<vmem>>, vector<1x256xf32>
    %698 = vector.broadcast %697 : vector<1x256xf32> to vector<16x256xf32>
    %699 = arith.mulf %696, %698 : vector<16x256xf32>
    %700 = arith.truncf %699 : vector<16x256xf32> to vector<16x256xbf16>
    %c336_464 = arith.constant 336 : index
    %c0_465 = arith.constant 0 : index
    %701 = vector.load %arg12[%c336_464, %c0_465] : memref<400x256xbf16, #tpu.memory_space<vmem>>, vector<16x256xbf16>
    tpu.vector_store %arg12[%c336_464, %c0_465], %700 {strides = array<i32>} : memref<400x256xbf16, #tpu.memory_space<vmem>>, vector<16x256xbf16>,
    %c224_i32_466 = arith.constant 224 : i32
    %702 = tpu.dynamic_rotate %573 by %c224_i32_466 dim 1 : vector<16x256xf32>, i32 -> vector<16x256xf32>
    %c22_467 = arith.constant 22 : index
    %c0_468 = arith.constant 0 : index
    %703 = vector.load %arg2[%c22_467, %c0_468] : memref<25x256xf32, #tpu.memory_space<vmem>>, vector<1x256xf32>
    %704 = vector.broadcast %703 : vector<1x256xf32> to vector<16x256xf32>
    %705 = arith.mulf %702, %704 : vector<16x256xf32>
    %706 = arith.truncf %705 : vector<16x256xf32> to vector<16x256xbf16>
    %c352_469 = arith.constant 352 : index
    %c0_470 = arith.constant 0 : index
    %707 = vector.load %arg12[%c352_469, %c0_470] : memref<400x256xbf16, #tpu.memory_space<vmem>>, vector<16x256xbf16>
    tpu.vector_store %arg12[%c352_469, %c0_470], %706 {strides = array<i32>} : memref<400x256xbf16, #tpu.memory_space<vmem>>, vector<16x256xbf16>,
    %c223_i32_471 = arith.constant 223 : i32
    %708 = tpu.dynamic_rotate %573 by %c223_i32_471 dim 1 : vector<16x256xf32>, i32 -> vector<16x256xf32>
    %c23_472 = arith.constant 23 : index
    %c0_473 = arith.constant 0 : index
    %709 = vector.load %arg2[%c23_472, %c0_473] : memref<25x256xf32, #tpu.memory_space<vmem>>, vector<1x256xf32>
    %710 = vector.broadcast %709 : vector<1x256xf32> to vector<16x256xf32>
    %711 = arith.mulf %708, %710 : vector<16x256xf32>
    %712 = arith.truncf %711 : vector<16x256xf32> to vector<16x256xbf16>
    %c368_474 = arith.constant 368 : index
    %c0_475 = arith.constant 0 : index
    %713 = vector.load %arg12[%c368_474, %c0_475] : memref<400x256xbf16, #tpu.memory_space<vmem>>, vector<16x256xbf16>
    tpu.vector_store %arg12[%c368_474, %c0_475], %712 {strides = array<i32>} : memref<400x256xbf16, #tpu.memory_space<vmem>>, vector<16x256xbf16>,
    %c222_i32_476 = arith.constant 222 : i32
    %714 = tpu.dynamic_rotate %573 by %c222_i32_476 dim 1 : vector<16x256xf32>, i32 -> vector<16x256xf32>
    %c24_477 = arith.constant 24 : index
    %c0_478 = arith.constant 0 : index
    %715 = vector.load %arg2[%c24_477, %c0_478] : memref<25x256xf32, #tpu.memory_space<vmem>>, vector<1x256xf32>
    %716 = vector.broadcast %715 : vector<1x256xf32> to vector<16x256xf32>
    %717 = arith.mulf %714, %716 : vector<16x256xf32>
    %718 = arith.truncf %717 : vector<16x256xf32> to vector<16x256xbf16>
    %c384_479 = arith.constant 384 : index
    %c0_480 = arith.constant 0 : index
    %719 = vector.load %arg12[%c384_479, %c0_480] : memref<400x256xbf16, #tpu.memory_space<vmem>>, vector<16x256xbf16>
    tpu.vector_store %arg12[%c384_479, %c0_480], %718 {strides = array<i32>} : memref<400x256xbf16, #tpu.memory_space<vmem>>, vector<16x256xbf16>,
    %c0_481 = arith.constant 0 : index
    %c0_482 = arith.constant 0 : index
    %720 = vector.load %arg9[%c0_481, %c0_482] : memref<32x400xbf16, #tpu.memory_space<vmem>>, vector<32x400xbf16>
    %c0_483 = arith.constant 0 : index
    %c0_484 = arith.constant 0 : index
    %721 = vector.load %arg12[%c0_483, %c0_484] : memref<400x256xbf16, #tpu.memory_space<vmem>>, vector<400x256xbf16>
    %cst_485 = arith.constant dense<0.000000e+00> : vector<32x256xf32>
    %722 = tpu.matmul %720, %721, %cst_485 {dimension_numbers = #tpu.dot_dimension_numbers<[1], [0], [0], [1], [0, 0, 1, 1], [], []>} : vector<32x400xbf16>, vector<400x256xbf16>, vector<32x256xf32> -> vector<32x256xf32>
    %c0_486 = arith.constant 0 : index
    %c0_487 = arith.constant 0 : index
    %723 = vector.load %arg10[%c0_486, %c0_487] : memref<32x1xf32, #tpu.memory_space<vmem>>, vector<32x1xf32>
    %724 = vector.broadcast %723 : vector<32x1xf32> to vector<32x256xf32>
    %725 = arith.addf %722, %724 : vector<32x256xf32>
    %cst_488 = arith.constant 5.000000e-01 : f32
    %726 = vector.broadcast %cst_488 : f32 to vector<32x256xf32>
    %727 = arith.mulf %726, %725 : vector<32x256xf32>
    %cst_489 = arith.constant 0.707106769 : f32
    %728 = vector.broadcast %cst_489 : f32 to vector<32x256xf32>
    %729 = arith.mulf %725, %728 : vector<32x256xf32>
    %730 = math.absf %729 : vector<32x256xf32>
    %cst_490 = arith.constant 0.327591091 : f32
    %731 = vector.broadcast %cst_490 : f32 to vector<32x256xf32>
    %732 = arith.mulf %731, %730 : vector<32x256xf32>
    %cst_491 = arith.constant 1.000000e+00 : f32
    %733 = vector.broadcast %cst_491 : f32 to vector<32x256xf32>
    %734 = arith.addf %733, %732 : vector<32x256xf32>
    %735 = tpu.reciprocal %734 {approx = true} : vector<32x256xf32> -> vector<32x256xf32>
    %cst_492 = arith.constant 1.06140542 : f32
    %736 = vector.broadcast %cst_492 : f32 to vector<32x256xf32>
    %737 = arith.mulf %735, %736 : vector<32x256xf32>
    %cst_493 = arith.constant -1.45315206 : f32
    %738 = vector.broadcast %cst_493 : f32 to vector<32x256xf32>
    %739 = arith.addf %738, %737 : vector<32x256xf32>
    %740 = arith.mulf %735, %739 : vector<32x256xf32>
    %cst_494 = arith.constant 1.42141378 : f32
    %741 = vector.broadcast %cst_494 : f32 to vector<32x256xf32>
    %742 = arith.addf %741, %740 : vector<32x256xf32>
    %743 = arith.mulf %735, %742 : vector<32x256xf32>
    %cst_495 = arith.constant -0.284496725 : f32
    %744 = vector.broadcast %cst_495 : f32 to vector<32x256xf32>
    %745 = arith.addf %744, %743 : vector<32x256xf32>
    %746 = arith.mulf %735, %745 : vector<32x256xf32>
    %cst_496 = arith.constant 0.254829586 : f32
    %747 = vector.broadcast %cst_496 : f32 to vector<32x256xf32>
    %748 = arith.addf %747, %746 : vector<32x256xf32>
    %749 = arith.mulf %735, %748 : vector<32x256xf32>
    %cst_497 = arith.constant 0.000000e+00 : f32
    %750 = vector.broadcast %cst_497 : f32 to vector<32x256xf32>
    %751 = arith.subf %750, %730 : vector<32x256xf32>
    %752 = arith.mulf %751, %730 : vector<32x256xf32>
    %753 = math.exp %752 : vector<32x256xf32>
    %754 = arith.mulf %749, %753 : vector<32x256xf32>
    %cst_498 = arith.constant 1.000000e+00 : f32
    %755 = vector.broadcast %cst_498 : f32 to vector<32x256xf32>
    %756 = arith.subf %755, %754 : vector<32x256xf32>
    %cst_499 = arith.constant 0.000000e+00 : f32
    %757 = vector.broadcast %cst_499 : f32 to vector<32x256xf32>
    %758 = arith.cmpf olt, %729, %757 : vector<32x256xf32>
    %cst_500 = arith.constant 0.000000e+00 : f32
    %759 = vector.broadcast %cst_500 : f32 to vector<32x256xf32>
    %760 = arith.subf %759, %756 : vector<32x256xf32>
    %761 = arith.select %758, %760, %756 : vector<32x256xi1>, vector<32x256xf32>
    %cst_501 = arith.constant 1.000000e+00 : f32
    %762 = vector.broadcast %cst_501 : f32 to vector<32x256xf32>
    %763 = arith.addf %762, %761 : vector<32x256xf32>
    %764 = arith.mulf %727, %763 : vector<32x256xf32>
    %c0_502 = arith.constant 0 : index
    %c0_503 = arith.constant 0 : index
    %765 = vector.load %arg11[%c0_502, %c0_503] : memref<32x256xf32, #tpu.memory_space<vmem>>, vector<32x256xf32>
    tpu.vector_store %arg11[%c0_502, %c0_503], %764 {strides = array<i32>} : memref<32x256xf32, #tpu.memory_space<vmem>>, vector<32x256xf32>,
    return
  }
  func.func @transform_0(%arg0: i32) -> (i32, i32) {
    %c0_i32 = arith.constant 0 : i32
    %c0_i32_0 = arith.constant 0 : i32
    return %c0_i32, %arg0 : i32, i32
  }
  func.func @transform_1(%arg0: i32) -> (i32, i32) {
    %c0_i32 = arith.constant 0 : i32
    %c0_i32_0 = arith.constant 0 : i32
    %c0_i32_1 = arith.constant 0 : i32
    return %c0_i32, %c0_i32_0 : i32, i32
  }
  func.func @transform_2(%arg0: i32) -> (i32, i32) {
    %c0_i32 = arith.constant 0 : i32
    %c0_i32_0 = arith.constant 0 : i32
    %c0_i32_1 = arith.constant 0 : i32
    return %c0_i32, %c0_i32_0 : i32, i32
  }
  func.func @transform_3(%arg0: i32) -> (i32, i32) {
    %c0_i32 = arith.constant 0 : i32
    %c0_i32_0 = arith.constant 0 : i32
    %c0_i32_1 = arith.constant 0 : i32
    return %c0_i32, %c0_i32_0 : i32, i32
  }
  func.func @transform_4(%arg0: i32) -> (i32, i32) {
    %c0_i32 = arith.constant 0 : i32
    %c0_i32_0 = arith.constant 0 : i32
    %c0_i32_1 = arith.constant 0 : i32
    return %c0_i32, %c0_i32_0 : i32, i32
  }
  func.func @transform_5(%arg0: i32) -> (i32, i32) {
    %c0_i32 = arith.constant 0 : i32
    %c0_i32_0 = arith.constant 0 : i32
    %c0_i32_1 = arith.constant 0 : i32
    return %c0_i32, %c0_i32_0 : i32, i32
  }
  func.func @transform_6(%arg0: i32) -> (i32, i32) {
    %c0_i32 = arith.constant 0 : i32
    %c0_i32_0 = arith.constant 0 : i32
    %c0_i32_1 = arith.constant 0 : i32
    return %c0_i32, %c0_i32_0 : i32, i32
  }
  func.func @transform_7(%arg0: i32) -> (i32, i32) {
    %c0_i32 = arith.constant 0 : i32
    %c0_i32_0 = arith.constant 0 : i32
    %c0_i32_1 = arith.constant 0 : i32
    return %c0_i32, %c0_i32_0 : i32, i32
  }
  func.func @transform_8(%arg0: i32) -> (i32, i32) {
    %c0_i32 = arith.constant 0 : i32
    %c0_i32_0 = arith.constant 0 : i32
    %c0_i32_1 = arith.constant 0 : i32
    return %c0_i32, %c0_i32_0 : i32, i32
  }
  func.func @transform_9(%arg0: i32) -> (i32, i32) {
    %c0_i32 = arith.constant 0 : i32
    %c0_i32_0 = arith.constant 0 : i32
    %c0_i32_1 = arith.constant 0 : i32
    return %c0_i32, %c0_i32_0 : i32, i32
  }
  func.func @transform_10(%arg0: i32) -> (i32, i32) {
    %c0_i32 = arith.constant 0 : i32
    %c0_i32_0 = arith.constant 0 : i32
    return %c0_i32, %arg0 : i32, i32
  }
}

</mosaic_0001>

<bundles_post_ra>
// kernel: tpu_custom_call.1
= control target key start
LH: loop header
LB: loop body
LE: loop exit
PB: predicated region body
PF: predicated region fallthrough
CT: control target
= control target key end

     0   :  { %s11213_s0 = inlined_call_operand.vmem [shape: f32[16,512], index: 0, kind: input, shape index: {}]   ;;  %s11214_s1 = inlined_call_operand.hbm [shape: f32[25,256], index: 1, kind: input, shape index: {}]   ;;  %s11215_s2 = inlined_call_operand.hbm [shape: bf16[16,400], index: 2, kind: input, shape index: {}]   ;;  %s11216_s3 = inlined_call_operand.vmem [shape: f32[16,1], index: 3, kind: input, shape index: {}]   ;;  %s11217_s4 = inlined_call_operand.hbm [shape: bf16[16,400], index: 4, kind: input, shape index: {}]   ;;  %s11218_s5 = inlined_call_operand.vmem [shape: f32[16,1], index: 5, kind: input, shape index: {}]   ;;  %s11219_s6 = inlined_call_operand.hbm [shape: bf16[16,400], index: 6, kind: input, shape index: {}]   ;;  %s11220_s7 = inlined_call_operand.vmem [shape: f32[16,1], index: 7, kind: input, shape index: {}]   ;;  %s11221_s8 = inlined_call_operand.hbm [shape: bf16[32,400], index: 8, kind: input, shape index: {}]   ;;  %s11222_s9 = inlined_call_operand.vmem [shape: f32[32,1], index: 9, kind: input, shape index: {}]   ;;  %s11223_s10 = inlined_call_operand.hbm [shape: f32[32,512], index: 10, kind: output, shape index: {}]  }
   0x1   :  { %11329 = sst [smem:[#allocation38_spill]] %s11213_s0 }
   0x2   :  { %11330 = sst [smem:[#allocation39_spill]] %s11214_s1 }
   0x3   :  { %11331 = sst [smem:[#allocation40_spill]] %s11215_s2 }
   0x4   :  { %11332 = sst [smem:[#allocation41_spill]] %s11216_s3 }
   0x5   :  { %11333 = sst [smem:[#allocation42_spill]] %s11217_s4 }
   0x6   :  { %11334 = sst [smem:[#allocation43_spill]] %s11219_s6 }
   0x7   :  { %11335 = sst [smem:[#allocation44_spill]] %s11221_s8 }
   0x8   :  { %11336 = sst [smem:[#allocation45_spill]] %s11223_s10 }
   0x9   :  { %15 = vsyncpa [#allocation5], 0 }
   0xa   :  { %16 = vsyncpa [#allocation8], 0 }
   0xb   :  { %17 = vsyncpa [#allocation11], 0 }
   0xc   :  { %18 = vsyncpa [#allocation6], 0 }
   0xd   :  { %20 = vsyncpa [#allocation6 + $0x1], 0  ;;  %s8392_s13 = smov 0   ;;  %s8394_s14 = smov 0  }
   0xe   :  { %s8396_s15 = smov 0   ;;  %s8398_s16 = smov 0  }
   0xf LB: > { %11337 = sst [smem:[#allocation18_spill]] %s8288_s13  ;;  %s8413_s17 = sadd.s32 4294967295, %s8300_s16   ;;  %s8300_s16 = sphi %s8398_s16, %s11606_s16   ;;  %s8296_s15 = sphi %s8396_s15, %s11609_s15   ;;  %s8292_s14 = sphi %s8394_s14, %s11608_s14   ;;  %s8288_s13 = sphi %s8392_s13, %s11607_s13  }
  0x10   : > { %11338 = sst [smem:[#allocation19_spill]] %s8292_s14  ;;  %s7016_s18 = sadd.s32 4294967294, %s8300_s16  }
  0x11   : > { %11339 = sst [smem:[#allocation20_spill]] %s8296_s15  ;;  %s8417_s19 = sadd.s32 1, %s8300_s16  }
  0x12   : > { %11340 = sst [smem:[#allocation21_spill]] %s8300_s16  ;;  %s33_s20 = sadd.s32 1, %s8296_s15 }
  0x13   : > { %11341 = sst [smem:[#allocation22_spill]] %s8413_s17  ;;  %s30_s21 = ssub.s32 %s8300_s16, %s8417_s19 }
  0x14   : > { %11342 = sst [smem:[#allocation23_spill]] %s8417_s19  ;;  %p40_p0 = scmp.ne.s32.totalorder %s8296_s15, %s8292_s14 }
  0x15   : > { %p31_p1 = scmp.eq.s32.totalorder %s30_s21, 0  ;;  %p41_p2 = scmp.eq.s32.totalorder %s8300_s16, 0 }
  0x16   : > { %p259_p3 = scmp.eq.s32.totalorder %s8413_s17, 1  ;;  %p264_p4 = scmp.ne.s32.totalorder %s8292_s14, %s8288_s13 }
  0x17   : > { %s8429_s22 = scalar_select %p31_p1, %s8296_s15, %s33_s20  }
  0x18   : > { %p8431_p5 = por %p41_p2, %p40_p0  ;;  %p8435_p6 = por %p259_p3, %p40_p0 }
  0x19   : > { %11343 = sst [smem:[#allocation24_spill]] %s8429_s22  ;;  %p265_p7 = scmp.eq.s32.totalorder %s7016_s18, 1 }
  0x1a   : > { %s11345_s24 = scalar_select %p8435_p6, 1, 0 }
  0x1b   : > { %p7017_p8 = scmp.ge.s32.totalorder %s8300_s16, 1  ;;  %p272_p9 = scmp.lt.s32.totalorder %s8300_s16, 3 }
  0x1c   : > { %11346 = sst [smem:[#allocation25_spill]] %s11345_s24  ;;  %p8441_p10 = por %p265_p7, %p264_p4 }
  0x1d   : > { %p11226_p11 = scmp.eq.s32.totalorder %s8413_s17, 0  ;;  %p8446_p12 = pnand %p7017_p8, %p272_p9 }
  0x1e   : > { %s11347_s25 = scalar_select %p8441_p10, 1, 0 }
  0x1f   : > { %p7889_p13 = pneg %p8446_p12  ;;  %s8302_s27 = smov [#allocation7]  }
  0x20   : > { %11348 = sst [smem:[#allocation26_spill]] %s11347_s25  ;;  %s297_s28 = sshll.u32 %s8302_s27, 4  ;;  %s298_s28 = int_to_ptr.vmem [resolvable:$true] %s297_s28 }
  0x21   : > { %p8454_p0 = pnand %p11226_p11, %p7889_p13  ;;  %s8303_s30 = smov [#allocation10]  }
  0x22   : > { %s329_s11 = sshll.u32 %s8303_s30, 4  ;;  %s8304_s12 = smov [#allocation4]   ;;  %s330_s11 = int_to_ptr.vmem [resolvable:$true] %s329_s11 }
  0x23   : > { %s284_s18 = sshll.u32 %s8304_s12, 4  ;;  %p8460_p1 = pneg %p8454_p0  ;;  %s285_s18 = int_to_ptr.vmem [resolvable:$true] %s284_s18 }
  0x24   : > { %s8109_s21 = scalar_lea.vmem %s298_s28, 512  ;;  %p8117_p7 = scmp.lt.s32.totalorder %s298_s28, %s298_s28 }
  0x25   : > { %p8110_p2 = scmp.ne.s32.totalorder %s298_s28, %s8109_s21  ;;  %p8118_p8 = scmp.lt.s32.totalorder %s8109_s21, %s8109_s21 }
  0x27   : > { %p8112_p3 = pnand %p8110_p2, %p8460_p1  ;;  %p8119_p9 = por %p8118_p8, %p8117_p7 }
  0x29   : > { %p8113_p4 = pneg %p8112_p3 }
  0x2b   : > { %p8120_p13 = pnand %p8119_p9, %p8113_p4 }
  0x2d   : > { %8123 = shalt.err (!%p8120_p13)
}
  0x2e   : > { %s8305_s27 = smov 256   ;;  %s8306_s30 = smov 16  }
  0x2f   : > { %s11352_s2 = sld [smem:[#allocation40_spill]]  ;;  %s8135_s19 = scalar_lea.vmem %s330_s11, 512 }
  0x30   : > { %p8136_p2 = scmp.ne.s32.totalorder %s330_s11, %s8135_s19  ;;  %p8143_p7 = scmp.lt.s32.totalorder %s330_s11, %s330_s11 }
  0x31   : > { %p8144_p4 = scmp.lt.s32.totalorder %s8135_s19, %s8135_s19 }
  0x32   : > { %p8138_p3 = pnand %p8136_p2, %p8460_p1 }
  0x33   : > { %p8145_p8 = por %p8144_p4, %p8143_p7 }
  0x34   : > { %p8139_p11 = pneg %p8138_p3 }
  0x35   : > { %7895 = dma.hbm_to_vmem [thread:$0]  (!%p8454_p0), %s11352_s2, 512, %s298_s28, [#allocation8], %s8305_s27, %s8305_s27, %s8306_s30  }
  0x36   : > { %p8146_p9 = pnand %p8145_p8, %p8139_p11 }
  0x38   : > { %8149 = shalt.err (!%p8146_p9)
}
  0x39   : > { %s11353_s6 = sld [smem:[#allocation43_spill]]  ;;  %s8161_s22 = scalar_lea.vmem %s285_s18, 1024 }
  0x3a   : > { %p8162_p13 = scmp.ne.s32.totalorder %s285_s18, %s8161_s22  ;;  %p8169_p10 = scmp.lt.s32.totalorder %s285_s18, %s285_s18 }
  0x3b   : > { %p8170_p7 = scmp.lt.s32.totalorder %s8161_s22, %s8161_s22 }
  0x3c   : > { %p8164_p2 = pnand %p8162_p13, %p8460_p1 }
  0x3d   : > { %p8171_p11 = por %p8170_p7, %p8169_p10 }
  0x3e   : > { %p8165_p3 = pneg %p8164_p2 }
  0x3f   : > { %7901 = dma.hbm_to_vmem [thread:$0]  (!%p8454_p0), %s11353_s6, 512, %s330_s11, [#allocation11], %s8305_s27, %s8305_s27, %s8306_s30  }
  0x40   : > { %p8172_p4 = pnand %p8171_p11, %p8165_p3 }
  0x42   : > { %8175 = shalt.err (!%p8172_p4)
}
  0x43   : > { %s11354_s1 = sld [smem:[#allocation39_spill]]  ;;  %s8307_s28 = smov [#allocation9]  }
  0x44   : > { %s313_s11 = sshll.u32 %s8307_s28, 4  ;;  %s8308_s12 = smov [#allocation12]   ;;  %s314_s11 = int_to_ptr.vmem [resolvable:$true] %s313_s11 }
  0x45   : > { %s345_s21 = sshll.u32 %s8308_s12, 4  ;;  %s8187_s2 = scalar_lea.vmem %s314_s11, 512  ;;  %s346_s21 = int_to_ptr.vmem [resolvable:$true] %s345_s21 }
  0x46   : > { %p8188_p8 = scmp.ne.s32.totalorder %s314_s11, %s8187_s2  ;;  %p8195_p13 = scmp.lt.s32.totalorder %s314_s11, %s314_s11 }
  0x47   : > { %p8196_p2 = scmp.lt.s32.totalorder %s8187_s2, %s8187_s2 }
  0x48   : > { %p8190_p10 = pnand %p8188_p8, %p8460_p1 }
  0x49   : > { %7892 = dma.hbm_to_vmem [thread:$0]  (!%p8454_p0), %s11354_s1, 1024, %s285_s18, [#allocation5], %s8305_s27, %s8305_s27, %s8306_s30  }
  0x4a   : > { %p8191_p9 = pneg %p8190_p10  ;;  %p8197_p3 = por %p8196_p2, %p8195_p13 }
  0x4c   : > { %p8198_p7 = pnand %p8197_p3, %p8191_p9 }
  0x4e   : > { %8201 = shalt.err (!%p8198_p7)
}
  0x4f   : > { %s11355_s4 = sld [smem:[#allocation42_spill]]  ;;  %s8213_s19 = scalar_lea.vmem %s346_s21, 1024 }
  0x50   : > { %p8214_p11 = scmp.ne.s32.totalorder %s346_s21, %s8213_s19  ;;  %p8221_p10 = scmp.lt.s32.totalorder %s346_s21, %s346_s21 }
  0x51   : > { %p8222_p13 = scmp.lt.s32.totalorder %s8213_s19, %s8213_s19 }
  0x52   : > { %p8216_p4 = pnand %p8214_p11, %p8460_p1 }
  0x53   : > { %p8223_p9 = por %p8222_p13, %p8221_p10 }
  0x54   : > { %p8217_p8 = pneg %p8216_p4 }
  0x55   : > { %7898 = dma.hbm_to_vmem [thread:$0]  (!%p8454_p0), %s11355_s4, 512, %s314_s11, [#allocation8], %s8305_s27, %s8305_s27, %s8306_s30  }
  0x56   : > { %p8224_p2 = pnand %p8223_p9, %p8217_p8 }
  0x58   : > { %8227 = shalt.err (!%p8224_p2)
}
  0x59   : > { %s11356_s8 = sld [smem:[#allocation44_spill]]  ;;  %p7023_p3 = scmp.ge.s32.totalorder %s8300_s16, 2 }
  0x5b   : > { %358 = sbr.rel (%p7023_p3) target bundleno = 108 (0x6c), region = 52 }
  0x5f   : > { %7904 = dma.hbm_to_vmem [thread:$0]  (!%p8454_p0), %s11356_s8, 1024, %s346_s21, [#allocation11], %s8305_s27, %s8305_s27, %s8306_s30  }
  0x60   : > { %361 = sbr.rel (!%p8431_p5) target bundleno = 108 (0x6c), region = 56  ;;  %s363_s20 = sand.u32 (%p8431_p5), 1, %s8296_s15  }
  0x61   : > { %s7465_s28 = sshll.u32 (%p8431_p5), %s8300_s16, 4  ;;  %s7024_s29 = sshll.u32 (%p8431_p5), %s363_s20, 5 }
  0x62   : > { %s11357_s0 = sld [smem:[#allocation38_spill]] (%p8431_p5)  ;;  %s365_s27 = scalar_lea.vmem (%p8431_p5), [#allocation3], %s7024_s29 }
  0x68   : > { %s368_s18 = scalar_lea.vmem %s11357_s0, %s7465_s28 }
  0x69   : > { %v381_v0 = vld [vmem:[%s368_s18] sm:$0xff]  ;;  %v383_v1 = vld [vmem:[%s368_s18 + $0x8] sm:$0xff] }
  0x6a   : > { %v385_v2 = vld [vmem:[%s368_s18 + $0x20] sm:$0xff]  ;;  %382 = vst [vmem:[%s365_s27] sm:$0xff] %v381_v0  ;;  %384 = vst [vmem:[%s365_s27 + $0x8] sm:$0xff] %v383_v1  ;;  %v387_v3 = vld [vmem:[%s368_s18 + $0x28] sm:$0xff] }
  0x6b   : > { %386 = vst [vmem:[%s365_s27 + $0x10] sm:$0xff] %v385_v2  ;;  %388 = vst [vmem:[%s365_s27 + $0x18] sm:$0xff] %v387_v3 }
  0x6c PF: > { %397 = sbr.rel (%p8446_p12) target bundleno = 2404 (0x964), region = 79 }
  0x71   : > { %s8527_s23 = sand.u32 1, %s8292_s14   ;;  %p11359_p5 = scmp.eq.s32.totalorder %s8413_s17, 0 }
  0x72   : > { %11358 = sst [smem:[#allocation27_spill]] %s8527_s23  ;;  %s7028_s30 = sshll.u32 %s8527_s23, 5 }
  0x73   : > { %s402_s21 = scalar_lea.vmem [#allocation3], %s7028_s30 }
  0x74   : > { %8271 = dma.done.wait (%p11359_p5), [#allocation5], 1024   ;;  %p11360_p0 = pmov %p11359_p5 }
  0x76   : > { %8273 = vsyncadd (%p11360_p0), [#allocation5], 4294966272  ;;  %p11361_p1 = pmov %p11360_p0 }
  0x77   : > { %p11362_p7 = pmov %p11360_p0 }
  0x78   : > { %8275 = dma.done.wait (%p11361_p1), [#allocation8], 1024  }
  0x79   : > { %8277 = vsyncadd (%p11362_p7), [#allocation8], 4294966272  ;;  %p11363_p12 = pmov %p11360_p0 }
  0x7a   : > { %p11364_p11 = pmov %p11360_p0 }
  0x7b   : > { %8279 = dma.done.wait (%p11363_p12), [#allocation11], 1536  }
  0x7c   : > { %8281 = vsyncadd (%p11364_p11), [#allocation11], 4294965760  ;;  %v8542_v4 = vld [vmem:[%s402_s21 + $0x8] sm:$0xff]  ;;  %v8544_v5 = vld [vmem:[%s402_s21] sm:$0xff]  ;;  %s11283_s26 = smov 16   ;;  %s11281_s22 = smov 17   ;;  %v472_v8 = vlaneseq }
  0x7d   : > { %777 = vrot.lane.b32.xlu1 %v8542_v4, %s11283_s26  ;;  %773 = vrot.lane.b32.xlu0 %v8544_v5, %s11283_s26  ;;  %v8550_v6 = vld [vmem:[%s402_s21 + $0x18] sm:$0xff]  ;;  %v8552_v7 = vld [vmem:[%s402_s21 + $0x10] sm:$0xff]  ;;  %s11279_s19 = smov 18   ;;  %s11277_s2 = smov 30   ;;  %vm1870_vm9 = vcmask 130048  }
  0x7e   : > { %s11275_s25 = smov 31   ;;  %s11273_s20 = smov 32   ;;  %v482_v9 = vshrl.u32 %v472_v8, 7  ;;  %v8662_v10 = vand.u32 127, %v472_v8 }
  0x7f   : > { %s11271_s28 = smov 33   ;;  %s11269_s29 = smov 34   ;;  %v787_v13 = vld [vmem:[#allocation4 + $0x7] ss:$8 sm:$0x3] }
  0x80   : > { %s11267_s11 = smov 95   ;;  %s11254_s12 = smov 114   ;;  %v8664_v11 = vsub.s32 1, %v482_v9  ;;  %v8670_v12 = vsub.s32 0, %v482_v9  ;;  %vm781_vm0 = vcmp.lt.s32.totalorder %v8662_v10, 16  ;;  %vm737_vm1 = vcmp.lt.s32.totalorder %v8662_v10, 17 }
  0x81   : > { %779 = vrot.lane.b32.xlu1 %v8550_v6, %s11283_s26  ;;  %775 = vrot.lane.b32.xlu0 %v8552_v7, %s11283_s26  ;;  %s11252_s18 = smov 96   ;;  %s11250_s27 = smov 126   ;;  %v743_v28 = vld [vmem:[#allocation4 + $0x6] ss:$8 sm:$0x3]  ;;  %vm693_vm2 = vcmp.lt.s32.totalorder %v8662_v10, 18 }
  0x82   : > { %s11228_s30 = smov 97   ;;  %s11230_s21 = smov 127   ;;  %v796_v16 = vrot.slane %v787_v13, %v8664_v11  ;;  %v792_v18 = vrot.slane %v787_v13, %v8670_v12  ;;  %v748_v33 = vrot.slane %v743_v28, %v8670_v12  ;;  %v752_v34 = vrot.slane %v743_v28, %v8664_v11  ;;  %v699_v45 = vld [vmem:[#allocation4 + $0x5] ss:$8 sm:$0x3] }
  0x83   : > { %v704_v50 = vrot.slane %v699_v45, %v8670_v12  ;;  %v708_v51 = vrot.slane %v699_v45, %v8664_v11  ;;  %v655_v62 = vld [vmem:[#allocation4 + $0x4] ss:$8 sm:$0x3]  ;;  %vm649_vm3 = vcmp.lt.s32.totalorder %v8662_v10, 30  ;;  %vm605_vm4 = vcmp.lt.s32.totalorder %v8662_v10, 31  ;;  %s11365_s3 = sld [smem:[#allocation41_spill]] }
  0x84   : > { %v660_v3 = vrot.slane %v655_v62, %v8670_v12  ;;  %v664_v8 = vrot.slane %v655_v62, %v8664_v11  ;;  %vm561_vm5 = vcmp.lt.s32.totalorder %v8662_v10, 32  ;;  %vm517_vm6 = vcmp.lt.s32.totalorder %v8662_v10, 33  ;;  %s11380_s0 = smov 94   ;;  %s11381_s1 = smov 16  }
  0x85   : > { %731 = vrot.lane.b32.xlu1 %v8552_v7, %s11281_s22  ;;  %729 = vrot.lane.b32.xlu0 %v8544_v5, %s11281_s22  ;;  %vm474_vm7 = vcmp.lt.s32.totalorder %v8662_v10, 34  ;;  %vm1455_vm8 = vcmp.lt.s32.totalorder %v8662_v10, 95  ;;  %vm1103_vm10 = vcmp.lt.s32.totalorder %v8662_v10, 114  ;;  %vm1411_vm11 = vcmp.lt.s32.totalorder %v8662_v10, 96  ;;  %s11383_s4 = smov 18   ;;  %s11384_s6 = smov 30  }
  0x86   : > { %vm11308_vm12 = vcmp.lt.s32.totalorder %v8662_v10, 126  ;;  %vm11307_vm13 = vcmp.lt.s32.totalorder %v8662_v10, 97  ;;  %vm11256_vm14 = vcmp.lt.s32.totalorder %v8662_v10, 127  ;;  %vm11257_vm15 = vcmp.lt.s32.totalorder %v8662_v10, 98  ;;  %s11385_s8 = smov 31   ;;  %s11386_s15 = smov 32  }
  0x87   : > { %s11387_s14 = smov 33   ;;  %s11388_s16 = smov 34  }
  0x88   : > { %s11389_s13 = smov 95  }
  0x89   : > { %735 = vrot.lane.b32.xlu1 %v8550_v6, %s11281_s22  ;;  %733 = vrot.lane.b32.xlu0 %v8542_v4, %s11281_s22 }
  0x8d   : > { %687 = vrot.lane.b32.xlu1 %v8552_v7, %s11279_s19  ;;  %685 = vrot.lane.b32.xlu0 %v8544_v5, %s11279_s19 }
  0x91   : > { %691 = vrot.lane.b32.xlu1 %v8550_v6, %s11279_s19  ;;  %689 = vrot.lane.b32.xlu0 %v8542_v4, %s11279_s19 }
  0x95   : > { %643 = vrot.lane.b32.xlu1 %v8552_v7, %s11277_s2  ;;  %641 = vrot.lane.b32.xlu0 %v8544_v5, %s11277_s2 }
  0x99   : > { %647 = vrot.lane.b32.xlu1 %v8550_v6, %s11277_s2  ;;  %645 = vrot.lane.b32.xlu0 %v8542_v4, %s11277_s2 }
  0x9d   : > { %599 = vrot.lane.b32.xlu1 %v8552_v7, %s11275_s25  ;;  %597 = vrot.lane.b32.xlu0 %v8544_v5, %s11275_s25 }
  0xa1   : > { %603 = vrot.lane.b32.xlu1 %v8550_v6, %s11275_s25  ;;  %601 = vrot.lane.b32.xlu0 %v8542_v4, %s11275_s25 }
  0xa5   : > { %555 = vrot.lane.b32.xlu1 %v8552_v7, %s11273_s20  ;;  %553 = vrot.lane.b32.xlu0 %v8544_v5, %s11273_s20 }
  0xa9   : > { %559 = vrot.lane.b32.xlu1 %v8550_v6, %s11273_s20  ;;  %557 = vrot.lane.b32.xlu0 %v8542_v4, %s11273_s20 }
  0xad   : > { %511 = vrot.lane.b32.xlu1 %v8552_v7, %s11271_s28  ;;  %509 = vrot.lane.b32.xlu0 %v8544_v5, %s11271_s28 }
  0xb1   : > { %515 = vrot.lane.b32.xlu1 %v8550_v6, %s11271_s28  ;;  %513 = vrot.lane.b32.xlu0 %v8542_v4, %s11271_s28 }
  0xb5   : > { %466 = vrot.lane.b32.xlu1 %v8552_v7, %s11269_s29  ;;  %464 = vrot.lane.b32.xlu0 %v8544_v5, %s11269_s29 }
  0xb9   : > { %470 = vrot.lane.b32.xlu1 %v8550_v6, %s11269_s29  ;;  %468 = vrot.lane.b32.xlu0 %v8542_v4, %s11269_s29 }
  0xbd   : > { %1449 = vrot.lane.b32.xlu1 %v8552_v7, %s11267_s11  ;;  %1447 = vrot.lane.b32.xlu0 %v8544_v5, %s11267_s11 }
  0xc1   : > { %1453 = vrot.lane.b32.xlu1 %v8550_v6, %s11267_s11  ;;  %1451 = vrot.lane.b32.xlu0 %v8542_v4, %s11267_s11 }
  0xc5   : > { %1097 = vrot.lane.b32.xlu1 %v8552_v7, %s11254_s12  ;;  %1095 = vrot.lane.b32.xlu0 %v8544_v5, %s11254_s12 }
  0xc9   : > { %1101 = vrot.lane.b32.xlu1 %v8550_v6, %s11254_s12  ;;  %1099 = vrot.lane.b32.xlu0 %v8542_v4, %s11254_s12  ;;  %s11366_s12 = smov 114  }
  0xcd   : > { %1405 = vrot.lane.b32.xlu1 %v8552_v7, %s11252_s18  ;;  %1403 = vrot.lane.b32.xlu0 %v8544_v5, %s11252_s18 }
  0xd1   : > { %1409 = vrot.lane.b32.xlu1 %v8550_v6, %s11252_s18  ;;  %1407 = vrot.lane.b32.xlu0 %v8542_v4, %s11252_s18  ;;  %s11367_s18 = smov 96  }
  0xd5   : > { %1053 = vrot.lane.b32.xlu1 %v8552_v7, %s11250_s27  ;;  %1051 = vrot.lane.b32.xlu0 %v8544_v5, %s11250_s27 }
  0xd9   : > { %1057 = vrot.lane.b32.xlu1 %v8550_v6, %s11250_s27  ;;  %1055 = vrot.lane.b32.xlu0 %v8542_v4, %s11250_s27  ;;  %s11368_s27 = smov 126  }
  0xdd   : > { %1361 = vrot.lane.b32.xlu1 %v8552_v7, %s11228_s30  ;;  %1359 = vrot.lane.b32.xlu0 %v8544_v5, %s11228_s30 }
  0xe1   : > { %1365 = vrot.lane.b32.xlu1 %v8550_v6, %s11228_s30  ;;  %1363 = vrot.lane.b32.xlu0 %v8542_v4, %s11228_s30  ;;  %s11246_s30 = smov 98  }
  0xe5   : > { %1009 = vrot.lane.b32.xlu1 %v8552_v7, %s11230_s21  ;;  %1007 = vrot.lane.b32.xlu0 %v8544_v5, %s11230_s21 }
  0xe9   : > { %1013 = vrot.lane.b32.xlu1 %v8550_v6, %s11230_s21  ;;  %1011 = vrot.lane.b32.xlu0 %v8542_v4, %s11230_s21  ;;  %s11232_s21 = smov 110  }
  0xed   : > { %1317 = vrot.lane.b32.xlu1 %v8552_v7, %s11246_s30  ;;  %1315 = vrot.lane.b32.xlu0 %v8544_v5, %s11246_s30 }
  0xef   : > { %v778_v14 = vpop.permute.xlu1 %777  ;;  %v774_v15 = vpop.permute.xlu0 %773 }
  0xf0   : > { %v782_v17 = vsel %vm781_vm0, %v774_v15, %v778_v14  ;;  %v784_v19 = vsel %vm781_vm0, %v778_v14, %v774_v15 }
  0xf1   : > { %1321 = vrot.lane.b32.xlu1 %v8550_v6, %s11246_s30  ;;  %1319 = vrot.lane.b32.xlu0 %v8542_v4, %s11246_s30  ;;  %v800_v24 = vmul.f32 %v796_v16, %v782_v17  ;;  %v799_v26 = vmul.f32 %v792_v18, %v784_v19  ;;  %s11285_s30 = smov 94  }
  0xf3   : > { %v780_v20 = vpop.permute.xlu1 %779  ;;  %v776_v21 = vpop.permute.xlu0 %775 }
  0xf4   : > { %v785_v22 = vsel %vm781_vm0, %v780_v20, %v776_v21  ;;  %v783_v23 = vsel %vm781_vm0, %v776_v21, %v780_v20 }
  0xf5   : > { %1273 = vrot.lane.b32.xlu1 %v8552_v7, %s11232_s21  ;;  %1271 = vrot.lane.b32.xlu0 %v8544_v5, %s11232_s21  ;;  %v802_v25 = vmul.f32 %v796_v16, %v783_v23  ;;  %v801_v27 = vmul.f32 %v792_v18, %v785_v22  ;;  %v611_v22 = vld [vmem:[#allocation4 + $0x3] ss:$8 sm:$0x3] }
  0xf6   : > { %v620_v28 = vrot.slane %v611_v22, %v8664_v11 }
  0xf7   : > { %v732_v29 = vpop.permute.xlu1 %731  ;;  %v730_v30 = vpop.permute.xlu0 %729  ;;  %v7682_v31 = vpack.c.bf16 %v802_v25, %v800_v24  ;;  %v7681_v32 = vpack.c.bf16 %v801_v27, %v799_v26  ;;  %v616_v27 = vrot.slane %v611_v22, %v8670_v12 }
  0xf9   : > { %1277 = vrot.lane.b32.xlu1 %v8550_v6, %s11232_s21  ;;  %1275 = vrot.lane.b32.xlu0 %v8542_v4, %s11232_s21  ;;  %s11234_s21 = smov 1  }
  0xfa   : > { %1874 = vmatprep.subr.bf16.mxu0 %v7682_v31 }
  0xfb   : > { %1875 = vmatpush1.bf16.msra.mxu0 %v7681_v32  ;;  %v736_v35 = vpop.permute.xlu1 %735  ;;  %v734_v36 = vpop.permute.xlu0 %733 }
  0xfc   : > { %v739_v37 = vsel %vm737_vm1, %v732_v29, %v736_v35  ;;  %v741_v38 = vsel %vm737_vm1, %v736_v35, %v732_v29  ;;  %v738_v39 = vsel %vm737_vm1, %v730_v30, %v734_v36  ;;  %v740_v40 = vsel %vm737_vm1, %v734_v36, %v730_v30 }
  0xfd   : > { %v757_v41 = vmul.f32 %v748_v33, %v741_v38  ;;  %v758_v42 = vmul.f32 %v752_v34, %v739_v37  ;;  %v755_v43 = vmul.f32 %v748_v33, %v740_v40  ;;  %v756_v44 = vmul.f32 %v752_v34, %v738_v39  ;;  %951 = vrot.lane.b32.xlu1 %v8552_v7, %s11234_s21  ;;  %v567_v39 = vld [vmem:[#allocation4 + $0x2] ss:$8 sm:$0x3] }
  0xfe   : > { %949 = vrot.lane.b32.xlu0 %v8544_v5, %s11234_s21  ;;  %v576_v45 = vrot.slane %v567_v39, %v8664_v11 }
  0xff   : > { %v688_v46 = vpop.permute.xlu1 %687  ;;  %v686_v47 = vpop.permute.xlu0 %685  ;;  %v7680_v48 = vpack.c.bf16 %v758_v42, %v756_v44  ;;  %v7679_v49 = vpack.c.bf16 %v757_v41, %v755_v43  ;;  %v572_v44 = vrot.slane %v567_v39, %v8670_v12 }
 0x101   : > { %955 = vrot.lane.b32.xlu1 %v8550_v6, %s11234_s21  ;;  %1876 = vmatprep.subr.bf16.mxu0 %v7680_v48 }
 0x102   : > { %953 = vrot.lane.b32.xlu0 %v8542_v4, %s11234_s21  ;;  %1877 = vmatpush1.bf16.msra.mxu0 %v7679_v49  ;;  %s11236_s21 = smov 111  }
 0x103   : > { %v692_v52 = vpop.permute.xlu1 %691  ;;  %v690_v53 = vpop.permute.xlu0 %689 }
 0x104   : > { %v695_v54 = vsel %vm693_vm2, %v688_v46, %v692_v52  ;;  %v697_v55 = vsel %vm693_vm2, %v692_v52, %v688_v46  ;;  %v694_v56 = vsel %vm693_vm2, %v686_v47, %v690_v53  ;;  %v696_v57 = vsel %vm693_vm2, %v690_v53, %v686_v47 }
 0x105   : > { %v713_v58 = vmul.f32 %v704_v50, %v697_v55  ;;  %v714_v59 = vmul.f32 %v708_v51, %v695_v54  ;;  %v711_v60 = vmul.f32 %v704_v50, %v696_v57  ;;  %v712_v61 = vmul.f32 %v708_v51, %v694_v56  ;;  %1229 = vrot.lane.b32.xlu1 %v8552_v7, %s11236_s21  ;;  %v523_v56 = vld [vmem:[#allocation4 + $0x1] ss:$8 sm:$0x3] }
 0x106   : > { %1227 = vrot.lane.b32.xlu0 %v8544_v5, %s11236_s21  ;;  %v532_v62 = vrot.slane %v523_v56, %v8664_v11 }
 0x107   : > { %v644_v63 = vpop.permute.xlu1 %643  ;;  %v642_v0 = vpop.permute.xlu0 %641  ;;  %v7678_v1 = vpack.c.bf16 %v714_v59, %v712_v61  ;;  %v7677_v2 = vpack.c.bf16 %v713_v58, %v711_v60  ;;  %v528_v61 = vrot.slane %v523_v56, %v8670_v12 }
 0x109   : > { %1233 = vrot.lane.b32.xlu1 %v8550_v6, %s11236_s21  ;;  %1878 = vmatprep.subr.bf16.mxu0 %v7678_v1 }
 0x10a   : > { %1231 = vrot.lane.b32.xlu0 %v8542_v4, %s11236_s21  ;;  %1879 = vmatpush1.bf16.msra.mxu0 %v7677_v2  ;;  %s11238_s21 = smov 2  }
 0x10b   : > { %v648_v9 = vpop.permute.xlu1 %647  ;;  %v646_v13 = vpop.permute.xlu0 %645 }
 0x10c   : > { %v651_v14 = vsel %vm649_vm3, %v644_v63, %v648_v9  ;;  %v653_v15 = vsel %vm649_vm3, %v648_v9, %v644_v63  ;;  %v650_v16 = vsel %vm649_vm3, %v642_v0, %v646_v13  ;;  %v652_v17 = vsel %vm649_vm3, %v646_v13, %v642_v0 }
 0x10d   : > { %v669_v18 = vmul.f32 %v660_v3, %v653_v15  ;;  %v670_v19 = vmul.f32 %v664_v8, %v651_v14  ;;  %v667_v20 = vmul.f32 %v660_v3, %v652_v17  ;;  %v668_v21 = vmul.f32 %v664_v8, %v650_v16  ;;  %907 = vrot.lane.b32.xlu1 %v8552_v7, %s11238_s21  ;;  %v479_v16 = vld [vmem:[#allocation4] ss:$8 sm:$0x3] }
 0x10e   : > { %905 = vrot.lane.b32.xlu0 %v8544_v5, %s11238_s21  ;;  %v488_v22 = vrot.slane %v479_v16, %v8664_v11 }
 0x10f   : > { %v600_v23 = vpop.permute.xlu1 %599  ;;  %v598_v24 = vpop.permute.xlu0 %597  ;;  %v7676_v25 = vpack.c.bf16 %v670_v19, %v668_v21  ;;  %v7675_v26 = vpack.c.bf16 %v669_v18, %v667_v20  ;;  %v484_v21 = vrot.slane %v479_v16, %v8670_v12 }
 0x111   : > { %911 = vrot.lane.b32.xlu1 %v8550_v6, %s11238_s21  ;;  %1880 = vmatprep.subr.bf16.mxu0 %v7676_v25  ;;  %v7990_v25 = vld [vmem:[#allocation7 + $0x4] ss:$16 sps:$4 sm:$0xff]  }
 0x112   : > { %909 = vrot.lane.b32.xlu0 %v8542_v4, %s11238_s21  ;;  %1881 = vmatpush1.bf16.msra.mxu0 %v7675_v26  ;;  %s11240_s21 = smov 112  }
 0x113   : > { %v604_v29 = vpop.permute.xlu1 %603  ;;  %v602_v30 = vpop.permute.xlu0 %601  ;;  %1906 = vmatprep.mubr.bf16.mxu0 %v7990_v25 }
 0x114   : > { %v607_v31 = vsel %vm605_vm4, %v600_v23, %v604_v29  ;;  %v609_v32 = vsel %vm605_vm4, %v604_v29, %v600_v23  ;;  %v606_v33 = vsel %vm605_vm4, %v598_v24, %v602_v30  ;;  %v608_v34 = vsel %vm605_vm4, %v602_v30, %v598_v24 }
 0x115   : > { %v625_v35 = vmul.f32 %v616_v27, %v609_v32  ;;  %v626_v36 = vmul.f32 %v620_v28, %v607_v31  ;;  %v623_v37 = vmul.f32 %v616_v27, %v608_v34  ;;  %v624_v38 = vmul.f32 %v620_v28, %v606_v33  ;;  %1185 = vrot.lane.b32.xlu1 %v8552_v7, %s11240_s21  ;;  %v1461_v34 = vld [vmem:[#allocation4 + $0x27] ss:$8 sm:$0x3] }
 0x116   : > { %1183 = vrot.lane.b32.xlu0 %v8544_v5, %s11240_s21  ;;  %v1470_v39 = vrot.slane %v1461_v34, %v8664_v11 }
 0x117   : > { %v556_v40 = vpop.permute.xlu1 %555  ;;  %v554_v41 = vpop.permute.xlu0 %553  ;;  %v7674_v42 = vpack.c.bf16 %v626_v36, %v624_v38  ;;  %v7673_v43 = vpack.c.bf16 %v625_v35, %v623_v37 }
 0x119   : > { %1189 = vrot.lane.b32.xlu1 %v8550_v6, %s11240_s21  ;;  %1882 = vmatprep.subr.bf16.mxu0 %v7674_v42 }
 0x11a   : > { %1187 = vrot.lane.b32.xlu0 %v8542_v4, %s11240_s21  ;;  %1883 = vmatpush1.bf16.msra.mxu0 %v7673_v43  ;;  %s11242_s21 = smov 14   ;;  %v7993_v43 = vld [vmem:[#allocation7 + $0xc] ss:$16 sps:$4 sm:$0xff]  }
 0x11b   : > { %v560_v46 = vpop.permute.xlu1 %559  ;;  %v558_v47 = vpop.permute.xlu0 %557  ;;  %7139 = vmatprep.mubr.msk.bf16.mxu1 %vm1870_vm9, %v7993_v43 }
 0x11c   : > { %v563_v48 = vsel %vm561_vm5, %v556_v40, %v560_v46  ;;  %v565_v49 = vsel %vm561_vm5, %v560_v46, %v556_v40  ;;  %v562_v50 = vsel %vm561_vm5, %v554_v41, %v558_v47  ;;  %v564_v51 = vsel %vm561_vm5, %v558_v47, %v554_v41 }
 0x11d   : > { %v581_v52 = vmul.f32 %v572_v44, %v565_v49  ;;  %v582_v53 = vmul.f32 %v576_v45, %v563_v48  ;;  %v579_v54 = vmul.f32 %v572_v44, %v564_v51  ;;  %v580_v55 = vmul.f32 %v576_v45, %v562_v50  ;;  %863 = vrot.lane.b32.xlu1 %v8552_v7, %s11242_s21 }
 0x11e   : > { %861 = vrot.lane.b32.xlu0 %v8544_v5, %s11242_s21  ;;  %v1466_v40 = vrot.slane %v1461_v34, %v8670_v12 }
 0x11f   : > { %v512_v57 = vpop.permute.xlu1 %511  ;;  %v510_v58 = vpop.permute.xlu0 %509  ;;  %v7672_v59 = vpack.c.bf16 %v582_v53, %v580_v55  ;;  %v7671_v60 = vpack.c.bf16 %v581_v52, %v579_v54  ;;  %v1109_v52 = vld [vmem:[#allocation4 + $0x17] ss:$8 sm:$0x3] }
 0x121   : > { %867 = vrot.lane.b32.xlu1 %v8550_v6, %s11242_s21  ;;  %1884 = vmatprep.subr.bf16.mxu0 %v7672_v59  ;;  %v1118_v59 = vrot.slane %v1109_v52, %v8664_v11 }
 0x122   : > { %865 = vrot.lane.b32.xlu0 %v8542_v4, %s11242_s21  ;;  %1885 = vmatpush1.bf16.msra.mxu0 %v7671_v60  ;;  %s11244_s21 = smov 113   ;;  %v1590_v60 = vld [vmem:[%s11365_s3 + $0x8] sm:$0xff] }
 0x123   : > { %v516_v63 = vpop.permute.xlu1 %515  ;;  %v514_v0 = vpop.permute.xlu0 %513 }
 0x124   : > { %v519_v1 = vsel %vm517_vm6, %v512_v57, %v516_v63  ;;  %v521_v2 = vsel %vm517_vm6, %v516_v63, %v512_v57  ;;  %v518_v3 = vsel %vm517_vm6, %v510_v58, %v514_v0  ;;  %v520_v8 = vsel %vm517_vm6, %v514_v0, %v510_v58  ;;  %v1589_v63 = vld [vmem:[%s11365_s3] sm:$0xff]  ;;  %s11382_s3 = smov 17  }
 0x125   : > { %v537_v9 = vmul.f32 %v528_v61, %v521_v2  ;;  %v538_v13 = vmul.f32 %v532_v62, %v519_v1  ;;  %v535_v14 = vmul.f32 %v528_v61, %v520_v8  ;;  %v536_v15 = vmul.f32 %v532_v62, %v518_v3  ;;  %1141 = vrot.lane.b32.xlu1 %v8552_v7, %s11244_s21 }
 0x126   : > { %1139 = vrot.lane.b32.xlu0 %v8544_v5, %s11244_s21  ;;  %v8333_v57 = vmov 0   ;;  %v1114_v58 = vrot.slane %v1109_v52, %v8670_v12 }
 0x127   : > { %v467_v17 = vpop.permute.xlu1 %466  ;;  %v465_v18 = vpop.permute.xlu0 %464  ;;  %v7670_v19 = vpack.c.bf16 %v538_v13, %v536_v15  ;;  %v7669_v20 = vpack.c.bf16 %v537_v9, %v535_v14  ;;  %7987 = vset.pattern.permute.xlu1 %v8333_v57  ;;  %7986 = vset.pattern.permute.xlu0 %v8333_v57  ;;  %v1417_v15 = vld [vmem:[#allocation4 + $0x26] ss:$8 sm:$0x3] }
 0x129   : > { %1145 = vrot.lane.b32.xlu1 %v8550_v6, %s11244_s21  ;;  %1886 = vmatprep.subr.bf16.mxu0 %v7670_v19 }
 0x12a   : > { %1143 = vrot.lane.b32.xlu0 %v8542_v4, %s11244_s21  ;;  %1887 = vmatpush1.bf16.msra.mxu0 %v7669_v20  ;;  %s11248_s21 = smov 15   ;;  %v1422_v20 = vrot.slane %v1417_v15, %v8670_v12 }
 0x12b   : > { %v471_v23 = vpop.permute.xlu1 %470  ;;  %v469_v24 = vpop.permute.xlu0 %468 }
 0x12c   : > { %v476_v26 = vsel %vm474_vm7, %v467_v17, %v471_v23  ;;  %v478_v27 = vsel %vm474_vm7, %v471_v23, %v467_v17  ;;  %v475_v28 = vsel %vm474_vm7, %v465_v18, %v469_v24  ;;  %v477_v29 = vsel %vm474_vm7, %v469_v24, %v465_v18 }
 0x12d   : > { %v493_v30 = vmul.f32 %v484_v21, %v478_v27  ;;  %v494_v31 = vmul.f32 %v488_v22, %v476_v26  ;;  %v491_v32 = vmul.f32 %v484_v21, %v477_v29  ;;  %v492_v33 = vmul.f32 %v488_v22, %v475_v28  ;;  %819 = vrot.lane.b32.xlu1 %v8552_v7, %s11248_s21 }
 0x12e   : > { %817 = vrot.lane.b32.xlu0 %v8544_v5, %s11248_s21  ;;  %v1426_v21 = vrot.slane %v1417_v15, %v8664_v11 }
 0x12f   : > { %v1450_v35 = vpop.permute.xlu1 %1449  ;;  %v1448_v36 = vpop.permute.xlu0 %1447  ;;  %v7668_v37 = vpack.c.bf16 %v494_v31, %v492_v33  ;;  %v7667_v38 = vpack.c.bf16 %v493_v30, %v491_v32  ;;  %v1065_v32 = vld [vmem:[#allocation4 + $0x16] ss:$8 sm:$0x3] }
 0x131   : > { %823 = vrot.lane.b32.xlu1 %v8550_v6, %s11248_s21  ;;  %1888 = vmatprep.subr.bf16.mxu0 %v7668_v37  ;;  %v1070_v37 = vrot.slane %v1065_v32, %v8670_v12 }
 0x132   : > { %821 = vrot.lane.b32.xlu0 %v8542_v4, %s11248_s21  ;;  %1889 = vmatpush1.bf16.msra.mxu0 %v7667_v38  ;;  %v1074_v38 = vrot.slane %v1065_v32, %v8664_v11  ;;  %s11369_s21 = smov 97  }
 0x133   : > { %v1454_v41 = vpop.permute.xlu1 %1453  ;;  %v1452_v42 = vpop.permute.xlu0 %1451 }
 0x134   : > { %v1457_v44 = vsel %vm1455_vm8, %v1450_v35, %v1454_v41  ;;  %v1456_v45 = vsel %vm1455_vm8, %v1448_v36, %v1452_v42  ;;  %v1458_v46 = vsel %vm1455_vm8, %v1452_v42, %v1448_v36  ;;  %v1459_v47 = vsel %vm1455_vm8, %v1454_v41, %v1450_v35 }
 0x135   : > { %1493 = vrot.lane.b32.xlu1 %v8552_v7, %s11285_s30  ;;  %v1474_v48 = vmul.f32 %v1470_v39, %v1458_v46  ;;  %v1476_v49 = vmul.f32 %v1470_v39, %v1459_v47  ;;  %v1473_v50 = vmul.f32 %v1466_v40, %v1456_v45  ;;  %v1475_v51 = vmul.f32 %v1466_v40, %v1457_v44 }
 0x136   : > { %1491 = vrot.lane.b32.xlu0 %v8544_v5, %s11285_s30 }
 0x137   : > { %v1098_v53 = vpop.permute.xlu1 %1097  ;;  %v1096_v54 = vpop.permute.xlu0 %1095  ;;  %v7714_v55 = vpack.c.bf16 %v1476_v49, %v1474_v48  ;;  %v7713_v56 = vpack.c.bf16 %v1475_v51, %v1473_v50  ;;  %v1373_v49 = vld [vmem:[#allocation4 + $0x25] ss:$8 sm:$0x3] }
 0x139   : > { %1497 = vrot.lane.b32.xlu1 %v8550_v6, %s11285_s30  ;;  %1917 = vmatprep.subr.bf16.mxu1 %v7714_v55  ;;  %v1382_v55 = vrot.slane %v1373_v49, %v8664_v11 }
 0x13a   : > { %1495 = vrot.lane.b32.xlu0 %v8542_v4, %s11285_s30  ;;  %1918 = vmatpush1.bf16.msra.mxu1 %v7713_v56  ;;  %s11379_s30 = smov 15  }
 0x13b   : > { %v1102_v61 = vpop.permute.xlu1 %1101  ;;  %v1100_v62 = vpop.permute.xlu0 %1099 }
 0x13c   : > { %v1105_v0 = vsel %vm1103_vm10, %v1098_v53, %v1102_v61  ;;  %v1107_v1 = vsel %vm1103_vm10, %v1102_v61, %v1098_v53  ;;  %v1104_v2 = vsel %vm1103_vm10, %v1096_v54, %v1100_v62  ;;  %v1106_v3 = vsel %vm1103_vm10, %v1100_v62, %v1096_v54 }
 0x13d   : > { %v1123_v8 = vmul.f32 %v1114_v58, %v1105_v0  ;;  %v1124_v9 = vmul.f32 %v1118_v59, %v1107_v1  ;;  %v1121_v13 = vmul.f32 %v1114_v58, %v1104_v2  ;;  %v1122_v14 = vmul.f32 %v1118_v59, %v1106_v3  ;;  %1598 = vperm.xlu1 %7987, %v1590_v60   ;;  %v1021_v2 = vld [vmem:[#allocation4 + $0x15] ss:$8 sm:$0x3] }
 0x13e   : > { %1593 = vperm.xlu0 %7986, %v1589_v63   ;;  %v1378_v54 = vrot.slane %v1373_v49, %v8670_v12  ;;  %v1030_v15 = vrot.slane %v1021_v2, %v8664_v11 }
 0x13f   : > { %v1406_v16 = vpop.permute.xlu1 %1405  ;;  %v1404_v17 = vpop.permute.xlu0 %1403  ;;  %v7698_v18 = vpack.c.bf16 %v1124_v9, %v1122_v14  ;;  %v7697_v19 = vpack.c.bf16 %v1123_v8, %v1121_v13  ;;  %v1026_v14 = vrot.slane %v1021_v2, %v8670_v12 }
 0x141   : > { %1890 = vmatprep.subr.bf16.mxu0 %v7698_v18 }
 0x142   : > { %1891 = vmatpush2.bf16.msra.mxu0 %v7697_v19 }
 0x143   : > { %v1410_v22 = vpop.permute.xlu1 %1409  ;;  %v1408_v23 = vpop.permute.xlu0 %1407 }
 0x144   : > { %v1413_v24 = vsel %vm1411_vm11, %v1406_v16, %v1410_v22  ;;  %v1415_v25 = vsel %vm1411_vm11, %v1410_v22, %v1406_v16  ;;  %v1412_v26 = vsel %vm1411_vm11, %v1404_v17, %v1408_v23  ;;  %v1414_v27 = vsel %vm1411_vm11, %v1408_v23, %v1404_v17 }
 0x145   : > { %v1431_v28 = vmul.f32 %v1422_v20, %v1413_v24  ;;  %v1432_v29 = vmul.f32 %v1426_v21, %v1415_v25  ;;  %v1429_v30 = vmul.f32 %v1422_v20, %v1412_v26  ;;  %v1430_v31 = vmul.f32 %v1426_v21, %v1414_v27  ;;  %v1329_v26 = vld [vmem:[#allocation4 + $0x24] ss:$8 sm:$0x3] }
 0x146   : > { %v1334_v32 = vrot.slane %v1329_v26, %v8670_v12 }
 0x147   : > { %v1054_v33 = vpop.permute.xlu1 %1053  ;;  %v1052_v34 = vpop.permute.xlu0 %1051  ;;  %v7712_v35 = vpack.c.bf16 %v1432_v29, %v1430_v31  ;;  %v7711_v36 = vpack.c.bf16 %v1431_v28, %v1429_v30  ;;  %v7692_v31 = vpack.c.bf16 %v8550_v6, %v8542_v4 }
 0x149   : > { %1919 = vmatprep.subr.bf16.mxu1 %v7712_v35 }
 0x14a   : > { %1920 = vmatpush1.bf16.msra.mxu1 %v7711_v36 }
 0x14b   : > { %v1058_v39 = vpop.permute.xlu1 %1057  ;;  %v1056_v40 = vpop.permute.xlu0 %1055 }
 0x14c   : > { %v1061_v41 = vsel %vm11308_vm12, %v1054_v33, %v1058_v39  ;;  %v1063_v42 = vsel %vm11308_vm12, %v1058_v39, %v1054_v33  ;;  %v1060_v43 = vsel %vm11308_vm12, %v1052_v34, %v1056_v40  ;;  %v1062_v44 = vsel %vm11308_vm12, %v1056_v40, %v1052_v34 }
 0x14d   : > { %v1079_v45 = vmul.f32 %v1070_v37, %v1061_v41  ;;  %v1080_v46 = vmul.f32 %v1074_v38, %v1063_v42  ;;  %v1077_v47 = vmul.f32 %v1070_v37, %v1060_v43  ;;  %v1078_v48 = vmul.f32 %v1074_v38, %v1062_v44 }
 0x14e   : > { %v1338_v33 = vrot.slane %v1329_v26, %v8664_v11  ;;  %v7691_v34 = vpack.c.bf16 %v8552_v7, %v8544_v5  ;;  %v1285_v5 = vld [vmem:[#allocation4 + $0x23] ss:$8 sm:$0x3] }
 0x14f   : > { %v1362_v50 = vpop.permute.xlu1 %1361  ;;  %v1360_v51 = vpop.permute.xlu0 %1359  ;;  %v7696_v52 = vpack.c.bf16 %v1080_v46, %v1078_v48  ;;  %v7695_v53 = vpack.c.bf16 %v1079_v45, %v1077_v47  ;;  %v1290_v46 = vrot.slane %v1285_v5, %v8670_v12  ;;  %v1294_v47 = vrot.slane %v1285_v5, %v8664_v11 }
 0x151   : > { %1892 = vmatprep.subr.bf16.mxu0 %v7696_v52 }
 0x152   : > { %1893 = vmatpush2.bf16.msra.mxu0 %v7695_v53 }
 0x153   : > { %v1366_v56 = vpop.permute.xlu1 %1365  ;;  %v1364_v57 = vpop.permute.xlu0 %1363 }
 0x154   : > { %v1369_v58 = vsel %vm11307_vm13, %v1362_v50, %v1366_v56  ;;  %v1371_v59 = vsel %vm11307_vm13, %v1366_v56, %v1362_v50  ;;  %v1368_v60 = vsel %vm11307_vm13, %v1360_v51, %v1364_v57  ;;  %v1370_v61 = vsel %vm11307_vm13, %v1364_v57, %v1360_v51 }
 0x155   : > { %v1387_v62 = vmul.f32 %v1378_v54, %v1369_v58  ;;  %v1388_v63 = vmul.f32 %v1382_v55, %v1371_v59  ;;  %v1385_v0 = vmul.f32 %v1378_v54, %v1368_v60  ;;  %v1386_v1 = vmul.f32 %v1382_v55, %v1370_v61  ;;  %v963_v58 = vld [vmem:[#allocation4 + $0x13] ss:$8 sm:$0x3] }
 0x157   : > { %v1010_v3 = vpop.permute.xlu1 %1009  ;;  %v1008_v8 = vpop.permute.xlu0 %1007  ;;  %v7710_v9 = vpack.c.bf16 %v1388_v63, %v1386_v1  ;;  %v7709_v13 = vpack.c.bf16 %v1387_v62, %v1385_v0  ;;  %v968_v63 = vrot.slane %v963_v58, %v8670_v12  ;;  %v972_v0 = vrot.slane %v963_v58, %v8664_v11 }
 0x159   : > { %1921 = vmatprep.subr.bf16.mxu1 %v7710_v9 }
 0x15a   : > { %1922 = vmatpush1.bf16.msra.mxu1 %v7709_v13 }
 0x15b   : > { %v1014_v16 = vpop.permute.xlu1 %1013  ;;  %v1012_v17 = vpop.permute.xlu0 %1011 }
 0x15c   : > { %v1017_v18 = vsel %vm11256_vm14, %v1010_v3, %v1014_v16  ;;  %v1019_v19 = vsel %vm11256_vm14, %v1014_v16, %v1010_v3  ;;  %v1016_v20 = vsel %vm11256_vm14, %v1008_v8, %v1012_v17  ;;  %v1018_v21 = vsel %vm11256_vm14, %v1012_v17, %v1008_v8 }
 0x15d   : > { %v1035_v22 = vmul.f32 %v1026_v14, %v1017_v18  ;;  %v1036_v23 = vmul.f32 %v1030_v15, %v1019_v19  ;;  %v1033_v24 = vmul.f32 %v1026_v14, %v1016_v20  ;;  %v1034_v25 = vmul.f32 %v1030_v15, %v1018_v21  ;;  %v1241_v18 = vld [vmem:[#allocation4 + $0x22] ss:$8 sm:$0x3] }
 0x15e   : > { %vm11258_vm14 = vcmp.lt.s32.totalorder %v8662_v10, 110 }
 0x15f   : > { %v1318_v27 = vpop.permute.xlu1 %1317  ;;  %v1316_v28 = vpop.permute.xlu0 %1315  ;;  %v7694_v29 = vpack.c.bf16 %v1036_v23, %v1034_v25  ;;  %v7693_v30 = vpack.c.bf16 %v1035_v22, %v1033_v24  ;;  %v1246_v23 = vrot.slane %v1241_v18, %v8670_v12  ;;  %v1250_v24 = vrot.slane %v1241_v18, %v8664_v11 }
 0x161   : > { %1894 = vmatprep.subr.bf16.mxu0 %v7694_v29 }
 0x162   : > { %1895 = vmatpush2.bf16.msra.mxu0 %v7693_v30 }
 0x163   : > { %v1322_v35 = vpop.permute.xlu1 %1321  ;;  %v1320_v36 = vpop.permute.xlu0 %1319  ;;  %1896 = vmatprep.subr.bf16.mxu0 %v7692_v31 }
 0x164   : > { %v1325_v37 = vsel %vm11257_vm15, %v1318_v27, %v1322_v35  ;;  %v1327_v4 = vsel %vm11257_vm15, %v1322_v35, %v1318_v27  ;;  %v1324_v6 = vsel %vm11257_vm15, %v1316_v28, %v1320_v36  ;;  %v1326_v38 = vsel %vm11257_vm15, %v1320_v36, %v1316_v28  ;;  %v919_v35 = vld [vmem:[#allocation4 + $0x12] ss:$8 sm:$0x3] }
 0x165   : > { %v1343_v39 = vmul.f32 %v1334_v32, %v1325_v37  ;;  %v1344_v40 = vmul.f32 %v1338_v33, %v1327_v4  ;;  %v1341_v41 = vmul.f32 %v1334_v32, %v1324_v6  ;;  %v1342_v42 = vmul.f32 %v1338_v33, %v1326_v38 }
 0x166   : > { %1897 = vmatpush2.bf16.msra.mxu0 %v7691_v34  ;;  %vm11259_vm15 = vcmp.lt.s32.totalorder %v8662_v10, 1  ;;  %v924_v38 = vrot.slane %v919_v35, %v8670_v12 }
 0x167   : > { %v1274_v7 = vpop.permute.xlu1 %1273  ;;  %v1272_v43 = vpop.permute.xlu0 %1271  ;;  %v7708_v44 = vpack.c.bf16 %v1344_v40, %v1342_v42  ;;  %v7707_v45 = vpack.c.bf16 %v1343_v39, %v1341_v41  ;;  %v928_v39 = vrot.slane %v919_v35, %v8664_v11 }
 0x169   : > { %1923 = vmatprep.subr.bf16.mxu1 %v7708_v44 }
 0x16a   : > { %1924 = vmatpush1.bf16.msra.mxu1 %v7707_v45 }
 0x16b   : > { %v1278_v48 = vpop.permute.xlu1 %1277  ;;  %v1276_v49 = vpop.permute.xlu0 %1275 }
 0x16c   : > { %v1281_v50 = vsel %vm11258_vm14, %v1274_v7, %v1278_v48  ;;  %v1283_v51 = vsel %vm11258_vm14, %v1278_v48, %v1274_v7  ;;  %v1280_v52 = vsel %vm11258_vm14, %v1272_v43, %v1276_v49  ;;  %v1282_v53 = vsel %vm11258_vm14, %v1276_v49, %v1272_v43  ;;  %v1197_v48 = vld [vmem:[#allocation4 + $0x21] ss:$8 sm:$0x3] }
 0x16d   : > { %v1299_v54 = vmul.f32 %v1290_v46, %v1281_v50  ;;  %v1300_v55 = vmul.f32 %v1294_v47, %v1283_v51  ;;  %v1297_v56 = vmul.f32 %v1290_v46, %v1280_v52  ;;  %v1298_v57 = vmul.f32 %v1294_v47, %v1282_v53 }
 0x16e   : > { %vm11260_vm14 = vcmp.lt.s32.totalorder %v8662_v10, 111  ;;  %v1202_v53 = vrot.slane %v1197_v48, %v8670_v12 }
 0x16f   : > { %v952_v59 = vpop.permute.xlu1 %951  ;;  %v7706_v60 = vpack.c.bf16 %v1300_v55, %v1298_v57  ;;  %v7705_v61 = vpack.c.bf16 %v1299_v54, %v1297_v56  ;;  %v1206_v54 = vrot.slane %v1197_v48, %v8664_v11 }
 0x170   : > { %v950_v62 = vpop.permute.xlu0 %949 }
 0x171   : > { %1925 = vmatprep.subr.bf16.mxu1 %v7706_v60 }
 0x172   : > { %1926 = vmatpush1.bf16.msra.mxu1 %v7705_v61 }
 0x173   : > { %v956_v1 = vpop.permute.xlu1 %955 }
 0x174   : > { %v959_v2 = vsel %vm11259_vm15, %v952_v59, %v956_v1  ;;  %v961_v3 = vsel %vm11259_vm15, %v956_v1, %v952_v59  ;;  %v954_v8 = vpop.permute.xlu0 %953  ;;  %v875_v1 = vld [vmem:[#allocation4 + $0x11] ss:$8 sm:$0x3] }
 0x175   : > { %v977_v9 = vmul.f32 %v968_v63, %v961_v3  ;;  %v978_v13 = vmul.f32 %v972_v0, %v959_v2  ;;  %v958_v14 = vsel %vm11259_vm15, %v950_v62, %v954_v8  ;;  %v960_v15 = vsel %vm11259_vm15, %v954_v8, %v950_v62 }
 0x176   : > { %v975_v16 = vmul.f32 %v968_v63, %v960_v15  ;;  %v976_v17 = vmul.f32 %v972_v0, %v958_v14  ;;  %vm11261_vm15 = vcmp.lt.s32.totalorder %v8662_v10, 2  ;;  %v884_v14 = vrot.slane %v875_v1, %v8664_v11 }
 0x177   : > { %v1230_v19 = vpop.permute.xlu1 %1229 }
 0x178   : > { %v1228_v20 = vpop.permute.xlu0 %1227  ;;  %v7690_v21 = vpack.c.bf16 %v978_v13, %v976_v17  ;;  %v7689_v22 = vpack.c.bf16 %v977_v9, %v975_v16  ;;  %v880_v13 = vrot.slane %v875_v1, %v8670_v12 }
 0x17a   : > { %1898 = vmatprep.subr.bf16.mxu0 %v7690_v21 }
 0x17b   : > { %1899 = vmatpush2.bf16.msra.mxu0 %v7689_v22  ;;  %v1234_v25 = vpop.permute.xlu1 %1233 }
 0x17c   : > { %v1237_v26 = vsel %vm11260_vm14, %v1230_v19, %v1234_v25  ;;  %v1239_v27 = vsel %vm11260_vm14, %v1234_v25, %v1230_v19  ;;  %v1232_v28 = vpop.permute.xlu0 %1231  ;;  %v1153_v25 = vld [vmem:[#allocation4 + $0x20] ss:$8 sm:$0x3] }
 0x17d   : > { %v1255_v29 = vmul.f32 %v1246_v23, %v1237_v26  ;;  %v1256_v30 = vmul.f32 %v1250_v24, %v1239_v27  ;;  %v1236_v31 = vsel %vm11260_vm14, %v1228_v20, %v1232_v28  ;;  %v1238_v32 = vsel %vm11260_vm14, %v1232_v28, %v1228_v20 }
 0x17e   : > { %v1253_v33 = vmul.f32 %v1246_v23, %v1236_v31  ;;  %v1254_v34 = vmul.f32 %v1250_v24, %v1238_v32  ;;  %vm11262_vm14 = vcmp.lt.s32.totalorder %v8662_v10, 112  ;;  %v1162_v31 = vrot.slane %v1153_v25, %v8664_v11 }
 0x17f   : > { %v908_v36 = vpop.permute.xlu1 %907 }
 0x180   : > { %v906_v37 = vpop.permute.xlu0 %905  ;;  %v7704_v4 = vpack.c.bf16 %v1256_v30, %v1254_v34  ;;  %v7703_v6 = vpack.c.bf16 %v1255_v29, %v1253_v33  ;;  %v1158_v30 = vrot.slane %v1153_v25, %v8670_v12 }
 0x182   : > { %1927 = vmatprep.subr.bf16.mxu1 %v7704_v4 }
 0x183   : > { %1928 = vmatpush1.bf16.msra.mxu1 %v7703_v6  ;;  %v912_v40 = vpop.permute.xlu1 %911 }
 0x184   : > { %v915_v41 = vsel %vm11261_vm15, %v908_v36, %v912_v40  ;;  %v917_v42 = vsel %vm11261_vm15, %v912_v40, %v908_v36  ;;  %v910_v5 = vpop.permute.xlu0 %909  ;;  %v831_v40 = vld [vmem:[#allocation4 + $0x10] ss:$8 sm:$0x3] }
 0x185   : > { %v933_v7 = vmul.f32 %v924_v38, %v917_v42  ;;  %v934_v43 = vmul.f32 %v928_v39, %v915_v41  ;;  %v914_v44 = vsel %vm11261_vm15, %v906_v37, %v910_v5  ;;  %v916_v45 = vsel %vm11261_vm15, %v910_v5, %v906_v37 }
 0x186   : > { %v931_v46 = vmul.f32 %v924_v38, %v916_v45  ;;  %v932_v47 = vmul.f32 %v928_v39, %v914_v44  ;;  %vm11263_vm15 = vcmp.lt.s32.totalorder %v8662_v10, 14  ;;  %v840_v44 = vrot.slane %v831_v40, %v8664_v11 }
 0x187   : > { %v1186_v49 = vpop.permute.xlu1 %1185 }
 0x188   : > { %v1184_v50 = vpop.permute.xlu0 %1183  ;;  %v7688_v51 = vpack.c.bf16 %v934_v43, %v932_v47  ;;  %v7687_v52 = vpack.c.bf16 %v933_v7, %v931_v46  ;;  %v836_v43 = vrot.slane %v831_v40, %v8670_v12 }
 0x18a   : > { %1900 = vmatprep.subr.bf16.mxu0 %v7688_v51 }
 0x18b   : > { %1901 = vmatpush2.bf16.msra.mxu0 %v7687_v52  ;;  %v1190_v55 = vpop.permute.xlu1 %1189 }
 0x18c   : > { %v1193_v56 = vsel %vm11262_vm14, %v1186_v49, %v1190_v55  ;;  %v1195_v57 = vsel %vm11262_vm14, %v1190_v55, %v1186_v49  ;;  %v1188_v58 = vpop.permute.xlu0 %1187  ;;  %v1505_v55 = vld [vmem:[#allocation4 + $0x30] ss:$8 sm:$0x3] }
 0x18d   : > { %v1211_v59 = vmul.f32 %v1202_v53, %v1193_v56  ;;  %v1212_v60 = vmul.f32 %v1206_v54, %v1195_v57  ;;  %v1192_v61 = vsel %vm11262_vm14, %v1184_v50, %v1188_v58  ;;  %v1194_v62 = vsel %vm11262_vm14, %v1188_v58, %v1184_v50 }
 0x18e   : > { %v1209_v63 = vmul.f32 %v1202_v53, %v1192_v61  ;;  %v1210_v0 = vmul.f32 %v1206_v54, %v1194_v62  ;;  %vm11264_vm14 = vcmp.lt.s32.totalorder %v8662_v10, 113  ;;  %v1514_v61 = vrot.slane %v1505_v55, %v8664_v11  ;;  %v7988_v62 = vld [vmem:[#allocation7] ss:$16 sps:$4 sm:$0xff]  }
 0x18f   : > { %v864_v2 = vpop.permute.xlu1 %863 }
 0x190   : > { %v862_v3 = vpop.permute.xlu0 %861  ;;  %v7702_v8 = vpack.c.bf16 %v1212_v60, %v1210_v0  ;;  %v7701_v9 = vpack.c.bf16 %v1211_v59, %v1209_v63  ;;  %v1510_v60 = vrot.slane %v1505_v55, %v8670_v12 }
 0x192   : > { %1929 = vmatprep.subr.bf16.mxu1 %v7702_v8 }
 0x193   : > { %1930 = vmatpush1.bf16.msra.mxu1 %v7701_v9  ;;  %v868_v15 = vpop.permute.xlu1 %867 }
 0x194   : > { %v871_v16 = vsel %vm11263_vm15, %v864_v2, %v868_v15  ;;  %v873_v17 = vsel %vm11263_vm15, %v868_v15, %v864_v2  ;;  %v866_v18 = vpop.permute.xlu0 %865 }
 0x195   : > { %v889_v19 = vmul.f32 %v880_v13, %v873_v17  ;;  %v890_v20 = vmul.f32 %v884_v14, %v871_v16  ;;  %v870_v21 = vsel %vm11263_vm15, %v862_v3, %v866_v18  ;;  %v872_v22 = vsel %vm11263_vm15, %v866_v18, %v862_v3  ;;  %v7991_v18 = vld [vmem:[#allocation7 + $0x8] ss:$16 sps:$4 sm:$0xff]  }
 0x196   : > { %v887_v23 = vmul.f32 %v880_v13, %v872_v22  ;;  %v888_v24 = vmul.f32 %v884_v14, %v870_v21  ;;  %vm11266_vm15 = vcmp.lt.s32.totalorder %v8662_v10, 15 }
 0x197   : > { %v1142_v26 = vpop.permute.xlu1 %1141 }
 0x198   : > { %v1140_v27 = vpop.permute.xlu0 %1139  ;;  %v7686_v28 = vpack.c.bf16 %v890_v20, %v888_v24  ;;  %v7685_v29 = vpack.c.bf16 %v889_v19, %v887_v23 }
 0x19a   : > { %1902 = vmatprep.subr.bf16.mxu0 %v7686_v28 }
 0x19b   : > { %1903 = vmatpush2.bf16.msra.mxu0 %v7685_v29  ;;  %v1146_v32 = vpop.permute.xlu1 %1145 }
 0x19c   : > { %v1149_v33 = vsel %vm11264_vm14, %v1142_v26, %v1146_v32  ;;  %v1151_v34 = vsel %vm11264_vm14, %v1146_v32, %v1142_v26  ;;  %v1144_v35 = vpop.permute.xlu0 %1143 }
 0x19d   : > { %v1167_v36 = vmul.f32 %v1158_v30, %v1149_v33  ;;  %v1168_v37 = vmul.f32 %v1162_v31, %v1151_v34  ;;  %v1148_v4 = vsel %vm11264_vm14, %v1140_v27, %v1144_v35  ;;  %v1150_v6 = vsel %vm11264_vm14, %v1144_v35, %v1140_v27 }
 0x19e   : > { %v1165_v38 = vmul.f32 %v1158_v30, %v1148_v4  ;;  %v1166_v39 = vmul.f32 %v1162_v31, %v1150_v6  ;;  %vm11265_vm14 = vcmp.lt.s32.totalorder %v8662_v10, 94 }
 0x19f   : > { %v820_v41 = vpop.permute.xlu1 %819 }
 0x1a0   : > { %v818_v42 = vpop.permute.xlu0 %817  ;;  %v7700_v5 = vpack.c.bf16 %v1168_v37, %v1166_v39  ;;  %v7699_v7 = vpack.c.bf16 %v1167_v36, %v1165_v38 }
 0x1a2   : > { %1931 = vmatprep.subr.bf16.mxu1 %v7700_v5 }
 0x1a3   : > { %1932 = vmatpush1.bf16.msra.mxu1 %v7699_v7  ;;  %v824_v45 = vpop.permute.xlu1 %823 }
 0x1a4   : > { %v827_v46 = vsel %vm11266_vm15, %v820_v41, %v824_v45  ;;  %v829_v47 = vsel %vm11266_vm15, %v824_v45, %v820_v41  ;;  %v822_v48 = vpop.permute.xlu0 %821 }
 0x1a5   : > { %v845_v49 = vmul.f32 %v836_v43, %v829_v47  ;;  %v846_v50 = vmul.f32 %v840_v44, %v827_v46  ;;  %v826_v51 = vsel %vm11266_vm15, %v818_v42, %v822_v48  ;;  %v828_v52 = vsel %vm11266_vm15, %v822_v48, %v818_v42 }
 0x1a6   : > { %v843_v53 = vmul.f32 %v836_v43, %v828_v52  ;;  %v844_v54 = vmul.f32 %v840_v44, %v826_v51 }
 0x1a7   : > { %v1494_v56 = vpop.permute.xlu1 %1493 }
 0x1a8   : > { %v1492_v57 = vpop.permute.xlu0 %1491  ;;  %v7684_v58 = vpack.c.bf16 %v846_v50, %v844_v54  ;;  %v7683_v59 = vpack.c.bf16 %v845_v49, %v843_v53 }
 0x1aa   : > { %1904 = vmatprep.subr.bf16.mxu0 %v7684_v58 }
 0x1ab   : > { %1905 = vmatpush2.bf16.msra.mxu0 %v7683_v59  ;;  %v1498_v63 = vpop.permute.xlu1 %1497 }
 0x1ac   : > { %v1501_v0 = vsel %vm11265_vm14, %v1494_v56, %v1498_v63  ;;  %v1503_v1 = vsel %vm11265_vm14, %v1498_v63, %v1494_v56  ;;  %v1496_v2 = vpop.permute.xlu0 %1495 }
 0x1ad   : > { %v1519_v3 = vmul.f32 %v1510_v60, %v1501_v0  ;;  %v1520_v8 = vmul.f32 %v1514_v61, %v1503_v1  ;;  %v1500_v9 = vsel %vm11265_vm14, %v1492_v57, %v1496_v2  ;;  %v1502_v13 = vsel %vm11265_vm14, %v1496_v2, %v1492_v57 }
 0x1ae   : > { %v1517_v14 = vmul.f32 %v1510_v60, %v1500_v9  ;;  %v1518_v15 = vmul.f32 %v1514_v61, %v1502_v13  ;;  %1907 = vmatmul.mubr.bf16.vlgmr.msra.gmra.mxu0 %v7988_v62 }
 0x1b0   : > { %v7716_v16 = vpack.c.bf16 %v1520_v8, %v1518_v15  ;;  %v7715_v17 = vpack.c.bf16 %v1519_v3, %v1517_v14 }
 0x1b2   : > { %1947 = vmatprep.subr.bf16.mxu1 %v7716_v16 }
 0x1b3   : > { %1948 = vmatpush2.bf16.msra.mxu1 %v7715_v17 }
 0x1b6   : > { %1950 = vmatmul.mubr.bf16.vlgmr.msra.gmra.mxu1 %v7991_v18 }
 0x1b8   : > { %v9023_v24 = vpop.permute.xlu1 %1598 }
 0x1b9   : > { %v1594_v19 = vpop.permute.xlu0 %1593 }
 0x26e   : > { %v1908_v20 = vpop.f32.mrf.mxu0 }
 0x26f   : > { %v1909_v21 = vadd.f32 %v1908_v20, %v1594_v19 }
 0x270   : > { %v1910_v22 = vpop.f32.mrf.mxu0 }
 0x271   : > { %v1911_v26 = vadd.f32 %v1910_v22, %v1594_v19 }
 0x272   : > { %v1912_v28 = vpop.f32.mrf.mxu0 }
 0x273   : > { %v1913_v31 = vadd.f32 %v1912_v28, %v9023_v24 }
 0x276   : > { %v1951_v23 = vpop.f32.mrf.mxu1 }
 0x277   : > { %v1952_v25 = vadd.f32 %v1951_v23, %v1909_v21  ;;  %v1914_v21 = vpop.f32.mrf.mxu0 }
 0x278   : > { %v1953_v27 = vpop.f32.mrf.mxu1 }
 0x279   : > { %v1964_v29 = vmul.f32 0.70710677, %v1952_v25  ;;  %v9025_v30 = vadd.f32 %v1953_v27, %v1911_v26  ;;  %v1960_v13 = vmul.f32 0.5, %v1952_v25  ;;  %v1915_v25 = vadd.f32 %v1914_v21, %v9023_v24 }
 0x27a   : > { %v1955_v32 = vpop.f32.mrf.mxu1 }
 0x27b   : > { %v1968_v33 = vand.u32 2147483647, %v1964_v29  ;;  %v1956_v34 = vadd.f32 %v1955_v32, %v1913_v31  ;;  %vm2044_vm14 = vcmp.lt.f32.partialorder %v1964_v29, 0.0  ;;  %v9040_v26 = vmul.f32 0.70710677, %v9025_v30 }
 0x27c   : > { %v1957_v23 = vpop.f32.mrf.mxu1 }
 0x27d   : > { %v1972_v35 = vmul.f32 0.3275911, %v1968_v33  ;;  %v1966_v36 = vmul.f32 0.70710677, %v1956_v34  ;;  %v2020_v39 = vsub.f32 0.0, %v1968_v33  ;;  %v1962_v19 = vmul.f32 0.5, %v1956_v34 }
 0x27e   : > { %v9042_v27 = vadd.f32 %v1957_v23, %v1915_v25  ;;  %v1969_v28 = vand.u32 2147483647, %v9040_v26 }
 0x27f   : > { %v1976_v37 = vadd.f32 1.0, %v1972_v35  ;;  %v1970_v4 = vand.u32 2147483647, %v1966_v36  ;;  %v2024_v40 = vmul.f32 %v2020_v39, %v1968_v33  ;;  %vm2046_vm15 = vcmp.lt.f32.partialorder %v1966_v36, 0.0 }
 0x280   : > { %v9050_v29 = vmul.f32 0.70710677, %v9042_v27  ;;  %v1973_v24 = vmul.f32 0.3275911, %v1969_v28 }
 0x281   : > { %8018 = vrcp.f32 %v1976_v37  ;;  %v1974_v6 = vmul.f32 0.3275911, %v1970_v4  ;;  %v2022_v41 = vsub.f32 0.0, %v1970_v4  ;;  %v2028_v7 = vmul.f32 1.442695, %v2024_v40 }
 0x282   : > { %v1971_v31 = vand.u32 2147483647, %v9050_v29  ;;  %v1977_v32 = vadd.f32 1.0, %v1973_v24  ;;  %v2021_v40 = vsub.f32 0.0, %v1969_v28 }
 0x283   : > { %v1978_v38 = vadd.f32 1.0, %v1974_v6  ;;  %v2026_v43 = vmul.f32 %v2022_v41, %v1970_v4 }
 0x284   : > { %v1975_v33 = vmul.f32 0.3275911, %v1971_v31 }
 0x285   : > { %8020 = vrcp.f32 %v1978_v38  ;;  %v2032_v48 = vmul.f32 1.442695, %v2026_v43 }
 0x286   : > { %8022 = vpow2.f32 %v2028_v7  ;;  %v1979_v34 = vadd.f32 1.0, %v1975_v33  ;;  %v2023_v7 = vsub.f32 0.0, %v1971_v31 }
 0x287   : > { %8024 = vpow2.f32 %v2032_v48 }
 0x288   : > { %8026 = vrcp.f32 %v1977_v32 }
 0x289   : > { %8028 = vrcp.f32 %v1979_v34 }
 0x28e   : > { %v8019_v42 = vpop.eup %8018 }
 0x28f   : > { %v1984_v5 = vmul.f32 1.0614054, %v8019_v42 }
 0x291   : > { %v1988_v44 = vadd.f32 -1.4531521, %v1984_v5  ;;  %v2025_v5 = vmul.f32 %v2021_v40, %v1969_v28 }
 0x292   : > { %v8021_v45 = vpop.eup %8020 }
 0x293   : > { %v1992_v46 = vmul.f32 %v8019_v42, %v1988_v44  ;;  %v1986_v47 = vmul.f32 1.0614054, %v8021_v45  ;;  %v8023_v60 = vpop.eup %8022 }
 0x294   : > { %v8025_v2 = vpop.eup %8024 }
 0x295   : > { %v1996_v49 = vadd.f32 1.4214138, %v1992_v46  ;;  %v1990_v50 = vadd.f32 -1.4531521, %v1986_v47  ;;  %v8027_v35 = vpop.eup %8026  ;;  %v2027_v46 = vmul.f32 %v2023_v7, %v1971_v31 }
 0x296   : > { %v1985_v36 = vmul.f32 1.0614054, %v8027_v35  ;;  %v8029_v37 = vpop.eup %8028 }
 0x297   : > { %v2000_v51 = vmul.f32 %v8019_v42, %v1996_v49  ;;  %v1994_v52 = vmul.f32 %v8021_v45, %v1990_v50  ;;  %v1987_v6 = vmul.f32 1.0614054, %v8029_v37  ;;  %v2034_v49 = vmul.f32 1.442695, %v2027_v46 }
 0x298   : > { %v1989_v4 = vadd.f32 -1.4531521, %v1985_v36 }
 0x299   : > { %v2004_v53 = vadd.f32 -0.28449672, %v2000_v51  ;;  %v1998_v54 = vadd.f32 1.4214138, %v1994_v52  ;;  %v1991_v39 = vadd.f32 -1.4531521, %v1987_v6 }
 0x29a   : > { %v1993_v38 = vmul.f32 %v8027_v35, %v1989_v4 }
 0x29b   : > { %v2008_v55 = vmul.f32 %v8019_v42, %v2004_v53  ;;  %v2002_v56 = vmul.f32 %v8021_v45, %v1998_v54 }
 0x29c   : > { %v1997_v41 = vadd.f32 1.4214138, %v1993_v38 }
 0x29d   : > { %v2012_v57 = vadd.f32 0.2548296, %v2008_v55  ;;  %v2006_v58 = vadd.f32 -0.28449672, %v2002_v56 }
 0x29e   : > { %v2001_v43 = vmul.f32 %v8027_v35, %v1997_v41 }
 0x29f   : > { %v2016_v59 = vmul.f32 %v8019_v42, %v2012_v57  ;;  %v2010_v61 = vmul.f32 %v8021_v45, %v2006_v58  ;;  %v1995_v42 = vmul.f32 %v8029_v37, %v1991_v39 }
 0x2a0   : > { %v2005_v47 = vadd.f32 -0.28449672, %v2001_v43 }
 0x2a1   : > { %v2036_v62 = vmul.f32 %v8023_v60, %v2016_v59  ;;  %v2014_v63 = vadd.f32 0.2548296, %v2010_v61  ;;  %v1999_v44 = vadd.f32 1.4214138, %v1995_v42 }
 0x2a2   : > { %v2009_v50 = vmul.f32 %v8027_v35, %v2005_v47 }
 0x2a3   : > { %v2040_v0 = vsub.f32 1.0, %v2036_v62  ;;  %v2018_v1 = vmul.f32 %v8021_v45, %v2014_v63  ;;  %v2030_v45 = vmul.f32 1.442695, %v2025_v5  ;;  %v2003_v48 = vmul.f32 %v8029_v37, %v1999_v44 }
 0x2a4   : > { %v2013_v52 = vadd.f32 0.2548296, %v2009_v50 }
 0x2a5   : > { %v2048_v3 = vsub.f32 0.0, %v2040_v0  ;;  %v2038_v8 = vmul.f32 %v8025_v2, %v2018_v1  ;;  %8030 = vpow2.f32 %v2030_v45  ;;  %v2007_v51 = vadd.f32 -0.28449672, %v2003_v48 }
 0x2a6   : > { %8032 = vpow2.f32 %v2034_v49  ;;  %v2017_v54 = vmul.f32 %v8027_v35, %v2013_v52  ;;  %v7996_v49 = vld [vmem:[#allocation9 + $0x4] ss:$16 sps:$4 sm:$0xff]  }
 0x2a7   : > { %v2052_v9 = vsel %vm2044_vm14, %v2048_v3, %v2040_v0  ;;  %v2042_v15 = vsub.f32 1.0, %v2038_v8  ;;  %v2011_v53 = vmul.f32 %v8029_v37, %v2007_v51  ;;  %vm2045_vm14 = vcmp.lt.f32.partialorder %v9040_v26, 0.0  ;;  %3456 = vmatprep.mubr.bf16.mxu1 %v7996_v49  ;;  %v7997_v51 = vld [vmem:[#allocation9 + $0xc] ss:$16 sps:$4 sm:$0xff]  }
 0x2a8   : > { %v2056_v14 = vadd.f32 1.0, %v2052_v9  ;;  %v1961_v3 = vmul.f32 0.5, %v9025_v30  ;;  %7244 = vmatprep.mubr.msk.bf16.mxu0 %vm1870_vm9, %v7997_v51 }
 0x2a9   : > { %v2050_v17 = vsub.f32 0.0, %v2042_v15  ;;  %v2015_v55 = vadd.f32 0.2548296, %v2011_v53  ;;  %v3140_v53 = vld [vmem:[%s11218_s5] sm:$0xff] }
 0x2aa   : > { %v9028_v16 = vmul.f32 %v2056_v14, %v1960_v13  ;;  %v1963_v14 = vmul.f32 0.5, %v9042_v27 }
 0x2ab   : > { %v2054_v18 = vsel %vm2046_vm15, %v2050_v17, %v2042_v15  ;;  %v2019_v58 = vmul.f32 %v8029_v37, %v2015_v55  ;;  %vm2047_vm15 = vcmp.lt.f32.partialorder %v9050_v29, 0.0 }
 0x2ac   : > { %2358 = vrot.lane.b32.xlu1 %v9028_v16, %s11283_s26  ;;  %v2058_v20 = vadd.f32 1.0, %v2054_v18 }
 0x2ae   : > { %v9032_v22 = vmul.f32 %v2058_v20, %v1962_v19 }
 0x2b0   : > { %2316 = vrot.lane.b32.xlu1 %v9028_v16, %s11281_s22  ;;  %2360 = vrot.lane.b32.xlu0 %v9032_v22, %s11283_s26  ;;  %s11378_s26 = smov 113  }
 0x2b2   : > { %v8031_v56 = vpop.eup %8030 }
 0x2b3   : > { %v2037_v57 = vmul.f32 %v8031_v56, %v2017_v54  ;;  %v8033_v59 = vpop.eup %8032 }
 0x2b4   : > { %2274 = vrot.lane.b32.xlu1 %v9028_v16, %s11279_s19  ;;  %2318 = vrot.lane.b32.xlu0 %v9032_v22, %s11281_s22  ;;  %v2039_v61 = vmul.f32 %v8033_v59, %v2019_v58  ;;  %s11377_s22 = smov 14  }
 0x2b5   : > { %v2041_v60 = vsub.f32 1.0, %v2037_v57  ;;  %v3141_v57 = vld [vmem:[%s11218_s5 + $0x8] sm:$0xff] }
 0x2b6   : > { %v2043_v63 = vsub.f32 1.0, %v2039_v61 }
 0x2b7   : > { %v2049_v62 = vsub.f32 0.0, %v2041_v60 }
 0x2b8   : > { %2232 = vrot.lane.b32.xlu1 %v9028_v16, %s11277_s2  ;;  %2276 = vrot.lane.b32.xlu0 %v9032_v22, %s11279_s19  ;;  %s11376_s19 = smov 112   ;;  %v2051_v1 = vsub.f32 0.0, %v2043_v63 }
 0x2b9   : > { %v2053_v0 = vsel %vm2045_vm14, %v2049_v62, %v2041_v60  ;;  %vm11400_vm14 = vcmp.lt.s32.totalorder %v8662_v10, 127 }
 0x2ba   : > { %v2057_v2 = vadd.f32 1.0, %v2053_v0  ;;  %v2055_v8 = vsel %vm2047_vm15, %v2051_v1, %v2043_v63  ;;  %v2370_v1 = vld [vmem:[#allocation4 + $0x7] ss:$8 sm:$0x3]  ;;  %vm11401_vm15 = vmmov %vm11400_vm14 }
 0x2bb   : > { %v2059_v13 = vadd.f32 1.0, %v2055_v8  ;;  %v2375_v8 = vrot.slane %v2370_v1, %v8670_v12 }
 0x2bc   : > { %2190 = vrot.lane.b32.xlu1 %v9028_v16, %s11275_s25  ;;  %2234 = vrot.lane.b32.xlu0 %v9032_v22, %s11277_s2  ;;  %s11375_s2 = smov 2   ;;  %v9140_v9 = vmul.f32 %v2057_v2, %v1961_v3 }
 0x2bd   : > { %v9147_v15 = vmul.f32 %v2059_v13, %v1963_v14  ;;  %v2379_v13 = vrot.slane %v2370_v1, %v8664_v11  ;;  %v2328_v14 = vld [vmem:[#allocation4 + $0x6] ss:$8 sm:$0x3] }
 0x2be   : > { %v2333_v1 = vrot.slane %v2328_v14, %v8670_v12 }
 0x2c0   : > { %2148 = vrot.lane.b32.xlu1 %v9028_v16, %s11273_s20  ;;  %2192 = vrot.lane.b32.xlu0 %v9032_v22, %s11275_s25  ;;  %s11374_s25 = smov 111  }
 0x2c4   : > { %2106 = vrot.lane.b32.xlu1 %v9028_v16, %s11271_s28  ;;  %2150 = vrot.lane.b32.xlu0 %v9032_v22, %s11273_s20  ;;  %s11373_s20 = smov 1  }
 0x2c8   : > { %2064 = vrot.lane.b32.xlu1 %v9028_v16, %s11269_s29  ;;  %2108 = vrot.lane.b32.xlu0 %v9032_v22, %s11271_s28  ;;  %s11372_s28 = smov 110  }
 0x2cc   : > { %3002 = vrot.lane.b32.xlu1 %v9028_v16, %s11267_s11  ;;  %2066 = vrot.lane.b32.xlu0 %v9032_v22, %s11269_s29  ;;  %s11371_s29 = smov 98  }
 0x2d0   : > { %2666 = vrot.lane.b32.xlu1 %v9028_v16, %s11366_s12  ;;  %3004 = vrot.lane.b32.xlu0 %v9032_v22, %s11267_s11  ;;  %s11370_s11 = smov 127  }
 0x2d4   : > { %2960 = vrot.lane.b32.xlu1 %v9028_v16, %s11367_s18  ;;  %2668 = vrot.lane.b32.xlu0 %v9032_v22, %s11366_s12 }
 0x2d8   : > { %2624 = vrot.lane.b32.xlu1 %v9028_v16, %s11368_s27  ;;  %2962 = vrot.lane.b32.xlu0 %v9032_v22, %s11367_s18 }
 0x2dc   : > { %2918 = vrot.lane.b32.xlu1 %v9028_v16, %s11369_s21  ;;  %2626 = vrot.lane.b32.xlu0 %v9032_v22, %s11368_s27 }
 0x2e0   : > { %2582 = vrot.lane.b32.xlu1 %v9028_v16, %s11370_s11  ;;  %2920 = vrot.lane.b32.xlu0 %v9032_v22, %s11369_s21 }
 0x2e4   : > { %2876 = vrot.lane.b32.xlu1 %v9028_v16, %s11371_s29  ;;  %2584 = vrot.lane.b32.xlu0 %v9032_v22, %s11370_s11 }
 0x2e8   : > { %2834 = vrot.lane.b32.xlu1 %v9028_v16, %s11372_s28  ;;  %2878 = vrot.lane.b32.xlu0 %v9032_v22, %s11371_s29 }
 0x2ec   : > { %2526 = vrot.lane.b32.xlu1 %v9028_v16, %s11373_s20  ;;  %2836 = vrot.lane.b32.xlu0 %v9032_v22, %s11372_s28 }
 0x2f0   : > { %2792 = vrot.lane.b32.xlu1 %v9028_v16, %s11374_s25  ;;  %2528 = vrot.lane.b32.xlu0 %v9032_v22, %s11373_s20 }
 0x2f4   : > { %2484 = vrot.lane.b32.xlu1 %v9028_v16, %s11375_s2  ;;  %2794 = vrot.lane.b32.xlu0 %v9032_v22, %s11374_s25 }
 0x2f8   : > { %2750 = vrot.lane.b32.xlu1 %v9028_v16, %s11376_s19  ;;  %2486 = vrot.lane.b32.xlu0 %v9032_v22, %s11375_s2 }
 0x2fc   : > { %2442 = vrot.lane.b32.xlu1 %v9028_v16, %s11377_s22  ;;  %2752 = vrot.lane.b32.xlu0 %v9032_v22, %s11376_s19 }
 0x300   : > { %2708 = vrot.lane.b32.xlu1 %v9028_v16, %s11378_s26  ;;  %2444 = vrot.lane.b32.xlu0 %v9032_v22, %s11377_s22 }
 0x304   : > { %2400 = vrot.lane.b32.xlu1 %v9028_v16, %s11379_s30  ;;  %2710 = vrot.lane.b32.xlu0 %v9032_v22, %s11378_s26 }
 0x308   : > { %3044 = vrot.lane.b32.xlu1 %v9028_v16, %s11380_s0  ;;  %2402 = vrot.lane.b32.xlu0 %v9032_v22, %s11379_s30 }
 0x30c   : > { %2362 = vrot.lane.b32.xlu1 %v9140_v9, %s11381_s1  ;;  %3046 = vrot.lane.b32.xlu0 %v9032_v22, %s11380_s0 }
 0x310   : > { %2320 = vrot.lane.b32.xlu1 %v9140_v9, %s11382_s3  ;;  %2364 = vrot.lane.b32.xlu0 %v9147_v15, %s11381_s1 }
 0x314   : > { %2278 = vrot.lane.b32.xlu1 %v9140_v9, %s11383_s4  ;;  %2322 = vrot.lane.b32.xlu0 %v9147_v15, %s11382_s3 }
 0x318   : > { %2236 = vrot.lane.b32.xlu1 %v9140_v9, %s11384_s6  ;;  %2280 = vrot.lane.b32.xlu0 %v9147_v15, %s11383_s4 }
 0x31c   : > { %2194 = vrot.lane.b32.xlu1 %v9140_v9, %s11385_s8  ;;  %2238 = vrot.lane.b32.xlu0 %v9147_v15, %s11384_s6 }
 0x31e   : > { %v9165_v30 = vpop.permute.xlu1 %2358 }
 0x320   : > { %2152 = vrot.lane.b32.xlu1 %v9140_v9, %s11386_s15  ;;  %2196 = vrot.lane.b32.xlu0 %v9147_v15, %s11385_s8 }
 0x322   : > { %v9171_v17 = vpop.permute.xlu1 %2316  ;;  %v9173_v18 = vpop.permute.xlu0 %2360 }
 0x324   : > { %2110 = vrot.lane.b32.xlu1 %v9140_v9, %s11387_s14  ;;  %2154 = vrot.lane.b32.xlu0 %v9147_v15, %s11386_s15 }
 0x326   : > { %v9179_v19 = vpop.permute.xlu1 %2274  ;;  %v9181_v20 = vpop.permute.xlu0 %2318 }
 0x328   : > { %2068 = vrot.lane.b32.xlu1 %v9140_v9, %s11388_s16  ;;  %2112 = vrot.lane.b32.xlu0 %v9147_v15, %s11387_s14 }
 0x32a   : > { %v9187_v21 = vpop.permute.xlu1 %2232  ;;  %v9189_v23 = vpop.permute.xlu0 %2276 }
 0x32c   : > { %3006 = vrot.lane.b32.xlu1 %v9140_v9, %s11389_s13  ;;  %2070 = vrot.lane.b32.xlu0 %v9147_v15, %s11388_s16 }
 0x32e   : > { %v9195_v25 = vpop.permute.xlu1 %2190  ;;  %v9197_v26 = vpop.permute.xlu0 %2234 }
 0x330   : > { %2670 = vrot.lane.b32.xlu1 %v9140_v9, %s11366_s12  ;;  %3008 = vrot.lane.b32.xlu0 %v9147_v15, %s11389_s13 }
 0x332   : > { %v9203_v27 = vpop.permute.xlu1 %2148  ;;  %v9205_v28 = vpop.permute.xlu0 %2192 }
 0x334   : > { %2964 = vrot.lane.b32.xlu1 %v9140_v9, %s11367_s18  ;;  %2672 = vrot.lane.b32.xlu0 %v9147_v15, %s11366_s12 }
 0x336   : > { %v9211_v29 = vpop.permute.xlu1 %2106  ;;  %v9213_v24 = vpop.permute.xlu0 %2150 }
 0x338   : > { %2628 = vrot.lane.b32.xlu1 %v9140_v9, %s11368_s27  ;;  %2966 = vrot.lane.b32.xlu0 %v9147_v15, %s11367_s18 }
 0x33a   : > { %v9219_v31 = vpop.permute.xlu1 %2064  ;;  %v9221_v32 = vpop.permute.xlu0 %2108 }
 0x33c   : > { %2922 = vrot.lane.b32.xlu1 %v9140_v9, %s11369_s21  ;;  %2630 = vrot.lane.b32.xlu0 %v9147_v15, %s11368_s27 }
 0x33e   : > { %v9227_v33 = vpop.permute.xlu1 %3002  ;;  %v9229_v34 = vpop.permute.xlu0 %2066 }
 0x340   : > { %2586 = vrot.lane.b32.xlu1 %v9140_v9, %s11370_s11  ;;  %2924 = vrot.lane.b32.xlu0 %v9147_v15, %s11369_s21 }
 0x342   : > { %v9235_v35 = vpop.permute.xlu1 %2666  ;;  %v9237_v36 = vpop.permute.xlu0 %3004 }
 0x344   : > { %2880 = vrot.lane.b32.xlu1 %v9140_v9, %s11371_s29  ;;  %2588 = vrot.lane.b32.xlu0 %v9147_v15, %s11370_s11 }
 0x346   : > { %v9243_v37 = vpop.permute.xlu1 %2960  ;;  %v9245_v4 = vpop.permute.xlu0 %2668 }
 0x348   : > { %2838 = vrot.lane.b32.xlu1 %v9140_v9, %s11372_s28  ;;  %2882 = vrot.lane.b32.xlu0 %v9147_v15, %s11371_s29 }
 0x34a   : > { %v9251_v6 = vpop.permute.xlu1 %2624  ;;  %v9253_v38 = vpop.permute.xlu0 %2962 }
 0x34c   : > { %2530 = vrot.lane.b32.xlu1 %v9140_v9, %s11373_s20  ;;  %2840 = vrot.lane.b32.xlu0 %v9147_v15, %s11372_s28 }
 0x34e   : > { %v9259_v39 = vpop.permute.xlu1 %2918  ;;  %v9261_v40 = vpop.permute.xlu0 %2626 }
 0x350   : > { %2796 = vrot.lane.b32.xlu1 %v9140_v9, %s11374_s25  ;;  %2532 = vrot.lane.b32.xlu0 %v9147_v15, %s11373_s20 }
 0x352   : > { %v9267_v41 = vpop.permute.xlu1 %2582  ;;  %v9269_v42 = vpop.permute.xlu0 %2920 }
 0x354   : > { %2488 = vrot.lane.b32.xlu1 %v9140_v9, %s11375_s2  ;;  %2798 = vrot.lane.b32.xlu0 %v9147_v15, %s11374_s25 }
 0x356   : > { %v9275_v5 = vpop.permute.xlu1 %2876  ;;  %v9277_v7 = vpop.permute.xlu0 %2584 }
 0x358   : > { %2754 = vrot.lane.b32.xlu1 %v9140_v9, %s11376_s19  ;;  %2490 = vrot.lane.b32.xlu0 %v9147_v15, %s11375_s2 }
 0x35a   : > { %v9283_v43 = vpop.permute.xlu1 %2834  ;;  %v9285_v44 = vpop.permute.xlu0 %2878 }
 0x35c   : > { %2446 = vrot.lane.b32.xlu1 %v9140_v9, %s11377_s22  ;;  %2756 = vrot.lane.b32.xlu0 %v9147_v15, %s11376_s19 }
 0x35e   : > { %v9291_v45 = vpop.permute.xlu1 %2526  ;;  %v9293_v46 = vpop.permute.xlu0 %2836 }
 0x360   : > { %2712 = vrot.lane.b32.xlu1 %v9140_v9, %s11378_s26  ;;  %2448 = vrot.lane.b32.xlu0 %v9147_v15, %s11377_s22 }
 0x362   : > { %v9299_v47 = vpop.permute.xlu1 %2792  ;;  %v9301_v48 = vpop.permute.xlu0 %2528 }
 0x364   : > { %2404 = vrot.lane.b32.xlu1 %v9140_v9, %s11379_s30  ;;  %2714 = vrot.lane.b32.xlu0 %v9147_v15, %s11378_s26 }
 0x366   : > { %v9307_v50 = vpop.permute.xlu1 %2484  ;;  %v9309_v52 = vpop.permute.xlu0 %2794 }
 0x368   : > { %3048 = vrot.lane.b32.xlu1 %v9140_v9, %s11380_s0  ;;  %2406 = vrot.lane.b32.xlu0 %v9147_v15, %s11379_s30 }
 0x36a   : > { %v9319_v54 = vpop.permute.xlu1 %2750  ;;  %v9321_v55 = vpop.permute.xlu0 %2486 }
 0x36b   : > { %11390 = vst [vmem:[#allocation28_spill] sm:$0xff] %v9319_v54 }
 0x36c   : > { %3144 = vperm.xlu1 %7987, %v3140_v53   ;;  %3050 = vrot.lane.b32.xlu0 %v9147_v15, %s11380_s0 }
 0x36e   : > { %v9325_v56 = vpop.permute.xlu1 %2442  ;;  %v9330_v58 = vpop.permute.xlu0 %2752 }
 0x36f   : > { %11391 = vst [vmem:[#allocation29_spill] sm:$0xff] %v9325_v56  ;;  %11392 = vst [vmem:[#allocation30_spill] sm:$0xff] %v9330_v58  ;;  %v2286_v56 = vld [vmem:[#allocation4 + $0x5] ss:$8 sm:$0x3] }
 0x370   : > { %3149 = vperm.xlu0 %7986, %v3141_v57  }
 0x372   : > { %v9332_v59 = vpop.permute.xlu1 %2708  ;;  %v9334_v60 = vpop.permute.xlu0 %2444 }
 0x373   : > { %11393 = vst [vmem:[#allocation31_spill] sm:$0xff] %v9332_v59  ;;  %11394 = vst [vmem:[#allocation32_spill] sm:$0xff] %v9334_v60 }
 0x376   : > { %v9336_v61 = vpop.permute.xlu1 %2400  ;;  %v9338_v62 = vpop.permute.xlu0 %2710 }
 0x377   : > { %11395 = vst [vmem:[#allocation33_spill] sm:$0xff] %v9336_v61  ;;  %11396 = vst [vmem:[#allocation34_spill] sm:$0xff] %v9338_v62 }
 0x37a   : > { %v9340_v63 = vpop.permute.xlu1 %3044  ;;  %v9342_v0 = vpop.permute.xlu0 %2402 }
 0x37b   : > { %11397 = vst [vmem:[#allocation35_spill] sm:$0xff] %v9340_v63  ;;  %11398 = vst [vmem:[#allocation36_spill] sm:$0xff] %v9342_v0  ;;  %v2337_v0 = vrot.slane %v2328_v14, %v8664_v11 }
 0x37e   : > { %v2363_v2 = vpop.permute.xlu1 %2362  ;;  %v9344_v3 = vpop.permute.xlu0 %3046 }
 0x37f   : > { %11399 = vst [vmem:[#allocation37_spill] sm:$0xff] %v9344_v3  ;;  %v2366_v49 = vsel %vm781_vm0, %v9165_v30, %v2363_v2  ;;  %v2368_v51 = vsel %vm781_vm0, %v2363_v2, %v9165_v30 }
 0x380   : > { %v2382_v61 = vmul.f32 %v2375_v8, %v2368_v51  ;;  %v2383_v62 = vmul.f32 %v2379_v13, %v2366_v49 }
 0x382   : > { %v2321_v53 = vpop.permute.xlu1 %2320  ;;  %v2365_v57 = vpop.permute.xlu0 %2364 }
 0x383   : > { %v2367_v63 = vsel %vm781_vm0, %v9173_v18, %v2365_v57  ;;  %v2369_v3 = vsel %vm781_vm0, %v2365_v57, %v9173_v18  ;;  %v2324_v30 = vsel %vm737_vm1, %v9171_v17, %v2321_v53  ;;  %v2326_v2 = vsel %vm737_vm1, %v2321_v53, %v9171_v17 }
 0x384   : > { %v2384_v59 = vmul.f32 %v2375_v8, %v2369_v3  ;;  %v2385_v60 = vmul.f32 %v2379_v13, %v2367_v63  ;;  %v2291_v3 = vrot.slane %v2286_v56, %v8670_v12  ;;  %v2295_v8 = vrot.slane %v2286_v56, %v8664_v11 }
 0x385   : > { %v2340_v13 = vmul.f32 %v2333_v1, %v2326_v2  ;;  %v2341_v49 = vmul.f32 %v2337_v0, %v2324_v30 }
 0x386   : > { %v2279_v58 = vpop.permute.xlu1 %2278  ;;  %v7731_v54 = vpack.c.bf16 %v2384_v59, %v2382_v61  ;;  %v2323_v18 = vpop.permute.xlu0 %2322  ;;  %v7732_v57 = vpack.c.bf16 %v2385_v60, %v2383_v62  ;;  %v2244_v59 = vld [vmem:[#allocation4 + $0x4] ss:$8 sm:$0x3] }
 0x387   : > { %v2325_v14 = vsel %vm737_vm1, %v9181_v20, %v2323_v18  ;;  %v2327_v63 = vsel %vm737_vm1, %v2323_v18, %v9181_v20  ;;  %v2282_v60 = vsel %vm693_vm2, %v9179_v19, %v2279_v58  ;;  %v2284_v61 = vsel %vm693_vm2, %v2279_v58, %v9179_v19  ;;  %v2202_v58 = vld [vmem:[#allocation4 + $0x3] ss:$8 sm:$0x3] }
 0x388   : > { %v2342_v51 = vmul.f32 %v2333_v1, %v2327_v63  ;;  %v2343_v17 = vmul.f32 %v2337_v0, %v2325_v14  ;;  %3424 = vmatprep.subr.bf16.mxu1 %v7732_v57  ;;  %v2249_v1 = vrot.slane %v2244_v59, %v8670_v12  ;;  %v2253_v30 = vrot.slane %v2244_v59, %v8664_v11 }
 0x389   : > { %3425 = vmatpush1.bf16.msra.mxu1 %v7731_v54  ;;  %v2298_v2 = vmul.f32 %v2291_v3, %v2284_v61  ;;  %v2299_v57 = vmul.f32 %v2295_v8, %v2282_v60  ;;  %v2211_v59 = vrot.slane %v2202_v58, %v8664_v11 }
 0x38a   : > { %v2237_v20 = vpop.permute.xlu1 %2236  ;;  %v7729_v62 = vpack.c.bf16 %v2342_v51, %v2340_v13  ;;  %v2281_v53 = vpop.permute.xlu0 %2280  ;;  %v7730_v18 = vpack.c.bf16 %v2343_v17, %v2341_v49  ;;  %v2207_v17 = vrot.slane %v2202_v58, %v8670_v12 }
 0x38b   : > { %v2283_v56 = vsel %vm693_vm2, %v9189_v23, %v2281_v53  ;;  %v2285_v0 = vsel %vm693_vm2, %v2281_v53, %v9189_v23  ;;  %v2240_v14 = vsel %vm649_vm3, %v9187_v21, %v2237_v20  ;;  %v2242_v63 = vsel %vm649_vm3, %v2237_v20, %v9187_v21 }
 0x38c   : > { %v2300_v19 = vmul.f32 %v2291_v3, %v2285_v0  ;;  %v2301_v54 = vmul.f32 %v2295_v8, %v2283_v56  ;;  %3426 = vmatprep.subr.bf16.mxu1 %v7730_v18  ;;  %v2256_v60 = vmul.f32 %v2249_v1, %v2242_v63  ;;  %v2257_v61 = vmul.f32 %v2253_v30, %v2240_v14  ;;  %v2118_v63 = vld [vmem:[#allocation4 + $0x1] ss:$8 sm:$0x3] }
 0x38d   : > { %3427 = vmatpush1.bf16.msra.mxu1 %v7729_v62  ;;  %v2160_v62 = vld [vmem:[#allocation4 + $0x2] ss:$8 sm:$0x3] }
 0x38e   : > { %v2195_v23 = vpop.permute.xlu1 %2194  ;;  %v7727_v13 = vpack.c.bf16 %v2300_v19, %v2298_v2  ;;  %v2239_v49 = vpop.permute.xlu0 %2238  ;;  %v7728_v51 = vpack.c.bf16 %v2301_v54, %v2299_v57  ;;  %v2165_v57 = vrot.slane %v2160_v62, %v8670_v12  ;;  %v2169_v19 = vrot.slane %v2160_v62, %v8664_v11  ;;  %v2076_v62 = vld [vmem:[#allocation4] ss:$8 sm:$0x3] }
 0x38f   : > { %v2241_v3 = vsel %vm649_vm3, %v9197_v26, %v2239_v49  ;;  %v2243_v8 = vsel %vm649_vm3, %v2239_v49, %v9197_v26  ;;  %v2198_v53 = vsel %vm605_vm4, %v9195_v25, %v2195_v23  ;;  %v2200_v18 = vsel %vm605_vm4, %v2195_v23, %v9195_v25 }
 0x390   : > { %v2258_v21 = vmul.f32 %v2249_v1, %v2243_v8  ;;  %v2259_v20 = vmul.f32 %v2253_v30, %v2241_v3  ;;  %3428 = vmatprep.subr.bf16.mxu1 %v7728_v51  ;;  %v2214_v54 = vmul.f32 %v2207_v17, %v2200_v18  ;;  %v2215_v58 = vmul.f32 %v2211_v59, %v2198_v53 }
 0x391   : > { %3429 = vmatpush1.bf16.msra.mxu1 %v7727_v13 }
 0x392   : > { %v2153_v26 = vpop.permute.xlu1 %2152  ;;  %v7725_v56 = vpack.c.bf16 %v2258_v21, %v2256_v60  ;;  %v2197_v0 = vpop.permute.xlu0 %2196  ;;  %v7726_v2 = vpack.c.bf16 %v2259_v20, %v2257_v61  ;;  %v2127_v60 = vrot.slane %v2118_v63, %v8664_v11 }
 0x393   : > { %v2199_v1 = vsel %vm605_vm4, %v9205_v28, %v2197_v0  ;;  %v2201_v30 = vsel %vm605_vm4, %v2197_v0, %v9205_v28  ;;  %v2156_v23 = vsel %vm561_vm5, %v9203_v27, %v2153_v26  ;;  %v2158_v13 = vsel %vm561_vm5, %v2153_v26, %v9203_v27 }
 0x394   : > { %v2216_v25 = vmul.f32 %v2207_v17, %v2201_v30  ;;  %v2217_v14 = vmul.f32 %v2211_v59, %v2199_v1  ;;  %3430 = vmatprep.subr.bf16.mxu1 %v7726_v2  ;;  %v2123_v59 = vrot.slane %v2118_v63, %v8670_v12  ;;  %v2172_v61 = vmul.f32 %v2165_v57, %v2158_v13 }
 0x395   : > { %3431 = vmatpush1.bf16.msra.mxu1 %v7725_v56  ;;  %v2173_v21 = vmul.f32 %v2169_v19, %v2156_v23  ;;  %v2081_v30 = vrot.slane %v2076_v62, %v8670_v12 }
 0x396   : > { %v2111_v28 = vpop.permute.xlu1 %2110  ;;  %v7723_v49 = vpack.c.bf16 %v2216_v25, %v2214_v54  ;;  %v2155_v51 = vpop.permute.xlu0 %2154  ;;  %v7724_v3 = vpack.c.bf16 %v2217_v14, %v2215_v58  ;;  %v3014_v25 = vld [vmem:[#allocation4 + $0x27] ss:$8 sm:$0x3] }
 0x397   : > { %v2157_v8 = vsel %vm561_vm5, %v9213_v24, %v2155_v51  ;;  %v2159_v17 = vsel %vm561_vm5, %v2155_v51, %v9213_v24  ;;  %v2114_v53 = vsel %vm517_vm6, %v9211_v29, %v2111_v28  ;;  %v2116_v18 = vsel %vm517_vm6, %v2111_v28, %v9211_v29 }
 0x398   : > { %v2174_v27 = vmul.f32 %v2165_v57, %v2159_v17  ;;  %v2175_v20 = vmul.f32 %v2169_v19, %v2157_v8  ;;  %3432 = vmatprep.subr.bf16.mxu1 %v7724_v3  ;;  %v2085_v57 = vrot.slane %v2076_v62, %v8664_v11  ;;  %v2130_v19 = vmul.f32 %v2123_v59, %v2116_v18 }
 0x399   : > { %3433 = vmatpush1.bf16.msra.mxu1 %v7723_v49  ;;  %v2131_v54 = vmul.f32 %v2127_v60, %v2114_v53  ;;  %v3019_v3 = vrot.slane %v3014_v25, %v8670_v12  ;;  %v3023_v8 = vrot.slane %v3014_v25, %v8664_v11 }
 0x39a   : > { %v2069_v24 = vpop.permute.xlu1 %2068  ;;  %v7721_v26 = vpack.c.bf16 %v2174_v27, %v2172_v61  ;;  %v2113_v56 = vpop.permute.xlu0 %2112  ;;  %v7722_v0 = vpack.c.bf16 %v2175_v20, %v2173_v21  ;;  %v2678_v61 = vld [vmem:[#allocation4 + $0x17] ss:$8 sm:$0x3] }
 0x39b   : > { %v2115_v2 = vsel %vm517_vm6, %v9221_v32, %v2113_v56  ;;  %v2117_v1 = vsel %vm517_vm6, %v2113_v56, %v9221_v32  ;;  %v2072_v14 = vsel %vm474_vm7, %v9219_v31, %v2069_v24  ;;  %v2074_v63 = vsel %vm474_vm7, %v2069_v24, %v9219_v31 }
 0x39c   : > { %v2132_v29 = vmul.f32 %v2123_v59, %v2117_v1  ;;  %v2133_v58 = vmul.f32 %v2127_v60, %v2115_v2  ;;  %3434 = vmatprep.subr.bf16.mxu1 %v7722_v0  ;;  %v2088_v17 = vmul.f32 %v2081_v30, %v2074_v63  ;;  %v2089_v59 = vmul.f32 %v2085_v57, %v2072_v14 }
 0x39d   : > { %3435 = vmatpush1.bf16.msra.mxu1 %v7721_v26  ;;  %v2683_v26 = vrot.slane %v2678_v61, %v8670_v12  ;;  %v2687_v56 = vrot.slane %v2678_v61, %v8664_v11 }
 0x39e   : > { %v3007_v32 = vpop.permute.xlu1 %3006  ;;  %v7719_v23 = vpack.c.bf16 %v2132_v29, %v2130_v19  ;;  %v2071_v13 = vpop.permute.xlu0 %2070  ;;  %v7720_v28 = vpack.c.bf16 %v2133_v58, %v2131_v54 }
 0x39f   : > { %v2073_v49 = vsel %vm474_vm7, %v9229_v34, %v2071_v13  ;;  %v2075_v51 = vsel %vm474_vm7, %v2071_v13, %v9229_v34  ;;  %v3010_v21 = vsel %vm1455_vm8, %v9227_v33, %v3007_v32  ;;  %v3012_v27 = vsel %vm1455_vm8, %v3007_v32, %v9227_v33 }
 0x3a0   : > { %v2090_v31 = vmul.f32 %v2081_v30, %v2075_v51  ;;  %v2091_v60 = vmul.f32 %v2085_v57, %v2073_v49  ;;  %3436 = vmatprep.subr.bf16.mxu1 %v7720_v28  ;;  %v3026_v0 = vmul.f32 %v3019_v3, %v3010_v21  ;;  %v3027_v2 = vmul.f32 %v3023_v8, %v3012_v27  ;;  %v2972_v30 = vld [vmem:[#allocation4 + $0x26] ss:$8 sm:$0x3]  ;;  %v2636_v49 = vld [vmem:[#allocation4 + $0x16] ss:$8 sm:$0x3] }
 0x3a1   : > { %3437 = vmatpush1.bf16.msra.mxu1 %v7719_v23  ;;  %v2977_v63 = vrot.slane %v2972_v30, %v8670_v12  ;;  %v2981_v32 = vrot.slane %v2972_v30, %v8664_v11  ;;  %v2641_v61 = vrot.slane %v2636_v49, %v8670_v12  ;;  %v2645_v21 = vrot.slane %v2636_v49, %v8664_v11 }
 0x3a2   : > { %v2671_v34 = vpop.permute.xlu1 %2670  ;;  %v7717_v20 = vpack.c.bf16 %v2090_v31, %v2088_v17  ;;  %v3009_v62 = vpop.permute.xlu0 %3008  ;;  %v7718_v53 = vpack.c.bf16 %v2091_v60, %v2089_v59 }
 0x3a3   : > { %v3011_v18 = vsel %vm1455_vm8, %v9237_v36, %v3009_v62  ;;  %v3013_v24 = vsel %vm1455_vm8, %v3009_v62, %v9237_v36  ;;  %v2674_v57 = vsel %vm1103_vm10, %v9235_v35, %v2671_v34  ;;  %v2676_v19 = vsel %vm1103_vm10, %v2671_v34, %v9235_v35  ;;  %v2930_v62 = vld [vmem:[#allocation4 + $0x25] ss:$8 sm:$0x3] }
 0x3a4   : > { %v3028_v33 = vmul.f32 %v3019_v3, %v3011_v18  ;;  %v3029_v1 = vmul.f32 %v3023_v8, %v3013_v24  ;;  %3438 = vmatprep.subr.bf16.mxu1 %v7718_v53  ;;  %v2690_v23 = vmul.f32 %v2683_v26, %v2674_v57  ;;  %v2691_v13 = vmul.f32 %v2687_v56, %v2676_v19 }
 0x3a5   : > { %3439 = vmatpush1.bf16.msra.mxu1 %v7717_v20 }
 0x3a6   : > { %v2965_v36 = vpop.permute.xlu1 %2964  ;;  %v7763_v54 = vpack.c.bf16 %v3028_v33, %v3026_v0  ;;  %v2673_v29 = vpop.permute.xlu0 %2672  ;;  %v7764_v58 = vpack.c.bf16 %v3029_v1, %v3027_v2  ;;  %v2935_v33 = vrot.slane %v2930_v62, %v8670_v12  ;;  %v2939_v1 = vrot.slane %v2930_v62, %v8664_v11 }
 0x3a7   : > { %v2675_v25 = vsel %vm1103_vm10, %v9245_v4, %v2673_v29  ;;  %v2677_v14 = vsel %vm1103_vm10, %v2673_v29, %v9245_v4  ;;  %v2968_v51 = vsel %vm1411_vm11, %v9243_v37, %v2965_v36  ;;  %v2970_v3 = vsel %vm1411_vm11, %v2965_v36, %v9243_v37  ;;  %v2594_v36 = vld [vmem:[#allocation4 + $0x15] ss:$8 sm:$0x3] }
 0x3a8   : > { %v2692_v35 = vmul.f32 %v2683_v26, %v2675_v25  ;;  %v2693_v28 = vmul.f32 %v2687_v56, %v2677_v14  ;;  %3467 = vmatprep.subr.bf16.mxu0 %v7764_v58  ;;  %v2984_v27 = vmul.f32 %v2977_v63, %v2968_v51  ;;  %v2985_v34 = vmul.f32 %v2981_v32, %v2970_v3  ;;  %v2888_v51 = vld [vmem:[#allocation4 + $0x24] ss:$8 sm:$0x3] }
 0x3a9   : > { %3468 = vmatpush1.bf16.msra.mxu0 %v7763_v54 }
 0x3aa   : > { %v2629_v4 = vpop.permute.xlu1 %2628  ;;  %v7747_v8 = vpack.c.bf16 %v2692_v35, %v2690_v23  ;;  %v2967_v17 = vpop.permute.xlu0 %2966  ;;  %v7748_v59 = vpack.c.bf16 %v2693_v28, %v2691_v13  ;;  %v2599_v23 = vrot.slane %v2594_v36, %v8670_v12  ;;  %v2603_v13 = vrot.slane %v2594_v36, %v8664_v11 }
 0x3ab   : > { %v2969_v31 = vsel %vm1411_vm11, %v9253_v38, %v2967_v17  ;;  %v2971_v60 = vsel %vm1411_vm11, %v2967_v17, %v9253_v38  ;;  %v2632_v53 = vsel %vm11308_vm12, %v9251_v6, %v2629_v4  ;;  %v2634_v18 = vsel %vm11308_vm12, %v2629_v4, %v9251_v6 }
 0x3ac   : > { %v2986_v37 = vmul.f32 %v2977_v63, %v2969_v31  ;;  %v2987_v20 = vmul.f32 %v2981_v32, %v2971_v60  ;;  %3440 = vmatprep.subr.bf16.mxu1 %v7748_v59  ;;  %v2648_v30 = vmul.f32 %v2641_v61, %v2632_v53  ;;  %v2649_v57 = vmul.f32 %v2645_v21, %v2634_v18 }
 0x3ad   : > { %3441 = vmatpush2.bf16.msra.mxu1 %v7747_v8 }
 0x3ae   : > { %v2923_v38 = vpop.permute.xlu1 %2922  ;;  %v7761_v24 = vpack.c.bf16 %v2986_v37, %v2984_v27  ;;  %v2631_v26 = vpop.permute.xlu0 %2630  ;;  %v7762_v56 = vpack.c.bf16 %v2987_v20, %v2985_v34  ;;  %v2846_v20 = vld [vmem:[#allocation4 + $0x23] ss:$8 sm:$0x3] }
 0x3af   : > { %v2633_v0 = vsel %vm11308_vm12, %v9261_v40, %v2631_v26  ;;  %v2635_v2 = vsel %vm11308_vm12, %v2631_v26, %v9261_v40  ;;  %v2926_v54 = vsel %vm11307_vm13, %v9259_v39, %v2923_v38  ;;  %v2928_v29 = vsel %vm11307_vm13, %v2923_v38, %v9259_v39 }
 0x3b0   : > { %v2650_v6 = vmul.f32 %v2641_v61, %v2633_v0  ;;  %v2651_v19 = vmul.f32 %v2645_v21, %v2635_v2  ;;  %3469 = vmatprep.subr.bf16.mxu0 %v7762_v56  ;;  %v2942_v35 = vmul.f32 %v2935_v33, %v2926_v54  ;;  %v2943_v28 = vmul.f32 %v2939_v1, %v2928_v29 }
 0x3b1   : > { %3470 = vmatpush1.bf16.msra.mxu0 %v7761_v24  ;;  %v2893_v61 = vrot.slane %v2888_v51, %v8670_v12  ;;  %v2897_v21 = vrot.slane %v2888_v51, %v8664_v11  ;;  %v7742_v26 = vpack.c.bf16 %v9147_v15, %v9140_v9  ;;  %v2851_v2 = vrot.slane %v2846_v20, %v8670_v12 }
 0x3b2   : > { %v2587_v40 = vpop.permute.xlu1 %2586  ;;  %v7745_v58 = vpack.c.bf16 %v2650_v6, %v2648_v30  ;;  %v2925_v25 = vpop.permute.xlu0 %2924  ;;  %v7746_v14 = vpack.c.bf16 %v2651_v19, %v2649_v57  ;;  %v2538_v6 = vld [vmem:[#allocation4 + $0x13] ss:$8 sm:$0x3]  ;;  %v7741_v29 = vpack.c.bf16 %v9032_v22, %v9028_v16 }
 0x3b3   : > { %v2927_v63 = vsel %vm11307_vm13, %v9269_v42, %v2925_v25  ;;  %v2929_v32 = vsel %vm11307_vm13, %v2925_v25, %v9269_v42  ;;  %v2590_v3 = vsel %vm11400_vm14, %v9267_v41, %v2587_v40  ;;  %v2592_v4 = vsel %vm11401_vm15, %v2587_v40, %v9267_v41  ;;  %vm11402_vm13 = vmmov %vm11400_vm14 }
 0x3b4   : > { %v2944_v39 = vmul.f32 %v2935_v33, %v2927_v63  ;;  %v2945_v49 = vmul.f32 %v2939_v1, %v2929_v32  ;;  %3442 = vmatprep.subr.bf16.mxu1 %v7746_v14  ;;  %vm11403_vm12 = vmmov %vm11402_vm13  ;;  %v2606_v27 = vmul.f32 %v2599_v23, %v2590_v3  ;;  %v2607_v34 = vmul.f32 %v2603_v13, %v2592_v4 }
 0x3b5   : > { %3443 = vmatpush2.bf16.msra.mxu1 %v7745_v58  ;;  %vm11404_vm14 = vcmp.lt.s32.totalorder %v8662_v10, 98  ;;  %v2543_v25 = vrot.slane %v2538_v6, %v8670_v12 }
 0x3b6   : > { %v2881_v42 = vpop.permute.xlu1 %2880  ;;  %v7759_v8 = vpack.c.bf16 %v2944_v39, %v2942_v35  ;;  %v2589_v17 = vpop.permute.xlu0 %2588  ;;  %v7760_v59 = vpack.c.bf16 %v2945_v49, %v2943_v28 }
 0x3b7   : > { %v2591_v31 = vsel %vm11402_vm13, %v9277_v7, %v2589_v17  ;;  %v2593_v60 = vsel %vm11403_vm12, %v2589_v17, %v9277_v7  ;;  %v2884_v62 = vsel %vm11404_vm14, %v9275_v5, %v2881_v42  ;;  %vm11405_vm13 = vmmov %vm11404_vm14  ;;  %vm11408_vm14 = vcmp.lt.s32.totalorder %v8662_v10, 110 }
 0x3b8   : > { %v2608_v41 = vmul.f32 %v2599_v23, %v2591_v31  ;;  %v2609_v37 = vmul.f32 %v2603_v13, %v2593_v60  ;;  %3471 = vmatprep.subr.bf16.mxu0 %v7760_v59  ;;  %v2886_v53 = vsel %vm11405_vm13, %v2881_v42, %v9275_v5  ;;  %vm11406_vm12 = vmmov %vm11405_vm13  ;;  %v2855_v5 = vrot.slane %v2846_v20, %v8664_v11  ;;  %v2804_v13 = vld [vmem:[#allocation4 + $0x22] ss:$8 sm:$0x3]  ;;  %v2496_v59 = vld [vmem:[#allocation4 + $0x12] ss:$8 sm:$0x3] }
 0x3b9   : > { %3472 = vmatpush1.bf16.msra.mxu0 %v7759_v8  ;;  %vm11407_vm15 = vmmov %vm11406_vm12  ;;  %v2900_v33 = vmul.f32 %v2893_v61, %v2884_v62  ;;  %v2901_v1 = vmul.f32 %v2897_v21, %v2886_v53  ;;  %v2809_v3 = vrot.slane %v2804_v13, %v8670_v12  ;;  %v2813_v4 = vrot.slane %v2804_v13, %v8664_v11 }
 0x3ba   : > { %v2839_v7 = vpop.permute.xlu1 %2838  ;;  %v7743_v18 = vpack.c.bf16 %v2608_v41, %v2606_v27  ;;  %v2883_v38 = vpop.permute.xlu0 %2882  ;;  %v7744_v24 = vpack.c.bf16 %v2609_v37, %v2607_v34  ;;  %vm11409_vm13 = vmmov %vm11408_vm14  ;;  %v2501_v37 = vrot.slane %v2496_v59, %v8670_v12  ;;  %v2505_v20 = vrot.slane %v2496_v59, %v8664_v11 }
 0x3bb   : > { %v2885_v56 = vsel %vm11406_vm12, %v9285_v44, %v2883_v38  ;;  %v2887_v0 = vsel %vm11407_vm15, %v2883_v38, %v9285_v44  ;;  %v2842_v9 = vsel %vm11408_vm14, %v9283_v43, %v2839_v7  ;;  %v2844_v15 = vsel %vm11409_vm13, %v2839_v7, %v9283_v43  ;;  %vm11410_vm12 = vmmov %vm11409_vm13 }
 0x3bc   : > { %v2902_v30 = vmul.f32 %v2893_v61, %v2885_v56  ;;  %v2903_v57 = vmul.f32 %v2897_v21, %v2887_v0  ;;  %3444 = vmatprep.subr.bf16.mxu1 %v7744_v24  ;;  %vm11411_vm15 = vmmov %vm11410_vm12  ;;  %v2547_v43 = vrot.slane %v2538_v6, %v8664_v11  ;;  %v2858_v14 = vmul.f32 %v2851_v2, %v2842_v9  ;;  %v2454_v9 = vld [vmem:[#allocation4 + $0x11] ss:$8 sm:$0x3] }
 0x3bd   : > { %3445 = vmatpush2.bf16.msra.mxu1 %v7743_v18  ;;  %v2859_v63 = vmul.f32 %v2855_v5, %v2844_v15  ;;  %vm11412_vm14 = vcmp.lt.s32.totalorder %v8662_v10, 1  ;;  %v2762_v18 = vld [vmem:[#allocation4 + $0x21] ss:$8 sm:$0x3] }
 0x3be   : > { %v2531_v44 = vpop.permute.xlu1 %2530  ;;  %v7757_v19 = vpack.c.bf16 %v2902_v30, %v2900_v33  ;;  %v2841_v36 = vpop.permute.xlu0 %2840  ;;  %3446 = vmatprep.subr.bf16.mxu1 %v7742_v26  ;;  %v7758_v54 = vpack.c.bf16 %v2903_v57, %v2901_v1  ;;  %vm11413_vm13 = vmmov %vm11412_vm14  ;;  %v2767_v33 = vrot.slane %v2762_v18, %v8670_v12  ;;  %v2771_v1 = vrot.slane %v2762_v18, %v8664_v11  ;;  %v11424_v15 = vld [vmem:[#allocation28_spill] sm:$0xff] }
 0x3bf   : > { %v2843_v40 = vsel %vm11410_vm12, %v9293_v46, %v2841_v36  ;;  %v2845_v58 = vsel %vm11411_vm15, %v2841_v36, %v9293_v46  ;;  %v2534_v16 = vsel %vm11412_vm14, %v9291_v45, %v2531_v44  ;;  %v2536_v22 = vsel %vm11413_vm13, %v2531_v44, %v9291_v45  ;;  %vm11414_vm12 = vmmov %vm11413_vm13 }
 0x3c0   : > { %v2860_v32 = vmul.f32 %v2851_v2, %v2843_v40  ;;  %v2861_v23 = vmul.f32 %v2855_v5, %v2845_v58  ;;  %3473 = vmatprep.subr.bf16.mxu0 %v7758_v54  ;;  %vm11415_vm15 = vmmov %vm11414_vm12  ;;  %v2550_v42 = vmul.f32 %v2543_v25, %v2536_v22  ;;  %v2551_v45 = vmul.f32 %v2547_v43, %v2534_v16  ;;  %v11427_v40 = vld [vmem:[#allocation30_spill] sm:$0xff]  ;;  %v2720_v16 = vld [vmem:[#allocation4 + $0x20] ss:$8 sm:$0x3] }
 0x3c1   : > { %3447 = vmatpush2.bf16.msra.mxu1 %v7741_v29  ;;  %3474 = vmatpush1.bf16.msra.mxu0 %v7757_v19  ;;  %vm11416_vm14 = vcmp.lt.s32.totalorder %v8662_v10, 111  ;;  %v11430_v22 = vld [vmem:[#allocation29_spill] sm:$0xff] }
 0x3c2   : > { %v2797_v46 = vpop.permute.xlu1 %2796  ;;  %v7755_v35 = vpack.c.bf16 %v2860_v32, %v2858_v14  ;;  %v2533_v28 = vpop.permute.xlu0 %2532  ;;  %v7756_v39 = vpack.c.bf16 %v2861_v23, %v2859_v63  ;;  %vm11417_vm13 = vmmov %vm11416_vm14  ;;  %v2463_v14 = vrot.slane %v2454_v9, %v8664_v11 }
 0x3c3   : > { %v2535_v49 = vsel %vm11414_vm12, %v9301_v48, %v2533_v28  ;;  %v2537_v51 = vsel %vm11415_vm15, %v2533_v28, %v9301_v48  ;;  %v2800_v31 = vsel %vm11416_vm14, %v9299_v47, %v2797_v46  ;;  %v2802_v60 = vsel %vm11417_vm13, %v2797_v46, %v9299_v47  ;;  %vm11418_vm12 = vmmov %vm11417_vm13 }
 0x3c4   : > { %v2552_v8 = vmul.f32 %v2543_v25, %v2537_v51  ;;  %v2553_v17 = vmul.f32 %v2547_v43, %v2535_v49  ;;  %3475 = vmatprep.subr.bf16.mxu0 %v7756_v39  ;;  %vm11419_vm15 = vmmov %vm11418_vm12  ;;  %v2816_v62 = vmul.f32 %v2809_v3, %v2800_v31  ;;  %v2817_v53 = vmul.f32 %v2813_v4, %v2802_v60 }
 0x3c5   : > { %3476 = vmatpush1.bf16.msra.mxu0 %v7755_v35  ;;  %vm11420_vm14 = vcmp.lt.s32.totalorder %v8662_v10, 2  ;;  %v2459_v43 = vrot.slane %v2454_v9, %v8670_v12 }
 0x3c6   : > { %v2489_v48 = vpop.permute.xlu1 %2488  ;;  %v7739_v61 = vpack.c.bf16 %v2552_v8, %v2550_v42  ;;  %v2799_v21 = vpop.permute.xlu0 %2798  ;;  %v7740_v27 = vpack.c.bf16 %v2553_v17, %v2551_v45  ;;  %vm11421_vm13 = vmmov %vm11420_vm14  ;;  %v2725_v45 = vrot.slane %v2720_v16, %v8670_v12  ;;  %v2729_v8 = vrot.slane %v2720_v16, %v8664_v11 }
 0x3c7   : > { %v2801_v34 = vsel %vm11418_vm12, %v9309_v52, %v2799_v21  ;;  %v2803_v41 = vsel %vm11419_vm15, %v2799_v21, %v9309_v52  ;;  %v2492_v38 = vsel %vm11420_vm14, %v9307_v50, %v2489_v48  ;;  %v2494_v24 = vsel %vm11421_vm13, %v2489_v48, %v9307_v50  ;;  %vm11422_vm12 = vmmov %vm11421_vm13  ;;  %v2412_v48 = vld [vmem:[#allocation4 + $0x10] ss:$8 sm:$0x3] }
 0x3c8   : > { %v2818_v47 = vmul.f32 %v2809_v3, %v2801_v34  ;;  %v2819_v7 = vmul.f32 %v2813_v4, %v2803_v41  ;;  %3448 = vmatprep.subr.bf16.mxu1 %v7740_v27  ;;  %vm11423_vm15 = vmmov %vm11422_vm12  ;;  %v2508_v30 = vmul.f32 %v2501_v37, %v2494_v24  ;;  %v2509_v57 = vmul.f32 %v2505_v20, %v2492_v38  ;;  %v11433_v3 = vld [vmem:[#allocation32_spill] sm:$0xff] }
 0x3c9   : > { %3449 = vmatpush2.bf16.msra.mxu1 %v7739_v61  ;;  %vm11425_vm14 = vcmp.lt.s32.totalorder %v8662_v10, 112  ;;  %v11436_v61 = vld [vmem:[#allocation31_spill] sm:$0xff]  ;;  %v2421_v18 = vrot.slane %v2412_v48, %v8664_v11 }
 0x3ca   : > { %v2755_v52 = vpop.permute.xlu1 %2754  ;;  %v7753_v26 = vpack.c.bf16 %v2818_v47, %v2816_v62  ;;  %v2491_v56 = vpop.permute.xlu0 %2490  ;;  %v7754_v0 = vpack.c.bf16 %v2819_v7, %v2817_v53  ;;  %vm11426_vm13 = vmmov %vm11425_vm14  ;;  %v11439_v62 = vld [vmem:[#allocation34_spill] sm:$0xff]  ;;  %v2417_v7 = vrot.slane %v2412_v48, %v8670_v12 }
 0x3cb   : > { %v2493_v2 = vsel %vm11422_vm12, %v9321_v55, %v2491_v56  ;;  %v2495_v5 = vsel %vm11423_vm15, %v2491_v56, %v9321_v55  ;;  %v2758_v44 = vsel %vm11425_vm14, %v11424_v15, %v2755_v52  ;;  %v2760_v19 = vsel %vm11426_vm13, %v2755_v52, %v11424_v15  ;;  %vm11428_vm12 = vmmov %vm11426_vm13  ;;  %v3056_v56 = vld [vmem:[#allocation4 + $0x30] ss:$8 sm:$0x3] }
 0x3cc   : > { %v2510_v50 = vmul.f32 %v2501_v37, %v2495_v5  ;;  %v2511_v6 = vmul.f32 %v2505_v20, %v2493_v2  ;;  %3477 = vmatprep.subr.bf16.mxu0 %v7754_v0  ;;  %vm11429_vm15 = vmmov %vm11428_vm12  ;;  %v2774_v63 = vmul.f32 %v2767_v33, %v2758_v44  ;;  %v2775_v32 = vmul.f32 %v2771_v1, %v2760_v19  ;;  %v11442_v0 = vld [vmem:[#allocation33_spill] sm:$0xff] }
 0x3cd   : > { %3478 = vmatpush1.bf16.msra.mxu0 %v7753_v26  ;;  %vm11431_vm14 = vcmp.lt.s32.totalorder %v8662_v10, 14  ;;  %v3061_v15 = vrot.slane %v3056_v56, %v8670_v12  ;;  %v3065_v44 = vrot.slane %v3056_v56, %v8664_v11 }
 0x3ce   : > { %v2447_v55 = vpop.permute.xlu1 %2446  ;;  %v7737_v36 = vpack.c.bf16 %v2510_v50, %v2508_v30  ;;  %v2757_v54 = vpop.permute.xlu0 %2756  ;;  %v7738_v29 = vpack.c.bf16 %v2511_v6, %v2509_v57  ;;  %vm11432_vm13 = vmmov %vm11431_vm14  ;;  %v11445_v50 = vld [vmem:[#allocation36_spill] sm:$0xff] }
 0x3cf   : > { %v2759_v58 = vsel %vm11428_vm12, %v11427_v40, %v2757_v54  ;;  %v2761_v25 = vsel %vm11429_vm15, %v2757_v54, %v11427_v40  ;;  %v2450_v46 = vsel %vm11431_vm14, %v11430_v22, %v2447_v55  ;;  %v2452_v35 = vsel %vm11432_vm13, %v2447_v55, %v11430_v22  ;;  %vm11434_vm12 = vmmov %vm11432_vm13 }
 0x3d0   : > { %v2776_v23 = vmul.f32 %v2767_v33, %v2759_v58  ;;  %v2777_v13 = vmul.f32 %v2771_v1, %v2761_v25  ;;  %3450 = vmatprep.subr.bf16.mxu1 %v7738_v29  ;;  %vm11435_vm15 = vmmov %vm11434_vm12  ;;  %v2466_v17 = vmul.f32 %v2459_v43, %v2452_v35  ;;  %v2467_v59 = vmul.f32 %v2463_v14, %v2450_v46  ;;  %v11448_v29 = vld [vmem:[#allocation35_spill] sm:$0xff]  ;;  %v7994_v35 = vld [vmem:[#allocation9] ss:$16 sps:$4 sm:$0xff]  }
 0x3d1   : > { %3451 = vmatpush2.bf16.msra.mxu1 %v7737_v36  ;;  %vm11437_vm14 = vcmp.lt.s32.totalorder %v8662_v10, 113 }
 0x3d2   : > { %v2713_v28 = vpop.permute.xlu1 %2712  ;;  %v7751_v39 = vpack.c.bf16 %v2776_v23, %v2774_v63  ;;  %v2449_v49 = vpop.permute.xlu0 %2448  ;;  %v7752_v51 = vpack.c.bf16 %v2777_v13, %v2775_v32  ;;  %vm11438_vm13 = vmmov %vm11437_vm14  ;;  %v11451_v63 = vld [vmem:[#allocation37_spill] sm:$0xff] }
 0x3d3   : > { %v2451_v4 = vsel %vm11434_vm12, %v11433_v3, %v2449_v49  ;;  %v2453_v42 = vsel %vm11435_vm15, %v2449_v49, %v11433_v3  ;;  %v2716_v21 = vsel %vm11437_vm14, %v11436_v61, %v2713_v28  ;;  %v2718_v27 = vsel %vm11438_vm13, %v2713_v28, %v11436_v61  ;;  %vm11440_vm12 = vmmov %vm11438_vm13  ;;  %v7999_v49 = vld [vmem:[#allocation9 + $0x8] ss:$16 sps:$4 sm:$0xff]  }
 0x3d4   : > { %v2468_v31 = vmul.f32 %v2459_v43, %v2453_v42  ;;  %v2469_v60 = vmul.f32 %v2463_v14, %v2451_v4  ;;  %3479 = vmatprep.subr.bf16.mxu0 %v7752_v51  ;;  %vm11441_vm15 = vmmov %vm11440_vm12  ;;  %v2732_v38 = vmul.f32 %v2725_v45, %v2716_v21  ;;  %v2733_v24 = vmul.f32 %v2729_v8, %v2718_v27 }
 0x3d5   : > { %3480 = vmatpush1.bf16.msra.mxu0 %v7751_v39  ;;  %vm11443_vm14 = vcmp.lt.s32.totalorder %v8662_v10, 15 }
 0x3d6   : > { %v2405_v34 = vpop.permute.xlu1 %2404  ;;  %v7735_v41 = vpack.c.bf16 %v2468_v31, %v2466_v17  ;;  %v2715_v37 = vpop.permute.xlu0 %2714  ;;  %v7736_v20 = vpack.c.bf16 %v2469_v60, %v2467_v59  ;;  %vm11444_vm13 = vmmov %vm11443_vm14 }
 0x3d7   : > { %v2717_v53 = vsel %vm11440_vm12, %v11439_v62, %v2715_v37  ;;  %v2719_v47 = vsel %vm11441_vm15, %v2715_v37, %v11439_v62  ;;  %v2408_v2 = vsel %vm11443_vm14, %v11442_v0, %v2405_v34  ;;  %v2410_v5 = vsel %vm11444_vm13, %v2405_v34, %v11442_v0  ;;  %vm11446_vm12 = vmmov %vm11444_vm13 }
 0x3d8   : > { %v2734_v52 = vmul.f32 %v2725_v45, %v2717_v53  ;;  %v2735_v26 = vmul.f32 %v2729_v8, %v2719_v47  ;;  %3452 = vmatprep.subr.bf16.mxu1 %v7736_v20  ;;  %vm11447_vm15 = vmmov %vm11446_vm12  ;;  %v2424_v19 = vmul.f32 %v2417_v7, %v2410_v5  ;;  %v2425_v55 = vmul.f32 %v2421_v18, %v2408_v2 }
 0x3d9   : > { %3453 = vmatpush2.bf16.msra.mxu1 %v7735_v41  ;;  %vm11449_vm14 = vcmp.lt.s32.totalorder %v8662_v10, 94 }
 0x3da   : > { %v7749_v33 = vpack.c.bf16 %v2734_v52, %v2732_v38  ;;  %v2407_v1 = vpop.permute.xlu0 %2406  ;;  %v3049_v30 = vpop.permute.xlu1 %3048  ;;  %v7750_v57 = vpack.c.bf16 %v2735_v26, %v2733_v24  ;;  %vm11450_vm13 = vmmov %vm11449_vm14 }
 0x3db   : > { %v2409_v6 = vsel %vm11446_vm12, %v11445_v50, %v2407_v1  ;;  %v2411_v9 = vsel %vm11447_vm15, %v2407_v1, %v11445_v50  ;;  %v3052_v40 = vsel %vm11449_vm14, %v11448_v29, %v3049_v30  ;;  %v3054_v58 = vsel %vm11450_vm13, %v3049_v30, %v11448_v29  ;;  %vm11452_vm12 = vmmov %vm11450_vm13 }
 0x3dc   : > { %v2426_v36 = vmul.f32 %v2417_v7, %v2411_v9  ;;  %v2427_v54 = vmul.f32 %v2421_v18, %v2409_v6  ;;  %3481 = vmatprep.subr.bf16.mxu0 %v7750_v57  ;;  %vm11453_vm15 = vmmov %vm11452_vm12  ;;  %v3068_v13 = vmul.f32 %v3061_v15, %v3052_v40  ;;  %v3069_v16 = vmul.f32 %v3065_v44, %v3054_v58 }
 0x3dd   : > { %3482 = vmatpush1.bf16.msra.mxu0 %v7749_v33 }
 0x3de   : > { %v7733_v25 = vpack.c.bf16 %v2426_v36, %v2424_v19  ;;  %v3051_v43 = vpop.permute.xlu0 %3050  ;;  %v7734_v14 = vpack.c.bf16 %v2427_v54, %v2425_v55 }
 0x3df   : > { %v3053_v32 = vsel %vm11452_vm12, %v11451_v63, %v3051_v43  ;;  %v3055_v23 = vsel %vm11453_vm15, %v3051_v43, %v11451_v63 }
 0x3e0   : > { %v3070_v22 = vmul.f32 %v3061_v15, %v3053_v32  ;;  %v3071_v46 = vmul.f32 %v3065_v44, %v3055_v23  ;;  %3454 = vmatprep.subr.bf16.mxu1 %v7734_v14 }
 0x3e1   : > { %3455 = vmatpush2.bf16.msra.mxu1 %v7733_v25 }
 0x3e2   : > { %v7765_v28 = vpack.c.bf16 %v3070_v22, %v3068_v13  ;;  %v7766_v39 = vpack.c.bf16 %v3071_v46, %v3069_v16 }
 0x3e4   : > { %3457 = vmatmul.mubr.bf16.vlgmr.msra.gmra.mxu1 %v7994_v35  ;;  %3497 = vmatprep.subr.bf16.mxu0 %v7766_v39 }
 0x3e5   : > { %3498 = vmatpush2.bf16.msra.mxu0 %v7765_v28 }
 0x3e7   : > { %v3145_v3 = vpop.permute.xlu1 %3144 }
 0x3e8   : > { %3500 = vmatmul.mubr.bf16.vlgmr.msra.gmra.mxu0 %v7999_v49 }
 0x3eb   : > { %v9686_v60 = vpop.permute.xlu0 %3149 }
 0x4a4   : > { %v3458_v51 = vpop.f32.mrf.mxu1 }
 0x4a5   : > { %v3459_v42 = vadd.f32 %v3458_v51, %v3145_v3 }
 0x4a6   : > { %v3460_v4 = vpop.f32.mrf.mxu1 }
 0x4a7   : > { %v3461_v8 = vadd.f32 %v3460_v4, %v3145_v3 }
 0x4a8   : > { %v3501_v45 = vpop.f32.mrf.mxu0  ;;  %v3462_v17 = vpop.f32.mrf.mxu1 }
 0x4a9   : > { %v3502_v59 = vadd.f32 %v3501_v45, %v3459_v42  ;;  %v3463_v21 = vadd.f32 %v3462_v17, %v9686_v60 }
 0x4aa   : > { %v3503_v31 = vpop.f32.mrf.mxu0  ;;  %v3464_v4 = vpop.f32.mrf.mxu1 }
 0x4ab   : > { %v3514_v48 = vmul.f32 0.70710677, %v3502_v59  ;;  %v9688_v61 = vadd.f32 %v3503_v31, %v3461_v8  ;;  %v3510_v22 = vmul.f32 0.5, %v3502_v59  ;;  %v3465_v8 = vadd.f32 %v3464_v4, %v9686_v60 }
 0x4ac   : > { %v3505_v27 = vpop.f32.mrf.mxu0 }
 0x4ad   : > { %v3518_v34 = vand.u32 2147483647, %v3514_v48  ;;  %v3506_v41 = vadd.f32 %v3505_v27, %v3463_v21  ;;  %vm3594_vm14 = vcmp.lt.f32.partialorder %v3514_v48, 0.0  ;;  %v9703_v17 = vmul.f32 0.70710677, %v9688_v61 }
 0x4ae   : > { %v3507_v45 = vpop.f32.mrf.mxu0 }
 0x4af   : > { %v3522_v37 = vmul.f32 0.3275911, %v3518_v34  ;;  %v3516_v20 = vmul.f32 0.70710677, %v3506_v41  ;;  %v3570_v18 = vsub.f32 0.0, %v3518_v34  ;;  %v3512_v51 = vmul.f32 0.5, %v3506_v41 }
 0x4b0   : > { %v9705_v59 = vadd.f32 %v3507_v45, %v3465_v8  ;;  %v3519_v31 = vand.u32 2147483647, %v9703_v17  ;;  %vm3595_vm12 = vcmp.lt.f32.partialorder %v9703_v17, 0.0 }
 0x4b1   : > { %v3526_v62 = vadd.f32 1.0, %v3522_v37  ;;  %v3520_v53 = vand.u32 2147483647, %v3516_v20  ;;  %v3574_v38 = vmul.f32 %v3570_v18, %v3518_v34  ;;  %vm3596_vm13 = vcmp.lt.f32.partialorder %v3516_v20, 0.0 }
 0x4b2   : > { %v9713_v48 = vmul.f32 0.70710677, %v9705_v59  ;;  %v3523_v60 = vmul.f32 0.3275911, %v3519_v31 }
 0x4b3   : > { %8034 = vrcp.f32 %v3526_v62  ;;  %v3524_v47 = vmul.f32 0.3275911, %v3520_v53  ;;  %v3572_v24 = vsub.f32 0.0, %v3520_v53  ;;  %v3578_v56 = vmul.f32 1.442695, %v3574_v38 }
 0x4b4   : > { %v3521_v21 = vand.u32 2147483647, %v9713_v48  ;;  %v3527_v27 = vadd.f32 1.0, %v3523_v60  ;;  %v3571_v38 = vsub.f32 0.0, %v3519_v31  ;;  %vm3597_vm15 = vcmp.lt.f32.partialorder %v9713_v48, 0.0 }
 0x4b5   : > { %v3528_v7 = vadd.f32 1.0, %v3524_v47  ;;  %v3576_v0 = vmul.f32 %v3572_v24, %v3520_v53 }
 0x4b6   : > { %v3525_v34 = vmul.f32 0.3275911, %v3521_v21 }
 0x4b7   : > { %8036 = vrcp.f32 %v3528_v7  ;;  %v3582_v30 = vmul.f32 1.442695, %v3576_v0 }
 0x4b8   : > { %8038 = vpow2.f32 %v3578_v56  ;;  %v3529_v41 = vadd.f32 1.0, %v3525_v34  ;;  %v3573_v56 = vsub.f32 0.0, %v3521_v21 }
 0x4b9   : > { %8040 = vpow2.f32 %v3582_v30 }
 0x4ba   : > { %8042 = vrcp.f32 %v3527_v27 }
 0x4bb   : > { %8044 = vrcp.f32 %v3529_v41 }
 0x4c0   : > { %v8035_v52 = vpop.eup %8034 }
 0x4c1   : > { %v3534_v26 = vmul.f32 1.0614054, %v8035_v52 }
 0x4c3   : > { %v3538_v2 = vadd.f32 -1.4531521, %v3534_v26  ;;  %v3575_v26 = vmul.f32 %v3571_v38, %v3519_v31 }
 0x4c4   : > { %v8037_v5 = vpop.eup %8036 }
 0x4c5   : > { %v3542_v33 = vmul.f32 %v8035_v52, %v3538_v2  ;;  %v3536_v1 = vmul.f32 1.0614054, %v8037_v5  ;;  %v8039_v40 = vpop.eup %8038 }
 0x4c6   : > { %v8041_v32 = vpop.eup %8040 }
 0x4c7   : > { %v3546_v57 = vadd.f32 1.4214138, %v3542_v33  ;;  %v3540_v50 = vadd.f32 -1.4531521, %v3536_v1  ;;  %v8043_v37 = vpop.eup %8042  ;;  %v3577_v33 = vmul.f32 %v3573_v56, %v3521_v21 }
 0x4c8   : > { %v3535_v20 = vmul.f32 1.0614054, %v8043_v37  ;;  %v8045_v62 = vpop.eup %8044 }
 0x4c9   : > { %v3550_v6 = vmul.f32 %v8035_v52, %v3546_v57  ;;  %v3544_v9 = vmul.f32 %v8037_v5, %v3540_v50  ;;  %v3537_v47 = vmul.f32 1.0614054, %v8045_v62  ;;  %v3584_v57 = vmul.f32 1.442695, %v3577_v33 }
 0x4ca   : > { %v3539_v53 = vadd.f32 -1.4531521, %v3535_v20 }
 0x4cb   : > { %v3554_v15 = vadd.f32 -0.28449672, %v3550_v6  ;;  %v3548_v44 = vadd.f32 1.4214138, %v3544_v9  ;;  %v3541_v18 = vadd.f32 -1.4531521, %v3537_v47 }
 0x4cc   : > { %v3543_v7 = vmul.f32 %v8043_v37, %v3539_v53 }
 0x4cd   : > { %v3558_v19 = vmul.f32 %v8035_v52, %v3554_v15  ;;  %v3552_v55 = vmul.f32 %v8037_v5, %v3548_v44 }
 0x4ce   : > { %v3547_v24 = vadd.f32 1.4214138, %v3543_v7 }
 0x4cf   : > { %v3562_v36 = vadd.f32 0.2548296, %v3558_v19  ;;  %v3556_v54 = vadd.f32 -0.28449672, %v3552_v55 }
 0x4d0   : > { %v3551_v0 = vmul.f32 %v8043_v37, %v3547_v24 }
 0x4d1   : > { %v3566_v29 = vmul.f32 %v8035_v52, %v3562_v36  ;;  %v3560_v58 = vmul.f32 %v8037_v5, %v3556_v54  ;;  %v3545_v52 = vmul.f32 %v8045_v62, %v3541_v18 }
 0x4d2   : > { %v3555_v1 = vadd.f32 -0.28449672, %v3551_v0 }
 0x4d3   : > { %v3586_v25 = vmul.f32 %v8039_v40, %v3566_v29  ;;  %v3564_v43 = vadd.f32 0.2548296, %v3560_v58  ;;  %v3549_v2 = vadd.f32 1.4214138, %v3545_v52 }
 0x4d4   : > { %v3559_v50 = vmul.f32 %v8043_v37, %v3555_v1 }
 0x4d5   : > { %v3590_v14 = vsub.f32 1.0, %v3586_v25  ;;  %v3568_v63 = vmul.f32 %v8037_v5, %v3564_v43  ;;  %v3580_v5 = vmul.f32 1.442695, %v3575_v26  ;;  %v3553_v30 = vmul.f32 %v8045_v62, %v3549_v2 }
 0x4d6   : > { %v3563_v9 = vadd.f32 0.2548296, %v3559_v50 }
 0x4d7   : > { %v3598_v23 = vsub.f32 0.0, %v3590_v14  ;;  %v3588_v13 = vmul.f32 %v8041_v32, %v3568_v63  ;;  %8046 = vpow2.f32 %v3580_v5  ;;  %v3557_v6 = vadd.f32 -0.28449672, %v3553_v30 }
 0x4d8   : > { %8048 = vpow2.f32 %v3584_v57  ;;  %v3567_v44 = vmul.f32 %v8043_v37, %v3563_v9  ;;  %v8002_v57 = vld [vmem:[#allocation10 + $0x4] ss:$16 sps:$4 sm:$0xff]  }
 0x4d9   : > { %v3602_v16 = vsel %vm3594_vm14, %v3598_v23, %v3590_v14  ;;  %v3592_v35 = vsub.f32 1.0, %v3588_v13  ;;  %v3561_v15 = vmul.f32 %v8045_v62, %v3557_v6  ;;  %v3511_v23 = vmul.f32 0.5, %v9688_v61  ;;  %5006 = vmatprep.mubr.bf16.mxu0 %v8002_v57  ;;  %v8003_v6 = vld [vmem:[#allocation10 + $0xc] ss:$16 sps:$4 sm:$0xff]  }
 0x4da   : > { %v3606_v46 = vadd.f32 1.0, %v3602_v16  ;;  %7349 = vmatprep.mubr.msk.bf16.mxu1 %vm1870_vm9, %v8003_v6  ;;  %vm11464_vm14 = vcmp.lt.s32.totalorder %v8662_v10, 126 }
 0x4db   : > { %v3600_v39 = vsub.f32 0.0, %v3592_v35  ;;  %v3565_v19 = vadd.f32 0.2548296, %v3561_v15  ;;  %v4690_v15 = vld [vmem:[%s11220_s7] sm:$0xff] }
 0x4dc   : > { %v9691_v28 = vmul.f32 %v3606_v46, %v3510_v22  ;;  %v3513_v46 = vmul.f32 0.5, %v9705_v59 }
 0x4dd   : > { %v3604_v49 = vsel %vm3596_vm13, %v3600_v39, %v3592_v35  ;;  %v3569_v54 = vmul.f32 %v8045_v62, %v3565_v19  ;;  %vm11465_vm13 = vmmov %vm11464_vm14 }
 0x4de   : > { %3908 = vrot.lane.b32.xlu1 %v9691_v28, %s11381_s1  ;;  %v3608_v3 = vadd.f32 1.0, %v3604_v49 }
 0x4e0   : > { %v9695_v42 = vmul.f32 %v3608_v3, %v3512_v51 }
 0x4e2   : > { %3866 = vrot.lane.b32.xlu1 %v9691_v28, %s11382_s3  ;;  %3910 = vrot.lane.b32.xlu0 %v9695_v42, %s11381_s1 }
 0x4e4   : > { %v8047_v55 = vpop.eup %8046 }
 0x4e5   : > { %v3587_v36 = vmul.f32 %v8047_v55, %v3567_v44  ;;  %v8049_v29 = vpop.eup %8048 }
 0x4e6   : > { %3824 = vrot.lane.b32.xlu1 %v9691_v28, %s11383_s4  ;;  %3868 = vrot.lane.b32.xlu0 %v9695_v42, %s11382_s3  ;;  %v3589_v58 = vmul.f32 %v8049_v29, %v3569_v54 }
 0x4e7   : > { %v3591_v40 = vsub.f32 1.0, %v3587_v36  ;;  %v4691_v36 = vld [vmem:[%s11220_s7 + $0x8] sm:$0xff] }
 0x4e8   : > { %v3593_v43 = vsub.f32 1.0, %v3589_v58 }
 0x4e9   : > { %v3599_v25 = vsub.f32 0.0, %v3591_v40 }
 0x4ea   : > { %3782 = vrot.lane.b32.xlu1 %v9691_v28, %s11384_s6  ;;  %3826 = vrot.lane.b32.xlu0 %v9695_v42, %s11383_s4  ;;  %v3601_v63 = vsub.f32 0.0, %v3593_v43 }
 0x4eb   : > { %v3603_v14 = vsel %vm3595_vm12, %v3599_v25, %v3591_v40  ;;  %vm11466_vm12 = vmmov %vm11465_vm13 }
 0x4ec   : > { %v3607_v32 = vadd.f32 1.0, %v3603_v14  ;;  %v3605_v13 = vsel %vm3597_vm15, %v3601_v63, %v3593_v43  ;;  %v3920_v63 = vld [vmem:[#allocation4 + $0x7] ss:$8 sm:$0x3]  ;;  %vm11467_vm15 = vmmov %vm11466_vm12 }
 0x4ed   : > { %v3609_v22 = vadd.f32 1.0, %v3605_v13  ;;  %v3925_v13 = vrot.slane %v3920_v63, %v8670_v12 }
 0x4ee   : > { %3740 = vrot.lane.b32.xlu1 %v9691_v28, %s11385_s8  ;;  %3784 = vrot.lane.b32.xlu0 %v9695_v42, %s11384_s6  ;;  %v9803_v16 = vmul.f32 %v3607_v32, %v3511_v23 }
 0x4ef   : > { %v9810_v35 = vmul.f32 %v3609_v22, %v3513_v46  ;;  %v3929_v22 = vrot.slane %v3920_v63, %v8664_v11  ;;  %v3878_v46 = vld [vmem:[#allocation4 + $0x6] ss:$8 sm:$0x3] }
 0x4f0   : > { %v3883_v63 = vrot.slane %v3878_v46, %v8670_v12 }
 0x4f2   : > { %3698 = vrot.lane.b32.xlu1 %v9691_v28, %s11386_s15  ;;  %3742 = vrot.lane.b32.xlu0 %v9695_v42, %s11385_s8 }
 0x4f6   : > { %3656 = vrot.lane.b32.xlu1 %v9691_v28, %s11387_s14  ;;  %3700 = vrot.lane.b32.xlu0 %v9695_v42, %s11386_s15 }
 0x4fa   : > { %3614 = vrot.lane.b32.xlu1 %v9691_v28, %s11388_s16  ;;  %3658 = vrot.lane.b32.xlu0 %v9695_v42, %s11387_s14 }
 0x4fe   : > { %4552 = vrot.lane.b32.xlu1 %v9691_v28, %s11389_s13  ;;  %3616 = vrot.lane.b32.xlu0 %v9695_v42, %s11388_s16 }
 0x502   : > { %4216 = vrot.lane.b32.xlu1 %v9691_v28, %s11366_s12  ;;  %4554 = vrot.lane.b32.xlu0 %v9695_v42, %s11389_s13 }
 0x506   : > { %4510 = vrot.lane.b32.xlu1 %v9691_v28, %s11367_s18  ;;  %4218 = vrot.lane.b32.xlu0 %v9695_v42, %s11366_s12 }
 0x50a   : > { %4174 = vrot.lane.b32.xlu1 %v9691_v28, %s11368_s27  ;;  %4512 = vrot.lane.b32.xlu0 %v9695_v42, %s11367_s18 }
 0x50e   : > { %4468 = vrot.lane.b32.xlu1 %v9691_v28, %s11369_s21  ;;  %4176 = vrot.lane.b32.xlu0 %v9695_v42, %s11368_s27 }
 0x512   : > { %4132 = vrot.lane.b32.xlu1 %v9691_v28, %s11370_s11  ;;  %4470 = vrot.lane.b32.xlu0 %v9695_v42, %s11369_s21 }
 0x516   : > { %4426 = vrot.lane.b32.xlu1 %v9691_v28, %s11371_s29  ;;  %4134 = vrot.lane.b32.xlu0 %v9695_v42, %s11370_s11 }
 0x51a   : > { %4384 = vrot.lane.b32.xlu1 %v9691_v28, %s11372_s28  ;;  %4428 = vrot.lane.b32.xlu0 %v9695_v42, %s11371_s29 }
 0x51e   : > { %4076 = vrot.lane.b32.xlu1 %v9691_v28, %s11373_s20  ;;  %4386 = vrot.lane.b32.xlu0 %v9695_v42, %s11372_s28 }
 0x522   : > { %4342 = vrot.lane.b32.xlu1 %v9691_v28, %s11374_s25  ;;  %4078 = vrot.lane.b32.xlu0 %v9695_v42, %s11373_s20 }
 0x526   : > { %4034 = vrot.lane.b32.xlu1 %v9691_v28, %s11375_s2  ;;  %4344 = vrot.lane.b32.xlu0 %v9695_v42, %s11374_s25 }
 0x52a   : > { %4300 = vrot.lane.b32.xlu1 %v9691_v28, %s11376_s19  ;;  %4036 = vrot.lane.b32.xlu0 %v9695_v42, %s11375_s2 }
 0x52e   : > { %3992 = vrot.lane.b32.xlu1 %v9691_v28, %s11377_s22  ;;  %4302 = vrot.lane.b32.xlu0 %v9695_v42, %s11376_s19 }
 0x532   : > { %4258 = vrot.lane.b32.xlu1 %v9691_v28, %s11378_s26  ;;  %3994 = vrot.lane.b32.xlu0 %v9695_v42, %s11377_s22 }
 0x536   : > { %3950 = vrot.lane.b32.xlu1 %v9691_v28, %s11379_s30  ;;  %4260 = vrot.lane.b32.xlu0 %v9695_v42, %s11378_s26 }
 0x53a   : > { %4594 = vrot.lane.b32.xlu1 %v9691_v28, %s11380_s0  ;;  %3952 = vrot.lane.b32.xlu0 %v9695_v42, %s11379_s30 }
 0x53e   : > { %3912 = vrot.lane.b32.xlu1 %v9803_v16, %s11381_s1  ;;  %4596 = vrot.lane.b32.xlu0 %v9695_v42, %s11380_s0 }
 0x542   : > { %3870 = vrot.lane.b32.xlu1 %v9803_v16, %s11382_s3  ;;  %3914 = vrot.lane.b32.xlu0 %v9810_v35, %s11381_s1 }
 0x546   : > { %3828 = vrot.lane.b32.xlu1 %v9803_v16, %s11383_s4  ;;  %3872 = vrot.lane.b32.xlu0 %v9810_v35, %s11382_s3 }
 0x54a   : > { %3786 = vrot.lane.b32.xlu1 %v9803_v16, %s11384_s6  ;;  %3830 = vrot.lane.b32.xlu0 %v9810_v35, %s11383_s4 }
 0x54e   : > { %3744 = vrot.lane.b32.xlu1 %v9803_v16, %s11385_s8  ;;  %3788 = vrot.lane.b32.xlu0 %v9810_v35, %s11384_s6 }
 0x550   : > { %v9828_v61 = vpop.permute.xlu1 %3908 }
 0x552   : > { %3702 = vrot.lane.b32.xlu1 %v9803_v16, %s11386_s15  ;;  %3746 = vrot.lane.b32.xlu0 %v9810_v35, %s11385_s8 }
 0x554   : > { %v9834_v39 = vpop.permute.xlu1 %3866  ;;  %v9836_v49 = vpop.permute.xlu0 %3910 }
 0x556   : > { %3660 = vrot.lane.b32.xlu1 %v9803_v16, %s11387_s14  ;;  %3704 = vrot.lane.b32.xlu0 %v9810_v35, %s11386_s15 }
 0x558   : > { %v9842_v51 = vpop.permute.xlu1 %3824  ;;  %v9844_v3 = vpop.permute.xlu0 %3868 }
 0x55a   : > { %3618 = vrot.lane.b32.xlu1 %v9803_v16, %s11388_s16  ;;  %3662 = vrot.lane.b32.xlu0 %v9810_v35, %s11387_s14 }
 0x55c   : > { %v9850_v4 = vpop.permute.xlu1 %3782  ;;  %v9852_v45 = vpop.permute.xlu0 %3826 }
 0x55e   : > { %4556 = vrot.lane.b32.xlu1 %v9803_v16, %s11389_s13  ;;  %3620 = vrot.lane.b32.xlu0 %v9810_v35, %s11388_s16 }
 0x560   : > { %v9858_v8 = vpop.permute.xlu1 %3740  ;;  %v9860_v17 = vpop.permute.xlu0 %3784 }
 0x562   : > { %4220 = vrot.lane.b32.xlu1 %v9803_v16, %s11366_s12  ;;  %4558 = vrot.lane.b32.xlu0 %v9810_v35, %s11389_s13 }
 0x564   : > { %v9866_v59 = vpop.permute.xlu1 %3698  ;;  %v9868_v31 = vpop.permute.xlu0 %3742 }
 0x566   : > { %4514 = vrot.lane.b32.xlu1 %v9803_v16, %s11367_s18  ;;  %4222 = vrot.lane.b32.xlu0 %v9810_v35, %s11366_s12 }
 0x568   : > { %v9874_v48 = vpop.permute.xlu1 %3656  ;;  %v9876_v60 = vpop.permute.xlu0 %3700 }
 0x56a   : > { %4178 = vrot.lane.b32.xlu1 %v9803_v16, %s11368_s27  ;;  %4516 = vrot.lane.b32.xlu0 %v9810_v35, %s11367_s18 }
 0x56c   : > { %v9882_v21 = vpop.permute.xlu1 %3614  ;;  %v9884_v27 = vpop.permute.xlu0 %3658 }
 0x56e   : > { %4472 = vrot.lane.b32.xlu1 %v9803_v16, %s11369_s21  ;;  %4180 = vrot.lane.b32.xlu0 %v9810_v35, %s11368_s27 }
 0x570   : > { %v9890_v34 = vpop.permute.xlu1 %4552  ;;  %v9892_v41 = vpop.permute.xlu0 %3616 }
 0x572   : > { %4136 = vrot.lane.b32.xlu1 %v9803_v16, %s11370_s11  ;;  %4474 = vrot.lane.b32.xlu0 %v9810_v35, %s11369_s21 }
 0x574   : > { %v9898_v37 = vpop.permute.xlu1 %4216  ;;  %v9900_v20 = vpop.permute.xlu0 %4554 }
 0x576   : > { %4430 = vrot.lane.b32.xlu1 %v9803_v16, %s11371_s29  ;;  %4138 = vrot.lane.b32.xlu0 %v9810_v35, %s11370_s11 }
 0x578   : > { %v9906_v62 = vpop.permute.xlu1 %4510  ;;  %v9908_v53 = vpop.permute.xlu0 %4218 }
 0x57a   : > { %4388 = vrot.lane.b32.xlu1 %v9803_v16, %s11372_s28  ;;  %4432 = vrot.lane.b32.xlu0 %v9810_v35, %s11371_s29 }
 0x57c   : > { %v9914_v47 = vpop.permute.xlu1 %4174  ;;  %v9916_v7 = vpop.permute.xlu0 %4512 }
 0x57e   : > { %4080 = vrot.lane.b32.xlu1 %v9803_v16, %s11373_s20  ;;  %4390 = vrot.lane.b32.xlu0 %v9810_v35, %s11372_s28 }
 0x580   : > { %v9922_v18 = vpop.permute.xlu1 %4468  ;;  %v9924_v38 = vpop.permute.xlu0 %4176 }
 0x582   : > { %4346 = vrot.lane.b32.xlu1 %v9803_v16, %s11374_s25  ;;  %4082 = vrot.lane.b32.xlu0 %v9810_v35, %s11373_s20 }
 0x584   : > { %v9930_v24 = vpop.permute.xlu1 %4132  ;;  %v9932_v52 = vpop.permute.xlu0 %4470 }
 0x586   : > { %4038 = vrot.lane.b32.xlu1 %v9803_v16, %s11375_s2  ;;  %4348 = vrot.lane.b32.xlu0 %v9810_v35, %s11374_s25 }
 0x588   : > { %v9938_v26 = vpop.permute.xlu1 %4426  ;;  %v9940_v56 = vpop.permute.xlu0 %4134 }
 0x58a   : > { %4304 = vrot.lane.b32.xlu1 %v9803_v16, %s11376_s19  ;;  %4040 = vrot.lane.b32.xlu0 %v9810_v35, %s11375_s2 }
 0x58c   : > { %v9946_v0 = vpop.permute.xlu1 %4384  ;;  %v9948_v2 = vpop.permute.xlu0 %4428 }
 0x58e   : > { %3996 = vrot.lane.b32.xlu1 %v9803_v16, %s11377_s22  ;;  %4306 = vrot.lane.b32.xlu0 %v9810_v35, %s11376_s19 }
 0x590   : > { %v9954_v5 = vpop.permute.xlu1 %4076  ;;  %v9956_v33 = vpop.permute.xlu0 %4386 }
 0x592   : > { %4262 = vrot.lane.b32.xlu1 %v9803_v16, %s11378_s26  ;;  %3998 = vrot.lane.b32.xlu0 %v9810_v35, %s11377_s22 }
 0x594   : > { %v9962_v1 = vpop.permute.xlu1 %4342  ;;  %v9964_v30 = vpop.permute.xlu0 %4078 }
 0x596   : > { %3954 = vrot.lane.b32.xlu1 %v9803_v16, %s11379_s30  ;;  %4264 = vrot.lane.b32.xlu0 %v9810_v35, %s11378_s26 }
 0x598   : > { %v9970_v50 = vpop.permute.xlu1 %4034  ;;  %v9972_v9 = vpop.permute.xlu0 %4344 }
 0x59a   : > { %4598 = vrot.lane.b32.xlu1 %v9803_v16, %s11380_s0  ;;  %3956 = vrot.lane.b32.xlu0 %v9810_v35, %s11379_s30 }
 0x59c   : > { %v9982_v44 = vpop.permute.xlu1 %4300  ;;  %v9984_v19 = vpop.permute.xlu0 %4036 }
 0x59d   : > { %11454 = vst [vmem:[#allocation28_spill] sm:$0xff] %v9982_v44 }
 0x59e   : > { %4694 = vperm.xlu1 %7987, %v4690_v15   ;;  %4600 = vrot.lane.b32.xlu0 %v9810_v35, %s11380_s0 }
 0x5a0   : > { %v9988_v55 = vpop.permute.xlu1 %3992  ;;  %v9993_v54 = vpop.permute.xlu0 %4302 }
 0x5a1   : > { %11455 = vst [vmem:[#allocation30_spill] sm:$0xff] %v9988_v55  ;;  %11456 = vst [vmem:[#allocation29_spill] sm:$0xff] %v9993_v54  ;;  %v3836_v55 = vld [vmem:[#allocation4 + $0x5] ss:$8 sm:$0x3] }
 0x5a2   : > { %4699 = vperm.xlu0 %7986, %v4691_v36  }
 0x5a4   : > { %v9995_v29 = vpop.permute.xlu1 %4258  ;;  %v9997_v40 = vpop.permute.xlu0 %3994 }
 0x5a5   : > { %11457 = vst [vmem:[#allocation32_spill] sm:$0xff] %v9995_v29  ;;  %11458 = vst [vmem:[#allocation31_spill] sm:$0xff] %v9997_v40 }
 0x5a8   : > { %v9999_v58 = vpop.permute.xlu1 %3950  ;;  %v10001_v25 = vpop.permute.xlu0 %4260 }
 0x5a9   : > { %11459 = vst [vmem:[#allocation34_spill] sm:$0xff] %v9999_v58  ;;  %11460 = vst [vmem:[#allocation33_spill] sm:$0xff] %v10001_v25 }
 0x5ac   : > { %v10003_v43 = vpop.permute.xlu1 %4594  ;;  %v10005_v14 = vpop.permute.xlu0 %3952 }
 0x5ad   : > { %11461 = vst [vmem:[#allocation36_spill] sm:$0xff] %v10003_v43  ;;  %11462 = vst [vmem:[#allocation35_spill] sm:$0xff] %v10005_v14  ;;  %v3887_v14 = vrot.slane %v3878_v46, %v8664_v11 }
 0x5b0   : > { %v3913_v32 = vpop.permute.xlu1 %3912  ;;  %v10007_v23 = vpop.permute.xlu0 %4596 }
 0x5b1   : > { %11463 = vst [vmem:[#allocation37_spill] sm:$0xff] %v10007_v23  ;;  %v3916_v57 = vsel %vm781_vm0, %v9828_v61, %v3913_v32  ;;  %v3918_v6 = vsel %vm781_vm0, %v3913_v32, %v9828_v61 }
 0x5b2   : > { %v3932_v58 = vmul.f32 %v3925_v13, %v3918_v6  ;;  %v3933_v25 = vmul.f32 %v3929_v22, %v3916_v57 }
 0x5b4   : > { %v3871_v15 = vpop.permute.xlu1 %3870  ;;  %v3915_v36 = vpop.permute.xlu0 %3914 }
 0x5b5   : > { %v3917_v43 = vsel %vm781_vm0, %v9836_v49, %v3915_v36  ;;  %v3919_v23 = vsel %vm781_vm0, %v3915_v36, %v9836_v49  ;;  %v3874_v61 = vsel %vm737_vm1, %v9834_v39, %v3871_v15  ;;  %v3876_v32 = vsel %vm737_vm1, %v3871_v15, %v9834_v39 }
 0x5b6   : > { %v3934_v29 = vmul.f32 %v3925_v13, %v3919_v23  ;;  %v3935_v40 = vmul.f32 %v3929_v22, %v3917_v43  ;;  %v3841_v23 = vrot.slane %v3836_v55, %v8670_v12  ;;  %v3845_v13 = vrot.slane %v3836_v55, %v8664_v11 }
 0x5b7   : > { %v3890_v22 = vmul.f32 %v3883_v63, %v3876_v32  ;;  %v3891_v57 = vmul.f32 %v3887_v14, %v3874_v61 }
 0x5b8   : > { %v3829_v54 = vpop.permute.xlu1 %3828  ;;  %v7781_v44 = vpack.c.bf16 %v3934_v29, %v3932_v58  ;;  %v3873_v49 = vpop.permute.xlu0 %3872  ;;  %v7782_v36 = vpack.c.bf16 %v3935_v40, %v3933_v25  ;;  %v3794_v29 = vld [vmem:[#allocation4 + $0x4] ss:$8 sm:$0x3] }
 0x5b9   : > { %v3875_v46 = vsel %vm737_vm1, %v9844_v3, %v3873_v49  ;;  %v3877_v43 = vsel %vm737_vm1, %v3873_v49, %v9844_v3  ;;  %v3832_v40 = vsel %vm693_vm2, %v9842_v51, %v3829_v54  ;;  %v3834_v58 = vsel %vm693_vm2, %v3829_v54, %v9842_v51  ;;  %v3752_v54 = vld [vmem:[#allocation4 + $0x3] ss:$8 sm:$0x3] }
 0x5ba   : > { %v3892_v6 = vmul.f32 %v3883_v63, %v3877_v43  ;;  %v3893_v39 = vmul.f32 %v3887_v14, %v3875_v46  ;;  %4974 = vmatprep.subr.bf16.mxu0 %v7782_v36  ;;  %v3799_v63 = vrot.slane %v3794_v29, %v8670_v12  ;;  %v3803_v61 = vrot.slane %v3794_v29, %v8664_v11 }
 0x5bb   : > { %4975 = vmatpush1.bf16.msra.mxu0 %v7781_v44  ;;  %v3848_v32 = vmul.f32 %v3841_v23, %v3834_v58  ;;  %v3849_v36 = vmul.f32 %v3845_v13, %v3832_v40  ;;  %v3761_v29 = vrot.slane %v3752_v54, %v8664_v11 }
 0x5bc   : > { %v3787_v3 = vpop.permute.xlu1 %3786  ;;  %v7779_v25 = vpack.c.bf16 %v3892_v6, %v3890_v22  ;;  %v3831_v15 = vpop.permute.xlu0 %3830  ;;  %v7780_v49 = vpack.c.bf16 %v3893_v39, %v3891_v57  ;;  %v3757_v39 = vrot.slane %v3752_v54, %v8670_v12 }
 0x5bd   : > { %v3833_v55 = vsel %vm693_vm2, %v9852_v45, %v3831_v15  ;;  %v3835_v14 = vsel %vm693_vm2, %v3831_v15, %v9852_v45  ;;  %v3790_v46 = vsel %vm649_vm3, %v9850_v4, %v3787_v3  ;;  %v3792_v43 = vsel %vm649_vm3, %v3787_v3, %v9850_v4 }
 0x5be   : > { %v3850_v51 = vmul.f32 %v3841_v23, %v3835_v14  ;;  %v3851_v44 = vmul.f32 %v3845_v13, %v3833_v55  ;;  %4976 = vmatprep.subr.bf16.mxu0 %v7780_v49  ;;  %v3806_v40 = vmul.f32 %v3799_v63, %v3792_v43  ;;  %v3807_v58 = vmul.f32 %v3803_v61, %v3790_v46  ;;  %v3668_v43 = vld [vmem:[#allocation4 + $0x1] ss:$8 sm:$0x3] }
 0x5bf   : > { %4977 = vmatpush1.bf16.msra.mxu0 %v7779_v25  ;;  %v3710_v25 = vld [vmem:[#allocation4 + $0x2] ss:$8 sm:$0x3] }
 0x5c0   : > { %v3745_v45 = vpop.permute.xlu1 %3744  ;;  %v7777_v22 = vpack.c.bf16 %v3850_v51, %v3848_v32  ;;  %v3789_v57 = vpop.permute.xlu0 %3788  ;;  %v7778_v6 = vpack.c.bf16 %v3851_v44, %v3849_v36  ;;  %v3715_v36 = vrot.slane %v3710_v25, %v8670_v12  ;;  %v3719_v51 = vrot.slane %v3710_v25, %v8664_v11  ;;  %v3626_v25 = vld [vmem:[#allocation4] ss:$8 sm:$0x3] }
 0x5c1   : > { %v3791_v23 = vsel %vm649_vm3, %v9860_v17, %v3789_v57  ;;  %v3793_v13 = vsel %vm649_vm3, %v3789_v57, %v9860_v17  ;;  %v3748_v15 = vsel %vm605_vm4, %v9858_v8, %v3745_v45  ;;  %v3750_v49 = vsel %vm605_vm4, %v3745_v45, %v9858_v8 }
 0x5c2   : > { %v3808_v4 = vmul.f32 %v3799_v63, %v3793_v13  ;;  %v3809_v3 = vmul.f32 %v3803_v61, %v3791_v23  ;;  %4978 = vmatprep.subr.bf16.mxu0 %v7778_v6  ;;  %v3764_v44 = vmul.f32 %v3757_v39, %v3750_v49  ;;  %v3765_v54 = vmul.f32 %v3761_v29, %v3748_v15 }
 0x5c3   : > { %4979 = vmatpush1.bf16.msra.mxu0 %v7777_v22 }
 0x5c4   : > { %v3703_v17 = vpop.permute.xlu1 %3702  ;;  %v7775_v55 = vpack.c.bf16 %v3808_v4, %v3806_v40  ;;  %v3747_v14 = vpop.permute.xlu0 %3746  ;;  %v7776_v32 = vpack.c.bf16 %v3809_v3, %v3807_v58  ;;  %v3677_v40 = vrot.slane %v3668_v43, %v8664_v11 }
 0x5c5   : > { %v3749_v63 = vsel %vm605_vm4, %v9868_v31, %v3747_v14  ;;  %v3751_v61 = vsel %vm605_vm4, %v3747_v14, %v9868_v31  ;;  %v3706_v45 = vsel %vm561_vm5, %v9866_v59, %v3703_v17  ;;  %v3708_v22 = vsel %vm561_vm5, %v3703_v17, %v9866_v59 }
 0x5c6   : > { %v3766_v8 = vmul.f32 %v3757_v39, %v3751_v61  ;;  %v3767_v46 = vmul.f32 %v3761_v29, %v3749_v63  ;;  %4980 = vmatprep.subr.bf16.mxu0 %v7776_v32  ;;  %v3673_v29 = vrot.slane %v3668_v43, %v8670_v12  ;;  %v3722_v58 = vmul.f32 %v3715_v36, %v3708_v22 }
 0x5c7   : > { %4981 = vmatpush1.bf16.msra.mxu0 %v7775_v55  ;;  %v3723_v4 = vmul.f32 %v3719_v51, %v3706_v45  ;;  %v3631_v61 = vrot.slane %v3626_v25, %v8670_v12 }
 0x5c8   : > { %v3661_v31 = vpop.permute.xlu1 %3660  ;;  %v7773_v57 = vpack.c.bf16 %v3766_v8, %v3764_v44  ;;  %v3705_v6 = vpop.permute.xlu0 %3704  ;;  %v7774_v23 = vpack.c.bf16 %v3767_v46, %v3765_v54  ;;  %v4564_v8 = vld [vmem:[#allocation4 + $0x27] ss:$8 sm:$0x3] }
 0x5c9   : > { %v3707_v13 = vsel %vm561_vm5, %v9876_v60, %v3705_v6  ;;  %v3709_v39 = vsel %vm561_vm5, %v3705_v6, %v9876_v60  ;;  %v3664_v15 = vsel %vm517_vm6, %v9874_v48, %v3661_v31  ;;  %v3666_v49 = vsel %vm517_vm6, %v3661_v31, %v9874_v48 }
 0x5ca   : > { %v3724_v59 = vmul.f32 %v3715_v36, %v3709_v39  ;;  %v3725_v3 = vmul.f32 %v3719_v51, %v3707_v13  ;;  %4982 = vmatprep.subr.bf16.mxu0 %v7774_v23  ;;  %v3635_v36 = vrot.slane %v3626_v25, %v8664_v11  ;;  %v3680_v51 = vmul.f32 %v3673_v29, %v3666_v49 }
 0x5cb   : > { %4983 = vmatpush1.bf16.msra.mxu0 %v7773_v57  ;;  %v3681_v44 = vmul.f32 %v3677_v40, %v3664_v15  ;;  %v4569_v23 = vrot.slane %v4564_v8, %v8670_v12  ;;  %v4573_v13 = vrot.slane %v4564_v8, %v8664_v11 }
 0x5cc   : > { %v3619_v60 = vpop.permute.xlu1 %3618  ;;  %v7771_v17 = vpack.c.bf16 %v3724_v59, %v3722_v58  ;;  %v3663_v55 = vpop.permute.xlu0 %3662  ;;  %v7772_v14 = vpack.c.bf16 %v3725_v3, %v3723_v4  ;;  %v4228_v58 = vld [vmem:[#allocation4 + $0x17] ss:$8 sm:$0x3] }
 0x5cd   : > { %v3665_v32 = vsel %vm517_vm6, %v9884_v27, %v3663_v55  ;;  %v3667_v63 = vsel %vm517_vm6, %v3663_v55, %v9884_v27  ;;  %v3622_v46 = vsel %vm474_vm7, %v9882_v21, %v3619_v60  ;;  %v3624_v43 = vsel %vm474_vm7, %v3619_v60, %v9882_v21 }
 0x5ce   : > { %v3682_v48 = vmul.f32 %v3673_v29, %v3667_v63  ;;  %v3683_v54 = vmul.f32 %v3677_v40, %v3665_v32  ;;  %4984 = vmatprep.subr.bf16.mxu0 %v7772_v14  ;;  %v3638_v39 = vmul.f32 %v3631_v61, %v3624_v43  ;;  %v3639_v29 = vmul.f32 %v3635_v36, %v3622_v46 }
 0x5cf   : > { %4985 = vmatpush1.bf16.msra.mxu0 %v7771_v17  ;;  %v4233_v17 = vrot.slane %v4228_v58, %v8670_v12  ;;  %v4237_v55 = vrot.slane %v4228_v58, %v8664_v11 }
 0x5d0   : > { %v4557_v27 = vpop.permute.xlu1 %4556  ;;  %v7769_v45 = vpack.c.bf16 %v3682_v48, %v3680_v51  ;;  %v3621_v22 = vpop.permute.xlu0 %3620  ;;  %v7770_v31 = vpack.c.bf16 %v3683_v54, %v3681_v44 }
 0x5d1   : > { %v3623_v57 = vsel %vm474_vm7, %v9892_v41, %v3621_v22  ;;  %v3625_v6 = vsel %vm474_vm7, %v3621_v22, %v9892_v41  ;;  %v4560_v4 = vsel %vm1455_vm8, %v9890_v34, %v4557_v27  ;;  %v4562_v59 = vsel %vm1455_vm8, %v4557_v27, %v9890_v34 }
 0x5d2   : > { %v3640_v21 = vmul.f32 %v3631_v61, %v3625_v6  ;;  %v3641_v40 = vmul.f32 %v3635_v36, %v3623_v57  ;;  %4986 = vmatprep.subr.bf16.mxu0 %v7770_v31  ;;  %v4576_v14 = vmul.f32 %v4569_v23, %v4560_v4  ;;  %v4577_v32 = vmul.f32 %v4573_v13, %v4562_v59  ;;  %v4522_v61 = vld [vmem:[#allocation4 + $0x26] ss:$8 sm:$0x3]  ;;  %v4186_v57 = vld [vmem:[#allocation4 + $0x16] ss:$8 sm:$0x3] }
 0x5d3   : > { %4987 = vmatpush1.bf16.msra.mxu0 %v7769_v45  ;;  %v4527_v43 = vrot.slane %v4522_v61, %v8670_v12  ;;  %v4531_v27 = vrot.slane %v4522_v61, %v8664_v11  ;;  %v4191_v58 = vrot.slane %v4186_v57, %v8670_v12  ;;  %v4195_v4 = vrot.slane %v4186_v57, %v8664_v11 }
 0x5d4   : > { %v4221_v41 = vpop.permute.xlu1 %4220  ;;  %v7767_v3 = vpack.c.bf16 %v3640_v21, %v3638_v39  ;;  %v4559_v25 = vpop.permute.xlu0 %4558  ;;  %v7768_v15 = vpack.c.bf16 %v3641_v40, %v3639_v29 }
 0x5d5   : > { %v4561_v49 = vsel %vm1455_vm8, %v9900_v20, %v4559_v25  ;;  %v4563_v60 = vsel %vm1455_vm8, %v4559_v25, %v9900_v20  ;;  %v4224_v36 = vsel %vm1103_vm10, %v9898_v37, %v4221_v41  ;;  %v4226_v51 = vsel %vm1103_vm10, %v4221_v41, %v9898_v37  ;;  %v4480_v25 = vld [vmem:[#allocation4 + $0x25] ss:$8 sm:$0x3] }
 0x5d6   : > { %v4578_v34 = vmul.f32 %v4569_v23, %v4561_v49  ;;  %v4579_v63 = vmul.f32 %v4573_v13, %v4563_v60  ;;  %4988 = vmatprep.subr.bf16.mxu0 %v7768_v15  ;;  %v4240_v45 = vmul.f32 %v4233_v17, %v4224_v36  ;;  %v4241_v22 = vmul.f32 %v4237_v55, %v4226_v51 }
 0x5d7   : > { %4989 = vmatpush1.bf16.msra.mxu0 %v7767_v3 }
 0x5d8   : > { %v4515_v20 = vpop.permute.xlu1 %4514  ;;  %v7813_v44 = vpack.c.bf16 %v4578_v34, %v4576_v14  ;;  %v4223_v48 = vpop.permute.xlu0 %4222  ;;  %v7814_v54 = vpack.c.bf16 %v4579_v63, %v4577_v32  ;;  %v4485_v34 = vrot.slane %v4480_v25, %v8670_v12  ;;  %v4489_v63 = vrot.slane %v4480_v25, %v8664_v11 }
 0x5d9   : > { %v4225_v8 = vsel %vm1103_vm10, %v9908_v53, %v4223_v48  ;;  %v4227_v46 = vsel %vm1103_vm10, %v4223_v48, %v9908_v53  ;;  %v4518_v6 = vsel %vm1411_vm11, %v9906_v62, %v4515_v20  ;;  %v4520_v23 = vsel %vm1411_vm11, %v4515_v20, %v9906_v62  ;;  %v4144_v20 = vld [vmem:[#allocation4 + $0x15] ss:$8 sm:$0x3] }
 0x5da   : > { %v4242_v37 = vmul.f32 %v4233_v17, %v4225_v8  ;;  %v4243_v31 = vmul.f32 %v4237_v55, %v4227_v46  ;;  %5017 = vmatprep.subr.bf16.mxu1 %v7814_v54  ;;  %v4534_v59 = vmul.f32 %v4527_v43, %v4518_v6  ;;  %v4535_v41 = vmul.f32 %v4531_v27, %v4520_v23  ;;  %v4438_v6 = vld [vmem:[#allocation4 + $0x24] ss:$8 sm:$0x3] }
 0x5db   : > { %5018 = vmatpush1.bf16.msra.mxu1 %v7813_v44 }
 0x5dc   : > { %v4179_v53 = vpop.permute.xlu1 %4178  ;;  %v7797_v13 = vpack.c.bf16 %v4242_v37, %v4240_v45  ;;  %v4517_v39 = vpop.permute.xlu0 %4516  ;;  %v7798_v29 = vpack.c.bf16 %v4243_v31, %v4241_v22  ;;  %v4149_v45 = vrot.slane %v4144_v20, %v8670_v12  ;;  %v4153_v22 = vrot.slane %v4144_v20, %v8664_v11 }
 0x5dd   : > { %v4519_v21 = vsel %vm1411_vm11, %v9916_v7, %v4517_v39  ;;  %v4521_v40 = vsel %vm1411_vm11, %v4517_v39, %v9916_v7  ;;  %v4182_v15 = vsel %vm11464_vm14, %v9914_v47, %v4179_v53  ;;  %v4184_v49 = vsel %vm11465_vm13, %v4179_v53, %v9914_v47 }
 0x5de   : > { %v4536_v62 = vmul.f32 %v4527_v43, %v4519_v21  ;;  %v4537_v3 = vmul.f32 %v4531_v27, %v4521_v40  ;;  %4990 = vmatprep.subr.bf16.mxu0 %v7798_v29  ;;  %v4198_v61 = vmul.f32 %v4191_v58, %v4182_v15  ;;  %v4199_v36 = vmul.f32 %v4195_v4, %v4184_v49 }
 0x5df   : > { %4991 = vmatpush2.bf16.msra.mxu0 %v7797_v13  ;;  %vm11468_vm14 = vcmp.lt.s32.totalorder %v8662_v10, 97 }
 0x5e0   : > { %v4473_v7 = vpop.permute.xlu1 %4472  ;;  %v7811_v60 = vpack.c.bf16 %v4536_v62, %v4534_v59  ;;  %v4181_v17 = vpop.permute.xlu0 %4180  ;;  %v7812_v55 = vpack.c.bf16 %v4537_v3, %v4535_v41  ;;  %vm11469_vm13 = vmmov %vm11468_vm14  ;;  %v4396_v3 = vld [vmem:[#allocation4 + $0x23] ss:$8 sm:$0x3] }
 0x5e1   : > { %v4183_v14 = vsel %vm11466_vm12, %v9924_v38, %v4181_v17  ;;  %v4185_v32 = vsel %vm11467_vm15, %v4181_v17, %v9924_v38  ;;  %v4476_v44 = vsel %vm11468_vm14, %v9922_v18, %v4473_v7  ;;  %v4478_v48 = vsel %vm11469_vm13, %v4473_v7, %v9922_v18  ;;  %vm11470_vm12 = vmmov %vm11469_vm13 }
 0x5e2   : > { %v4200_v47 = vmul.f32 %v4191_v58, %v4183_v14  ;;  %v4201_v51 = vmul.f32 %v4195_v4, %v4185_v32  ;;  %5019 = vmatprep.subr.bf16.mxu1 %v7812_v55  ;;  %vm11471_vm15 = vmmov %vm11470_vm12  ;;  %v4492_v37 = vmul.f32 %v4485_v34, %v4476_v44  ;;  %v4493_v31 = vmul.f32 %v4489_v63, %v4478_v48 }
 0x5e3   : > { %5020 = vmatpush1.bf16.msra.mxu1 %v7811_v60  ;;  %vm11472_vm14 = vcmp.lt.s32.totalorder %v8662_v10, 127  ;;  %v4443_v58 = vrot.slane %v4438_v6, %v8670_v12  ;;  %v4447_v4 = vrot.slane %v4438_v6, %v8664_v11  ;;  %v7792_v17 = vpack.c.bf16 %v9810_v35, %v9803_v16 }
 0x5e4   : > { %v4137_v38 = vpop.permute.xlu1 %4136  ;;  %v7795_v54 = vpack.c.bf16 %v4200_v47, %v4198_v61  ;;  %v4475_v8 = vpop.permute.xlu0 %4474  ;;  %v7796_v46 = vpack.c.bf16 %v4201_v51, %v4199_v36  ;;  %vm11473_vm13 = vmmov %vm11472_vm14  ;;  %v4401_v32 = vrot.slane %v4396_v3, %v8670_v12  ;;  %v4088_v47 = vld [vmem:[#allocation4 + $0x13] ss:$8 sm:$0x3]  ;;  %v7791_v48 = vpack.c.bf16 %v9695_v42, %v9691_v28 }
 0x5e5   : > { %v4477_v43 = vsel %vm11470_vm12, %v9932_v52, %v4475_v8  ;;  %v4479_v27 = vsel %vm11471_vm15, %v4475_v8, %v9932_v52  ;;  %v4140_v23 = vsel %vm11472_vm14, %v9930_v24, %v4137_v38  ;;  %v4142_v53 = vsel %vm11473_vm13, %v4137_v38, %v9930_v24  ;;  %vm11474_vm12 = vmmov %vm11473_vm13 }
 0x5e6   : > { %v4494_v18 = vmul.f32 %v4485_v34, %v4477_v43  ;;  %v4495_v57 = vmul.f32 %v4489_v63, %v4479_v27  ;;  %4992 = vmatprep.subr.bf16.mxu0 %v7796_v46  ;;  %vm11475_vm15 = vmmov %vm11474_vm12  ;;  %v4156_v59 = vmul.f32 %v4149_v45, %v4140_v23  ;;  %v4157_v41 = vmul.f32 %v4153_v22, %v4142_v53 }
 0x5e7   : > { %4993 = vmatpush2.bf16.msra.mxu0 %v7795_v54  ;;  %vm11476_vm14 = vcmp.lt.s32.totalorder %v8662_v10, 98  ;;  %v4093_v8 = vrot.slane %v4088_v47, %v8670_v12 }
 0x5e8   : > { %v4431_v52 = vpop.permute.xlu1 %4430  ;;  %v7809_v13 = vpack.c.bf16 %v4494_v18, %v4492_v37  ;;  %v4139_v39 = vpop.permute.xlu0 %4138  ;;  %v7810_v29 = vpack.c.bf16 %v4495_v57, %v4493_v31  ;;  %vm11477_vm13 = vmmov %vm11476_vm14 }
 0x5e9   : > { %v4141_v21 = vsel %vm11474_vm12, %v9940_v56, %v4139_v39  ;;  %v4143_v40 = vsel %vm11475_vm15, %v4139_v39, %v9940_v56  ;;  %v4434_v25 = vsel %vm11476_vm14, %v9938_v26, %v4431_v52  ;;  %v4436_v15 = vsel %vm11477_vm13, %v4431_v52, %v9938_v26  ;;  %vm11478_vm12 = vmmov %vm11477_vm13 }
 0x5ea   : > { %v4158_v24 = vmul.f32 %v4149_v45, %v4141_v21  ;;  %v4159_v62 = vmul.f32 %v4153_v22, %v4143_v40  ;;  %5021 = vmatprep.subr.bf16.mxu1 %v7810_v29  ;;  %vm11479_vm15 = vmmov %vm11478_vm12  ;;  %v4405_v26 = vrot.slane %v4396_v3, %v8664_v11  ;;  %v4450_v34 = vmul.f32 %v4443_v58, %v4434_v25  ;;  %v4354_v22 = vld [vmem:[#allocation4 + $0x22] ss:$8 sm:$0x3]  ;;  %v4046_v29 = vld [vmem:[#allocation4 + $0x12] ss:$8 sm:$0x3] }
 0x5eb   : > { %5022 = vmatpush1.bf16.msra.mxu1 %v7809_v13  ;;  %v4451_v63 = vmul.f32 %v4447_v4, %v4436_v15  ;;  %vm11480_vm14 = vcmp.lt.s32.totalorder %v8662_v10, 110  ;;  %v4359_v23 = vrot.slane %v4354_v22, %v8670_v12  ;;  %v4363_v53 = vrot.slane %v4354_v22, %v8664_v11 }
 0x5ec   : > { %v4389_v56 = vpop.permute.xlu1 %4388  ;;  %v7793_v49 = vpack.c.bf16 %v4158_v24, %v4156_v59  ;;  %v4433_v7 = vpop.permute.xlu0 %4432  ;;  %v7794_v60 = vpack.c.bf16 %v4159_v62, %v4157_v41  ;;  %vm11481_vm13 = vmmov %vm11480_vm14  ;;  %v4051_v62 = vrot.slane %v4046_v29, %v8670_v12  ;;  %v4055_v3 = vrot.slane %v4046_v29, %v8664_v11 }
 0x5ed   : > { %v4435_v55 = vsel %vm11478_vm12, %v9948_v2, %v4433_v7  ;;  %v4437_v14 = vsel %vm11479_vm15, %v4433_v7, %v9948_v2  ;;  %v4392_v16 = vsel %vm11480_vm14, %v9946_v0, %v4389_v56  ;;  %v4394_v35 = vsel %vm11481_vm13, %v4389_v56, %v9946_v0  ;;  %vm11482_vm12 = vmmov %vm11481_vm13 }
 0x5ee   : > { %v4452_v61 = vmul.f32 %v4443_v58, %v4435_v55  ;;  %v4453_v36 = vmul.f32 %v4447_v4, %v4437_v14  ;;  %4994 = vmatprep.subr.bf16.mxu0 %v7794_v60  ;;  %vm11483_vm15 = vmmov %vm11482_vm12  ;;  %v4097_v0 = vrot.slane %v4088_v47, %v8664_v11  ;;  %v4408_v46 = vmul.f32 %v4401_v32, %v4392_v16  ;;  %v4004_v16 = vld [vmem:[#allocation4 + $0x11] ss:$8 sm:$0x3] }
 0x5ef   : > { %4995 = vmatpush2.bf16.msra.mxu0 %v7793_v49  ;;  %v4409_v43 = vmul.f32 %v4405_v26, %v4394_v35  ;;  %vm11484_vm14 = vcmp.lt.s32.totalorder %v8662_v10, 1  ;;  %v4312_v49 = vld [vmem:[#allocation4 + $0x21] ss:$8 sm:$0x3] }
 0x5f0   : > { %v4081_v2 = vpop.permute.xlu1 %4080  ;;  %v7807_v51 = vpack.c.bf16 %v4452_v61, %v4450_v34  ;;  %v4391_v20 = vpop.permute.xlu0 %4390  ;;  %4996 = vmatprep.subr.bf16.mxu0 %v7792_v17  ;;  %v7808_v44 = vpack.c.bf16 %v4453_v36, %v4451_v63  ;;  %vm11485_vm13 = vmmov %vm11484_vm14  ;;  %v4317_v34 = vrot.slane %v4312_v49, %v8670_v12  ;;  %v4321_v63 = vrot.slane %v4312_v49, %v8664_v11  ;;  %v11496_v35 = vld [vmem:[#allocation28_spill] sm:$0xff] }
 0x5f1   : > { %v4393_v38 = vsel %vm11482_vm12, %v9956_v33, %v4391_v20  ;;  %v4395_v54 = vsel %vm11483_vm15, %v4391_v20, %v9956_v33  ;;  %v4084_v28 = vsel %vm11484_vm14, %v9954_v5, %v4081_v2  ;;  %v4086_v42 = vsel %vm11485_vm13, %v4081_v2, %v9954_v5  ;;  %vm11486_vm12 = vmmov %vm11485_vm13 }
 0x5f2   : > { %v4410_v27 = vmul.f32 %v4401_v32, %v4393_v38  ;;  %v4411_v45 = vmul.f32 %v4405_v26, %v4395_v54  ;;  %5023 = vmatprep.subr.bf16.mxu1 %v7808_v44  ;;  %vm11487_vm15 = vmmov %vm11486_vm12  ;;  %v4100_v52 = vmul.f32 %v4093_v8, %v4086_v42  ;;  %v4101_v5 = vmul.f32 %v4097_v0, %v4084_v28  ;;  %v11499_v38 = vld [vmem:[#allocation29_spill] sm:$0xff]  ;;  %v11502_v42 = vld [vmem:[#allocation30_spill] sm:$0xff] }
 0x5f3   : > { %4997 = vmatpush2.bf16.msra.mxu0 %v7791_v48  ;;  %5024 = vmatpush1.bf16.msra.mxu1 %v7807_v51  ;;  %vm11488_vm14 = vcmp.lt.s32.totalorder %v8662_v10, 111  ;;  %v4270_v28 = vld [vmem:[#allocation4 + $0x20] ss:$8 sm:$0x3] }
 0x5f4   : > { %v4347_v33 = vpop.permute.xlu1 %4346  ;;  %v7805_v37 = vpack.c.bf16 %v4410_v27, %v4408_v46  ;;  %v4083_v31 = vpop.permute.xlu0 %4082  ;;  %v7806_v18 = vpack.c.bf16 %v4411_v45, %v4409_v43  ;;  %vm11489_vm13 = vmmov %vm11488_vm14  ;;  %v4013_v46 = vrot.slane %v4004_v16, %v8664_v11 }
 0x5f5   : > { %v4085_v57 = vsel %vm11486_vm12, %v9964_v30, %v4083_v31  ;;  %v4087_v6 = vsel %vm11487_vm15, %v4083_v31, %v9964_v30  ;;  %v4350_v21 = vsel %vm11488_vm14, %v9962_v1, %v4347_v33  ;;  %v4352_v40 = vsel %vm11489_vm13, %v4347_v33, %v9962_v1  ;;  %vm11490_vm12 = vmmov %vm11489_vm13 }
 0x5f6   : > { %v4102_v13 = vmul.f32 %v4093_v8, %v4087_v6  ;;  %v4103_v39 = vmul.f32 %v4097_v0, %v4085_v57  ;;  %5025 = vmatprep.subr.bf16.mxu1 %v7806_v18  ;;  %vm11491_vm15 = vmmov %vm11490_vm12  ;;  %v4366_v25 = vmul.f32 %v4359_v23, %v4350_v21  ;;  %v4367_v15 = vmul.f32 %v4363_v53, %v4352_v40 }
 0x5f7   : > { %5026 = vmatpush1.bf16.msra.mxu1 %v7805_v37  ;;  %vm11492_vm14 = vcmp.lt.s32.totalorder %v8662_v10, 2  ;;  %v4009_v0 = vrot.slane %v4004_v16, %v8670_v12 }
 0x5f8   : > { %v4039_v30 = vpop.permute.xlu1 %4038  ;;  %v7789_v58 = vpack.c.bf16 %v4102_v13, %v4100_v52  ;;  %v4349_v4 = vpop.permute.xlu0 %4348  ;;  %v7790_v59 = vpack.c.bf16 %v4103_v39, %v4101_v5  ;;  %vm11493_vm13 = vmmov %vm11492_vm14  ;;  %v4275_v5 = vrot.slane %v4270_v28, %v8670_v12  ;;  %v4279_v13 = vrot.slane %v4270_v28, %v8664_v11 }
 0x5f9   : > { %v4351_v41 = vsel %vm11490_vm12, %v9972_v9, %v4349_v4  ;;  %v4353_v24 = vsel %vm11491_vm15, %v4349_v4, %v9972_v9  ;;  %v4042_v7 = vsel %vm11492_vm14, %v9970_v50, %v4039_v30  ;;  %v4044_v60 = vsel %vm11493_vm13, %v4039_v30, %v9970_v50  ;;  %vm11494_vm12 = vmmov %vm11493_vm13  ;;  %v3962_v30 = vld [vmem:[#allocation4 + $0x10] ss:$8 sm:$0x3] }
 0x5fa   : > { %v4368_v1 = vmul.f32 %v4359_v23, %v4351_v41  ;;  %v4369_v56 = vmul.f32 %v4363_v53, %v4353_v24  ;;  %4998 = vmatprep.subr.bf16.mxu0 %v7790_v59  ;;  %vm11495_vm15 = vmmov %vm11494_vm12  ;;  %v4058_v61 = vmul.f32 %v4051_v62, %v4044_v60  ;;  %v4059_v36 = vmul.f32 %v4055_v3, %v4042_v7  ;;  %v11505_v23 = vld [vmem:[#allocation31_spill] sm:$0xff] }
 0x5fb   : > { %4999 = vmatpush2.bf16.msra.mxu0 %v7789_v58  ;;  %vm11497_vm14 = vcmp.lt.s32.totalorder %v8662_v10, 112  ;;  %v11508_v58 = vld [vmem:[#allocation32_spill] sm:$0xff]  ;;  %v3971_v49 = vrot.slane %v3962_v30, %v8664_v11 }
 0x5fc   : > { %v4305_v9 = vpop.permute.xlu1 %4304  ;;  %v7803_v17 = vpack.c.bf16 %v4368_v1, %v4366_v25  ;;  %v4041_v55 = vpop.permute.xlu0 %4040  ;;  %v7804_v14 = vpack.c.bf16 %v4369_v56, %v4367_v15  ;;  %vm11498_vm13 = vmmov %vm11497_vm14  ;;  %v11511_v25 = vld [vmem:[#allocation33_spill] sm:$0xff]  ;;  %v3967_v56 = vrot.slane %v3962_v30, %v8670_v12 }
 0x5fd   : > { %v4043_v32 = vsel %vm11494_vm12, %v9984_v19, %v4041_v55  ;;  %v4045_v26 = vsel %vm11495_vm15, %v4041_v55, %v9984_v19  ;;  %v4308_v2 = vsel %vm11497_vm14, %v11496_v35, %v4305_v9  ;;  %v4310_v51 = vsel %vm11498_vm13, %v4305_v9, %v11496_v35  ;;  %vm11500_vm12 = vmmov %vm11498_vm13  ;;  %v4606_v55 = vld [vmem:[#allocation4 + $0x30] ss:$8 sm:$0x3] }
 0x5fe   : > { %v4060_v50 = vmul.f32 %v4051_v62, %v4045_v26  ;;  %v4061_v47 = vmul.f32 %v4055_v3, %v4043_v32  ;;  %5027 = vmatprep.subr.bf16.mxu1 %v7804_v14  ;;  %vm11501_vm15 = vmmov %vm11500_vm12  ;;  %v4324_v43 = vmul.f32 %v4317_v34, %v4308_v2  ;;  %v4325_v27 = vmul.f32 %v4321_v63, %v4310_v51  ;;  %v11514_v14 = vld [vmem:[#allocation34_spill] sm:$0xff] }
 0x5ff   : > { %5028 = vmatpush1.bf16.msra.mxu1 %v7803_v17  ;;  %vm11503_vm14 = vcmp.lt.s32.totalorder %v8662_v10, 14  ;;  %v4611_v35 = vrot.slane %v4606_v55, %v8670_v12  ;;  %v4615_v2 = vrot.slane %v4606_v55, %v8664_v11 }
 0x600   : > { %v3997_v19 = vpop.permute.xlu1 %3996  ;;  %v7787_v20 = vpack.c.bf16 %v4060_v50, %v4058_v61  ;;  %v4307_v44 = vpop.permute.xlu0 %4306  ;;  %v7788_v48 = vpack.c.bf16 %v4061_v47, %v4059_v36  ;;  %vm11504_vm13 = vmmov %vm11503_vm14  ;;  %v11517_v50 = vld [vmem:[#allocation35_spill] sm:$0xff] }
 0x601   : > { %v4309_v54 = vsel %vm11500_vm12, %v11499_v38, %v4307_v44  ;;  %v4311_v8 = vsel %vm11501_vm15, %v4307_v44, %v11499_v38  ;;  %v4000_v33 = vsel %vm11503_vm14, %v11502_v42, %v3997_v19  ;;  %v4002_v37 = vsel %vm11504_vm13, %v3997_v19, %v11502_v42  ;;  %vm11506_vm12 = vmmov %vm11504_vm13 }
 0x602   : > { %v4326_v45 = vmul.f32 %v4317_v34, %v4309_v54  ;;  %v4327_v22 = vmul.f32 %v4321_v63, %v4311_v8  ;;  %5000 = vmatprep.subr.bf16.mxu0 %v7788_v48  ;;  %vm11507_vm15 = vmmov %vm11506_vm12  ;;  %v4016_v39 = vmul.f32 %v4009_v0, %v4002_v37  ;;  %v4017_v29 = vmul.f32 %v4013_v46, %v4000_v33  ;;  %v11520_v48 = vld [vmem:[#allocation36_spill] sm:$0xff] }
 0x603   : > { %5001 = vmatpush2.bf16.msra.mxu0 %v7787_v20  ;;  %vm11509_vm14 = vcmp.lt.s32.totalorder %v8662_v10, 113  ;;  %v8000_v37 = vld [vmem:[#allocation10] ss:$16 sps:$4 sm:$0xff]  }
 0x604   : > { %v4263_v31 = vpop.permute.xlu1 %4262  ;;  %v7801_v18 = vpack.c.bf16 %v4326_v45, %v4324_v43  ;;  %v3999_v57 = vpop.permute.xlu0 %3998  ;;  %v7802_v6 = vpack.c.bf16 %v4327_v22, %v4325_v27  ;;  %vm11510_vm13 = vmmov %vm11509_vm14  ;;  %v11523_v43 = vld [vmem:[#allocation37_spill] sm:$0xff] }
 0x605   : > { %v4001_v53 = vsel %vm11506_vm12, %v11505_v23, %v3999_v57  ;;  %v4003_v52 = vsel %vm11507_vm15, %v3999_v57, %v11505_v23  ;;  %v4266_v4 = vsel %vm11509_vm14, %v11508_v58, %v4263_v31  ;;  %v4268_v59 = vsel %vm11510_vm13, %v4263_v31, %v11508_v58  ;;  %vm11512_vm12 = vmmov %vm11510_vm13  ;;  %v8005_v57 = vld [vmem:[#allocation10 + $0x8] ss:$16 sps:$4 sm:$0xff]  }
 0x606   : > { %v4018_v21 = vmul.f32 %v4009_v0, %v4003_v52  ;;  %v4019_v40 = vmul.f32 %v4013_v46, %v4001_v53  ;;  %5029 = vmatprep.subr.bf16.mxu1 %v7802_v6  ;;  %vm11513_vm15 = vmmov %vm11512_vm12  ;;  %v4282_v7 = vmul.f32 %v4275_v5, %v4266_v4  ;;  %v4283_v60 = vmul.f32 %v4279_v13, %v4268_v59 }
 0x607   : > { %5030 = vmatpush1.bf16.msra.mxu1 %v7801_v18  ;;  %vm11515_vm14 = vcmp.lt.s32.totalorder %v8662_v10, 15 }
 0x608   : > { %v3955_v41 = vpop.permute.xlu1 %3954  ;;  %v7785_v24 = vpack.c.bf16 %v4018_v21, %v4016_v39  ;;  %v4265_v62 = vpop.permute.xlu0 %4264  ;;  %v7786_v3 = vpack.c.bf16 %v4019_v40, %v4017_v29  ;;  %vm11516_vm13 = vmmov %vm11515_vm14 }
 0x609   : > { %v4267_v15 = vsel %vm11512_vm12, %v11511_v25, %v4265_v62  ;;  %v4269_v1 = vsel %vm11513_vm15, %v4265_v62, %v11511_v25  ;;  %v3958_v32 = vsel %vm11515_vm14, %v11514_v14, %v3955_v41  ;;  %v3960_v26 = vsel %vm11516_vm13, %v3955_v41, %v11514_v14  ;;  %vm11518_vm12 = vmmov %vm11516_vm13 }
 0x60a   : > { %v4284_v9 = vmul.f32 %v4275_v5, %v4267_v15  ;;  %v4285_v17 = vmul.f32 %v4279_v13, %v4269_v1  ;;  %5002 = vmatprep.subr.bf16.mxu0 %v7786_v3  ;;  %vm11519_vm15 = vmmov %vm11518_vm12  ;;  %v3974_v51 = vmul.f32 %v3967_v56, %v3960_v26  ;;  %v3975_v19 = vmul.f32 %v3971_v49, %v3958_v32 }
 0x60b   : > { %5003 = vmatpush2.bf16.msra.mxu0 %v7785_v24  ;;  %vm11521_vm14 = vcmp.lt.s32.totalorder %v8662_v10, 94 }
 0x60c   : > { %v7799_v34 = vpack.c.bf16 %v4284_v9, %v4282_v7  ;;  %v3957_v63 = vpop.permute.xlu0 %3956  ;;  %v4599_v61 = vpop.permute.xlu1 %4598  ;;  %v7800_v36 = vpack.c.bf16 %v4285_v17, %v4283_v60  ;;  %vm11522_vm13 = vmmov %vm11521_vm14 }
 0x60d   : > { %v3959_v47 = vsel %vm11518_vm12, %v11517_v50, %v3957_v63  ;;  %v3961_v16 = vsel %vm11519_vm15, %v3957_v63, %v11517_v50  ;;  %v4602_v38 = vsel %vm11521_vm14, %v11520_v48, %v4599_v61  ;;  %v4604_v54 = vsel %vm11522_vm13, %v4599_v61, %v11520_v48  ;;  %vm11524_vm12 = vmmov %vm11522_vm13 }
 0x60e   : > { %v3976_v20 = vmul.f32 %v3967_v56, %v3961_v16  ;;  %v3977_v44 = vmul.f32 %v3971_v49, %v3959_v47  ;;  %5031 = vmatprep.subr.bf16.mxu1 %v7800_v36  ;;  %vm11525_vm15 = vmmov %vm11524_vm12  ;;  %v4618_v22 = vmul.f32 %v4611_v35, %v4602_v38  ;;  %v4619_v28 = vmul.f32 %v4615_v2, %v4604_v54 }
 0x60f   : > { %5032 = vmatpush1.bf16.msra.mxu1 %v7799_v34 }
 0x610   : > { %v7783_v8 = vpack.c.bf16 %v3976_v20, %v3974_v51  ;;  %v4601_v0 = vpop.permute.xlu0 %4600  ;;  %v7784_v46 = vpack.c.bf16 %v3977_v44, %v3975_v19 }
 0x611   : > { %v4603_v27 = vsel %vm11524_vm12, %v11523_v43, %v4601_v0  ;;  %v4605_v45 = vsel %vm11525_vm15, %v4601_v0, %v11523_v43 }
 0x612   : > { %v4620_v42 = vmul.f32 %v4611_v35, %v4603_v27  ;;  %v4621_v33 = vmul.f32 %v4615_v2, %v4605_v45  ;;  %5004 = vmatprep.subr.bf16.mxu0 %v7784_v46 }
 0x613   : > { %5005 = vmatpush2.bf16.msra.mxu0 %v7783_v8 }
 0x614   : > { %v7815_v31 = vpack.c.bf16 %v4620_v42, %v4618_v22  ;;  %v7816_v18 = vpack.c.bf16 %v4621_v33, %v4619_v28 }
 0x616   : > { %5007 = vmatmul.mubr.bf16.vlgmr.msra.gmra.mxu0 %v8000_v37  ;;  %5047 = vmatprep.subr.bf16.mxu1 %v7816_v18 }
 0x617   : > { %5048 = vmatpush2.bf16.msra.mxu1 %v7815_v31 }
 0x619   : > { %v4695_v23 = vpop.permute.xlu1 %4694 }
 0x61a   : > { %5050 = vmatmul.mubr.bf16.vlgmr.msra.gmra.mxu1 %v8005_v57 }
 0x61d   : > { %v10349_v40 = vpop.permute.xlu0 %4699 }
 0x6d6   : > { %v5008_v6 = vpop.f32.mrf.mxu0 }
 0x6d7   : > { %v5009_v52 = vadd.f32 %v5008_v6, %v4695_v23 }
 0x6d8   : > { %v5010_v53 = vpop.f32.mrf.mxu0 }
 0x6d9   : > { %v5011_v13 = vadd.f32 %v5010_v53, %v4695_v23 }
 0x6da   : > { %v5051_v5 = vpop.f32.mrf.mxu1  ;;  %v5012_v39 = vpop.f32.mrf.mxu0 }
 0x6db   : > { %v5052_v29 = vadd.f32 %v5051_v5, %v5009_v52  ;;  %v5013_v4 = vadd.f32 %v5012_v39, %v10349_v40 }
 0x6dc   : > { %v5053_v21 = vpop.f32.mrf.mxu1  ;;  %v5014_v53 = vpop.f32.mrf.mxu0 }
 0x6dd   : > { %v5064_v30 = vmul.f32 0.70710677, %v5052_v29  ;;  %v10351_v58 = vadd.f32 %v5053_v21, %v5011_v13  ;;  %v5060_v42 = vmul.f32 0.5, %v5052_v29  ;;  %v5015_v13 = vadd.f32 %v5014_v53, %v10349_v40 }
 0x6de   : > { %v5055_v59 = vpop.f32.mrf.mxu1 }
 0x6df   : > { %v5068_v41 = vand.u32 2147483647, %v5064_v30  ;;  %v5056_v24 = vadd.f32 %v5055_v59, %v5013_v4  ;;  %vm5144_vm14 = vcmp.lt.f32.partialorder %v5064_v30, 0.0  ;;  %v10366_v39 = vmul.f32 0.70710677, %v10351_v58 }
 0x6e0   : > { %v5057_v5 = vpop.f32.mrf.mxu1 }
 0x6e1   : > { %v5072_v62 = vmul.f32 0.3275911, %v5068_v41  ;;  %v5066_v3 = vmul.f32 0.70710677, %v5056_v24  ;;  %v5120_v49 = vsub.f32 0.0, %v5068_v41  ;;  %v5062_v6 = vmul.f32 0.5, %v5056_v24 }
 0x6e2   : > { %v10368_v29 = vadd.f32 %v5057_v5, %v5015_v13  ;;  %v5069_v21 = vand.u32 2147483647, %v10366_v39  ;;  %vm5145_vm12 = vcmp.lt.f32.partialorder %v10366_v39, 0.0 }
 0x6e3   : > { %v5076_v25 = vadd.f32 1.0, %v5072_v62  ;;  %v5070_v15 = vand.u32 2147483647, %v5066_v3  ;;  %v5124_v7 = vmul.f32 %v5120_v49, %v5068_v41  ;;  %vm5146_vm13 = vcmp.lt.f32.partialorder %v5066_v3, 0.0 }
 0x6e4   : > { %v10376_v30 = vmul.f32 0.70710677, %v10368_v29  ;;  %v5073_v40 = vmul.f32 0.3275911, %v5069_v21 }
 0x6e5   : > { %8050 = vrcp.f32 %v5076_v25  ;;  %v5074_v1 = vmul.f32 0.3275911, %v5070_v15  ;;  %v5122_v60 = vsub.f32 0.0, %v5070_v15  ;;  %v5128_v55 = vmul.f32 1.442695, %v5124_v7 }
 0x6e6   : > { %v5071_v4 = vand.u32 2147483647, %v10376_v30  ;;  %v5077_v59 = vadd.f32 1.0, %v5073_v40  ;;  %v5121_v7 = vsub.f32 0.0, %v5069_v21  ;;  %vm5147_vm15 = vcmp.lt.f32.partialorder %v10376_v30, 0.0 }
 0x6e7   : > { %v5078_v56 = vadd.f32 1.0, %v5074_v1  ;;  %v5126_v14 = vmul.f32 %v5122_v60, %v5070_v15 }
 0x6e8   : > { %v5075_v41 = vmul.f32 0.3275911, %v5071_v4 }
 0x6e9   : > { %8052 = vrcp.f32 %v5078_v56  ;;  %v5132_v61 = vmul.f32 1.442695, %v5126_v14 }
 0x6ea   : > { %8054 = vpow2.f32 %v5128_v55  ;;  %v5079_v24 = vadd.f32 1.0, %v5075_v41  ;;  %v5123_v55 = vsub.f32 0.0, %v5071_v4 }
 0x6eb   : > { %8056 = vpow2.f32 %v5132_v61 }
 0x6ec   : > { %8058 = vrcp.f32 %v5077_v59 }
 0x6ed   : > { %8060 = vrcp.f32 %v5079_v24 }
 0x6f2   : > { %v8051_v9 = vpop.eup %8050 }
 0x6f3   : > { %v5084_v17 = vmul.f32 1.0614054, %v8051_v9 }
 0x6f5   : > { %v5088_v32 = vadd.f32 -1.4531521, %v5084_v17  ;;  %v5125_v17 = vmul.f32 %v5121_v7, %v5069_v21 }
 0x6f6   : > { %v8053_v26 = vpop.eup %8052 }
 0x6f7   : > { %v5092_v34 = vmul.f32 %v8051_v9, %v5088_v32  ;;  %v5086_v63 = vmul.f32 1.0614054, %v8053_v26  ;;  %v8055_v38 = vpop.eup %8054 }
 0x6f8   : > { %v8057_v27 = vpop.eup %8056 }
 0x6f9   : > { %v5096_v36 = vadd.f32 1.4214138, %v5092_v34  ;;  %v5090_v50 = vadd.f32 -1.4531521, %v5086_v63  ;;  %v8059_v62 = vpop.eup %8058  ;;  %v5127_v34 = vmul.f32 %v5123_v55, %v5071_v4 }
 0x6fa   : > { %v5085_v3 = vmul.f32 1.0614054, %v8059_v62  ;;  %v8061_v25 = vpop.eup %8060 }
 0x6fb   : > { %v5100_v47 = vmul.f32 %v8051_v9, %v5096_v36  ;;  %v5094_v16 = vmul.f32 %v8053_v26, %v5090_v50  ;;  %v5087_v1 = vmul.f32 1.0614054, %v8061_v25  ;;  %v5134_v36 = vmul.f32 1.442695, %v5127_v34 }
 0x6fc   : > { %v5089_v15 = vadd.f32 -1.4531521, %v5085_v3 }
 0x6fd   : > { %v5104_v35 = vadd.f32 -0.28449672, %v5100_v47  ;;  %v5098_v2 = vadd.f32 1.4214138, %v5094_v16  ;;  %v5091_v49 = vadd.f32 -1.4531521, %v5087_v1 }
 0x6fe   : > { %v5093_v56 = vmul.f32 %v8059_v62, %v5089_v15 }
 0x6ff   : > { %v5108_v51 = vmul.f32 %v8051_v9, %v5104_v35  ;;  %v5102_v19 = vmul.f32 %v8053_v26, %v5098_v2 }
 0x700   : > { %v5097_v60 = vadd.f32 1.4214138, %v5093_v56 }
 0x701   : > { %v5112_v20 = vadd.f32 0.2548296, %v5108_v51  ;;  %v5106_v44 = vadd.f32 -0.28449672, %v5102_v19 }
 0x702   : > { %v5101_v14 = vmul.f32 %v8059_v62, %v5097_v60 }
 0x703   : > { %v5116_v48 = vmul.f32 %v8051_v9, %v5112_v20  ;;  %v5110_v54 = vmul.f32 %v8053_v26, %v5106_v44  ;;  %v5095_v9 = vmul.f32 %v8061_v25, %v5091_v49 }
 0x704   : > { %v5105_v63 = vadd.f32 -0.28449672, %v5101_v14 }
 0x705   : > { %v5136_v8 = vmul.f32 %v8055_v38, %v5116_v48  ;;  %v5114_v0 = vadd.f32 0.2548296, %v5110_v54  ;;  %v5099_v32 = vadd.f32 1.4214138, %v5095_v9 }
 0x706   : > { %v5109_v50 = vmul.f32 %v8059_v62, %v5105_v63 }
 0x707   : > { %v5140_v46 = vsub.f32 1.0, %v5136_v8  ;;  %v5118_v43 = vmul.f32 %v8053_v26, %v5114_v0  ;;  %v5130_v26 = vmul.f32 1.442695, %v5125_v17  ;;  %v5103_v61 = vmul.f32 %v8061_v25, %v5099_v32 }
 0x708   : > { %v5113_v16 = vadd.f32 0.2548296, %v5109_v50 }
 0x709   : > { %v5148_v45 = vsub.f32 0.0, %v5140_v46  ;;  %v5138_v22 = vmul.f32 %v8057_v27, %v5118_v43  ;;  %8062 = vpow2.f32 %v5130_v26  ;;  %v5107_v47 = vadd.f32 -0.28449672, %v5103_v61 }
 0x70a   : > { %8064 = vpow2.f32 %v5134_v36  ;;  %v5117_v2 = vmul.f32 %v8059_v62, %v5113_v16  ;;  %v8008_v36 = vld [vmem:[#allocation12 + $0x4] ss:$16 sps:$4 sm:$0xff]  }
 0x70b   : > { %v5152_v28 = vsel %vm5144_vm14, %v5148_v45, %v5140_v46  ;;  %v5142_v37 = vsub.f32 1.0, %v5138_v22  ;;  %v5111_v35 = vmul.f32 %v8061_v25, %v5107_v47  ;;  %v5061_v45 = vmul.f32 0.5, %v10351_v58  ;;  %6594 = vmatprep.mubr.bf16.mxu1 %v8008_v36  ;;  %v8009_v47 = vld [vmem:[#allocation12 + $0xc] ss:$16 sps:$4 sm:$0xff]  }
 0x70c   : > { %v5156_v33 = vadd.f32 1.0, %v5152_v28  ;;  %7458 = vmatprep.mubr.msk.bf16.mxu0 %vm1870_vm9, %v8009_v47  ;;  %v5428_v47 = vld [vmem:[#allocation4 + $0x6] ss:$8 sm:$0x3] }
 0x70d   : > { %v5150_v18 = vsub.f32 0.0, %v5142_v37  ;;  %v5115_v51 = vadd.f32 0.2548296, %v5111_v35  ;;  %v6244_v35 = vld [vmem:[%s11222_s9] sm:$0xff] }
 0x70e   : > { %v10354_v31 = vmul.f32 %v5156_v33, %v5060_v42  ;;  %v5063_v33 = vmul.f32 0.5, %v10368_v29 }
 0x70f   : > { %v5154_v57 = vsel %vm5146_vm13, %v5150_v18, %v5142_v37  ;;  %v5119_v44 = vmul.f32 %v8061_v25, %v5115_v51  ;;  %vm11548_vm13 = vcmp.lt.s32.totalorder %v8662_v10, 98 }
 0x710   : > { %5458 = vrot.lane.b32.xlu1 %v10354_v31, %s11381_s1  ;;  %v5158_v23 = vadd.f32 1.0, %v5154_v57 }
 0x712   : > { %v10358_v52 = vmul.f32 %v5158_v23, %v5062_v6 }
 0x714   : > { %5416 = vrot.lane.b32.xlu1 %v10354_v31, %s11382_s3  ;;  %5460 = vrot.lane.b32.xlu0 %v10358_v52, %s11381_s1 }
 0x716   : > { %v8063_v19 = vpop.eup %8062 }
 0x717   : > { %v5137_v20 = vmul.f32 %v8063_v19, %v5117_v2  ;;  %v8065_v48 = vpop.eup %8064  ;;  %v6246_v19 = vld [vmem:[%s11222_s9 + $0x10] sm:$0xff] }
 0x718   : > { %5374 = vrot.lane.b32.xlu1 %v10354_v31, %s11383_s4  ;;  %5418 = vrot.lane.b32.xlu0 %v10358_v52, %s11382_s3  ;;  %v5139_v54 = vmul.f32 %v8065_v48, %v5119_v44  ;;  %v6245_v44 = vld [vmem:[%s11222_s9 + $0x8] sm:$0xff] }
 0x719   : > { %v5141_v38 = vsub.f32 1.0, %v5137_v20 }
 0x71a   : > { %v5143_v0 = vsub.f32 1.0, %v5139_v54  ;;  %v6247_v54 = vld [vmem:[%s11222_s9 + $0x18] sm:$0xff] }
 0x71b   : > { %v5149_v8 = vsub.f32 0.0, %v5141_v38 }
 0x71c   : > { %5332 = vrot.lane.b32.xlu1 %v10354_v31, %s11384_s6  ;;  %5376 = vrot.lane.b32.xlu0 %v10358_v52, %s11383_s4  ;;  %v5151_v43 = vsub.f32 0.0, %v5143_v0 }
 0x71d   : > { %v5153_v46 = vsel %vm5145_vm12, %v5149_v8, %v5141_v38  ;;  %vm11549_vm12 = vmmov %vm11548_vm13 }
 0x71e   : > { %v5157_v27 = vadd.f32 1.0, %v5153_v46  ;;  %v5155_v22 = vsel %vm5147_vm15, %v5151_v43, %v5143_v0  ;;  %vm11550_vm15 = vmmov %vm11549_vm12 }
 0x71f   : > { %v5159_v42 = vadd.f32 1.0, %v5155_v22 }
 0x720   : > { %5290 = vrot.lane.b32.xlu1 %v10354_v31, %s11385_s8  ;;  %5334 = vrot.lane.b32.xlu0 %v10358_v52, %s11384_s6  ;;  %v10466_v28 = vmul.f32 %v5157_v27, %v5061_v45  ;;  %v5470_v45 = vld [vmem:[#allocation4 + $0x7] ss:$8 sm:$0x3] }
 0x721   : > { %v10473_v37 = vmul.f32 %v5159_v42, %v5063_v33  ;;  %v5475_v33 = vrot.slane %v5470_v45, %v8670_v12  ;;  %v5479_v36 = vrot.slane %v5470_v45, %v8664_v11  ;;  %v5433_v45 = vrot.slane %v5428_v47, %v8670_v12 }
 0x724   : > { %5248 = vrot.lane.b32.xlu1 %v10354_v31, %s11386_s15  ;;  %5292 = vrot.lane.b32.xlu0 %v10358_v52, %s11385_s8 }
 0x728   : > { %5206 = vrot.lane.b32.xlu1 %v10354_v31, %s11387_s14  ;;  %5250 = vrot.lane.b32.xlu0 %v10358_v52, %s11386_s15 }
 0x72c   : > { %5164 = vrot.lane.b32.xlu1 %v10354_v31, %s11388_s16  ;;  %5208 = vrot.lane.b32.xlu0 %v10358_v52, %s11387_s14 }
 0x730   : > { %6102 = vrot.lane.b32.xlu1 %v10354_v31, %s11389_s13  ;;  %5166 = vrot.lane.b32.xlu0 %v10358_v52, %s11388_s16 }
 0x734   : > { %5766 = vrot.lane.b32.xlu1 %v10354_v31, %s11366_s12  ;;  %6104 = vrot.lane.b32.xlu0 %v10358_v52, %s11389_s13 }
 0x738   : > { %6060 = vrot.lane.b32.xlu1 %v10354_v31, %s11367_s18  ;;  %5768 = vrot.lane.b32.xlu0 %v10358_v52, %s11366_s12 }
 0x73c   : > { %5724 = vrot.lane.b32.xlu1 %v10354_v31, %s11368_s27  ;;  %6062 = vrot.lane.b32.xlu0 %v10358_v52, %s11367_s18 }
 0x740   : > { %6018 = vrot.lane.b32.xlu1 %v10354_v31, %s11369_s21  ;;  %5726 = vrot.lane.b32.xlu0 %v10358_v52, %s11368_s27 }
 0x744   : > { %5682 = vrot.lane.b32.xlu1 %v10354_v31, %s11370_s11  ;;  %6020 = vrot.lane.b32.xlu0 %v10358_v52, %s11369_s21 }
 0x748   : > { %5976 = vrot.lane.b32.xlu1 %v10354_v31, %s11371_s29  ;;  %5684 = vrot.lane.b32.xlu0 %v10358_v52, %s11370_s11 }
 0x74c   : > { %5934 = vrot.lane.b32.xlu1 %v10354_v31, %s11372_s28  ;;  %5978 = vrot.lane.b32.xlu0 %v10358_v52, %s11371_s29 }
 0x750   : > { %5626 = vrot.lane.b32.xlu1 %v10354_v31, %s11373_s20  ;;  %5936 = vrot.lane.b32.xlu0 %v10358_v52, %s11372_s28 }
 0x754   : > { %5892 = vrot.lane.b32.xlu1 %v10354_v31, %s11374_s25  ;;  %5628 = vrot.lane.b32.xlu0 %v10358_v52, %s11373_s20 }
 0x758   : > { %5584 = vrot.lane.b32.xlu1 %v10354_v31, %s11375_s2  ;;  %5894 = vrot.lane.b32.xlu0 %v10358_v52, %s11374_s25 }
 0x75c   : > { %5850 = vrot.lane.b32.xlu1 %v10354_v31, %s11376_s19  ;;  %5586 = vrot.lane.b32.xlu0 %v10358_v52, %s11375_s2 }
 0x760   : > { %5542 = vrot.lane.b32.xlu1 %v10354_v31, %s11377_s22  ;;  %5852 = vrot.lane.b32.xlu0 %v10358_v52, %s11376_s19 }
 0x764   : > { %5808 = vrot.lane.b32.xlu1 %v10354_v31, %s11378_s26  ;;  %5544 = vrot.lane.b32.xlu0 %v10358_v52, %s11377_s22 }
 0x768   : > { %5500 = vrot.lane.b32.xlu1 %v10354_v31, %s11379_s30  ;;  %5810 = vrot.lane.b32.xlu0 %v10358_v52, %s11378_s26 }
 0x76c   : > { %6144 = vrot.lane.b32.xlu1 %v10354_v31, %s11380_s0  ;;  %5502 = vrot.lane.b32.xlu0 %v10358_v52, %s11379_s30 }
 0x770   : > { %5462 = vrot.lane.b32.xlu1 %v10466_v28, %s11381_s1  ;;  %6146 = vrot.lane.b32.xlu0 %v10358_v52, %s11380_s0 }
 0x774   : > { %5420 = vrot.lane.b32.xlu1 %v10466_v28, %s11382_s3  ;;  %5464 = vrot.lane.b32.xlu0 %v10473_v37, %s11381_s1 }
 0x778   : > { %5378 = vrot.lane.b32.xlu1 %v10466_v28, %s11383_s4  ;;  %5422 = vrot.lane.b32.xlu0 %v10473_v37, %s11382_s3 }
 0x77c   : > { %5336 = vrot.lane.b32.xlu1 %v10466_v28, %s11384_s6  ;;  %5380 = vrot.lane.b32.xlu0 %v10473_v37, %s11383_s4 }
 0x780   : > { %5294 = vrot.lane.b32.xlu1 %v10466_v28, %s11385_s8  ;;  %5338 = vrot.lane.b32.xlu0 %v10473_v37, %s11384_s6 }
 0x782   : > { %v10491_v58 = vpop.permute.xlu1 %5458 }
 0x784   : > { %5252 = vrot.lane.b32.xlu1 %v10466_v28, %s11386_s15  ;;  %5296 = vrot.lane.b32.xlu0 %v10473_v37, %s11385_s8 }
 0x786   : > { %v10497_v18 = vpop.permute.xlu1 %5416  ;;  %v10499_v57 = vpop.permute.xlu0 %5460 }
 0x788   : > { %5210 = vrot.lane.b32.xlu1 %v10466_v28, %s11387_s14  ;;  %5254 = vrot.lane.b32.xlu0 %v10473_v37, %s11386_s15 }
 0x78a   : > { %v10505_v6 = vpop.permute.xlu1 %5374  ;;  %v10507_v23 = vpop.permute.xlu0 %5418 }
 0x78c   : > { %5168 = vrot.lane.b32.xlu1 %v10466_v28, %s11388_s16  ;;  %5212 = vrot.lane.b32.xlu0 %v10473_v37, %s11387_s14 }
 0x78e   : > { %v10513_v53 = vpop.permute.xlu1 %5332  ;;  %v10515_v5 = vpop.permute.xlu0 %5376 }
 0x790   : > { %6106 = vrot.lane.b32.xlu1 %v10466_v28, %s11389_s13  ;;  %5170 = vrot.lane.b32.xlu0 %v10473_v37, %s11388_s16 }
 0x792   : > { %v10521_v13 = vpop.permute.xlu1 %5290  ;;  %v10523_v39 = vpop.permute.xlu0 %5334 }
 0x794   : > { %5770 = vrot.lane.b32.xlu1 %v10466_v28, %s11366_s12  ;;  %6108 = vrot.lane.b32.xlu0 %v10473_v37, %s11389_s13 }
 0x796   : > { %v10529_v29 = vpop.permute.xlu1 %5248  ;;  %v10531_v21 = vpop.permute.xlu0 %5292 }
 0x798   : > { %6064 = vrot.lane.b32.xlu1 %v10466_v28, %s11367_s18  ;;  %5772 = vrot.lane.b32.xlu0 %v10473_v37, %s11366_s12 }
 0x79a   : > { %v10537_v30 = vpop.permute.xlu1 %5206  ;;  %v10539_v40 = vpop.permute.xlu0 %5250 }
 0x79c   : > { %5728 = vrot.lane.b32.xlu1 %v10466_v28, %s11368_s27  ;;  %6066 = vrot.lane.b32.xlu0 %v10473_v37, %s11367_s18 }
 0x79e   : > { %v10545_v4 = vpop.permute.xlu1 %5164  ;;  %v10547_v59 = vpop.permute.xlu0 %5208 }
 0x7a0   : > { %6022 = vrot.lane.b32.xlu1 %v10466_v28, %s11369_s21  ;;  %5730 = vrot.lane.b32.xlu0 %v10473_v37, %s11368_s27  ;;  %s8334_s27 = smov [#allocation13]  }
 0x7a2   : > { %v10553_v41 = vpop.permute.xlu1 %6102  ;;  %v10555_v24 = vpop.permute.xlu0 %5166 }
 0x7a4   : > { %5686 = vrot.lane.b32.xlu1 %v10466_v28, %s11370_s11  ;;  %6024 = vrot.lane.b32.xlu0 %v10473_v37, %s11369_s21  ;;  %s8232_s21 = sshll.u32 %s8334_s27, 4  ;;  %s8233_s21 = int_to_ptr.vmem [resolvable:$false] %s8232_s21 }
 0x7a5   : > { %s8234_s10 = scalar_lea.vmem %s8233_s21, 2048 }
 0x7a6   : > { %v10561_v62 = vpop.permute.xlu1 %5766  ;;  %v10563_v3 = vpop.permute.xlu0 %6104 }
 0x7a8   : > { %5980 = vrot.lane.b32.xlu1 %v10466_v28, %s11371_s29  ;;  %5688 = vrot.lane.b32.xlu0 %v10473_v37, %s11370_s11  ;;  %s11601_s11 = sld [smem:[#allocation45_spill]] }
 0x7aa   : > { %v10569_v25 = vpop.permute.xlu1 %6060  ;;  %v10571_v15 = vpop.permute.xlu0 %5768 }
 0x7ac   : > { %5938 = vrot.lane.b32.xlu1 %v10466_v28, %s11372_s28  ;;  %5982 = vrot.lane.b32.xlu0 %v10473_v37, %s11371_s29 }
 0x7ae   : > { %v10577_v1 = vpop.permute.xlu1 %5724  ;;  %v10579_v56 = vpop.permute.xlu0 %6062 }
 0x7b0   : > { %5630 = vrot.lane.b32.xlu1 %v10466_v28, %s11373_s20  ;;  %5940 = vrot.lane.b32.xlu0 %v10473_v37, %s11372_s28 }
 0x7b2   : > { %v10585_v49 = vpop.permute.xlu1 %6018  ;;  %v10587_v7 = vpop.permute.xlu0 %5726 }
 0x7b4   : > { %5896 = vrot.lane.b32.xlu1 %v10466_v28, %s11374_s25  ;;  %5632 = vrot.lane.b32.xlu0 %v10473_v37, %s11373_s20 }
 0x7b6   : > { %v10593_v60 = vpop.permute.xlu1 %5682  ;;  %v10595_v9 = vpop.permute.xlu0 %6020 }
 0x7b8   : > { %5588 = vrot.lane.b32.xlu1 %v10466_v28, %s11375_s2  ;;  %5898 = vrot.lane.b32.xlu0 %v10473_v37, %s11374_s25 }
 0x7ba   : > { %v10601_v17 = vpop.permute.xlu1 %5976  ;;  %v10603_v55 = vpop.permute.xlu0 %5684 }
 0x7bc   : > { %5854 = vrot.lane.b32.xlu1 %v10466_v28, %s11376_s19  ;;  %5590 = vrot.lane.b32.xlu0 %v10473_v37, %s11375_s2 }
 0x7be   : > { %v10609_v14 = vpop.permute.xlu1 %5934  ;;  %v10611_v32 = vpop.permute.xlu0 %5978 }
 0x7c0   : > { %5546 = vrot.lane.b32.xlu1 %v10466_v28, %s11377_s22  ;;  %5856 = vrot.lane.b32.xlu0 %v10473_v37, %s11376_s19  ;;  %s11599_s19 = sld [smem:[#allocation22_spill]] }
 0x7c2   : > { %v10617_v26 = vpop.permute.xlu1 %5626  ;;  %v10619_v34 = vpop.permute.xlu0 %5936 }
 0x7c4   : > { %5812 = vrot.lane.b32.xlu1 %v10466_v28, %s11378_s26  ;;  %5548 = vrot.lane.b32.xlu0 %v10473_v37, %s11377_s22 }
 0x7c6   : > { %v10625_v63 = vpop.permute.xlu1 %5892  ;;  %v10627_v61 = vpop.permute.xlu0 %5628  ;;  %s7666_s20 = sshll.u32 %s11599_s19, 8 }
 0x7c8   : > { %5504 = vrot.lane.b32.xlu1 %v10466_v28, %s11379_s30  ;;  %5814 = vrot.lane.b32.xlu0 %v10473_v37, %s11378_s26 }
 0x7ca   : > { %v10633_v50 = vpop.permute.xlu1 %5584  ;;  %v10635_v16 = vpop.permute.xlu0 %5894 }
 0x7cc   : > { %6148 = vrot.lane.b32.xlu1 %v10466_v28, %s11380_s0  ;;  %5506 = vrot.lane.b32.xlu0 %v10473_v37, %s11379_s30  ;;  %s11168_s30 = scalar_lea.hbm %s11601_s11, %s7666_s20 }
 0x7ce   : > { %v10645_v2 = vpop.permute.xlu1 %5850  ;;  %v10647_v51 = vpop.permute.xlu0 %5586 }
 0x7cf   : > { %11526 = vst [vmem:[#allocation28_spill] sm:$0xff] %v10645_v2 }
 0x7d0   : > { %6250 = vperm.xlu1 %7987, %v6244_v35   ;;  %6150 = vrot.lane.b32.xlu0 %v10473_v37, %s11380_s0  ;;  %s11598_s0 = sld [smem:[#allocation27_spill]] }
 0x7d2   : > { %v10654_v20 = vpop.permute.xlu1 %5542  ;;  %v10659_v48 = vpop.permute.xlu0 %5852 }
 0x7d3   : > { %11527 = vst [vmem:[#allocation29_spill] sm:$0xff] %v10654_v20  ;;  %11528 = vst [vmem:[#allocation30_spill] sm:$0xff] %v10659_v48  ;;  %v5386_v20 = vld [vmem:[#allocation4 + $0x5] ss:$8 sm:$0x3] }
 0x7d4   : > { %6260 = vperm.xlu1 %7987, %v6246_v19   ;;  %6255 = vperm.xlu0 %7986, %v6245_v44  }
 0x7d6   : > { %v10661_v38 = vpop.permute.xlu1 %5808  ;;  %v10666_v8 = vpop.permute.xlu0 %5544  ;;  %s7034_s26 = sshll.u32 %s11598_s0, 6  ;;  %s6885_s12 = scalar_lea.sflag [#allocation6], %s11598_s0 }
 0x7d7   : > { %11529 = vst [vmem:[#allocation31_spill] sm:$0xff] %v10661_v38  ;;  %11530 = vst [vmem:[#allocation32_spill] sm:$0xff] %v10666_v8  ;;  %s11131_s22 = scalar_lea.vmem [#allocation13], %s7034_s26 }
 0x7d8   : > { %6265 = vperm.xlu0 %7986, %v6247_v54   ;;  %s6898_s2 = sshll.u32 %s11131_s22, 4  ;;  %s11161_s2 = int_to_ptr.vmem [resolvable:$true] %s6898_s2 }
 0x7d9   : > { %s8228_s18 = scalar_lea.vmem %s11161_s2, 1024  ;;  %p8235_p13 = scmp.lt.s32.totalorder %s11161_s2, %s8233_s21 }
 0x7da   : > { %v10668_v0 = vpop.permute.xlu1 %5500  ;;  %v10670_v46 = vpop.permute.xlu0 %5810  ;;  %p8229_p4 = scmp.ne.s32.totalorder %s11161_s2, %s8228_s18  ;;  %p8236_p9 = scmp.lt.s32.totalorder %s8234_s10, %s8228_s18 }
 0x7db   : > { %11531 = vst [vmem:[#allocation33_spill] sm:$0xff] %v10668_v0  ;;  %11532 = vst [vmem:[#allocation34_spill] sm:$0xff] %v10670_v46 }
 0x7dc   : > { %p8230_p8 = pnand %p8229_p4, %p8435_p6  ;;  %p8237_p2 = por %p8236_p9, %p8235_p13 }
 0x7de   : > { %v10672_v43 = vpop.permute.xlu1 %6144  ;;  %v10674_v27 = vpop.permute.xlu0 %5502  ;;  %p8231_p10 = pneg %p8230_p8 }
 0x7df   : > { %11533 = vst [vmem:[#allocation35_spill] sm:$0xff] %v10672_v43  ;;  %11534 = vst [vmem:[#allocation36_spill] sm:$0xff] %v10674_v27  ;;  %v5437_v27 = vrot.slane %v5428_v47, %v8664_v11 }
 0x7e0   : > { %p8238_p5 = pnand %p8237_p2, %p8231_p10 }
 0x7e2   : > { %v5463_v22 = vpop.permute.xlu1 %5462  ;;  %v10676_v42 = vpop.permute.xlu0 %6146 }
 0x7e3   : > { %11535 = vst [vmem:[#allocation37_spill] sm:$0xff] %v10676_v42  ;;  %v5466_v35 = vsel %vm781_vm0, %v10491_v58, %v5463_v22  ;;  %v5468_v19 = vsel %vm781_vm0, %v5463_v22, %v10491_v58 }
 0x7e4   : > { %v5482_v0 = vmul.f32 %v5475_v33, %v5468_v19  ;;  %v5483_v46 = vmul.f32 %v5479_v36, %v5466_v35 }
 0x7e6   : > { %v5421_v44 = vpop.permute.xlu1 %5420  ;;  %v5465_v54 = vpop.permute.xlu0 %5464 }
 0x7e7   : > { %v5467_v43 = vsel %vm781_vm0, %v10499_v57, %v5465_v54  ;;  %v5469_v42 = vsel %vm781_vm0, %v5465_v54, %v10499_v57  ;;  %v5424_v58 = vsel %vm737_vm1, %v10497_v18, %v5421_v44  ;;  %v5426_v22 = vsel %vm737_vm1, %v5421_v44, %v10497_v18 }
 0x7e8   : > { %v5484_v38 = vmul.f32 %v5475_v33, %v5469_v42  ;;  %v5485_v8 = vmul.f32 %v5479_v36, %v5467_v43  ;;  %v5391_v42 = vrot.slane %v5386_v20, %v8670_v12  ;;  %v5395_v33 = vrot.slane %v5386_v20, %v8664_v11 }
 0x7e9   : > { %v5440_v36 = vmul.f32 %v5433_v45, %v5426_v22  ;;  %v5441_v35 = vmul.f32 %v5437_v27, %v5424_v58  ;;  %vm11536_vm0 = vcmp.lt.s32.totalorder %v8662_v10, 126 }
 0x7ea   : > { %v5379_v48 = vpop.permute.xlu1 %5378  ;;  %v7831_v2 = vpack.c.bf16 %v5484_v38, %v5482_v0  ;;  %v5423_v57 = vpop.permute.xlu0 %5422  ;;  %v7832_v54 = vpack.c.bf16 %v5485_v8, %v5483_v46  ;;  %v5344_v38 = vld [vmem:[#allocation4 + $0x4] ss:$8 sm:$0x3] }
 0x7eb   : > { %v5425_v47 = vsel %vm737_vm1, %v10507_v23, %v5423_v57  ;;  %v5427_v43 = vsel %vm737_vm1, %v5423_v57, %v10507_v23  ;;  %v5382_v8 = vsel %vm693_vm2, %v10505_v6, %v5379_v48  ;;  %v5384_v0 = vsel %vm693_vm2, %v5379_v48, %v10505_v6  ;;  %v5302_v48 = vld [vmem:[#allocation4 + $0x3] ss:$8 sm:$0x3]  ;;  %vm11537_vm1 = vmmov %vm11536_vm0 }
 0x7ec   : > { %v5442_v19 = vmul.f32 %v5433_v45, %v5427_v43  ;;  %v5443_v18 = vmul.f32 %v5437_v27, %v5425_v47  ;;  %6562 = vmatprep.subr.bf16.mxu1 %v7832_v54  ;;  %v5349_v45 = vrot.slane %v5344_v38, %v8670_v12  ;;  %v5353_v58 = vrot.slane %v5344_v38, %v8664_v11 }
 0x7ed   : > { %6563 = vmatpush1.bf16.msra.mxu1 %v7831_v2  ;;  %v5398_v22 = vmul.f32 %v5391_v42, %v5384_v0  ;;  %v5399_v54 = vmul.f32 %v5395_v33, %v5382_v8  ;;  %v5311_v38 = vrot.slane %v5302_v48, %v8664_v11 }
 0x7ee   : > { %v5337_v23 = vpop.permute.xlu1 %5336  ;;  %v7829_v46 = vpack.c.bf16 %v5442_v19, %v5440_v36  ;;  %v5381_v44 = vpop.permute.xlu0 %5380  ;;  %v7830_v57 = vpack.c.bf16 %v5443_v18, %v5441_v35  ;;  %v5307_v18 = vrot.slane %v5302_v48, %v8670_v12 }
 0x7ef   : > { %v5383_v20 = vsel %vm693_vm2, %v10515_v5, %v5381_v44  ;;  %v5385_v27 = vsel %vm693_vm2, %v5381_v44, %v10515_v5  ;;  %v5340_v47 = vsel %vm649_vm3, %v10513_v53, %v5337_v23  ;;  %v5342_v43 = vsel %vm649_vm3, %v5337_v23, %v10513_v53  ;;  %vm11538_vm2 = vmmov %vm11536_vm0 }
 0x7f0   : > { %v5400_v6 = vmul.f32 %v5391_v42, %v5385_v27  ;;  %v5401_v2 = vmul.f32 %v5395_v33, %v5383_v20  ;;  %6564 = vmatprep.subr.bf16.mxu1 %v7830_v57  ;;  %v5356_v8 = vmul.f32 %v5349_v45, %v5342_v43  ;;  %v5357_v0 = vmul.f32 %v5353_v58, %v5340_v47  ;;  %v5218_v43 = vld [vmem:[#allocation4 + $0x1] ss:$8 sm:$0x3] }
 0x7f1   : > { %6565 = vmatpush1.bf16.msra.mxu1 %v7829_v46  ;;  %v5260_v46 = vld [vmem:[#allocation4 + $0x2] ss:$8 sm:$0x3] }
 0x7f2   : > { %v5295_v5 = vpop.permute.xlu1 %5294  ;;  %v7827_v36 = vpack.c.bf16 %v5400_v6, %v5398_v22  ;;  %v5339_v35 = vpop.permute.xlu0 %5338  ;;  %v7828_v19 = vpack.c.bf16 %v5401_v2, %v5399_v54  ;;  %v5265_v54 = vrot.slane %v5260_v46, %v8670_v12  ;;  %v5269_v6 = vrot.slane %v5260_v46, %v8664_v11  ;;  %v5176_v46 = vld [vmem:[#allocation4] ss:$8 sm:$0x3] }
 0x7f3   : > { %v5341_v42 = vsel %vm649_vm3, %v10523_v39, %v5339_v35  ;;  %v5343_v33 = vsel %vm649_vm3, %v5339_v35, %v10523_v39  ;;  %v5298_v44 = vsel %vm605_vm4, %v10521_v13, %v5295_v5  ;;  %v5300_v57 = vsel %vm605_vm4, %v5295_v5, %v10521_v13  ;;  %vm11539_vm3 = vmmov %vm11536_vm0 }
 0x7f4   : > { %v5358_v53 = vmul.f32 %v5349_v45, %v5343_v33  ;;  %v5359_v23 = vmul.f32 %v5353_v58, %v5341_v42  ;;  %6566 = vmatprep.subr.bf16.mxu1 %v7828_v19  ;;  %v5314_v2 = vmul.f32 %v5307_v18, %v5300_v57  ;;  %v5315_v48 = vmul.f32 %v5311_v38, %v5298_v44 }
 0x7f5   : > { %6567 = vmatpush1.bf16.msra.mxu1 %v7827_v36 }
 0x7f6   : > { %v5253_v39 = vpop.permute.xlu1 %5252  ;;  %v7825_v20 = vpack.c.bf16 %v5358_v53, %v5356_v8  ;;  %v5297_v27 = vpop.permute.xlu0 %5296  ;;  %v7826_v22 = vpack.c.bf16 %v5359_v23, %v5357_v0  ;;  %v5227_v8 = vrot.slane %v5218_v43, %v8664_v11 }
 0x7f7   : > { %v5299_v45 = vsel %vm605_vm4, %v10531_v21, %v5297_v27  ;;  %v5301_v58 = vsel %vm605_vm4, %v5297_v27, %v10531_v21  ;;  %v5256_v5 = vsel %vm561_vm5, %v10529_v29, %v5253_v39  ;;  %v5258_v36 = vsel %vm561_vm5, %v5253_v39, %v10529_v29 }
 0x7f8   : > { %v5316_v13 = vmul.f32 %v5307_v18, %v5301_v58  ;;  %v5317_v47 = vmul.f32 %v5311_v38, %v5299_v45  ;;  %6568 = vmatprep.subr.bf16.mxu1 %v7826_v22  ;;  %v5223_v38 = vrot.slane %v5218_v43, %v8670_v12  ;;  %v5272_v0 = vmul.f32 %v5265_v54, %v5258_v36 }
 0x7f9   : > { %6569 = vmatpush1.bf16.msra.mxu1 %v7825_v20  ;;  %v5273_v53 = vmul.f32 %v5269_v6, %v5256_v5  ;;  %v5181_v58 = vrot.slane %v5176_v46, %v8670_v12  ;;  %vm11540_vm4 = vcmp.lt.s32.totalorder %v8662_v10, 97 }
 0x7fa   : > { %v5211_v21 = vpop.permute.xlu1 %5210  ;;  %v7823_v35 = vpack.c.bf16 %v5316_v13, %v5314_v2  ;;  %v5255_v19 = vpop.permute.xlu0 %5254  ;;  %v7824_v42 = vpack.c.bf16 %v5317_v47, %v5315_v48  ;;  %v6114_v13 = vld [vmem:[#allocation4 + $0x27] ss:$8 sm:$0x3] }
 0x7fb   : > { %v5257_v33 = vsel %vm561_vm5, %v10539_v40, %v5255_v19  ;;  %v5259_v18 = vsel %vm561_vm5, %v5255_v19, %v10539_v40  ;;  %v5214_v44 = vsel %vm517_vm6, %v10537_v30, %v5211_v21  ;;  %v5216_v57 = vsel %vm517_vm6, %v5211_v21, %v10537_v30  ;;  %vm11541_vm5 = vmmov %vm11540_vm4 }
 0x7fc   : > { %v5274_v29 = vmul.f32 %v5265_v54, %v5259_v18  ;;  %v5275_v23 = vmul.f32 %v5269_v6, %v5257_v33  ;;  %6570 = vmatprep.subr.bf16.mxu1 %v7824_v42  ;;  %v5185_v54 = vrot.slane %v5176_v46, %v8664_v11  ;;  %v5230_v6 = vmul.f32 %v5223_v38, %v5216_v57 }
 0x7fd   : > { %6571 = vmatpush1.bf16.msra.mxu1 %v7823_v35  ;;  %v5231_v2 = vmul.f32 %v5227_v8, %v5214_v44  ;;  %v6119_v42 = vrot.slane %v6114_v13, %v8670_v12  ;;  %v6123_v33 = vrot.slane %v6114_v13, %v8664_v11 }
 0x7fe   : > { %v5169_v40 = vpop.permute.xlu1 %5168  ;;  %v7821_v39 = vpack.c.bf16 %v5274_v29, %v5272_v0  ;;  %v5213_v20 = vpop.permute.xlu0 %5212  ;;  %v7822_v27 = vpack.c.bf16 %v5275_v23, %v5273_v53  ;;  %v5778_v0 = vld [vmem:[#allocation4 + $0x17] ss:$8 sm:$0x3] }
 0x7ff   : > { %v5215_v22 = vsel %vm517_vm6, %v10547_v59, %v5213_v20  ;;  %v5217_v45 = vsel %vm517_vm6, %v5213_v20, %v10547_v59  ;;  %v5172_v47 = vsel %vm474_vm7, %v10545_v4, %v5169_v40  ;;  %v5174_v43 = vsel %vm474_vm7, %v5169_v40, %v10545_v4  ;;  %vm11542_vm6 = vmmov %vm11540_vm4 }
 0x800   : > { %v5232_v30 = vmul.f32 %v5223_v38, %v5217_v45  ;;  %v5233_v48 = vmul.f32 %v5227_v8, %v5215_v22  ;;  %6572 = vmatprep.subr.bf16.mxu1 %v7822_v27  ;;  %v5188_v18 = vmul.f32 %v5181_v58, %v5174_v43  ;;  %v5189_v38 = vmul.f32 %v5185_v54, %v5172_v47 }
 0x801   : > { %6573 = vmatpush1.bf16.msra.mxu1 %v7821_v39  ;;  %v5783_v39 = vrot.slane %v5778_v0, %v8670_v12  ;;  %v5787_v20 = vrot.slane %v5778_v0, %v8664_v11 }
 0x802   : > { %v6107_v59 = vpop.permute.xlu1 %6106  ;;  %v7819_v5 = vpack.c.bf16 %v5232_v30, %v5230_v6  ;;  %v5171_v36 = vpop.permute.xlu0 %5170  ;;  %v7820_v21 = vpack.c.bf16 %v5233_v48, %v5231_v2 }
 0x803   : > { %v5173_v35 = vsel %vm474_vm7, %v10555_v24, %v5171_v36  ;;  %v5175_v19 = vsel %vm474_vm7, %v5171_v36, %v10555_v24  ;;  %v6110_v53 = vsel %vm1455_vm8, %v10553_v41, %v6107_v59  ;;  %v6112_v29 = vsel %vm1455_vm8, %v6107_v59, %v10553_v41  ;;  %vm11543_vm7 = vmmov %vm11540_vm4 }
 0x804   : > { %v5190_v4 = vmul.f32 %v5181_v58, %v5175_v19  ;;  %v5191_v8 = vmul.f32 %v5185_v54, %v5173_v35  ;;  %6574 = vmatprep.subr.bf16.mxu1 %v7820_v21  ;;  %v6126_v27 = vmul.f32 %v6119_v42, %v6110_v53  ;;  %v6127_v22 = vmul.f32 %v6123_v33, %v6112_v29  ;;  %v6072_v58 = vld [vmem:[#allocation4 + $0x26] ss:$8 sm:$0x3]  ;;  %v5736_v35 = vld [vmem:[#allocation4 + $0x16] ss:$8 sm:$0x3] }
 0x805   : > { %6575 = vmatpush1.bf16.msra.mxu1 %v7819_v5  ;;  %v6077_v43 = vrot.slane %v6072_v58, %v8670_v12  ;;  %v6081_v59 = vrot.slane %v6072_v58, %v8664_v11  ;;  %v5741_v0 = vrot.slane %v5736_v35, %v8670_v12  ;;  %v5745_v53 = vrot.slane %v5736_v35, %v8664_v11 }
 0x806   : > { %v5771_v24 = vpop.permute.xlu1 %5770  ;;  %v7817_v23 = vpack.c.bf16 %v5190_v4, %v5188_v18  ;;  %v6109_v46 = vpop.permute.xlu0 %6108  ;;  %v7818_v44 = vpack.c.bf16 %v5191_v8, %v5189_v38 }
 0x807   : > { %v6111_v57 = vsel %vm1455_vm8, %v10563_v3, %v6109_v46  ;;  %v6113_v40 = vsel %vm1455_vm8, %v6109_v46, %v10563_v3  ;;  %v5774_v54 = vsel %vm1103_vm10, %v10561_v62, %v5771_v24  ;;  %v5776_v6 = vsel %vm1103_vm10, %v5771_v24, %v10561_v62  ;;  %v6030_v46 = vld [vmem:[#allocation4 + $0x25] ss:$8 sm:$0x3] }
 0x808   : > { %v6128_v41 = vmul.f32 %v6119_v42, %v6111_v57  ;;  %v6129_v45 = vmul.f32 %v6123_v33, %v6113_v40  ;;  %6576 = vmatprep.subr.bf16.mxu1 %v7818_v44  ;;  %v5790_v5 = vmul.f32 %v5783_v39, %v5774_v54  ;;  %v5791_v36 = vmul.f32 %v5787_v20, %v5776_v6 }
 0x809   : > { %6577 = vmatpush1.bf16.msra.mxu1 %v7817_v23  ;;  %vm11544_vm8 = vcmp.lt.s32.totalorder %v8662_v10, 127 }
 0x80a   : > { %v6065_v3 = vpop.permute.xlu1 %6064  ;;  %v7863_v2 = vpack.c.bf16 %v6128_v41, %v6126_v27  ;;  %v5773_v30 = vpop.permute.xlu0 %5772  ;;  %v7864_v48 = vpack.c.bf16 %v6129_v45, %v6127_v22  ;;  %v6035_v41 = vrot.slane %v6030_v46, %v8670_v12  ;;  %v6039_v45 = vrot.slane %v6030_v46, %v8664_v11  ;;  %vm11547_vm14 = vmmov %vm11544_vm8 }
 0x80b   : > { %v5775_v13 = vsel %vm1103_vm10, %v10571_v15, %v5773_v30  ;;  %v5777_v47 = vsel %vm1103_vm10, %v5773_v30, %v10571_v15  ;;  %v6068_v19 = vsel %vm1411_vm11, %v10569_v25, %v6065_v3  ;;  %v6070_v42 = vsel %vm1411_vm11, %v6065_v3, %v10569_v25  ;;  %v5694_v3 = vld [vmem:[#allocation4 + $0x15] ss:$8 sm:$0x3]  ;;  %vm11545_vm10 = vmmov %vm11544_vm8 }
 0x80c   : > { %v5792_v62 = vmul.f32 %v5783_v39, %v5775_v13  ;;  %v5793_v21 = vmul.f32 %v5787_v20, %v5777_v47  ;;  %6615 = vmatprep.subr.bf16.mxu0 %v7864_v48  ;;  %v6084_v29 = vmul.f32 %v6077_v43, %v6068_v19  ;;  %v6085_v24 = vmul.f32 %v6081_v59, %v6070_v42  ;;  %v5988_v19 = vld [vmem:[#allocation4 + $0x24] ss:$8 sm:$0x3] }
 0x80d   : > { %6616 = vmatpush1.bf16.msra.mxu0 %v7863_v2 }
 0x80e   : > { %v5729_v15 = vpop.permute.xlu1 %5728  ;;  %v7847_v33 = vpack.c.bf16 %v5792_v62, %v5790_v5  ;;  %v6067_v18 = vpop.permute.xlu0 %6066  ;;  %v7848_v38 = vpack.c.bf16 %v5793_v21, %v5791_v36  ;;  %v5699_v5 = vrot.slane %v5694_v3, %v8670_v12  ;;  %v5703_v36 = vrot.slane %v5694_v3, %v8664_v11 }
 0x80f   : > { %v6069_v4 = vsel %vm1411_vm11, %v10579_v56, %v6067_v18  ;;  %v6071_v8 = vsel %vm1411_vm11, %v6067_v18, %v10579_v56  ;;  %v5732_v44 = vsel %vm11536_vm0, %v10577_v1, %v5729_v15  ;;  %v5734_v57 = vsel %vm11537_vm1, %v5729_v15, %v10577_v1  ;;  %vm11546_vm11 = vmmov %vm11544_vm8 }
 0x810   : > { %v6086_v25 = vmul.f32 %v6077_v43, %v6069_v4  ;;  %v6087_v23 = vmul.f32 %v6081_v59, %v6071_v8  ;;  %6578 = vmatprep.subr.bf16.mxu1 %v7848_v38  ;;  %v5748_v58 = vmul.f32 %v5741_v0, %v5732_v44  ;;  %v5749_v54 = vmul.f32 %v5745_v53, %v5734_v57  ;;  %vm11551_vm0 = vmmov %vm11549_vm12 }
 0x811   : > { %6579 = vmatpush2.bf16.msra.mxu1 %v7847_v33  ;;  %vm11552_vm1 = vcmp.lt.s32.totalorder %v8662_v10, 110 }
 0x812   : > { %v6023_v56 = vpop.permute.xlu1 %6022  ;;  %v7861_v40 = vpack.c.bf16 %v6086_v25, %v6084_v29  ;;  %v5731_v39 = vpop.permute.xlu0 %5730  ;;  %v7862_v20 = vpack.c.bf16 %v6087_v23, %v6085_v24  ;;  %v5946_v23 = vld [vmem:[#allocation4 + $0x23] ss:$8 sm:$0x3] }
 0x813   : > { %v5733_v27 = vsel %vm11538_vm2, %v10587_v7, %v5731_v39  ;;  %v5735_v22 = vsel %vm11539_vm3, %v5731_v39, %v10587_v7  ;;  %v6026_v2 = vsel %vm11540_vm4, %v10585_v49, %v6023_v56  ;;  %v6028_v30 = vsel %vm11541_vm5, %v6023_v56, %v10585_v49  ;;  %vm11553_vm2 = vmmov %vm11552_vm1 }
 0x814   : > { %v5750_v1 = vmul.f32 %v5741_v0, %v5733_v27  ;;  %v5751_v6 = vmul.f32 %v5745_v53, %v5735_v22  ;;  %6617 = vmatprep.subr.bf16.mxu0 %v7862_v20  ;;  %v6042_v62 = vmul.f32 %v6035_v41, %v6026_v2  ;;  %v6043_v21 = vmul.f32 %v6039_v45, %v6028_v30  ;;  %vm11554_vm3 = vmmov %vm11552_vm1 }
 0x815   : > { %6618 = vmatpush1.bf16.msra.mxu0 %v7861_v40  ;;  %v5993_v0 = vrot.slane %v5988_v19, %v8670_v12  ;;  %v5997_v53 = vrot.slane %v5988_v19, %v8664_v11  ;;  %v7842_v39 = vpack.c.bf16 %v10473_v37, %v10466_v28  ;;  %v5951_v22 = vrot.slane %v5946_v23, %v8670_v12  ;;  %vm11555_vm4 = vmmov %vm11552_vm1 }
 0x816   : > { %v5687_v7 = vpop.permute.xlu1 %5686  ;;  %v7845_v48 = vpack.c.bf16 %v5750_v1, %v5748_v58  ;;  %v6025_v13 = vpop.permute.xlu0 %6024  ;;  %v7846_v47 = vpack.c.bf16 %v5751_v6, %v5749_v54  ;;  %v5638_v1 = vld [vmem:[#allocation4 + $0x13] ss:$8 sm:$0x3]  ;;  %v7841_v30 = vpack.c.bf16 %v10358_v52, %v10354_v31  ;;  %vm11556_vm5 = vcmp.lt.s32.totalorder %v8662_v10, 1 }
 0x817   : > { %v6027_v43 = vsel %vm11542_vm6, %v10595_v9, %v6025_v13  ;;  %v6029_v59 = vsel %vm11543_vm7, %v6025_v13, %v10595_v9  ;;  %v5690_v42 = vsel %vm11544_vm8, %v10593_v60, %v5687_v7  ;;  %v5692_v15 = vsel %vm11545_vm10, %v5687_v7, %v10593_v60  ;;  %vm11557_vm6 = vmmov %vm11556_vm5 }
 0x818   : > { %v6044_v49 = vmul.f32 %v6035_v41, %v6027_v43  ;;  %v6045_v35 = vmul.f32 %v6039_v45, %v6029_v59  ;;  %6580 = vmatprep.subr.bf16.mxu1 %v7846_v47  ;;  %v5706_v29 = vmul.f32 %v5699_v5, %v5690_v42  ;;  %v5707_v24 = vmul.f32 %v5703_v36, %v5692_v15  ;;  %vm11558_vm7 = vmmov %vm11556_vm5 }
 0x819   : > { %6581 = vmatpush2.bf16.msra.mxu1 %v7845_v48  ;;  %v5643_v13 = vrot.slane %v5638_v1, %v8670_v12  ;;  %vm11559_vm8 = vmmov %vm11556_vm5  ;;  %vm11560_vm10 = vcmp.lt.s32.totalorder %v8662_v10, 111 }
 0x81a   : > { %v5981_v9 = vpop.permute.xlu1 %5980  ;;  %v7859_v33 = vpack.c.bf16 %v6044_v49, %v6042_v62  ;;  %v5689_v18 = vpop.permute.xlu0 %5688  ;;  %v7860_v38 = vpack.c.bf16 %v6045_v35, %v6043_v21 }
 0x81b   : > { %v5691_v4 = vsel %vm11546_vm11, %v10603_v55, %v5689_v18  ;;  %v5693_v8 = vsel %vm11547_vm14, %v5689_v18, %v10603_v55  ;;  %v5984_v46 = vsel %vm11548_vm13, %v10601_v17, %v5981_v9  ;;  %v5986_v44 = vsel %vm11549_vm12, %v5981_v9, %v10601_v17  ;;  %vm11561_vm11 = vmmov %vm11560_vm10 }
 0x81c   : > { %v5708_v60 = vmul.f32 %v5699_v5, %v5691_v4  ;;  %v5709_v25 = vmul.f32 %v5703_v36, %v5693_v8  ;;  %6619 = vmatprep.subr.bf16.mxu0 %v7860_v38  ;;  %v5955_v17 = vrot.slane %v5946_v23, %v8664_v11  ;;  %v6000_v41 = vmul.f32 %v5993_v0, %v5984_v46  ;;  %v5904_v36 = vld [vmem:[#allocation4 + $0x22] ss:$8 sm:$0x3]  ;;  %v5596_v38 = vld [vmem:[#allocation4 + $0x12] ss:$8 sm:$0x3]  ;;  %vm11562_vm14 = vmmov %vm11560_vm10 }
 0x81d   : > { %6620 = vmatpush1.bf16.msra.mxu0 %v7859_v33  ;;  %v6001_v45 = vmul.f32 %v5997_v53, %v5986_v44  ;;  %v5909_v42 = vrot.slane %v5904_v36, %v8670_v12  ;;  %v5913_v15 = vrot.slane %v5904_v36, %v8664_v11  ;;  %vm11563_vm13 = vmmov %vm11560_vm10  ;;  %v5605_v23 = vrot.slane %v5596_v38, %v8664_v11 }
 0x81e   : > { %v5939_v55 = vpop.permute.xlu1 %5938  ;;  %v7843_v57 = vpack.c.bf16 %v5708_v60, %v5706_v29  ;;  %v5983_v56 = vpop.permute.xlu0 %5982  ;;  %v7844_v40 = vpack.c.bf16 %v5709_v25, %v5707_v24  ;;  %v5601_v25 = vrot.slane %v5596_v38, %v8670_v12  ;;  %vm11564_vm12 = vcmp.lt.s32.totalorder %v8662_v10, 2 }
 0x81f   : > { %v5985_v20 = vsel %vm11550_vm15, %v10611_v32, %v5983_v56  ;;  %v5987_v27 = vsel %vm11551_vm0, %v5983_v56, %v10611_v32  ;;  %v5942_v28 = vsel %vm11552_vm1, %v10609_v14, %v5939_v55  ;;  %v5944_v37 = vsel %vm11553_vm2, %v5939_v55, %v10609_v14  ;;  %vm11565_vm15 = vmmov %vm11564_vm12 }
 0x820   : > { %v6002_v58 = vmul.f32 %v5993_v0, %v5985_v20  ;;  %v6003_v54 = vmul.f32 %v5997_v53, %v5987_v27  ;;  %6582 = vmatprep.subr.bf16.mxu1 %v7844_v40  ;;  %v5647_v14 = vrot.slane %v5638_v1, %v8664_v11  ;;  %v5958_v47 = vmul.f32 %v5951_v22, %v5942_v28  ;;  %vm11566_vm0 = vmmov %vm11564_vm12  ;;  %v5554_v28 = vld [vmem:[#allocation4 + $0x11] ss:$8 sm:$0x3] }
 0x821   : > { %6583 = vmatpush2.bf16.msra.mxu1 %v7843_v57  ;;  %v5959_v43 = vmul.f32 %v5955_v17, %v5944_v37  ;;  %v5862_v57 = vld [vmem:[#allocation4 + $0x21] ss:$8 sm:$0x3]  ;;  %vm11567_vm1 = vmmov %vm11566_vm0  ;;  %vm11569_vm2 = vcmp.lt.s32.totalorder %v8662_v10, 112 }
 0x822   : > { %v5631_v32 = vpop.permute.xlu1 %5630  ;;  %v7857_v6 = vpack.c.bf16 %v6002_v58, %v6000_v41  ;;  %v5941_v3 = vpop.permute.xlu0 %5940  ;;  %6584 = vmatprep.subr.bf16.mxu1 %v7842_v39  ;;  %v7858_v2 = vpack.c.bf16 %v6003_v54, %v6001_v45  ;;  %v5867_v41 = vrot.slane %v5862_v57, %v8670_v12  ;;  %v5871_v45 = vrot.slane %v5862_v57, %v8664_v11  ;;  %v11568_v37 = vld [vmem:[#allocation28_spill] sm:$0xff] }
 0x823   : > { %v5943_v7 = vsel %vm11554_vm3, %v10619_v34, %v5941_v3  ;;  %v5945_v48 = vsel %vm11555_vm4, %v5941_v3, %v10619_v34  ;;  %v5634_v31 = vsel %vm11556_vm5, %v10617_v26, %v5631_v32  ;;  %v5636_v52 = vsel %vm11557_vm6, %v5631_v32, %v10617_v26  ;;  %vm11570_vm3 = vmmov %vm11569_vm2 }
 0x824   : > { %v5960_v59 = vmul.f32 %v5951_v22, %v5943_v7  ;;  %v5961_v5 = vmul.f32 %v5955_v17, %v5945_v48  ;;  %6621 = vmatprep.subr.bf16.mxu0 %v7858_v2  ;;  %v5650_v9 = vmul.f32 %v5643_v13, %v5636_v52  ;;  %v5651_v26 = vmul.f32 %v5647_v14, %v5634_v31  ;;  %v11571_v7 = vld [vmem:[#allocation30_spill] sm:$0xff]  ;;  %vm11572_vm4 = vmmov %vm11569_vm2  ;;  %v5820_v31 = vld [vmem:[#allocation4 + $0x20] ss:$8 sm:$0x3] }
 0x825   : > { %6585 = vmatpush2.bf16.msra.mxu1 %v7841_v30  ;;  %6622 = vmatpush1.bf16.msra.mxu0 %v7857_v6  ;;  %vm11573_vm5 = vmmov %vm11569_vm2  ;;  %v11574_v52 = vld [vmem:[#allocation29_spill] sm:$0xff]  ;;  %vm11575_vm6 = vcmp.lt.s32.totalorder %v8662_v10, 14 }
 0x826   : > { %v5897_v34 = vpop.permute.xlu1 %5896  ;;  %v7855_v62 = vpack.c.bf16 %v5960_v59, %v5958_v47  ;;  %v5633_v21 = vpop.permute.xlu0 %5632  ;;  %v7856_v49 = vpack.c.bf16 %v5961_v5, %v5959_v43  ;;  %v5563_v47 = vrot.slane %v5554_v28, %v8664_v11 }
 0x827   : > { %v5635_v35 = vsel %vm11558_vm7, %v10627_v61, %v5633_v21  ;;  %v5637_v19 = vsel %vm11559_vm8, %v5633_v21, %v10627_v61  ;;  %v5900_v4 = vsel %vm11560_vm10, %v10625_v63, %v5897_v34  ;;  %v5902_v8 = vsel %vm11561_vm11, %v5897_v34, %v10625_v63  ;;  %vm11576_vm7 = vmmov %vm11575_vm6 }
 0x828   : > { %v5652_v33 = vmul.f32 %v5643_v13, %v5637_v19  ;;  %v5653_v18 = vmul.f32 %v5647_v14, %v5635_v35  ;;  %6623 = vmatprep.subr.bf16.mxu0 %v7856_v49  ;;  %v5916_v46 = vmul.f32 %v5909_v42, %v5900_v4  ;;  %v5917_v44 = vmul.f32 %v5913_v15, %v5902_v8  ;;  %vm11578_vm8 = vmmov %vm11575_vm6 }
 0x829   : > { %6624 = vmatpush1.bf16.msra.mxu0 %v7855_v62  ;;  %v5559_v14 = vrot.slane %v5554_v28, %v8670_v12  ;;  %vm11579_vm10 = vmmov %vm11575_vm6  ;;  %vm11581_vm11 = vcmp.lt.s32.totalorder %v8662_v10, 113 }
 0x82a   : > { %v5589_v61 = vpop.permute.xlu1 %5588  ;;  %v7839_v0 = vpack.c.bf16 %v5652_v33, %v5650_v9  ;;  %v5899_v53 = vpop.permute.xlu0 %5898  ;;  %v7840_v29 = vpack.c.bf16 %v5653_v18, %v5651_v26  ;;  %v5825_v26 = vrot.slane %v5820_v31, %v8670_v12  ;;  %v5829_v33 = vrot.slane %v5820_v31, %v8664_v11 }
 0x82b   : > { %v5901_v24 = vsel %vm11562_vm14, %v10635_v16, %v5899_v53  ;;  %v5903_v60 = vsel %vm11563_vm13, %v5899_v53, %v10635_v16  ;;  %v5592_v56 = vsel %vm11564_vm12, %v10633_v50, %v5589_v61  ;;  %v5594_v40 = vsel %vm11565_vm15, %v5589_v61, %v10633_v50  ;;  %v5512_v61 = vld [vmem:[#allocation4 + $0x10] ss:$8 sm:$0x3]  ;;  %vm11582_vm14 = vmmov %vm11581_vm11 }
 0x82c   : > { %v5918_v63 = vmul.f32 %v5909_v42, %v5901_v24  ;;  %v5919_v55 = vmul.f32 %v5913_v15, %v5903_v60  ;;  %6586 = vmatprep.subr.bf16.mxu1 %v7840_v29  ;;  %v5608_v58 = vmul.f32 %v5601_v25, %v5594_v40  ;;  %v5609_v54 = vmul.f32 %v5605_v23, %v5592_v56  ;;  %v11577_v42 = vld [vmem:[#allocation32_spill] sm:$0xff]  ;;  %vm11584_vm13 = vmmov %vm11581_vm11 }
 0x82d   : > { %6587 = vmatpush2.bf16.msra.mxu1 %v7839_v0  ;;  %v11580_v0 = vld [vmem:[#allocation31_spill] sm:$0xff]  ;;  %vm11585_vm12 = vmmov %vm11581_vm11  ;;  %v5521_v57 = vrot.slane %v5512_v61, %v8664_v11  ;;  %vm11587_vm15 = vcmp.lt.s32.totalorder %v8662_v10, 15 }
 0x82e   : > { %v5855_v16 = vpop.permute.xlu1 %5854  ;;  %v7853_v39 = vpack.c.bf16 %v5918_v63, %v5916_v46  ;;  %v5591_v20 = vpop.permute.xlu0 %5590  ;;  %v7854_v27 = vpack.c.bf16 %v5919_v55, %v5917_v44  ;;  %v11583_v46 = vld [vmem:[#allocation34_spill] sm:$0xff]  ;;  %v5517_v55 = vrot.slane %v5512_v61, %v8670_v12 }
 0x82f   : > { %v5593_v22 = vsel %vm11566_vm0, %v10647_v51, %v5591_v20  ;;  %v5595_v17 = vsel %vm11567_vm1, %v5591_v20, %v10647_v51  ;;  %v5858_v32 = vsel %vm11569_vm2, %v11568_v37, %v5855_v16  ;;  %v5860_v6 = vsel %vm11570_vm3, %v5855_v16, %v11568_v37  ;;  %v6156_v20 = vld [vmem:[#allocation4 + $0x30] ss:$8 sm:$0x3]  ;;  %vm11588_vm0 = vmmov %vm11587_vm15 }
 0x830   : > { %v5610_v50 = vmul.f32 %v5601_v25, %v5595_v17  ;;  %v5611_v1 = vmul.f32 %v5605_v23, %v5593_v22  ;;  %6625 = vmatprep.subr.bf16.mxu0 %v7854_v27  ;;  %v5874_v43 = vmul.f32 %v5867_v41, %v5858_v32  ;;  %v5875_v59 = vmul.f32 %v5871_v45, %v5860_v6  ;;  %v11586_v27 = vld [vmem:[#allocation33_spill] sm:$0xff]  ;;  %vm11590_vm1 = vmmov %vm11588_vm0 }
 0x831   : > { %6626 = vmatpush1.bf16.msra.mxu0 %v7853_v39  ;;  %vm11591_vm2 = vmmov %vm11588_vm0  ;;  %v6161_v37 = vrot.slane %v6156_v20, %v8670_v12  ;;  %v6165_v32 = vrot.slane %v6156_v20, %v8664_v11  ;;  %vm11593_vm3 = vcmp.lt.s32.totalorder %v8662_v10, 94  ;;  %v11595_v12 = vld [vmem:[#allocation37_spill] sm:$0xff] }
 0x832   : > { %v5547_v51 = vpop.permute.xlu1 %5546  ;;  %v7837_v3 = vpack.c.bf16 %v5610_v50, %v5608_v58  ;;  %v5857_v2 = vpop.permute.xlu0 %5856  ;;  %v7838_v30 = vpack.c.bf16 %v5611_v1, %v5609_v54  ;;  %v11589_v50 = vld [vmem:[#allocation36_spill] sm:$0xff]  ;;  %v8017_v10 = vld [vmem:[#allocation12 + $0x28] ss:$16 sps:$4 sm:$0xff]  }
 0x833   : > { %v5859_v48 = vsel %vm11572_vm4, %v11571_v7, %v5857_v2  ;;  %v5861_v13 = vsel %vm11573_vm5, %v5857_v2, %v11571_v7  ;;  %v5550_v34 = vsel %vm11575_vm6, %v11574_v52, %v5547_v51  ;;  %v5552_v62 = vsel %vm11576_vm7, %v5547_v51, %v11574_v52  ;;  %vm11594_vm4 = vmmov %vm11593_vm3  ;;  %v8006_v52 = vld [vmem:[#allocation12] ss:$16 sps:$4 sm:$0xff]  }
 0x834   : > { %v5876_v5 = vmul.f32 %v5867_v41, %v5859_v48  ;;  %v5877_v36 = vmul.f32 %v5871_v45, %v5861_v13  ;;  %6588 = vmatprep.subr.bf16.mxu1 %v7838_v30  ;;  %v5566_v18 = vmul.f32 %v5559_v14, %v5552_v62  ;;  %v5567_v38 = vmul.f32 %v5563_v47, %v5550_v34  ;;  %v11592_v30 = vld [vmem:[#allocation35_spill] sm:$0xff]  ;;  %vm11596_vm5 = vmmov %vm11593_vm3  ;;  %v8012_v34 = vld [vmem:[#allocation12 + $0x24] ss:$16 sps:$4 sm:$0xff]  }
 0x835   : > { %6589 = vmatpush2.bf16.msra.mxu1 %v7837_v3  ;;  %vm11597_vm6 = vmmov %vm11593_vm3 }
 0x836   : > { %v5813_v21 = vpop.permute.xlu1 %5812  ;;  %v7851_v49 = vpack.c.bf16 %v5876_v5, %v5874_v43  ;;  %v5549_v35 = vpop.permute.xlu0 %5548  ;;  %v7852_v19 = vpack.c.bf16 %v5877_v36, %v5875_v59 }
 0x837   : > { %v5551_v15 = vsel %vm11578_vm8, %v11577_v42, %v5549_v35  ;;  %v5553_v9 = vsel %vm11579_vm10, %v5549_v35, %v11577_v42  ;;  %v5816_v53 = vsel %vm11581_vm11, %v11580_v0, %v5813_v21  ;;  %v5818_v29 = vsel %vm11582_vm14, %v5813_v21, %v11580_v0  ;;  %v8015_v35 = vld [vmem:[#allocation12 + $0x2c] ss:$16 sps:$4 sm:$0xff]  }
 0x838   : > { %v5568_v4 = vmul.f32 %v5559_v14, %v5553_v9  ;;  %v5569_v8 = vmul.f32 %v5563_v47, %v5551_v15  ;;  %6627 = vmatprep.subr.bf16.mxu0 %v7852_v19  ;;  %v5832_v56 = vmul.f32 %v5825_v26, %v5816_v53  ;;  %v5833_v40 = vmul.f32 %v5829_v33, %v5818_v29  ;;  %v8014_v19 = vld [vmem:[#allocation12 + $0x20] ss:$16 sps:$4 sm:$0xff]  }
 0x839   : > { %6628 = vmatpush1.bf16.msra.mxu0 %v7851_v49  ;;  %v8011_v49 = vld [vmem:[#allocation12 + $0x8] ss:$16 sps:$4 sm:$0xff]  }
 0x83a   : > { %v5505_v24 = vpop.permute.xlu1 %5504  ;;  %v7835_v60 = vpack.c.bf16 %v5568_v4, %v5566_v18  ;;  %v5815_v25 = vpop.permute.xlu0 %5814  ;;  %v7836_v23 = vpack.c.bf16 %v5569_v8, %v5567_v38 }
 0x83b   : > { %v5817_v44 = vsel %vm11584_vm13, %v11583_v46, %v5815_v25  ;;  %v5819_v63 = vsel %vm11585_vm12, %v5815_v25, %v11583_v46  ;;  %v5508_v22 = vsel %vm11587_vm15, %v11586_v27, %v5505_v24  ;;  %v5510_v17 = vsel %vm11588_vm0, %v5505_v24, %v11586_v27 }
 0x83c   : > { %v5834_v16 = vmul.f32 %v5825_v26, %v5817_v44  ;;  %v5835_v39 = vmul.f32 %v5829_v33, %v5819_v63  ;;  %6590 = vmatprep.subr.bf16.mxu1 %v7836_v23  ;;  %v5524_v6 = vmul.f32 %v5517_v55, %v5510_v17  ;;  %v5525_v51 = vmul.f32 %v5521_v57, %v5508_v22 }
 0x83d   : > { %6591 = vmatpush2.bf16.msra.mxu1 %v7835_v60 }
 0x83e   : > { %v7849_v41 = vpack.c.bf16 %v5834_v16, %v5832_v56  ;;  %v5507_v45 = vpop.permute.xlu0 %5506  ;;  %v6149_v58 = vpop.permute.xlu1 %6148  ;;  %v7850_v54 = vpack.c.bf16 %v5835_v39, %v5833_v40 }
 0x83f   : > { %v5509_v1 = vsel %vm11590_vm1, %v11589_v50, %v5507_v45  ;;  %v5511_v28 = vsel %vm11591_vm2, %v5507_v45, %v11589_v50  ;;  %v6152_v7 = vsel %vm11593_vm3, %v11592_v30, %v6149_v58  ;;  %v6154_v48 = vsel %vm11594_vm4, %v6149_v58, %v11592_v30 }
 0x840   : > { %v5526_v3 = vmul.f32 %v5517_v55, %v5511_v28  ;;  %v5527_v2 = vmul.f32 %v5521_v57, %v5509_v1  ;;  %6629 = vmatprep.subr.bf16.mxu0 %v7850_v54  ;;  %v6168_v59 = vmul.f32 %v6161_v37, %v6152_v7  ;;  %v6169_v5 = vmul.f32 %v6165_v32, %v6154_v48 }
 0x841   : > { %6630 = vmatpush1.bf16.msra.mxu0 %v7849_v41 }
 0x842   : > { %v7833_v13 = vpack.c.bf16 %v5526_v3, %v5524_v6  ;;  %v6151_v14 = vpop.permute.xlu0 %6150  ;;  %v7834_v47 = vpack.c.bf16 %v5527_v2, %v5525_v51 }
 0x843   : > { %v6153_v11 = vsel %vm11596_vm5, %v11595_v12, %v6151_v14  ;;  %v6155_v43 = vsel %vm11597_vm6, %v6151_v14, %v11595_v12 }
 0x844   : > { %v6170_v36 = vmul.f32 %v6161_v37, %v6153_v11  ;;  %v6171_v31 = vmul.f32 %v6165_v32, %v6155_v43  ;;  %6592 = vmatprep.subr.bf16.mxu1 %v7834_v47 }
 0x845   : > { %6593 = vmatpush2.bf16.msra.mxu1 %v7833_v13 }
 0x846   : > { %v7865_v62 = vpack.c.bf16 %v6170_v36, %v6168_v59  ;;  %v7866_v21 = vpack.c.bf16 %v6171_v31, %v6169_v5 }
 0x848   : > { %6595 = vmatmul.mubr.bf16.vlgmr.msra.gmra.mxu1 %v8006_v52  ;;  %6645 = vmatprep.subr.bf16.mxu0 %v7866_v21 }
 0x849   : > { %6646 = vmatpush2.bf16.msra.mxu0 %v7865_v62  ;;  %6604 = vmatprep.mubr.bf16.mxu1 %v8012_v34 }
 0x84b   : > { %v6251_v15 = vpop.permute.xlu1 %6250 }
 0x84c   : > { %6648 = vmatmul.mubr.bf16.vlgmr.msra.gmra.mxu0 %v8011_v49 }
 0x84d   : > { %7459 = vmatprep.mubr.msk.bf16.mxu0 %vm1870_vm9, %v8015_v35 }
 0x84f   : > { %v6256_v0 = vpop.permute.xlu0 %6255  ;;  %v6261_v27 = vpop.permute.xlu1 %6260 }
 0x850   : > { %6605 = vmatmul.mubr.bf16.gmra.mxu1 %v8014_v19 }
 0x853   : > { %v6266_v7 = vpop.permute.xlu0 %6265 }
 0x854   : > { %6658 = vmatmul.mubr.bf16.gmra.mxu0 %v8017_v10 }
 0x908   : > { %v6596_v42 = vpop.f32.mrf.mxu1 }
 0x909   : > { %v6597_v26 = vadd.f32 %v6596_v42, %v6251_v15 }
 0x90a   : > { %v6598_v9 = vpop.f32.mrf.mxu1 }
 0x90b   : > { %v6599_v38 = vadd.f32 %v6598_v9, %v6251_v15 }
 0x90c   : > { %v6600_v33 = vpop.f32.mrf.mxu1  ;;  %v6649_v18 = vpop.f32.mrf.mxu0 }
 0x90d   : > { %v11019_v4 = vadd.f32 %v6649_v18, %v6597_v26  ;;  %v6601_v24 = vadd.f32 %v6600_v33, %v6256_v0 }
 0x90e   : > { %v6602_v8 = vpop.f32.mrf.mxu1  ;;  %v6651_v61 = vpop.f32.mrf.mxu0 }
 0x90f   : > { %v11022_v53 = vmul.f32 0.70710677, %v11019_v4  ;;  %v11024_v29 = vadd.f32 %v6651_v61, %v6599_v38  ;;  %v6603_v44 = vadd.f32 %v6602_v8, %v6256_v0 }
 0x910   : > { %v6606_v60 = vpop.f32.mrf.mxu1  ;;  %v6653_v25 = vpop.f32.mrf.mxu0 }
 0x911   : > { %v6684_v23 = vand.u32 2147483647, %v11022_v53  ;;  %v11028_v46 = vmul.f32 0.70710677, %v11024_v29  ;;  %v11030_v63 = vadd.f32 %v6653_v25, %v6601_v24  ;;  %v6607_v1 = vadd.f32 %v6606_v60, %v6261_v27 }
 0x912   : > { %v6608_v55 = vpop.f32.mrf.mxu1  ;;  %v6655_v57 = vpop.f32.mrf.mxu0  ;;  %vm6836_vm9 = vcmp.lt.f32.partialorder %v11022_v53, 0.0 }
 0x913   : > { %v6692_v56 = vmul.f32 0.3275911, %v6684_v23  ;;  %v6685_v40 = vand.u32 2147483647, %v11028_v46  ;;  %v11034_v16 = vmul.f32 0.70710677, %v11030_v63  ;;  %v11036_v39 = vadd.f32 %v6655_v57, %v6603_v44 }
 0x914   : > { %v6659_v20 = vpop.f32.mrf.mxu0  ;;  %v6610_v58 = vpop.f32.mrf.mxu1  ;;  %v6788_v51 = vsub.f32 0.0, %v6684_v23  ;;  %v6609_v48 = vadd.f32 %v6608_v55, %v6261_v27  ;;  %vm6837_vm7 = vcmp.lt.f32.partialorder %v11028_v46, 0.0 }
 0x915   : > { %v6700_v22 = vadd.f32 1.0, %v6692_v56  ;;  %v6693_v17 = vmul.f32 0.3275911, %v6685_v40  ;;  %v6686_v41 = vand.u32 2147483647, %v11034_v16  ;;  %v11043_v6 = vadd.f32 %v6659_v20, %v6607_v1 }
 0x916   : > { %v11040_v45 = vmul.f32 0.70710677, %v11036_v39  ;;  %v6661_v54 = vpop.f32.mrf.mxu0  ;;  %v6612_v30 = vpop.f32.mrf.mxu1  ;;  %v6611_v47 = vadd.f32 %v6610_v58, %v6266_v7  ;;  %v6796_v5 = vmul.f32 %v6788_v51, %v6684_v23  ;;  %v6789_v36 = vsub.f32 0.0, %v6685_v40 }
 0x917   : > { %8066 = vrcp.f32 %v6700_v22  ;;  %v6701_v50 = vadd.f32 1.0, %v6693_v17  ;;  %v6694_v28 = vmul.f32 0.3275911, %v6686_v41  ;;  %v11046_v13 = vmul.f32 0.70710677, %v11043_v6 }
 0x918   : > { %v6687_v37 = vand.u32 2147483647, %v11040_v45  ;;  %v6663_v32 = vpop.f32.mrf.mxu0  ;;  %v6613_v43 = vadd.f32 %v6612_v30, %v6266_v7  ;;  %v11049_v59 = vadd.f32 %v6661_v54, %v6609_v48  ;;  %v6790_v62 = vsub.f32 0.0, %v6686_v41 }
 0x919   : > { %8068 = vrcp.f32 %v6701_v50  ;;  %v6702_v3 = vadd.f32 1.0, %v6694_v28  ;;  %v6688_v11 = vand.u32 2147483647, %v11046_v13  ;;  %v11051_v31 = vadd.f32 %v6663_v32, %v6611_v47 }
 0x91a   : > { %v6695_v2 = vmul.f32 0.3275911, %v6687_v37  ;;  %v6665_v12 = vpop.f32.mrf.mxu0  ;;  %v11056_v21 = vmul.f32 0.70710677, %v11049_v59  ;;  %v6804_v19 = vmul.f32 1.442695, %v6796_v5  ;;  %v6797_v10 = vmul.f32 %v6789_v36, %v6685_v40 }
 0x91b   : > { %8070 = vrcp.f32 %v6702_v3  ;;  %v6696_v52 = vmul.f32 0.3275911, %v6688_v11  ;;  %v11053_v34 = vadd.f32 %v6665_v12, %v6613_v43  ;;  %v11059_v49 = vmul.f32 0.70710677, %v11051_v31 }
 0x91c   : > { %v6703_v14 = vadd.f32 1.0, %v6695_v2  ;;  %v6689_v42 = vand.u32 2147483647, %v11056_v21  ;;  %v6791_v9 = vsub.f32 0.0, %v6687_v37  ;;  %v6798_v18 = vmul.f32 %v6790_v62, %v6686_v41 }
 0x91d   : > { %v6704_v35 = vadd.f32 1.0, %v6696_v52  ;;  %v6690_v15 = vand.u32 2147483647, %v11059_v49  ;;  %v11064_v26 = vmul.f32 0.70710677, %v11053_v34  ;;  %v6792_v57 = vsub.f32 0.0, %v6688_v11 }
 0x91e   : > { %8072 = vrcp.f32 %v6703_v14  ;;  %v6697_v38 = vmul.f32 0.3275911, %v6689_v42  ;;  %v6806_v24 = vmul.f32 1.442695, %v6797_v10  ;;  %v6799_v55 = vmul.f32 %v6791_v9, %v6687_v37 }
 0x91f   : > { %8074 = vrcp.f32 %v6704_v35  ;;  %v6698_v8 = vmul.f32 0.3275911, %v6690_v15  ;;  %v6691_v0 = vand.u32 2147483647, %v11064_v26  ;;  %v6808_v20 = vmul.f32 1.442695, %v6798_v18 }
 0x920   : > { %8076 = vpow2.f32 %v6804_v19  ;;  %v6705_v60 = vadd.f32 1.0, %v6697_v38  ;;  %v6793_v17 = vsub.f32 0.0, %v6689_v42  ;;  %v6794_v50 = vsub.f32 0.0, %v6690_v15 }
 0x921   : > { %v6706_v25 = vadd.f32 1.0, %v6698_v8  ;;  %v6699_v56 = vmul.f32 0.3275911, %v6691_v0  ;;  %v6810_v28 = vmul.f32 1.442695, %v6799_v55  ;;  %v6800_v37 = vmul.f32 %v6792_v57, %v6688_v11 }
 0x922   : > { %8078 = vrcp.f32 %v6705_v60  ;;  %v6795_v2 = vsub.f32 0.0, %v6691_v0  ;;  %v6801_v48 = vmul.f32 %v6793_v17, %v6689_v42  ;;  %v6802_v12 = vmul.f32 %v6794_v50, %v6690_v15 }
 0x923   : > { %8080 = vrcp.f32 %v6706_v25  ;;  %v6707_v41 = vadd.f32 1.0, %v6699_v56  ;;  %v11084_v43 = vmul.f32 0.5, %v11019_v4  ;;  %v6812_v35 = vmul.f32 1.442695, %v6800_v37 }
 0x924   : > { %v11066_v33 = vpop.eup %8066  ;;  %8082 = vpow2.f32 %v6806_v24  ;;  %v6803_v19 = vmul.f32 %v6795_v2, %v6691_v0  ;;  %v6814_v15 = vmul.f32 1.442695, %v6801_v48  ;;  %v11093_v4 = vmul.f32 0.5, %v11024_v29 }
 0x925   : > { %v6716_v61 = vmul.f32 1.0614054, %v11066_v33  ;;  %8084 = vrcp.f32 %v6707_v41  ;;  %v6816_v8 = vmul.f32 1.442695, %v6802_v12  ;;  %vm6838_vm8 = vcmp.lt.f32.partialorder %v11034_v16, 0.0 }
 0x926   : > { %v11070_v23 = vpop.eup %8068  ;;  %8086 = vpow2.f32 %v6808_v20  ;;  %v6818_v55 = vmul.f32 1.442695, %v6803_v19  ;;  %vm6839_vm10 = vcmp.lt.f32.partialorder %v11040_v45, 0.0  ;;  %vm6840_vm11 = vcmp.lt.f32.partialorder %v11046_v13, 0.0 }
 0x927   : > { %v6724_v44 = vadd.f32 -1.4531521, %v6716_v61  ;;  %v6717_v40 = vmul.f32 1.0614054, %v11070_v23  ;;  %8088 = vpow2.f32 %v6810_v28  ;;  %vm6841_vm14 = vcmp.lt.f32.partialorder %v11056_v21, 0.0 }
 0x928   : > { %v11073_v27 = vpop.eup %8070  ;;  %8090 = vpow2.f32 %v6812_v35  ;;  %vm6842_vm13 = vcmp.lt.f32.partialorder %v11059_v49, 0.0  ;;  %vm6843_vm12 = vcmp.lt.f32.partialorder %v11064_v26, 0.0  ;;  %v6675_v49 = vmul.f32 0.5, %v11053_v34 }
 0x929   : > { %v6732_v22 = vmul.f32 %v11066_v33, %v6724_v44  ;;  %v6725_v58 = vadd.f32 -1.4531521, %v6717_v40  ;;  %v6718_v54 = vmul.f32 1.0614054, %v11073_v27  ;;  %8092 = vpow2.f32 %v6814_v15 }
 0x92a   : > { %8094 = vpow2.f32 %v6816_v8 }
 0x92b   : > { %v6740_v1 = vadd.f32 1.4214138, %v6732_v22  ;;  %v11077_v32 = vpop.eup %8072  ;;  %v6733_v51 = vmul.f32 %v11070_v23, %v6725_v58  ;;  %v6726_v3 = vadd.f32 -1.4531521, %v6718_v54  ;;  %8096 = vpow2.f32 %v6818_v55 }
 0x92c   : > { %v6719_v7 = vmul.f32 1.0614054, %v11077_v32  ;;  %v11086_v36 = vpop.eup %8074 }
 0x92d   : > { %v6748_v30 = vmul.f32 %v11066_v33, %v6740_v1  ;;  %v6741_v14 = vadd.f32 1.4214138, %v6733_v51  ;;  %v6734_v47 = vmul.f32 %v11073_v27, %v6726_v3  ;;  %v6720_v9 = vmul.f32 1.0614054, %v11086_v36  ;;  %v8077_v61 = vpop.eup %8076 }
 0x92e   : > { %v6727_v5 = vadd.f32 -1.4531521, %v6719_v7 }
 0x92f   : > { %v6756_v11 = vadd.f32 -0.28449672, %v6748_v30  ;;  %v6749_v52 = vmul.f32 %v11070_v23, %v6741_v14  ;;  %v6742_v62 = vadd.f32 1.4214138, %v6734_v47  ;;  %v6728_v25 = vadd.f32 -1.4531521, %v6720_v9  ;;  %v11098_v57 = vpop.eup %8078 }
 0x930   : > { %v6735_v42 = vmul.f32 %v11077_v32, %v6727_v5  ;;  %v11103_v20 = vpop.eup %8080  ;;  %v6721_v41 = vmul.f32 1.0614054, %v11098_v57 }
 0x931   : > { %v6764_v10 = vmul.f32 %v11066_v33, %v6756_v11  ;;  %v6757_v18 = vadd.f32 -0.28449672, %v6749_v52  ;;  %v6750_v38 = vmul.f32 %v11073_v27, %v6742_v62  ;;  %v6736_v40 = vmul.f32 %v11086_v36, %v6728_v25  ;;  %v8083_v1 = vpop.eup %8082 }
 0x932   : > { %v6743_v60 = vadd.f32 1.4214138, %v6735_v42  ;;  %v6729_v51 = vadd.f32 -1.4531521, %v6721_v41  ;;  %v11110_v3 = vpop.eup %8084 }
 0x933   : > { %v6772_v24 = vadd.f32 0.2548296, %v6764_v10  ;;  %v6765_v0 = vmul.f32 %v11070_v23, %v6757_v18  ;;  %v6758_v44 = vadd.f32 -0.28449672, %v6750_v38  ;;  %v6744_v50 = vadd.f32 1.4214138, %v6736_v40  ;;  %v8087_v11 = vpop.eup %8086 }
 0x934   : > { %v6751_v56 = vmul.f32 %v11077_v32, %v6743_v60  ;;  %v6737_v12 = vmul.f32 %v11098_v57, %v6729_v51  ;;  %v8089_v19 = vpop.eup %8088 }
 0x935   : > { %v6780_v29 = vmul.f32 %v11066_v33, %v6772_v24  ;;  %v6773_v22 = vadd.f32 0.2548296, %v6765_v0  ;;  %v6766_v17 = vmul.f32 %v11073_v27, %v6758_v44  ;;  %v6722_v33 = vmul.f32 1.0614054, %v11103_v20 }
 0x936   : > { %v6759_v54 = vadd.f32 -0.28449672, %v6751_v56  ;;  %v6752_v7 = vmul.f32 %v11086_v36, %v6744_v50  ;;  %v6745_v9 = vadd.f32 1.4214138, %v6737_v12 }
 0x937   : > { %v6820_v58 = vmul.f32 %v8077_v61, %v6780_v29  ;;  %v6781_v28 = vmul.f32 %v11070_v23, %v6773_v22  ;;  %v6774_v37 = vadd.f32 0.2548296, %v6766_v17  ;;  %v6730_v48 = vadd.f32 -1.4531521, %v6722_v33  ;;  %v8091_v22 = vpop.eup %8090 }
 0x938   : > { %v6767_v30 = vmul.f32 %v11077_v32, %v6759_v54  ;;  %v6723_v23 = vmul.f32 1.0614054, %v11110_v3  ;;  %v6760_v62 = vadd.f32 -0.28449672, %v6752_v7  ;;  %v6753_v25 = vmul.f32 %v11098_v57, %v6745_v9  ;;  %v8093_v50 = vpop.eup %8092 }
 0x939   : > { %v6828_v2 = vsub.f32 1.0, %v6820_v58  ;;  %v6821_v14 = vmul.f32 %v8083_v1, %v6781_v28  ;;  %v6782_v47 = vmul.f32 %v11073_v27, %v6774_v37  ;;  %v6738_v35 = vmul.f32 %v11103_v20, %v6730_v48  ;;  %v8095_v28 = vpop.eup %8094 }
 0x93a   : > { %v6775_v52 = vadd.f32 0.2548296, %v6767_v30  ;;  %v6731_v15 = vadd.f32 -1.4531521, %v6723_v23  ;;  %v6768_v38 = vmul.f32 %v11086_v36, %v6760_v62  ;;  %v6761_v40 = vadd.f32 -0.28449672, %v6753_v25  ;;  %v8097_v48 = vpop.eup %8096 }
 0x93b   : > { %v6844_v5 = vsub.f32 0.0, %v6828_v2  ;;  %v6829_v10 = vsub.f32 1.0, %v6821_v14  ;;  %v6822_v42 = vmul.f32 %v8087_v11, %v6782_v47  ;;  %v6746_v8 = vadd.f32 1.4214138, %v6738_v35 }
 0x93c   : > { %v6783_v27 = vmul.f32 %v11077_v32, %v6775_v52  ;;  %v6776_v44 = vadd.f32 0.2548296, %v6768_v38  ;;  %v6739_v29 = vmul.f32 %v11110_v3, %v6731_v15  ;;  %v6670_v33 = vmul.f32 0.5, %v11030_v63 }
 0x93d   : > { %v6852_v18 = vsel %vm6836_vm9, %v6844_v5, %v6828_v2  ;;  %v6845_v24 = vsub.f32 0.0, %v6829_v10  ;;  %v6830_v60 = vsub.f32 1.0, %v6822_v42  ;;  %v6754_v55 = vmul.f32 %v11103_v20, %v6746_v8 }
 0x93e   : > { %v6860_v61 = vadd.f32 1.0, %v6852_v18  ;;  %v6823_v0 = vmul.f32 %v8089_v19, %v6783_v27  ;;  %v6784_v58 = vmul.f32 %v11086_v36, %v6776_v44  ;;  %v6747_v1 = vadd.f32 1.4214138, %v6739_v29 }
 0x93f   : > { %v6853_v53 = vsel %vm6837_vm7, %v6845_v24, %v6829_v10  ;;  %v6846_v32 = vsub.f32 0.0, %v6830_v60  ;;  %v6762_v54 = vadd.f32 -0.28449672, %v6754_v55  ;;  %v6671_v14 = vmul.f32 0.5, %v11036_v39 }
 0x940   : > { %v6868_v56 = vmul.f32 %v6860_v61, %v11084_v43  ;;  %v6861_v17 = vadd.f32 1.0, %v6853_v53  ;;  %v6831_v41 = vsub.f32 1.0, %v6823_v0  ;;  %v6769_v43 = vmul.f32 %v11098_v57, %v6761_v40 }
 0x941   : > { %v6854_v46 = vsel %vm6838_vm8, %v6846_v32, %v6830_v60  ;;  %v6824_v2 = vmul.f32 %v8091_v22, %v6784_v58  ;;  %v6770_v7 = vmul.f32 %v11103_v20, %v6762_v54  ;;  %v6755_v63 = vmul.f32 %v11110_v3, %v6747_v1 }
 0x942   : > { %6876 = vst [vmem:[%s11131_s22] sm:$0xff] %v6868_v56  ;;  %v6869_v37 = vmul.f32 %v6861_v17, %v11093_v4  ;;  %v6862_v51 = vadd.f32 1.0, %v6854_v46  ;;  %v6847_v36 = vsub.f32 0.0, %v6831_v41  ;;  %v6777_v30 = vadd.f32 0.2548296, %v6769_v43 }
 0x943   : > { %v6832_v12 = vsub.f32 1.0, %v6824_v2  ;;  %v6778_v11 = vadd.f32 0.2548296, %v6770_v7  ;;  %v6763_v5 = vadd.f32 -0.28449672, %v6755_v63  ;;  %v6672_v39 = vmul.f32 0.5, %v11043_v6 }
 0x944   : > { %6877 = vst [vmem:[%s11131_s22 + $0x8] sm:$0xff] %v6869_v37  ;;  %v6870_v16 = vmul.f32 %v6862_v51, %v6670_v33  ;;  %v6855_v47 = vsel %vm6839_vm10, %v6847_v36, %v6831_v41  ;;  %v6785_v23 = vmul.f32 %v11098_v57, %v6777_v30  ;;  %v6673_v61 = vmul.f32 0.5, %v11049_v59 }
 0x945   : > { %v6863_v4 = vadd.f32 1.0, %v6855_v47  ;;  %v6848_v45 = vsub.f32 0.0, %v6832_v12  ;;  %v6786_v35 = vmul.f32 %v11103_v20, %v6778_v11  ;;  %v6771_v19 = vmul.f32 %v11110_v3, %v6763_v5 }
 0x946   : > { %6878 = vst [vmem:[%s11131_s22 + $0x10] sm:$0xff] %v6870_v16  ;;  %v6825_v62 = vmul.f32 %v8093_v50, %v6785_v23 }
 0x947   : > { %v6871_v52 = vmul.f32 %v6863_v4, %v6671_v14  ;;  %v6856_v10 = vsel %vm6840_vm11, %v6848_v45, %v6832_v12  ;;  %v6826_v57 = vmul.f32 %v8095_v28, %v6786_v35  ;;  %v6779_v15 = vadd.f32 0.2548296, %v6771_v19 }
 0x948   : > { %v6864_v42 = vadd.f32 1.0, %v6856_v10  ;;  %v6833_v9 = vsub.f32 1.0, %v6825_v62 }
 0x949   : > { %6879 = vst [vmem:[%s11131_s22 + $0x18] sm:$0xff] %v6871_v52  ;;  %v6834_v13 = vsub.f32 1.0, %v6826_v57  ;;  %v6787_v38 = vmul.f32 %v11110_v3, %v6779_v15  ;;  %v6674_v3 = vmul.f32 0.5, %v11051_v31 }
 0x94a   : > { %v6872_v18 = vmul.f32 %v6864_v42, %v6672_v39  ;;  %v6849_v27 = vsub.f32 0.0, %v6833_v9 }
 0x94b   : > { %v6850_v8 = vsub.f32 0.0, %v6834_v13  ;;  %v6827_v6 = vmul.f32 %v8097_v48, %v6787_v38 }
 0x94c   : > { %6880 = vst [vmem:[%s11131_s22 + $0x20] sm:$0xff] %v6872_v18  ;;  %v6857_v20 = vsel %vm6841_vm14, %v6849_v27, %v6833_v9 }
 0x94d   : > { %v6865_v24 = vadd.f32 1.0, %v6857_v20  ;;  %v6858_v60 = vsel %vm6842_vm13, %v6850_v8, %v6834_v13  ;;  %v6835_v25 = vsub.f32 1.0, %v6827_v6 }
 0x94e   : > { %v6866_v44 = vadd.f32 1.0, %v6858_v60 }
 0x94f   : > { %v6873_v0 = vmul.f32 %v6865_v24, %v6673_v61  ;;  %v6851_v21 = vsub.f32 0.0, %v6835_v25 }
 0x950   : > { %v6874_v55 = vmul.f32 %v6866_v44, %v6674_v3 }
 0x951   : > { %6881 = vst [vmem:[%s11131_s22 + $0x28] sm:$0xff] %v6873_v0  ;;  %v6859_v59 = vsel %vm6843_vm12, %v6851_v21, %v6835_v25 }
 0x952   : > { %6882 = vst [vmem:[%s11131_s22 + $0x30] sm:$0xff] %v6874_v55  ;;  %v6867_v31 = vadd.f32 1.0, %v6859_v59 }
 0x954   : > { %v6875_v29 = vmul.f32 %v6867_v31, %v6675_v49 }
 0x956   : > { %6883 = vst [vmem:[%s11131_s22 + $0x38] sm:$0xff] %v6875_v29 }
 0x957   : > { %8241 = shalt.err (!%p8238_p5)
}
 0x958   : > { %s8242_s17 = scalar_lea.hbm %s11168_s30, 1024  ;;  %s8246_s3 = scalar_lea.hbm %s11601_s11, 2048 }
 0x959   : > { %p8243_p0 = scmp.ne.s32.totalorder %s11168_s30, %s8242_s17  ;;  %p8247_p12 = scmp.lt.s32.totalorder %s11168_s30, %s11601_s11 }
 0x95a   : > { %p8248_p11 = scmp.lt.s32.totalorder %s8246_s3, %s8242_s17 }
 0x95b   : > { %p8244_p1 = pnand %p8243_p0, %p8435_p6 }
 0x95c   : > { %p8249_p4 = por %p8248_p11, %p8247_p12 }
 0x95d   : > { %p8245_p7 = pneg %p8244_p1 }
 0x95f   : > { %p8250_p8 = pnand %p8249_p4, %p8245_p7 }
 0x961   : > { %8253 = shalt.err (!%p8250_p8)
}
 0x962   : > { %s8335_s8 = smov 256   ;;  %s8336_s13 = smov 512  }
 0x963   : > { %7887 = dma.vmem_to_hbm [thread:$0]  (%p8435_p6), %s11161_s2, 1024, %s11168_s30, %s6885_s12, %s8335_s8, %s8336_s13, %s11381_s1  }
 0x964 PF: > { %s11602_s14 = sld [smem:[#allocation18_spill]] }
 0x965   : > { %s11603_s15 = sld [smem:[#allocation26_spill]] }
 0x96a   : > { %s6913_s26 = sand.u32 1, %s11602_s14  }
 0x96b   : > { %p11605_p10 = scmp.ne.s32.totalorder %s11603_s15, 0  ;;  %s6914_s22 = scalar_lea.sflag [#allocation6], %s6913_s26 }
 0x96d   : > { %p7906_p13 = pnand %p7023_p3, %p11605_p10 }
 0x96f   : > { %p7907_p9 = pneg %p7906_p13 }
 0x971   : > { %8283 = dma.done.wait (%p7907_p9), %s6914_s22, 1024  }
 0x972   : > { %8285 = vsyncadd (%p7907_p9), %s6914_s22, 4294966272  ;;  %s11606_s16 = sld [smem:[#allocation23_spill]] }
 0x973   : > { %s11607_s13 = sld [smem:[#allocation19_spill]] }
 0x974   : > { %s11608_s14 = sld [smem:[#allocation20_spill]] }
 0x975   : > { %s11609_s15 = sld [smem:[#allocation24_spill]] }
 0x978   : > { %p23_p2 = scmp.ge.s32.totalorder %s11606_s16, 4  }
 0x97a   :  { %25 = sbr.rel (!%p23_p2) target bundleno = 15 (0xf), region = 167 }
 0x97f   :  { %6919 = vsyncpa [#allocation5], 1 }
 0x980   :  { %6921 = vsyncpa [#allocation5 + $0x1], 1 }
 0x981   :  { %6922 = vsyncpa [#allocation8], 1 }
 0x982   :  { %6923 = vsyncpa [#allocation11], 1 }
 0x983   :  { %6924 = vsyncpa [#allocation6], 1 }
 0x984   :  { %6926 = vsyncpa [#allocation6 + $0x1], 1 }

</bundles_post_ra>
